<compile_context>
chip_gen: v5e
topology: v5e:2x2
jax: 0.10.0
libtpu: 0.0.40
codegen_flags: <defaults>
</compile_context>

<pallas_src>
import math

import jax
import jax.numpy as jnp
from jax import lax
from jax.experimental import pallas as pl
from jax.experimental.pallas import tpu as pltpu

VMEM_SPEC = pl.BlockSpec(memory_space=pltpu.MemorySpace.VMEM)


# --------------------------- parameter construction -------------------------- #

def _uniform(key, shape, bound):
    return jax.random.uniform(key, shape, jnp.float32, -bound, bound)


def _init_lstm_dir(key, part_widths, hidden):
    """One LSTM direction.  The input-projection weight is stored pre-split per
    input part (so PyTorch's feature-axis concats become sums of matmuls).
    Weights are stored transposed vs. PyTorch ((Din,4H) / (H,4H)); gate order
    i, f, g, o; bias = b_ih + b_hh; zero initial (h, c)."""
    bound = 1.0 / math.sqrt(hidden)
    keys = jax.random.split(key, len(part_widths) + 3)
    w_parts = [_uniform(keys[i], (w, 4 * hidden), bound)
               for i, w in enumerate(part_widths)]
    w_hh = _uniform(keys[-3], (hidden, 4 * hidden), bound)
    b = (_uniform(keys[-2], (1, 4 * hidden), bound)
         + _uniform(keys[-1], (1, 4 * hidden), bound))
    return {"w_parts": w_parts, "w_hh": w_hh, "b": b}


def init_params(key, input_size, output_size, hidden, num_layers):
    ks = iter(jax.random.split(key, 5 * num_layers + 2))
    lower, higher, decoder = [], [], []
    for layer in range(num_layers):                       # bidirectional
        widths = [input_size] if layer == 0 else [hidden, hidden]
        lower.append((_init_lstm_dir(next(ks), widths, hidden),
                      _init_lstm_dir(next(ks), widths, hidden)))
    for _ in range(num_layers):                           # bidirectional
        widths = [hidden, hidden]
        higher.append((_init_lstm_dir(next(ks), widths, hidden),
                       _init_lstm_dir(next(ks), widths, hidden)))
    for layer in range(num_layers):                       # unidirectional
        widths = [input_size, hidden, hidden] if layer == 0 else [hidden]
        decoder.append(_init_lstm_dir(next(ks), widths, hidden))
    bound = 1.0 / math.sqrt(hidden)
    out_w = _uniform(next(ks), (hidden, output_size), bound)
    out_b = _uniform(next(ks), (1, output_size), bound)
    return {"lower": lower, "higher": higher, "decoder": decoder,
            "out_w": out_w, "out_b": out_b}


def flatten_params(params):
    """Flatten all weights into one list (kernel operands) + an index plan."""
    flat = []

    def add(a):
        flat.append(a)
        return len(flat) - 1

    def plan_dir(d):
        return {"w_parts": tuple(add(w) for w in d["w_parts"]),
                "w_hh": add(d["w_hh"]), "b": add(d["b"])}

    plan = {
        "lower": tuple((plan_dir(f), plan_dir(b)) for f, b in params["lower"]),
        "higher": tuple((plan_dir(f), plan_dir(b)) for f, b in params["higher"]),
        "decoder": tuple(plan_dir(d) for d in params["decoder"]),
    }
    plan["out_w"] = add(params["out_w"])
    plan["out_b"] = add(params["out_b"])
    return flat, plan


# ------------------------------ fused kernel -------------------------------- #

def build_forward(plan, n_params, seq_len, batch, hidden, output_size):
    T, B, H = seq_len, batch, hidden
    TB = T * B

    def kernel(*refs):
        x_ref = refs[0]
        wrefs = refs[1:1 + n_params]
        out_ref = refs[1 + n_params]
        xg_buf = refs[2 + n_params]                 # (TB, 4H) gate scratch
        dir_bufs = refs[3 + n_params: 7 + n_params]  # 4 x (TB, H) output scratch

        def run_direction(in_parts, p, out_buf, reverse):
            # Whole-sequence input projection: one big MXU matmul per input
            # part, accumulated in f32, kept resident in VMEM scratch.
            acc = jnp.dot(in_parts[0], wrefs[p["w_parts"][0]][...],
                          preferred_element_type=jnp.float32)
            for part, wi in zip(in_parts[1:], p["w_parts"][1:]):
                acc = acc + jnp.dot(part, wrefs[wi][...],
                                    preferred_element_type=jnp.float32)
            xg_buf[...] = acc + wrefs[p["b"]][...]

            w_hh = wrefs[p["w_hh"]][...]            # hoisted out of the loop
            h = jnp.zeros((B, H), jnp.float32)      # carried as values (vregs)
            c = jnp.zeros((B, H), jnp.float32)
            steps = range(T - 1, -1, -1) if reverse else range(T)
            for t in steps:                         # fully unrolled (T static)
                g = xg_buf[t * B:(t + 1) * B, :] + jnp.dot(
                    h, w_hh, preferred_element_type=jnp.float32)
                sig = jax.nn.sigmoid(g)             # one full-vreg sigmoid
                tnh = jnp.tanh(g)                   # one full-vreg tanh
                c = sig[:, H:2 * H] * c + sig[:, 0:H] * tnh[:, 2 * H:3 * H]
                h = sig[:, 3 * H:4 * H] * jnp.tanh(c)
                out_buf[t * B:(t + 1) * B, :] = h
            return out_buf[...]                     # whole-sequence value

        x_val = x_ref[...]

        # lower_encoder + higher_encoder: bidirectional, stacked.
        parts = [x_val]
        slot = 0
        for pf, pb in plan["lower"] + plan["higher"]:
            out_f = run_direction(parts, pf, dir_bufs[slot], reverse=False)
            out_b = run_direction(parts, pb, dir_bufs[slot + 1], reverse=True)
            parts = [out_f, out_b]                  # implicit feature concat
            slot = 2 - slot                         # ping-pong buffer pair

        # decoder: input is [inputs | higher_fwd | higher_bwd] via split weights.
        dec_parts = [x_val] + parts
        for p in plan["decoder"]:
            dec_parts = [run_direction(dec_parts, p, dir_bufs[slot], reverse=False)]
            slot = (slot + 1) % 4

        # output_layer
        out_ref[...] = (jnp.dot(dec_parts[0], wrefs[plan["out_w"]][...],
                                preferred_element_type=jnp.float32)
                        + wrefs[plan["out_b"]][...])

    def forward(x, flat_params):
        x2d = x.reshape(TB, x.shape[-1])
        out2d = pl.pallas_call(
            kernel,
            out_shape=jax.ShapeDtypeStruct((TB, output_size), jnp.float32),
            in_specs=[VMEM_SPEC] * (1 + n_params),
            out_specs=VMEM_SPEC,
            scratch_shapes=[pltpu.VMEM((TB, 4 * H), jnp.float32)]
                           + [pltpu.VMEM((TB, H), jnp.float32)] * 4,
        )(x2d, *flat_params)
        return out2d.reshape(T, B, output_size)

    return jax.jit(forward)


# ----------------------------- pure-JAX reference ---------------------------- #

def reference_forward(x, params, seq_len, batch, hidden, output_size):
    T, B, H = seq_len, batch, hidden
    TB = T * B
    PREC = lax.Precision.HIGHEST

    def run_dir(parts, d, reverse):
        xg = sum(jnp.dot(p, w, precision=PREC)
                 for p, w in zip(parts, d["w_parts"])) + d["b"]
        h = jnp.zeros((B, H), jnp.float32)
        c = jnp.zeros((B, H), jnp.float32)
        outs = [None] * T
        for t in (range(T - 1, -1, -1) if reverse else range(T)):
            g = xg[t * B:(t + 1) * B, :] + jnp.dot(h, d["w_hh"], precision=PREC)
            i = jax.nn.sigmoid(g[:, 0:H])
            f = jax.nn.sigmoid(g[:, H:2 * H])
            gg = jnp.tanh(g[:, 2 * H:3 * H])
            o = jax.nn.sigmoid(g[:, 3 * H:4 * H])
            c = f * c + i * gg
            h = o * jnp.tanh(c)
            outs[t] = h
        return jnp.concatenate(outs, axis=0)

    x2d = x.reshape(TB, -1)
    parts = [x2d]
    for pf, pb in list(params["lower"]) + list(params["higher"]):
        parts = [run_dir(parts, pf, False), run_dir(parts, pb, True)]
    dec = [x2d] + parts
    for d in params["decoder"]:
        dec = [run_dir(dec, d, False)]
    out = jnp.dot(dec[0], params["out_w"], precision=PREC) + params["out_b"]
    return out.reshape(T, B, output_size)


# ---------------------------------- main ------------------------------------ #

if __name__ == "__main__":
    input_size = 16
    output_size = 16
    hidden_size = 32      # 4H = 128 -> lane-dense gate buffer
    num_layers = 2
    seq_len = 8
    batch = 2

    key = jax.random.PRNGKey(0)
    k_x, k_p = jax.random.split(key)
    inputs = jax.random.normal(k_x, (seq_len, batch, input_size), jnp.float32)

    params = init_params(k_p, input_size, output_size, hidden_size, num_layers)
    flat, plan = flatten_params(params)
    forward = build_forward(plan, len(flat), seq_len, batch, hidden_size, output_size)

    out = forward(inputs, flat)
    jax.block_until_ready(out)
    assert out.shape == (seq_len, batch, output_size)

    ref = reference_forward(inputs, params, seq_len, batch, hidden_size, output_size)
    max_err = float(jnp.max(jnp.abs(out - ref)))
    assert max_err < 5e-2, f"numerical mismatch vs reference: {max_err}"

    print("KERNEL_OK")
</pallas_src>

<mosaic_0001>
module attributes {stable_mosaic.version = 11 : i64} {
  func.func @kernel(%arg0: memref<16x16xf32, #tpu.memory_space<vmem>>, %arg1: memref<16x128xf32, #tpu.memory_space<vmem>>, %arg2: memref<32x128xf32, #tpu.memory_space<vmem>>, %arg3: memref<1x128xf32, #tpu.memory_space<vmem>>, %arg4: memref<16x128xf32, #tpu.memory_space<vmem>>, %arg5: memref<32x128xf32, #tpu.memory_space<vmem>>, %arg6: memref<1x128xf32, #tpu.memory_space<vmem>>, %arg7: memref<32x128xf32, #tpu.memory_space<vmem>>, %arg8: memref<32x128xf32, #tpu.memory_space<vmem>>, %arg9: memref<32x128xf32, #tpu.memory_space<vmem>>, %arg10: memref<1x128xf32, #tpu.memory_space<vmem>>, %arg11: memref<32x128xf32, #tpu.memory_space<vmem>>, %arg12: memref<32x128xf32, #tpu.memory_space<vmem>>, %arg13: memref<32x128xf32, #tpu.memory_space<vmem>>, %arg14: memref<1x128xf32, #tpu.memory_space<vmem>>, %arg15: memref<32x128xf32, #tpu.memory_space<vmem>>, %arg16: memref<32x128xf32, #tpu.memory_space<vmem>>, %arg17: memref<32x128xf32, #tpu.memory_space<vmem>>, %arg18: memref<1x128xf32, #tpu.memory_space<vmem>>, %arg19: memref<32x128xf32, #tpu.memory_space<vmem>>, %arg20: memref<32x128xf32, #tpu.memory_space<vmem>>, %arg21: memref<32x128xf32, #tpu.memory_space<vmem>>, %arg22: memref<1x128xf32, #tpu.memory_space<vmem>>, %arg23: memref<32x128xf32, #tpu.memory_space<vmem>>, %arg24: memref<32x128xf32, #tpu.memory_space<vmem>>, %arg25: memref<32x128xf32, #tpu.memory_space<vmem>>, %arg26: memref<1x128xf32, #tpu.memory_space<vmem>>, %arg27: memref<32x128xf32, #tpu.memory_space<vmem>>, %arg28: memref<32x128xf32, #tpu.memory_space<vmem>>, %arg29: memref<32x128xf32, #tpu.memory_space<vmem>>, %arg30: memref<1x128xf32, #tpu.memory_space<vmem>>, %arg31: memref<16x128xf32, #tpu.memory_space<vmem>>, %arg32: memref<32x128xf32, #tpu.memory_space<vmem>>, %arg33: memref<32x128xf32, #tpu.memory_space<vmem>>, %arg34: memref<32x128xf32, #tpu.memory_space<vmem>>, %arg35: memref<1x128xf32, #tpu.memory_space<vmem>>, %arg36: memref<32x128xf32, #tpu.memory_space<vmem>>, %arg37: memref<32x128xf32, #tpu.memory_space<vmem>>, %arg38: memref<1x128xf32, #tpu.memory_space<vmem>>, %arg39: memref<32x16xf32, #tpu.memory_space<vmem>>, %arg40: memref<1x16xf32, #tpu.memory_space<vmem>>, %arg41: memref<16x16xf32, #tpu.memory_space<vmem>>, %arg42: memref<16x128xf32, #tpu.memory_space<vmem>>, %arg43: memref<16x32xf32, #tpu.memory_space<vmem>>, %arg44: memref<16x32xf32, #tpu.memory_space<vmem>>, %arg45: memref<16x32xf32, #tpu.memory_space<vmem>>, %arg46: memref<16x32xf32, #tpu.memory_space<vmem>>) attributes {dimension_semantics = [], scalar_prefetch = 0 : i64, scratch_operands = 5 : i64, tpu.core_type = #tpu.core_type<tc>} {
    %c0 = arith.constant 0 : index
    %c0_0 = arith.constant 0 : index
    %0 = vector.load %arg0[%c0, %c0_0] : memref<16x16xf32, #tpu.memory_space<vmem>>, vector<16x16xf32>
    %c0_1 = arith.constant 0 : index
    %c0_2 = arith.constant 0 : index
    %1 = vector.load %arg1[%c0_1, %c0_2] : memref<16x128xf32, #tpu.memory_space<vmem>>, vector<16x128xf32>
    %cst = arith.constant dense<0.000000e+00> : vector<16x128xf32>
    %2 = tpu.matmul %0, %1, %cst {dimension_numbers = #tpu.dot_dimension_numbers<[1], [0], [0], [1], [0, 0, 1, 1], [], []>} : vector<16x16xf32>, vector<16x128xf32>, vector<16x128xf32> -> vector<16x128xf32>
    %c0_3 = arith.constant 0 : index
    %c0_4 = arith.constant 0 : index
    %3 = vector.load %arg3[%c0_3, %c0_4] : memref<1x128xf32, #tpu.memory_space<vmem>>, vector<1x128xf32>
    %4 = vector.broadcast %3 : vector<1x128xf32> to vector<16x128xf32>
    %5 = arith.addf %2, %4 : vector<16x128xf32>
    %c0_5 = arith.constant 0 : index
    %c0_6 = arith.constant 0 : index
    %6 = vector.load %arg42[%c0_5, %c0_6] : memref<16x128xf32, #tpu.memory_space<vmem>>, vector<16x128xf32>
    tpu.vector_store %arg42[%c0_5, %c0_6], %5 {strides = array<i32>} : memref<16x128xf32, #tpu.memory_space<vmem>>, vector<16x128xf32>,
    %c0_7 = arith.constant 0 : index
    %c0_8 = arith.constant 0 : index
    %7 = vector.load %arg2[%c0_7, %c0_8] : memref<32x128xf32, #tpu.memory_space<vmem>>, vector<32x128xf32>
    %cst_9 = arith.constant 0.000000e+00 : f32
    %8 = vector.broadcast %cst_9 : f32 to vector<2x32xf32>
    %cst_10 = arith.constant 0.000000e+00 : f32
    %9 = vector.broadcast %cst_10 : f32 to vector<2x32xf32>
    %c0_11 = arith.constant 0 : index
    %c0_12 = arith.constant 0 : index
    %10 = vector.load %arg42[%c0_11, %c0_12] : memref<16x128xf32, #tpu.memory_space<vmem>>, vector<2x128xf32>
    %cst_13 = arith.constant dense<0.000000e+00> : vector<2x128xf32>
    %11 = tpu.matmul %8, %7, %cst_13 {dimension_numbers = #tpu.dot_dimension_numbers<[1], [0], [0], [1], [0, 0, 1, 1], [], []>} : vector<2x32xf32>, vector<32x128xf32>, vector<2x128xf32> -> vector<2x128xf32>
    %12 = arith.addf %10, %11 : vector<2x128xf32>
    %13 = arith.negf %12 : vector<2x128xf32>
    %14 = math.exp %13 : vector<2x128xf32>
    %cst_14 = arith.constant 1.000000e+00 : f32
    %15 = vector.broadcast %cst_14 : f32 to vector<2x128xf32>
    %16 = arith.addf %15, %14 : vector<2x128xf32>
    %17 = arith.divf %15, %16 : vector<2x128xf32>
    %18 = math.tanh %12 : vector<2x128xf32>
    %19 = vector.extract_strided_slice %17 {offsets = [0, 32], sizes = [2, 32], strides = [1, 1]} : vector<2x128xf32> to vector<2x32xf32>
    %20 = arith.mulf %19, %9 : vector<2x32xf32>
    %21 = vector.extract_strided_slice %17 {offsets = [0, 0], sizes = [2, 32], strides = [1, 1]} : vector<2x128xf32> to vector<2x32xf32>
    %22 = vector.extract_strided_slice %18 {offsets = [0, 64], sizes = [2, 32], strides = [1, 1]} : vector<2x128xf32> to vector<2x32xf32>
    %23 = arith.mulf %21, %22 : vector<2x32xf32>
    %24 = arith.addf %20, %23 : vector<2x32xf32>
    %25 = vector.extract_strided_slice %17 {offsets = [0, 96], sizes = [2, 32], strides = [1, 1]} : vector<2x128xf32> to vector<2x32xf32>
    %26 = math.tanh %24 : vector<2x32xf32>
    %27 = arith.mulf %25, %26 : vector<2x32xf32>
    %c0_15 = arith.constant 0 : index
    %c0_16 = arith.constant 0 : index
    %28 = vector.load %arg43[%c0_15, %c0_16] : memref<16x32xf32, #tpu.memory_space<vmem>>, vector<2x32xf32>
    tpu.vector_store %arg43[%c0_15, %c0_16], %27 {strides = array<i32>} : memref<16x32xf32, #tpu.memory_space<vmem>>, vector<2x32xf32>,
    %c2 = arith.constant 2 : index
    %c0_17 = arith.constant 0 : index
    %29 = vector.load %arg42[%c2, %c0_17] : memref<16x128xf32, #tpu.memory_space<vmem>>, vector<2x128xf32>
    %cst_18 = arith.constant dense<0.000000e+00> : vector<2x128xf32>
    %30 = tpu.matmul %27, %7, %cst_18 {dimension_numbers = #tpu.dot_dimension_numbers<[1], [0], [0], [1], [0, 0, 1, 1], [], []>} : vector<2x32xf32>, vector<32x128xf32>, vector<2x128xf32> -> vector<2x128xf32>
    %31 = arith.addf %29, %30 : vector<2x128xf32>
    %32 = arith.negf %31 : vector<2x128xf32>
    %33 = math.exp %32 : vector<2x128xf32>
    %cst_19 = arith.constant 1.000000e+00 : f32
    %34 = vector.broadcast %cst_19 : f32 to vector<2x128xf32>
    %35 = arith.addf %34, %33 : vector<2x128xf32>
    %36 = arith.divf %34, %35 : vector<2x128xf32>
    %37 = math.tanh %31 : vector<2x128xf32>
    %38 = vector.extract_strided_slice %36 {offsets = [0, 32], sizes = [2, 32], strides = [1, 1]} : vector<2x128xf32> to vector<2x32xf32>
    %39 = arith.mulf %38, %24 : vector<2x32xf32>
    %40 = vector.extract_strided_slice %36 {offsets = [0, 0], sizes = [2, 32], strides = [1, 1]} : vector<2x128xf32> to vector<2x32xf32>
    %41 = vector.extract_strided_slice %37 {offsets = [0, 64], sizes = [2, 32], strides = [1, 1]} : vector<2x128xf32> to vector<2x32xf32>
    %42 = arith.mulf %40, %41 : vector<2x32xf32>
    %43 = arith.addf %39, %42 : vector<2x32xf32>
    %44 = vector.extract_strided_slice %36 {offsets = [0, 96], sizes = [2, 32], strides = [1, 1]} : vector<2x128xf32> to vector<2x32xf32>
    %45 = math.tanh %43 : vector<2x32xf32>
    %46 = arith.mulf %44, %45 : vector<2x32xf32>
    %c2_20 = arith.constant 2 : index
    %c0_21 = arith.constant 0 : index
    %47 = vector.load %arg43[%c2_20, %c0_21] : memref<16x32xf32, #tpu.memory_space<vmem>>, vector<2x32xf32>
    tpu.vector_store %arg43[%c2_20, %c0_21], %46 {strides = array<i32>} : memref<16x32xf32, #tpu.memory_space<vmem>>, vector<2x32xf32>,
    %c4 = arith.constant 4 : index
    %c0_22 = arith.constant 0 : index
    %48 = vector.load %arg42[%c4, %c0_22] : memref<16x128xf32, #tpu.memory_space<vmem>>, vector<2x128xf32>
    %cst_23 = arith.constant dense<0.000000e+00> : vector<2x128xf32>
    %49 = tpu.matmul %46, %7, %cst_23 {dimension_numbers = #tpu.dot_dimension_numbers<[1], [0], [0], [1], [0, 0, 1, 1], [], []>} : vector<2x32xf32>, vector<32x128xf32>, vector<2x128xf32> -> vector<2x128xf32>
    %50 = arith.addf %48, %49 : vector<2x128xf32>
    %51 = arith.negf %50 : vector<2x128xf32>
    %52 = math.exp %51 : vector<2x128xf32>
    %cst_24 = arith.constant 1.000000e+00 : f32
    %53 = vector.broadcast %cst_24 : f32 to vector<2x128xf32>
    %54 = arith.addf %53, %52 : vector<2x128xf32>
    %55 = arith.divf %53, %54 : vector<2x128xf32>
    %56 = math.tanh %50 : vector<2x128xf32>
    %57 = vector.extract_strided_slice %55 {offsets = [0, 32], sizes = [2, 32], strides = [1, 1]} : vector<2x128xf32> to vector<2x32xf32>
    %58 = arith.mulf %57, %43 : vector<2x32xf32>
    %59 = vector.extract_strided_slice %55 {offsets = [0, 0], sizes = [2, 32], strides = [1, 1]} : vector<2x128xf32> to vector<2x32xf32>
    %60 = vector.extract_strided_slice %56 {offsets = [0, 64], sizes = [2, 32], strides = [1, 1]} : vector<2x128xf32> to vector<2x32xf32>
    %61 = arith.mulf %59, %60 : vector<2x32xf32>
    %62 = arith.addf %58, %61 : vector<2x32xf32>
    %63 = vector.extract_strided_slice %55 {offsets = [0, 96], sizes = [2, 32], strides = [1, 1]} : vector<2x128xf32> to vector<2x32xf32>
    %64 = math.tanh %62 : vector<2x32xf32>
    %65 = arith.mulf %63, %64 : vector<2x32xf32>
    %c4_25 = arith.constant 4 : index
    %c0_26 = arith.constant 0 : index
    %66 = vector.load %arg43[%c4_25, %c0_26] : memref<16x32xf32, #tpu.memory_space<vmem>>, vector<2x32xf32>
    tpu.vector_store %arg43[%c4_25, %c0_26], %65 {strides = array<i32>} : memref<16x32xf32, #tpu.memory_space<vmem>>, vector<2x32xf32>,
    %c6 = arith.constant 6 : index
    %c0_27 = arith.constant 0 : index
    %67 = vector.load %arg42[%c6, %c0_27] : memref<16x128xf32, #tpu.memory_space<vmem>>, vector<2x128xf32>
    %cst_28 = arith.constant dense<0.000000e+00> : vector<2x128xf32>
    %68 = tpu.matmul %65, %7, %cst_28 {dimension_numbers = #tpu.dot_dimension_numbers<[1], [0], [0], [1], [0, 0, 1, 1], [], []>} : vector<2x32xf32>, vector<32x128xf32>, vector<2x128xf32> -> vector<2x128xf32>
    %69 = arith.addf %67, %68 : vector<2x128xf32>
    %70 = arith.negf %69 : vector<2x128xf32>
    %71 = math.exp %70 : vector<2x128xf32>
    %cst_29 = arith.constant 1.000000e+00 : f32
    %72 = vector.broadcast %cst_29 : f32 to vector<2x128xf32>
    %73 = arith.addf %72, %71 : vector<2x128xf32>
    %74 = arith.divf %72, %73 : vector<2x128xf32>
    %75 = math.tanh %69 : vector<2x128xf32>
    %76 = vector.extract_strided_slice %74 {offsets = [0, 32], sizes = [2, 32], strides = [1, 1]} : vector<2x128xf32> to vector<2x32xf32>
    %77 = arith.mulf %76, %62 : vector<2x32xf32>
    %78 = vector.extract_strided_slice %74 {offsets = [0, 0], sizes = [2, 32], strides = [1, 1]} : vector<2x128xf32> to vector<2x32xf32>
    %79 = vector.extract_strided_slice %75 {offsets = [0, 64], sizes = [2, 32], strides = [1, 1]} : vector<2x128xf32> to vector<2x32xf32>
    %80 = arith.mulf %78, %79 : vector<2x32xf32>
    %81 = arith.addf %77, %80 : vector<2x32xf32>
    %82 = vector.extract_strided_slice %74 {offsets = [0, 96], sizes = [2, 32], strides = [1, 1]} : vector<2x128xf32> to vector<2x32xf32>
    %83 = math.tanh %81 : vector<2x32xf32>
    %84 = arith.mulf %82, %83 : vector<2x32xf32>
    %c6_30 = arith.constant 6 : index
    %c0_31 = arith.constant 0 : index
    %85 = vector.load %arg43[%c6_30, %c0_31] : memref<16x32xf32, #tpu.memory_space<vmem>>, vector<2x32xf32>
    tpu.vector_store %arg43[%c6_30, %c0_31], %84 {strides = array<i32>} : memref<16x32xf32, #tpu.memory_space<vmem>>, vector<2x32xf32>,
    %c8 = arith.constant 8 : index
    %c0_32 = arith.constant 0 : index
    %86 = vector.load %arg42[%c8, %c0_32] : memref<16x128xf32, #tpu.memory_space<vmem>>, vector<2x128xf32>
    %cst_33 = arith.constant dense<0.000000e+00> : vector<2x128xf32>
    %87 = tpu.matmul %84, %7, %cst_33 {dimension_numbers = #tpu.dot_dimension_numbers<[1], [0], [0], [1], [0, 0, 1, 1], [], []>} : vector<2x32xf32>, vector<32x128xf32>, vector<2x128xf32> -> vector<2x128xf32>
    %88 = arith.addf %86, %87 : vector<2x128xf32>
    %89 = arith.negf %88 : vector<2x128xf32>
    %90 = math.exp %89 : vector<2x128xf32>
    %cst_34 = arith.constant 1.000000e+00 : f32
    %91 = vector.broadcast %cst_34 : f32 to vector<2x128xf32>
    %92 = arith.addf %91, %90 : vector<2x128xf32>
    %93 = arith.divf %91, %92 : vector<2x128xf32>
    %94 = math.tanh %88 : vector<2x128xf32>
    %95 = vector.extract_strided_slice %93 {offsets = [0, 32], sizes = [2, 32], strides = [1, 1]} : vector<2x128xf32> to vector<2x32xf32>
    %96 = arith.mulf %95, %81 : vector<2x32xf32>
    %97 = vector.extract_strided_slice %93 {offsets = [0, 0], sizes = [2, 32], strides = [1, 1]} : vector<2x128xf32> to vector<2x32xf32>
    %98 = vector.extract_strided_slice %94 {offsets = [0, 64], sizes = [2, 32], strides = [1, 1]} : vector<2x128xf32> to vector<2x32xf32>
    %99 = arith.mulf %97, %98 : vector<2x32xf32>
    %100 = arith.addf %96, %99 : vector<2x32xf32>
    %101 = vector.extract_strided_slice %93 {offsets = [0, 96], sizes = [2, 32], strides = [1, 1]} : vector<2x128xf32> to vector<2x32xf32>
    %102 = math.tanh %100 : vector<2x32xf32>
    %103 = arith.mulf %101, %102 : vector<2x32xf32>
    %c8_35 = arith.constant 8 : index
    %c0_36 = arith.constant 0 : index
    %104 = vector.load %arg43[%c8_35, %c0_36] : memref<16x32xf32, #tpu.memory_space<vmem>>, vector<2x32xf32>
    tpu.vector_store %arg43[%c8_35, %c0_36], %103 {strides = array<i32>} : memref<16x32xf32, #tpu.memory_space<vmem>>, vector<2x32xf32>,
    %c10 = arith.constant 10 : index
    %c0_37 = arith.constant 0 : index
    %105 = vector.load %arg42[%c10, %c0_37] : memref<16x128xf32, #tpu.memory_space<vmem>>, vector<2x128xf32>
    %cst_38 = arith.constant dense<0.000000e+00> : vector<2x128xf32>
    %106 = tpu.matmul %103, %7, %cst_38 {dimension_numbers = #tpu.dot_dimension_numbers<[1], [0], [0], [1], [0, 0, 1, 1], [], []>} : vector<2x32xf32>, vector<32x128xf32>, vector<2x128xf32> -> vector<2x128xf32>
    %107 = arith.addf %105, %106 : vector<2x128xf32>
    %108 = arith.negf %107 : vector<2x128xf32>
    %109 = math.exp %108 : vector<2x128xf32>
    %cst_39 = arith.constant 1.000000e+00 : f32
    %110 = vector.broadcast %cst_39 : f32 to vector<2x128xf32>
    %111 = arith.addf %110, %109 : vector<2x128xf32>
    %112 = arith.divf %110, %111 : vector<2x128xf32>
    %113 = math.tanh %107 : vector<2x128xf32>
    %114 = vector.extract_strided_slice %112 {offsets = [0, 32], sizes = [2, 32], strides = [1, 1]} : vector<2x128xf32> to vector<2x32xf32>
    %115 = arith.mulf %114, %100 : vector<2x32xf32>
    %116 = vector.extract_strided_slice %112 {offsets = [0, 0], sizes = [2, 32], strides = [1, 1]} : vector<2x128xf32> to vector<2x32xf32>
    %117 = vector.extract_strided_slice %113 {offsets = [0, 64], sizes = [2, 32], strides = [1, 1]} : vector<2x128xf32> to vector<2x32xf32>
    %118 = arith.mulf %116, %117 : vector<2x32xf32>
    %119 = arith.addf %115, %118 : vector<2x32xf32>
    %120 = vector.extract_strided_slice %112 {offsets = [0, 96], sizes = [2, 32], strides = [1, 1]} : vector<2x128xf32> to vector<2x32xf32>
    %121 = math.tanh %119 : vector<2x32xf32>
    %122 = arith.mulf %120, %121 : vector<2x32xf32>
    %c10_40 = arith.constant 10 : index
    %c0_41 = arith.constant 0 : index
    %123 = vector.load %arg43[%c10_40, %c0_41] : memref<16x32xf32, #tpu.memory_space<vmem>>, vector<2x32xf32>
    tpu.vector_store %arg43[%c10_40, %c0_41], %122 {strides = array<i32>} : memref<16x32xf32, #tpu.memory_space<vmem>>, vector<2x32xf32>,
    %c12 = arith.constant 12 : index
    %c0_42 = arith.constant 0 : index
    %124 = vector.load %arg42[%c12, %c0_42] : memref<16x128xf32, #tpu.memory_space<vmem>>, vector<2x128xf32>
    %cst_43 = arith.constant dense<0.000000e+00> : vector<2x128xf32>
    %125 = tpu.matmul %122, %7, %cst_43 {dimension_numbers = #tpu.dot_dimension_numbers<[1], [0], [0], [1], [0, 0, 1, 1], [], []>} : vector<2x32xf32>, vector<32x128xf32>, vector<2x128xf32> -> vector<2x128xf32>
    %126 = arith.addf %124, %125 : vector<2x128xf32>
    %127 = arith.negf %126 : vector<2x128xf32>
    %128 = math.exp %127 : vector<2x128xf32>
    %cst_44 = arith.constant 1.000000e+00 : f32
    %129 = vector.broadcast %cst_44 : f32 to vector<2x128xf32>
    %130 = arith.addf %129, %128 : vector<2x128xf32>
    %131 = arith.divf %129, %130 : vector<2x128xf32>
    %132 = math.tanh %126 : vector<2x128xf32>
    %133 = vector.extract_strided_slice %131 {offsets = [0, 32], sizes = [2, 32], strides = [1, 1]} : vector<2x128xf32> to vector<2x32xf32>
    %134 = arith.mulf %133, %119 : vector<2x32xf32>
    %135 = vector.extract_strided_slice %131 {offsets = [0, 0], sizes = [2, 32], strides = [1, 1]} : vector<2x128xf32> to vector<2x32xf32>
    %136 = vector.extract_strided_slice %132 {offsets = [0, 64], sizes = [2, 32], strides = [1, 1]} : vector<2x128xf32> to vector<2x32xf32>
    %137 = arith.mulf %135, %136 : vector<2x32xf32>
    %138 = arith.addf %134, %137 : vector<2x32xf32>
    %139 = vector.extract_strided_slice %131 {offsets = [0, 96], sizes = [2, 32], strides = [1, 1]} : vector<2x128xf32> to vector<2x32xf32>
    %140 = math.tanh %138 : vector<2x32xf32>
    %141 = arith.mulf %139, %140 : vector<2x32xf32>
    %c12_45 = arith.constant 12 : index
    %c0_46 = arith.constant 0 : index
    %142 = vector.load %arg43[%c12_45, %c0_46] : memref<16x32xf32, #tpu.memory_space<vmem>>, vector<2x32xf32>
    tpu.vector_store %arg43[%c12_45, %c0_46], %141 {strides = array<i32>} : memref<16x32xf32, #tpu.memory_space<vmem>>, vector<2x32xf32>,
    %c14 = arith.constant 14 : index
    %c0_47 = arith.constant 0 : index
    %143 = vector.load %arg42[%c14, %c0_47] : memref<16x128xf32, #tpu.memory_space<vmem>>, vector<2x128xf32>
    %cst_48 = arith.constant dense<0.000000e+00> : vector<2x128xf32>
    %144 = tpu.matmul %141, %7, %cst_48 {dimension_numbers = #tpu.dot_dimension_numbers<[1], [0], [0], [1], [0, 0, 1, 1], [], []>} : vector<2x32xf32>, vector<32x128xf32>, vector<2x128xf32> -> vector<2x128xf32>
    %145 = arith.addf %143, %144 : vector<2x128xf32>
    %146 = arith.negf %145 : vector<2x128xf32>
    %147 = math.exp %146 : vector<2x128xf32>
    %cst_49 = arith.constant 1.000000e+00 : f32
    %148 = vector.broadcast %cst_49 : f32 to vector<2x128xf32>
    %149 = arith.addf %148, %147 : vector<2x128xf32>
    %150 = arith.divf %148, %149 : vector<2x128xf32>
    %151 = math.tanh %145 : vector<2x128xf32>
    %152 = vector.extract_strided_slice %150 {offsets = [0, 32], sizes = [2, 32], strides = [1, 1]} : vector<2x128xf32> to vector<2x32xf32>
    %153 = arith.mulf %152, %138 : vector<2x32xf32>
    %154 = vector.extract_strided_slice %150 {offsets = [0, 0], sizes = [2, 32], strides = [1, 1]} : vector<2x128xf32> to vector<2x32xf32>
    %155 = vector.extract_strided_slice %151 {offsets = [0, 64], sizes = [2, 32], strides = [1, 1]} : vector<2x128xf32> to vector<2x32xf32>
    %156 = arith.mulf %154, %155 : vector<2x32xf32>
    %157 = arith.addf %153, %156 : vector<2x32xf32>
    %158 = vector.extract_strided_slice %150 {offsets = [0, 96], sizes = [2, 32], strides = [1, 1]} : vector<2x128xf32> to vector<2x32xf32>
    %159 = math.tanh %157 : vector<2x32xf32>
    %160 = arith.mulf %158, %159 : vector<2x32xf32>
    %c14_50 = arith.constant 14 : index
    %c0_51 = arith.constant 0 : index
    %161 = vector.load %arg43[%c14_50, %c0_51] : memref<16x32xf32, #tpu.memory_space<vmem>>, vector<2x32xf32>
    tpu.vector_store %arg43[%c14_50, %c0_51], %160 {strides = array<i32>} : memref<16x32xf32, #tpu.memory_space<vmem>>, vector<2x32xf32>,
    %c0_52 = arith.constant 0 : index
    %c0_53 = arith.constant 0 : index
    %162 = vector.load %arg43[%c0_52, %c0_53] : memref<16x32xf32, #tpu.memory_space<vmem>>, vector<16x32xf32>
    %c0_54 = arith.constant 0 : index
    %c0_55 = arith.constant 0 : index
    %163 = vector.load %arg4[%c0_54, %c0_55] : memref<16x128xf32, #tpu.memory_space<vmem>>, vector<16x128xf32>
    %cst_56 = arith.constant dense<0.000000e+00> : vector<16x128xf32>
    %164 = tpu.matmul %0, %163, %cst_56 {dimension_numbers = #tpu.dot_dimension_numbers<[1], [0], [0], [1], [0, 0, 1, 1], [], []>} : vector<16x16xf32>, vector<16x128xf32>, vector<16x128xf32> -> vector<16x128xf32>
    %c0_57 = arith.constant 0 : index
    %c0_58 = arith.constant 0 : index
    %165 = vector.load %arg6[%c0_57, %c0_58] : memref<1x128xf32, #tpu.memory_space<vmem>>, vector<1x128xf32>
    %166 = vector.broadcast %165 : vector<1x128xf32> to vector<16x128xf32>
    %167 = arith.addf %164, %166 : vector<16x128xf32>
    %c0_59 = arith.constant 0 : index
    %c0_60 = arith.constant 0 : index
    %168 = vector.load %arg42[%c0_59, %c0_60] : memref<16x128xf32, #tpu.memory_space<vmem>>, vector<16x128xf32>
    tpu.vector_store %arg42[%c0_59, %c0_60], %167 {strides = array<i32>} : memref<16x128xf32, #tpu.memory_space<vmem>>, vector<16x128xf32>,
    %c0_61 = arith.constant 0 : index
    %c0_62 = arith.constant 0 : index
    %169 = vector.load %arg5[%c0_61, %c0_62] : memref<32x128xf32, #tpu.memory_space<vmem>>, vector<32x128xf32>
    %cst_63 = arith.constant 0.000000e+00 : f32
    %170 = vector.broadcast %cst_63 : f32 to vector<2x32xf32>
    %cst_64 = arith.constant 0.000000e+00 : f32
    %171 = vector.broadcast %cst_64 : f32 to vector<2x32xf32>
    %c14_65 = arith.constant 14 : index
    %c0_66 = arith.constant 0 : index
    %172 = vector.load %arg42[%c14_65, %c0_66] : memref<16x128xf32, #tpu.memory_space<vmem>>, vector<2x128xf32>
    %cst_67 = arith.constant dense<0.000000e+00> : vector<2x128xf32>
    %173 = tpu.matmul %170, %169, %cst_67 {dimension_numbers = #tpu.dot_dimension_numbers<[1], [0], [0], [1], [0, 0, 1, 1], [], []>} : vector<2x32xf32>, vector<32x128xf32>, vector<2x128xf32> -> vector<2x128xf32>
    %174 = arith.addf %172, %173 : vector<2x128xf32>
    %175 = arith.negf %174 : vector<2x128xf32>
    %176 = math.exp %175 : vector<2x128xf32>
    %cst_68 = arith.constant 1.000000e+00 : f32
    %177 = vector.broadcast %cst_68 : f32 to vector<2x128xf32>
    %178 = arith.addf %177, %176 : vector<2x128xf32>
    %179 = arith.divf %177, %178 : vector<2x128xf32>
    %180 = math.tanh %174 : vector<2x128xf32>
    %181 = vector.extract_strided_slice %179 {offsets = [0, 32], sizes = [2, 32], strides = [1, 1]} : vector<2x128xf32> to vector<2x32xf32>
    %182 = arith.mulf %181, %171 : vector<2x32xf32>
    %183 = vector.extract_strided_slice %179 {offsets = [0, 0], sizes = [2, 32], strides = [1, 1]} : vector<2x128xf32> to vector<2x32xf32>
    %184 = vector.extract_strided_slice %180 {offsets = [0, 64], sizes = [2, 32], strides = [1, 1]} : vector<2x128xf32> to vector<2x32xf32>
    %185 = arith.mulf %183, %184 : vector<2x32xf32>
    %186 = arith.addf %182, %185 : vector<2x32xf32>
    %187 = vector.extract_strided_slice %179 {offsets = [0, 96], sizes = [2, 32], strides = [1, 1]} : vector<2x128xf32> to vector<2x32xf32>
    %188 = math.tanh %186 : vector<2x32xf32>
    %189 = arith.mulf %187, %188 : vector<2x32xf32>
    %c14_69 = arith.constant 14 : index
    %c0_70 = arith.constant 0 : index
    %190 = vector.load %arg44[%c14_69, %c0_70] : memref<16x32xf32, #tpu.memory_space<vmem>>, vector<2x32xf32>
    tpu.vector_store %arg44[%c14_69, %c0_70], %189 {strides = array<i32>} : memref<16x32xf32, #tpu.memory_space<vmem>>, vector<2x32xf32>,
    %c12_71 = arith.constant 12 : index
    %c0_72 = arith.constant 0 : index
    %191 = vector.load %arg42[%c12_71, %c0_72] : memref<16x128xf32, #tpu.memory_space<vmem>>, vector<2x128xf32>
    %cst_73 = arith.constant dense<0.000000e+00> : vector<2x128xf32>
    %192 = tpu.matmul %189, %169, %cst_73 {dimension_numbers = #tpu.dot_dimension_numbers<[1], [0], [0], [1], [0, 0, 1, 1], [], []>} : vector<2x32xf32>, vector<32x128xf32>, vector<2x128xf32> -> vector<2x128xf32>
    %193 = arith.addf %191, %192 : vector<2x128xf32>
    %194 = arith.negf %193 : vector<2x128xf32>
    %195 = math.exp %194 : vector<2x128xf32>
    %cst_74 = arith.constant 1.000000e+00 : f32
    %196 = vector.broadcast %cst_74 : f32 to vector<2x128xf32>
    %197 = arith.addf %196, %195 : vector<2x128xf32>
    %198 = arith.divf %196, %197 : vector<2x128xf32>
    %199 = math.tanh %193 : vector<2x128xf32>
    %200 = vector.extract_strided_slice %198 {offsets = [0, 32], sizes = [2, 32], strides = [1, 1]} : vector<2x128xf32> to vector<2x32xf32>
    %201 = arith.mulf %200, %186 : vector<2x32xf32>
    %202 = vector.extract_strided_slice %198 {offsets = [0, 0], sizes = [2, 32], strides = [1, 1]} : vector<2x128xf32> to vector<2x32xf32>
    %203 = vector.extract_strided_slice %199 {offsets = [0, 64], sizes = [2, 32], strides = [1, 1]} : vector<2x128xf32> to vector<2x32xf32>
    %204 = arith.mulf %202, %203 : vector<2x32xf32>
    %205 = arith.addf %201, %204 : vector<2x32xf32>
    %206 = vector.extract_strided_slice %198 {offsets = [0, 96], sizes = [2, 32], strides = [1, 1]} : vector<2x128xf32> to vector<2x32xf32>
    %207 = math.tanh %205 : vector<2x32xf32>
    %208 = arith.mulf %206, %207 : vector<2x32xf32>
    %c12_75 = arith.constant 12 : index
    %c0_76 = arith.constant 0 : index
    %209 = vector.load %arg44[%c12_75, %c0_76] : memref<16x32xf32, #tpu.memory_space<vmem>>, vector<2x32xf32>
    tpu.vector_store %arg44[%c12_75, %c0_76], %208 {strides = array<i32>} : memref<16x32xf32, #tpu.memory_space<vmem>>, vector<2x32xf32>,
    %c10_77 = arith.constant 10 : index
    %c0_78 = arith.constant 0 : index
    %210 = vector.load %arg42[%c10_77, %c0_78] : memref<16x128xf32, #tpu.memory_space<vmem>>, vector<2x128xf32>
    %cst_79 = arith.constant dense<0.000000e+00> : vector<2x128xf32>
    %211 = tpu.matmul %208, %169, %cst_79 {dimension_numbers = #tpu.dot_dimension_numbers<[1], [0], [0], [1], [0, 0, 1, 1], [], []>} : vector<2x32xf32>, vector<32x128xf32>, vector<2x128xf32> -> vector<2x128xf32>
    %212 = arith.addf %210, %211 : vector<2x128xf32>
    %213 = arith.negf %212 : vector<2x128xf32>
    %214 = math.exp %213 : vector<2x128xf32>
    %cst_80 = arith.constant 1.000000e+00 : f32
    %215 = vector.broadcast %cst_80 : f32 to vector<2x128xf32>
    %216 = arith.addf %215, %214 : vector<2x128xf32>
    %217 = arith.divf %215, %216 : vector<2x128xf32>
    %218 = math.tanh %212 : vector<2x128xf32>
    %219 = vector.extract_strided_slice %217 {offsets = [0, 32], sizes = [2, 32], strides = [1, 1]} : vector<2x128xf32> to vector<2x32xf32>
    %220 = arith.mulf %219, %205 : vector<2x32xf32>
    %221 = vector.extract_strided_slice %217 {offsets = [0, 0], sizes = [2, 32], strides = [1, 1]} : vector<2x128xf32> to vector<2x32xf32>
    %222 = vector.extract_strided_slice %218 {offsets = [0, 64], sizes = [2, 32], strides = [1, 1]} : vector<2x128xf32> to vector<2x32xf32>
    %223 = arith.mulf %221, %222 : vector<2x32xf32>
    %224 = arith.addf %220, %223 : vector<2x32xf32>
    %225 = vector.extract_strided_slice %217 {offsets = [0, 96], sizes = [2, 32], strides = [1, 1]} : vector<2x128xf32> to vector<2x32xf32>
    %226 = math.tanh %224 : vector<2x32xf32>
    %227 = arith.mulf %225, %226 : vector<2x32xf32>
    %c10_81 = arith.constant 10 : index
    %c0_82 = arith.constant 0 : index
    %228 = vector.load %arg44[%c10_81, %c0_82] : memref<16x32xf32, #tpu.memory_space<vmem>>, vector<2x32xf32>
    tpu.vector_store %arg44[%c10_81, %c0_82], %227 {strides = array<i32>} : memref<16x32xf32, #tpu.memory_space<vmem>>, vector<2x32xf32>,
    %c8_83 = arith.constant 8 : index
    %c0_84 = arith.constant 0 : index
    %229 = vector.load %arg42[%c8_83, %c0_84] : memref<16x128xf32, #tpu.memory_space<vmem>>, vector<2x128xf32>
    %cst_85 = arith.constant dense<0.000000e+00> : vector<2x128xf32>
    %230 = tpu.matmul %227, %169, %cst_85 {dimension_numbers = #tpu.dot_dimension_numbers<[1], [0], [0], [1], [0, 0, 1, 1], [], []>} : vector<2x32xf32>, vector<32x128xf32>, vector<2x128xf32> -> vector<2x128xf32>
    %231 = arith.addf %229, %230 : vector<2x128xf32>
    %232 = arith.negf %231 : vector<2x128xf32>
    %233 = math.exp %232 : vector<2x128xf32>
    %cst_86 = arith.constant 1.000000e+00 : f32
    %234 = vector.broadcast %cst_86 : f32 to vector<2x128xf32>
    %235 = arith.addf %234, %233 : vector<2x128xf32>
    %236 = arith.divf %234, %235 : vector<2x128xf32>
    %237 = math.tanh %231 : vector<2x128xf32>
    %238 = vector.extract_strided_slice %236 {offsets = [0, 32], sizes = [2, 32], strides = [1, 1]} : vector<2x128xf32> to vector<2x32xf32>
    %239 = arith.mulf %238, %224 : vector<2x32xf32>
    %240 = vector.extract_strided_slice %236 {offsets = [0, 0], sizes = [2, 32], strides = [1, 1]} : vector<2x128xf32> to vector<2x32xf32>
    %241 = vector.extract_strided_slice %237 {offsets = [0, 64], sizes = [2, 32], strides = [1, 1]} : vector<2x128xf32> to vector<2x32xf32>
    %242 = arith.mulf %240, %241 : vector<2x32xf32>
    %243 = arith.addf %239, %242 : vector<2x32xf32>
    %244 = vector.extract_strided_slice %236 {offsets = [0, 96], sizes = [2, 32], strides = [1, 1]} : vector<2x128xf32> to vector<2x32xf32>
    %245 = math.tanh %243 : vector<2x32xf32>
    %246 = arith.mulf %244, %245 : vector<2x32xf32>
    %c8_87 = arith.constant 8 : index
    %c0_88 = arith.constant 0 : index
    %247 = vector.load %arg44[%c8_87, %c0_88] : memref<16x32xf32, #tpu.memory_space<vmem>>, vector<2x32xf32>
    tpu.vector_store %arg44[%c8_87, %c0_88], %246 {strides = array<i32>} : memref<16x32xf32, #tpu.memory_space<vmem>>, vector<2x32xf32>,
    %c6_89 = arith.constant 6 : index
    %c0_90 = arith.constant 0 : index
    %248 = vector.load %arg42[%c6_89, %c0_90] : memref<16x128xf32, #tpu.memory_space<vmem>>, vector<2x128xf32>
    %cst_91 = arith.constant dense<0.000000e+00> : vector<2x128xf32>
    %249 = tpu.matmul %246, %169, %cst_91 {dimension_numbers = #tpu.dot_dimension_numbers<[1], [0], [0], [1], [0, 0, 1, 1], [], []>} : vector<2x32xf32>, vector<32x128xf32>, vector<2x128xf32> -> vector<2x128xf32>
    %250 = arith.addf %248, %249 : vector<2x128xf32>
    %251 = arith.negf %250 : vector<2x128xf32>
    %252 = math.exp %251 : vector<2x128xf32>
    %cst_92 = arith.constant 1.000000e+00 : f32
    %253 = vector.broadcast %cst_92 : f32 to vector<2x128xf32>
    %254 = arith.addf %253, %252 : vector<2x128xf32>
    %255 = arith.divf %253, %254 : vector<2x128xf32>
    %256 = math.tanh %250 : vector<2x128xf32>
    %257 = vector.extract_strided_slice %255 {offsets = [0, 32], sizes = [2, 32], strides = [1, 1]} : vector<2x128xf32> to vector<2x32xf32>
    %258 = arith.mulf %257, %243 : vector<2x32xf32>
    %259 = vector.extract_strided_slice %255 {offsets = [0, 0], sizes = [2, 32], strides = [1, 1]} : vector<2x128xf32> to vector<2x32xf32>
    %260 = vector.extract_strided_slice %256 {offsets = [0, 64], sizes = [2, 32], strides = [1, 1]} : vector<2x128xf32> to vector<2x32xf32>
    %261 = arith.mulf %259, %260 : vector<2x32xf32>
    %262 = arith.addf %258, %261 : vector<2x32xf32>
    %263 = vector.extract_strided_slice %255 {offsets = [0, 96], sizes = [2, 32], strides = [1, 1]} : vector<2x128xf32> to vector<2x32xf32>
    %264 = math.tanh %262 : vector<2x32xf32>
    %265 = arith.mulf %263, %264 : vector<2x32xf32>
    %c6_93 = arith.constant 6 : index
    %c0_94 = arith.constant 0 : index
    %266 = vector.load %arg44[%c6_93, %c0_94] : memref<16x32xf32, #tpu.memory_space<vmem>>, vector<2x32xf32>
    tpu.vector_store %arg44[%c6_93, %c0_94], %265 {strides = array<i32>} : memref<16x32xf32, #tpu.memory_space<vmem>>, vector<2x32xf32>,
    %c4_95 = arith.constant 4 : index
    %c0_96 = arith.constant 0 : index
    %267 = vector.load %arg42[%c4_95, %c0_96] : memref<16x128xf32, #tpu.memory_space<vmem>>, vector<2x128xf32>
    %cst_97 = arith.constant dense<0.000000e+00> : vector<2x128xf32>
    %268 = tpu.matmul %265, %169, %cst_97 {dimension_numbers = #tpu.dot_dimension_numbers<[1], [0], [0], [1], [0, 0, 1, 1], [], []>} : vector<2x32xf32>, vector<32x128xf32>, vector<2x128xf32> -> vector<2x128xf32>
    %269 = arith.addf %267, %268 : vector<2x128xf32>
    %270 = arith.negf %269 : vector<2x128xf32>
    %271 = math.exp %270 : vector<2x128xf32>
    %cst_98 = arith.constant 1.000000e+00 : f32
    %272 = vector.broadcast %cst_98 : f32 to vector<2x128xf32>
    %273 = arith.addf %272, %271 : vector<2x128xf32>
    %274 = arith.divf %272, %273 : vector<2x128xf32>
    %275 = math.tanh %269 : vector<2x128xf32>
    %276 = vector.extract_strided_slice %274 {offsets = [0, 32], sizes = [2, 32], strides = [1, 1]} : vector<2x128xf32> to vector<2x32xf32>
    %277 = arith.mulf %276, %262 : vector<2x32xf32>
    %278 = vector.extract_strided_slice %274 {offsets = [0, 0], sizes = [2, 32], strides = [1, 1]} : vector<2x128xf32> to vector<2x32xf32>
    %279 = vector.extract_strided_slice %275 {offsets = [0, 64], sizes = [2, 32], strides = [1, 1]} : vector<2x128xf32> to vector<2x32xf32>
    %280 = arith.mulf %278, %279 : vector<2x32xf32>
    %281 = arith.addf %277, %280 : vector<2x32xf32>
    %282 = vector.extract_strided_slice %274 {offsets = [0, 96], sizes = [2, 32], strides = [1, 1]} : vector<2x128xf32> to vector<2x32xf32>
    %283 = math.tanh %281 : vector<2x32xf32>
    %284 = arith.mulf %282, %283 : vector<2x32xf32>
    %c4_99 = arith.constant 4 : index
    %c0_100 = arith.constant 0 : index
    %285 = vector.load %arg44[%c4_99, %c0_100] : memref<16x32xf32, #tpu.memory_space<vmem>>, vector<2x32xf32>
    tpu.vector_store %arg44[%c4_99, %c0_100], %284 {strides = array<i32>} : memref<16x32xf32, #tpu.memory_space<vmem>>, vector<2x32xf32>,
    %c2_101 = arith.constant 2 : index
    %c0_102 = arith.constant 0 : index
    %286 = vector.load %arg42[%c2_101, %c0_102] : memref<16x128xf32, #tpu.memory_space<vmem>>, vector<2x128xf32>
    %cst_103 = arith.constant dense<0.000000e+00> : vector<2x128xf32>
    %287 = tpu.matmul %284, %169, %cst_103 {dimension_numbers = #tpu.dot_dimension_numbers<[1], [0], [0], [1], [0, 0, 1, 1], [], []>} : vector<2x32xf32>, vector<32x128xf32>, vector<2x128xf32> -> vector<2x128xf32>
    %288 = arith.addf %286, %287 : vector<2x128xf32>
    %289 = arith.negf %288 : vector<2x128xf32>
    %290 = math.exp %289 : vector<2x128xf32>
    %cst_104 = arith.constant 1.000000e+00 : f32
    %291 = vector.broadcast %cst_104 : f32 to vector<2x128xf32>
    %292 = arith.addf %291, %290 : vector<2x128xf32>
    %293 = arith.divf %291, %292 : vector<2x128xf32>
    %294 = math.tanh %288 : vector<2x128xf32>
    %295 = vector.extract_strided_slice %293 {offsets = [0, 32], sizes = [2, 32], strides = [1, 1]} : vector<2x128xf32> to vector<2x32xf32>
    %296 = arith.mulf %295, %281 : vector<2x32xf32>
    %297 = vector.extract_strided_slice %293 {offsets = [0, 0], sizes = [2, 32], strides = [1, 1]} : vector<2x128xf32> to vector<2x32xf32>
    %298 = vector.extract_strided_slice %294 {offsets = [0, 64], sizes = [2, 32], strides = [1, 1]} : vector<2x128xf32> to vector<2x32xf32>
    %299 = arith.mulf %297, %298 : vector<2x32xf32>
    %300 = arith.addf %296, %299 : vector<2x32xf32>
    %301 = vector.extract_strided_slice %293 {offsets = [0, 96], sizes = [2, 32], strides = [1, 1]} : vector<2x128xf32> to vector<2x32xf32>
    %302 = math.tanh %300 : vector<2x32xf32>
    %303 = arith.mulf %301, %302 : vector<2x32xf32>
    %c2_105 = arith.constant 2 : index
    %c0_106 = arith.constant 0 : index
    %304 = vector.load %arg44[%c2_105, %c0_106] : memref<16x32xf32, #tpu.memory_space<vmem>>, vector<2x32xf32>
    tpu.vector_store %arg44[%c2_105, %c0_106], %303 {strides = array<i32>} : memref<16x32xf32, #tpu.memory_space<vmem>>, vector<2x32xf32>,
    %c0_107 = arith.constant 0 : index
    %c0_108 = arith.constant 0 : index
    %305 = vector.load %arg42[%c0_107, %c0_108] : memref<16x128xf32, #tpu.memory_space<vmem>>, vector<2x128xf32>
    %cst_109 = arith.constant dense<0.000000e+00> : vector<2x128xf32>
    %306 = tpu.matmul %303, %169, %cst_109 {dimension_numbers = #tpu.dot_dimension_numbers<[1], [0], [0], [1], [0, 0, 1, 1], [], []>} : vector<2x32xf32>, vector<32x128xf32>, vector<2x128xf32> -> vector<2x128xf32>
    %307 = arith.addf %305, %306 : vector<2x128xf32>
    %308 = arith.negf %307 : vector<2x128xf32>
    %309 = math.exp %308 : vector<2x128xf32>
    %cst_110 = arith.constant 1.000000e+00 : f32
    %310 = vector.broadcast %cst_110 : f32 to vector<2x128xf32>
    %311 = arith.addf %310, %309 : vector<2x128xf32>
    %312 = arith.divf %310, %311 : vector<2x128xf32>
    %313 = math.tanh %307 : vector<2x128xf32>
    %314 = vector.extract_strided_slice %312 {offsets = [0, 32], sizes = [2, 32], strides = [1, 1]} : vector<2x128xf32> to vector<2x32xf32>
    %315 = arith.mulf %314, %300 : vector<2x32xf32>
    %316 = vector.extract_strided_slice %312 {offsets = [0, 0], sizes = [2, 32], strides = [1, 1]} : vector<2x128xf32> to vector<2x32xf32>
    %317 = vector.extract_strided_slice %313 {offsets = [0, 64], sizes = [2, 32], strides = [1, 1]} : vector<2x128xf32> to vector<2x32xf32>
    %318 = arith.mulf %316, %317 : vector<2x32xf32>
    %319 = arith.addf %315, %318 : vector<2x32xf32>
    %320 = vector.extract_strided_slice %312 {offsets = [0, 96], sizes = [2, 32], strides = [1, 1]} : vector<2x128xf32> to vector<2x32xf32>
    %321 = math.tanh %319 : vector<2x32xf32>
    %322 = arith.mulf %320, %321 : vector<2x32xf32>
    %c0_111 = arith.constant 0 : index
    %c0_112 = arith.constant 0 : index
    %323 = vector.load %arg44[%c0_111, %c0_112] : memref<16x32xf32, #tpu.memory_space<vmem>>, vector<2x32xf32>
    tpu.vector_store %arg44[%c0_111, %c0_112], %322 {strides = array<i32>} : memref<16x32xf32, #tpu.memory_space<vmem>>, vector<2x32xf32>,
    %c0_113 = arith.constant 0 : index
    %c0_114 = arith.constant 0 : index
    %324 = vector.load %arg44[%c0_113, %c0_114] : memref<16x32xf32, #tpu.memory_space<vmem>>, vector<16x32xf32>
    %c0_115 = arith.constant 0 : index
    %c0_116 = arith.constant 0 : index
    %325 = vector.load %arg7[%c0_115, %c0_116] : memref<32x128xf32, #tpu.memory_space<vmem>>, vector<32x128xf32>
    %cst_117 = arith.constant dense<0.000000e+00> : vector<16x128xf32>
    %326 = tpu.matmul %162, %325, %cst_117 {dimension_numbers = #tpu.dot_dimension_numbers<[1], [0], [0], [1], [0, 0, 1, 1], [], []>} : vector<16x32xf32>, vector<32x128xf32>, vector<16x128xf32> -> vector<16x128xf32>
    %c0_118 = arith.constant 0 : index
    %c0_119 = arith.constant 0 : index
    %327 = vector.load %arg8[%c0_118, %c0_119] : memref<32x128xf32, #tpu.memory_space<vmem>>, vector<32x128xf32>
    %cst_120 = arith.constant dense<0.000000e+00> : vector<16x128xf32>
    %328 = tpu.matmul %324, %327, %cst_120 {dimension_numbers = #tpu.dot_dimension_numbers<[1], [0], [0], [1], [0, 0, 1, 1], [], []>} : vector<16x32xf32>, vector<32x128xf32>, vector<16x128xf32> -> vector<16x128xf32>
    %329 = arith.addf %326, %328 : vector<16x128xf32>
    %c0_121 = arith.constant 0 : index
    %c0_122 = arith.constant 0 : index
    %330 = vector.load %arg10[%c0_121, %c0_122] : memref<1x128xf32, #tpu.memory_space<vmem>>, vector<1x128xf32>
    %331 = vector.broadcast %330 : vector<1x128xf32> to vector<16x128xf32>
    %332 = arith.addf %329, %331 : vector<16x128xf32>
    %c0_123 = arith.constant 0 : index
    %c0_124 = arith.constant 0 : index
    %333 = vector.load %arg42[%c0_123, %c0_124] : memref<16x128xf32, #tpu.memory_space<vmem>>, vector<16x128xf32>
    tpu.vector_store %arg42[%c0_123, %c0_124], %332 {strides = array<i32>} : memref<16x128xf32, #tpu.memory_space<vmem>>, vector<16x128xf32>,
    %c0_125 = arith.constant 0 : index
    %c0_126 = arith.constant 0 : index
    %334 = vector.load %arg9[%c0_125, %c0_126] : memref<32x128xf32, #tpu.memory_space<vmem>>, vector<32x128xf32>
    %cst_127 = arith.constant 0.000000e+00 : f32
    %335 = vector.broadcast %cst_127 : f32 to vector<2x32xf32>
    %cst_128 = arith.constant 0.000000e+00 : f32
    %336 = vector.broadcast %cst_128 : f32 to vector<2x32xf32>
    %c0_129 = arith.constant 0 : index
    %c0_130 = arith.constant 0 : index
    %337 = vector.load %arg42[%c0_129, %c0_130] : memref<16x128xf32, #tpu.memory_space<vmem>>, vector<2x128xf32>
    %cst_131 = arith.constant dense<0.000000e+00> : vector<2x128xf32>
    %338 = tpu.matmul %335, %334, %cst_131 {dimension_numbers = #tpu.dot_dimension_numbers<[1], [0], [0], [1], [0, 0, 1, 1], [], []>} : vector<2x32xf32>, vector<32x128xf32>, vector<2x128xf32> -> vector<2x128xf32>
    %339 = arith.addf %337, %338 : vector<2x128xf32>
    %340 = arith.negf %339 : vector<2x128xf32>
    %341 = math.exp %340 : vector<2x128xf32>
    %cst_132 = arith.constant 1.000000e+00 : f32
    %342 = vector.broadcast %cst_132 : f32 to vector<2x128xf32>
    %343 = arith.addf %342, %341 : vector<2x128xf32>
    %344 = arith.divf %342, %343 : vector<2x128xf32>
    %345 = math.tanh %339 : vector<2x128xf32>
    %346 = vector.extract_strided_slice %344 {offsets = [0, 32], sizes = [2, 32], strides = [1, 1]} : vector<2x128xf32> to vector<2x32xf32>
    %347 = arith.mulf %346, %336 : vector<2x32xf32>
    %348 = vector.extract_strided_slice %344 {offsets = [0, 0], sizes = [2, 32], strides = [1, 1]} : vector<2x128xf32> to vector<2x32xf32>
    %349 = vector.extract_strided_slice %345 {offsets = [0, 64], sizes = [2, 32], strides = [1, 1]} : vector<2x128xf32> to vector<2x32xf32>
    %350 = arith.mulf %348, %349 : vector<2x32xf32>
    %351 = arith.addf %347, %350 : vector<2x32xf32>
    %352 = vector.extract_strided_slice %344 {offsets = [0, 96], sizes = [2, 32], strides = [1, 1]} : vector<2x128xf32> to vector<2x32xf32>
    %353 = math.tanh %351 : vector<2x32xf32>
    %354 = arith.mulf %352, %353 : vector<2x32xf32>
    %c0_133 = arith.constant 0 : index
    %c0_134 = arith.constant 0 : index
    %355 = vector.load %arg45[%c0_133, %c0_134] : memref<16x32xf32, #tpu.memory_space<vmem>>, vector<2x32xf32>
    tpu.vector_store %arg45[%c0_133, %c0_134], %354 {strides = array<i32>} : memref<16x32xf32, #tpu.memory_space<vmem>>, vector<2x32xf32>,
    %c2_135 = arith.constant 2 : index
    %c0_136 = arith.constant 0 : index
    %356 = vector.load %arg42[%c2_135, %c0_136] : memref<16x128xf32, #tpu.memory_space<vmem>>, vector<2x128xf32>
    %cst_137 = arith.constant dense<0.000000e+00> : vector<2x128xf32>
    %357 = tpu.matmul %354, %334, %cst_137 {dimension_numbers = #tpu.dot_dimension_numbers<[1], [0], [0], [1], [0, 0, 1, 1], [], []>} : vector<2x32xf32>, vector<32x128xf32>, vector<2x128xf32> -> vector<2x128xf32>
    %358 = arith.addf %356, %357 : vector<2x128xf32>
    %359 = arith.negf %358 : vector<2x128xf32>
    %360 = math.exp %359 : vector<2x128xf32>
    %cst_138 = arith.constant 1.000000e+00 : f32
    %361 = vector.broadcast %cst_138 : f32 to vector<2x128xf32>
    %362 = arith.addf %361, %360 : vector<2x128xf32>
    %363 = arith.divf %361, %362 : vector<2x128xf32>
    %364 = math.tanh %358 : vector<2x128xf32>
    %365 = vector.extract_strided_slice %363 {offsets = [0, 32], sizes = [2, 32], strides = [1, 1]} : vector<2x128xf32> to vector<2x32xf32>
    %366 = arith.mulf %365, %351 : vector<2x32xf32>
    %367 = vector.extract_strided_slice %363 {offsets = [0, 0], sizes = [2, 32], strides = [1, 1]} : vector<2x128xf32> to vector<2x32xf32>
    %368 = vector.extract_strided_slice %364 {offsets = [0, 64], sizes = [2, 32], strides = [1, 1]} : vector<2x128xf32> to vector<2x32xf32>
    %369 = arith.mulf %367, %368 : vector<2x32xf32>
    %370 = arith.addf %366, %369 : vector<2x32xf32>
    %371 = vector.extract_strided_slice %363 {offsets = [0, 96], sizes = [2, 32], strides = [1, 1]} : vector<2x128xf32> to vector<2x32xf32>
    %372 = math.tanh %370 : vector<2x32xf32>
    %373 = arith.mulf %371, %372 : vector<2x32xf32>
    %c2_139 = arith.constant 2 : index
    %c0_140 = arith.constant 0 : index
    %374 = vector.load %arg45[%c2_139, %c0_140] : memref<16x32xf32, #tpu.memory_space<vmem>>, vector<2x32xf32>
    tpu.vector_store %arg45[%c2_139, %c0_140], %373 {strides = array<i32>} : memref<16x32xf32, #tpu.memory_space<vmem>>, vector<2x32xf32>,
    %c4_141 = arith.constant 4 : index
    %c0_142 = arith.constant 0 : index
    %375 = vector.load %arg42[%c4_141, %c0_142] : memref<16x128xf32, #tpu.memory_space<vmem>>, vector<2x128xf32>
    %cst_143 = arith.constant dense<0.000000e+00> : vector<2x128xf32>
    %376 = tpu.matmul %373, %334, %cst_143 {dimension_numbers = #tpu.dot_dimension_numbers<[1], [0], [0], [1], [0, 0, 1, 1], [], []>} : vector<2x32xf32>, vector<32x128xf32>, vector<2x128xf32> -> vector<2x128xf32>
    %377 = arith.addf %375, %376 : vector<2x128xf32>
    %378 = arith.negf %377 : vector<2x128xf32>
    %379 = math.exp %378 : vector<2x128xf32>
    %cst_144 = arith.constant 1.000000e+00 : f32
    %380 = vector.broadcast %cst_144 : f32 to vector<2x128xf32>
    %381 = arith.addf %380, %379 : vector<2x128xf32>
    %382 = arith.divf %380, %381 : vector<2x128xf32>
    %383 = math.tanh %377 : vector<2x128xf32>
    %384 = vector.extract_strided_slice %382 {offsets = [0, 32], sizes = [2, 32], strides = [1, 1]} : vector<2x128xf32> to vector<2x32xf32>
    %385 = arith.mulf %384, %370 : vector<2x32xf32>
    %386 = vector.extract_strided_slice %382 {offsets = [0, 0], sizes = [2, 32], strides = [1, 1]} : vector<2x128xf32> to vector<2x32xf32>
    %387 = vector.extract_strided_slice %383 {offsets = [0, 64], sizes = [2, 32], strides = [1, 1]} : vector<2x128xf32> to vector<2x32xf32>
    %388 = arith.mulf %386, %387 : vector<2x32xf32>
    %389 = arith.addf %385, %388 : vector<2x32xf32>
    %390 = vector.extract_strided_slice %382 {offsets = [0, 96], sizes = [2, 32], strides = [1, 1]} : vector<2x128xf32> to vector<2x32xf32>
    %391 = math.tanh %389 : vector<2x32xf32>
    %392 = arith.mulf %390, %391 : vector<2x32xf32>
    %c4_145 = arith.constant 4 : index
    %c0_146 = arith.constant 0 : index
    %393 = vector.load %arg45[%c4_145, %c0_146] : memref<16x32xf32, #tpu.memory_space<vmem>>, vector<2x32xf32>
    tpu.vector_store %arg45[%c4_145, %c0_146], %392 {strides = array<i32>} : memref<16x32xf32, #tpu.memory_space<vmem>>, vector<2x32xf32>,
    %c6_147 = arith.constant 6 : index
    %c0_148 = arith.constant 0 : index
    %394 = vector.load %arg42[%c6_147, %c0_148] : memref<16x128xf32, #tpu.memory_space<vmem>>, vector<2x128xf32>
    %cst_149 = arith.constant dense<0.000000e+00> : vector<2x128xf32>
    %395 = tpu.matmul %392, %334, %cst_149 {dimension_numbers = #tpu.dot_dimension_numbers<[1], [0], [0], [1], [0, 0, 1, 1], [], []>} : vector<2x32xf32>, vector<32x128xf32>, vector<2x128xf32> -> vector<2x128xf32>
    %396 = arith.addf %394, %395 : vector<2x128xf32>
    %397 = arith.negf %396 : vector<2x128xf32>
    %398 = math.exp %397 : vector<2x128xf32>
    %cst_150 = arith.constant 1.000000e+00 : f32
    %399 = vector.broadcast %cst_150 : f32 to vector<2x128xf32>
    %400 = arith.addf %399, %398 : vector<2x128xf32>
    %401 = arith.divf %399, %400 : vector<2x128xf32>
    %402 = math.tanh %396 : vector<2x128xf32>
    %403 = vector.extract_strided_slice %401 {offsets = [0, 32], sizes = [2, 32], strides = [1, 1]} : vector<2x128xf32> to vector<2x32xf32>
    %404 = arith.mulf %403, %389 : vector<2x32xf32>
    %405 = vector.extract_strided_slice %401 {offsets = [0, 0], sizes = [2, 32], strides = [1, 1]} : vector<2x128xf32> to vector<2x32xf32>
    %406 = vector.extract_strided_slice %402 {offsets = [0, 64], sizes = [2, 32], strides = [1, 1]} : vector<2x128xf32> to vector<2x32xf32>
    %407 = arith.mulf %405, %406 : vector<2x32xf32>
    %408 = arith.addf %404, %407 : vector<2x32xf32>
    %409 = vector.extract_strided_slice %401 {offsets = [0, 96], sizes = [2, 32], strides = [1, 1]} : vector<2x128xf32> to vector<2x32xf32>
    %410 = math.tanh %408 : vector<2x32xf32>
    %411 = arith.mulf %409, %410 : vector<2x32xf32>
    %c6_151 = arith.constant 6 : index
    %c0_152 = arith.constant 0 : index
    %412 = vector.load %arg45[%c6_151, %c0_152] : memref<16x32xf32, #tpu.memory_space<vmem>>, vector<2x32xf32>
    tpu.vector_store %arg45[%c6_151, %c0_152], %411 {strides = array<i32>} : memref<16x32xf32, #tpu.memory_space<vmem>>, vector<2x32xf32>,
    %c8_153 = arith.constant 8 : index
    %c0_154 = arith.constant 0 : index
    %413 = vector.load %arg42[%c8_153, %c0_154] : memref<16x128xf32, #tpu.memory_space<vmem>>, vector<2x128xf32>
    %cst_155 = arith.constant dense<0.000000e+00> : vector<2x128xf32>
    %414 = tpu.matmul %411, %334, %cst_155 {dimension_numbers = #tpu.dot_dimension_numbers<[1], [0], [0], [1], [0, 0, 1, 1], [], []>} : vector<2x32xf32>, vector<32x128xf32>, vector<2x128xf32> -> vector<2x128xf32>
    %415 = arith.addf %413, %414 : vector<2x128xf32>
    %416 = arith.negf %415 : vector<2x128xf32>
    %417 = math.exp %416 : vector<2x128xf32>
    %cst_156 = arith.constant 1.000000e+00 : f32
    %418 = vector.broadcast %cst_156 : f32 to vector<2x128xf32>
    %419 = arith.addf %418, %417 : vector<2x128xf32>
    %420 = arith.divf %418, %419 : vector<2x128xf32>
    %421 = math.tanh %415 : vector<2x128xf32>
    %422 = vector.extract_strided_slice %420 {offsets = [0, 32], sizes = [2, 32], strides = [1, 1]} : vector<2x128xf32> to vector<2x32xf32>
    %423 = arith.mulf %422, %408 : vector<2x32xf32>
    %424 = vector.extract_strided_slice %420 {offsets = [0, 0], sizes = [2, 32], strides = [1, 1]} : vector<2x128xf32> to vector<2x32xf32>
    %425 = vector.extract_strided_slice %421 {offsets = [0, 64], sizes = [2, 32], strides = [1, 1]} : vector<2x128xf32> to vector<2x32xf32>
    %426 = arith.mulf %424, %425 : vector<2x32xf32>
    %427 = arith.addf %423, %426 : vector<2x32xf32>
    %428 = vector.extract_strided_slice %420 {offsets = [0, 96], sizes = [2, 32], strides = [1, 1]} : vector<2x128xf32> to vector<2x32xf32>
    %429 = math.tanh %427 : vector<2x32xf32>
    %430 = arith.mulf %428, %429 : vector<2x32xf32>
    %c8_157 = arith.constant 8 : index
    %c0_158 = arith.constant 0 : index
    %431 = vector.load %arg45[%c8_157, %c0_158] : memref<16x32xf32, #tpu.memory_space<vmem>>, vector<2x32xf32>
    tpu.vector_store %arg45[%c8_157, %c0_158], %430 {strides = array<i32>} : memref<16x32xf32, #tpu.memory_space<vmem>>, vector<2x32xf32>,
    %c10_159 = arith.constant 10 : index
    %c0_160 = arith.constant 0 : index
    %432 = vector.load %arg42[%c10_159, %c0_160] : memref<16x128xf32, #tpu.memory_space<vmem>>, vector<2x128xf32>
    %cst_161 = arith.constant dense<0.000000e+00> : vector<2x128xf32>
    %433 = tpu.matmul %430, %334, %cst_161 {dimension_numbers = #tpu.dot_dimension_numbers<[1], [0], [0], [1], [0, 0, 1, 1], [], []>} : vector<2x32xf32>, vector<32x128xf32>, vector<2x128xf32> -> vector<2x128xf32>
    %434 = arith.addf %432, %433 : vector<2x128xf32>
    %435 = arith.negf %434 : vector<2x128xf32>
    %436 = math.exp %435 : vector<2x128xf32>
    %cst_162 = arith.constant 1.000000e+00 : f32
    %437 = vector.broadcast %cst_162 : f32 to vector<2x128xf32>
    %438 = arith.addf %437, %436 : vector<2x128xf32>
    %439 = arith.divf %437, %438 : vector<2x128xf32>
    %440 = math.tanh %434 : vector<2x128xf32>
    %441 = vector.extract_strided_slice %439 {offsets = [0, 32], sizes = [2, 32], strides = [1, 1]} : vector<2x128xf32> to vector<2x32xf32>
    %442 = arith.mulf %441, %427 : vector<2x32xf32>
    %443 = vector.extract_strided_slice %439 {offsets = [0, 0], sizes = [2, 32], strides = [1, 1]} : vector<2x128xf32> to vector<2x32xf32>
    %444 = vector.extract_strided_slice %440 {offsets = [0, 64], sizes = [2, 32], strides = [1, 1]} : vector<2x128xf32> to vector<2x32xf32>
    %445 = arith.mulf %443, %444 : vector<2x32xf32>
    %446 = arith.addf %442, %445 : vector<2x32xf32>
    %447 = vector.extract_strided_slice %439 {offsets = [0, 96], sizes = [2, 32], strides = [1, 1]} : vector<2x128xf32> to vector<2x32xf32>
    %448 = math.tanh %446 : vector<2x32xf32>
    %449 = arith.mulf %447, %448 : vector<2x32xf32>
    %c10_163 = arith.constant 10 : index
    %c0_164 = arith.constant 0 : index
    %450 = vector.load %arg45[%c10_163, %c0_164] : memref<16x32xf32, #tpu.memory_space<vmem>>, vector<2x32xf32>
    tpu.vector_store %arg45[%c10_163, %c0_164], %449 {strides = array<i32>} : memref<16x32xf32, #tpu.memory_space<vmem>>, vector<2x32xf32>,
    %c12_165 = arith.constant 12 : index
    %c0_166 = arith.constant 0 : index
    %451 = vector.load %arg42[%c12_165, %c0_166] : memref<16x128xf32, #tpu.memory_space<vmem>>, vector<2x128xf32>
    %cst_167 = arith.constant dense<0.000000e+00> : vector<2x128xf32>
    %452 = tpu.matmul %449, %334, %cst_167 {dimension_numbers = #tpu.dot_dimension_numbers<[1], [0], [0], [1], [0, 0, 1, 1], [], []>} : vector<2x32xf32>, vector<32x128xf32>, vector<2x128xf32> -> vector<2x128xf32>
    %453 = arith.addf %451, %452 : vector<2x128xf32>
    %454 = arith.negf %453 : vector<2x128xf32>
    %455 = math.exp %454 : vector<2x128xf32>
    %cst_168 = arith.constant 1.000000e+00 : f32
    %456 = vector.broadcast %cst_168 : f32 to vector<2x128xf32>
    %457 = arith.addf %456, %455 : vector<2x128xf32>
    %458 = arith.divf %456, %457 : vector<2x128xf32>
    %459 = math.tanh %453 : vector<2x128xf32>
    %460 = vector.extract_strided_slice %458 {offsets = [0, 32], sizes = [2, 32], strides = [1, 1]} : vector<2x128xf32> to vector<2x32xf32>
    %461 = arith.mulf %460, %446 : vector<2x32xf32>
    %462 = vector.extract_strided_slice %458 {offsets = [0, 0], sizes = [2, 32], strides = [1, 1]} : vector<2x128xf32> to vector<2x32xf32>
    %463 = vector.extract_strided_slice %459 {offsets = [0, 64], sizes = [2, 32], strides = [1, 1]} : vector<2x128xf32> to vector<2x32xf32>
    %464 = arith.mulf %462, %463 : vector<2x32xf32>
    %465 = arith.addf %461, %464 : vector<2x32xf32>
    %466 = vector.extract_strided_slice %458 {offsets = [0, 96], sizes = [2, 32], strides = [1, 1]} : vector<2x128xf32> to vector<2x32xf32>
    %467 = math.tanh %465 : vector<2x32xf32>
    %468 = arith.mulf %466, %467 : vector<2x32xf32>
    %c12_169 = arith.constant 12 : index
    %c0_170 = arith.constant 0 : index
    %469 = vector.load %arg45[%c12_169, %c0_170] : memref<16x32xf32, #tpu.memory_space<vmem>>, vector<2x32xf32>
    tpu.vector_store %arg45[%c12_169, %c0_170], %468 {strides = array<i32>} : memref<16x32xf32, #tpu.memory_space<vmem>>, vector<2x32xf32>,
    %c14_171 = arith.constant 14 : index
    %c0_172 = arith.constant 0 : index
    %470 = vector.load %arg42[%c14_171, %c0_172] : memref<16x128xf32, #tpu.memory_space<vmem>>, vector<2x128xf32>
    %cst_173 = arith.constant dense<0.000000e+00> : vector<2x128xf32>
    %471 = tpu.matmul %468, %334, %cst_173 {dimension_numbers = #tpu.dot_dimension_numbers<[1], [0], [0], [1], [0, 0, 1, 1], [], []>} : vector<2x32xf32>, vector<32x128xf32>, vector<2x128xf32> -> vector<2x128xf32>
    %472 = arith.addf %470, %471 : vector<2x128xf32>
    %473 = arith.negf %472 : vector<2x128xf32>
    %474 = math.exp %473 : vector<2x128xf32>
    %cst_174 = arith.constant 1.000000e+00 : f32
    %475 = vector.broadcast %cst_174 : f32 to vector<2x128xf32>
    %476 = arith.addf %475, %474 : vector<2x128xf32>
    %477 = arith.divf %475, %476 : vector<2x128xf32>
    %478 = math.tanh %472 : vector<2x128xf32>
    %479 = vector.extract_strided_slice %477 {offsets = [0, 32], sizes = [2, 32], strides = [1, 1]} : vector<2x128xf32> to vector<2x32xf32>
    %480 = arith.mulf %479, %465 : vector<2x32xf32>
    %481 = vector.extract_strided_slice %477 {offsets = [0, 0], sizes = [2, 32], strides = [1, 1]} : vector<2x128xf32> to vector<2x32xf32>
    %482 = vector.extract_strided_slice %478 {offsets = [0, 64], sizes = [2, 32], strides = [1, 1]} : vector<2x128xf32> to vector<2x32xf32>
    %483 = arith.mulf %481, %482 : vector<2x32xf32>
    %484 = arith.addf %480, %483 : vector<2x32xf32>
    %485 = vector.extract_strided_slice %477 {offsets = [0, 96], sizes = [2, 32], strides = [1, 1]} : vector<2x128xf32> to vector<2x32xf32>
    %486 = math.tanh %484 : vector<2x32xf32>
    %487 = arith.mulf %485, %486 : vector<2x32xf32>
    %c14_175 = arith.constant 14 : index
    %c0_176 = arith.constant 0 : index
    %488 = vector.load %arg45[%c14_175, %c0_176] : memref<16x32xf32, #tpu.memory_space<vmem>>, vector<2x32xf32>
    tpu.vector_store %arg45[%c14_175, %c0_176], %487 {strides = array<i32>} : memref<16x32xf32, #tpu.memory_space<vmem>>, vector<2x32xf32>,
    %c0_177 = arith.constant 0 : index
    %c0_178 = arith.constant 0 : index
    %489 = vector.load %arg45[%c0_177, %c0_178] : memref<16x32xf32, #tpu.memory_space<vmem>>, vector<16x32xf32>
    %c0_179 = arith.constant 0 : index
    %c0_180 = arith.constant 0 : index
    %490 = vector.load %arg11[%c0_179, %c0_180] : memref<32x128xf32, #tpu.memory_space<vmem>>, vector<32x128xf32>
    %cst_181 = arith.constant dense<0.000000e+00> : vector<16x128xf32>
    %491 = tpu.matmul %162, %490, %cst_181 {dimension_numbers = #tpu.dot_dimension_numbers<[1], [0], [0], [1], [0, 0, 1, 1], [], []>} : vector<16x32xf32>, vector<32x128xf32>, vector<16x128xf32> -> vector<16x128xf32>
    %c0_182 = arith.constant 0 : index
    %c0_183 = arith.constant 0 : index
    %492 = vector.load %arg12[%c0_182, %c0_183] : memref<32x128xf32, #tpu.memory_space<vmem>>, vector<32x128xf32>
    %cst_184 = arith.constant dense<0.000000e+00> : vector<16x128xf32>
    %493 = tpu.matmul %324, %492, %cst_184 {dimension_numbers = #tpu.dot_dimension_numbers<[1], [0], [0], [1], [0, 0, 1, 1], [], []>} : vector<16x32xf32>, vector<32x128xf32>, vector<16x128xf32> -> vector<16x128xf32>
    %494 = arith.addf %491, %493 : vector<16x128xf32>
    %c0_185 = arith.constant 0 : index
    %c0_186 = arith.constant 0 : index
    %495 = vector.load %arg14[%c0_185, %c0_186] : memref<1x128xf32, #tpu.memory_space<vmem>>, vector<1x128xf32>
    %496 = vector.broadcast %495 : vector<1x128xf32> to vector<16x128xf32>
    %497 = arith.addf %494, %496 : vector<16x128xf32>
    %c0_187 = arith.constant 0 : index
    %c0_188 = arith.constant 0 : index
    %498 = vector.load %arg42[%c0_187, %c0_188] : memref<16x128xf32, #tpu.memory_space<vmem>>, vector<16x128xf32>
    tpu.vector_store %arg42[%c0_187, %c0_188], %497 {strides = array<i32>} : memref<16x128xf32, #tpu.memory_space<vmem>>, vector<16x128xf32>,
    %c0_189 = arith.constant 0 : index
    %c0_190 = arith.constant 0 : index
    %499 = vector.load %arg13[%c0_189, %c0_190] : memref<32x128xf32, #tpu.memory_space<vmem>>, vector<32x128xf32>
    %cst_191 = arith.constant 0.000000e+00 : f32
    %500 = vector.broadcast %cst_191 : f32 to vector<2x32xf32>
    %cst_192 = arith.constant 0.000000e+00 : f32
    %501 = vector.broadcast %cst_192 : f32 to vector<2x32xf32>
    %c14_193 = arith.constant 14 : index
    %c0_194 = arith.constant 0 : index
    %502 = vector.load %arg42[%c14_193, %c0_194] : memref<16x128xf32, #tpu.memory_space<vmem>>, vector<2x128xf32>
    %cst_195 = arith.constant dense<0.000000e+00> : vector<2x128xf32>
    %503 = tpu.matmul %500, %499, %cst_195 {dimension_numbers = #tpu.dot_dimension_numbers<[1], [0], [0], [1], [0, 0, 1, 1], [], []>} : vector<2x32xf32>, vector<32x128xf32>, vector<2x128xf32> -> vector<2x128xf32>
    %504 = arith.addf %502, %503 : vector<2x128xf32>
    %505 = arith.negf %504 : vector<2x128xf32>
    %506 = math.exp %505 : vector<2x128xf32>
    %cst_196 = arith.constant 1.000000e+00 : f32
    %507 = vector.broadcast %cst_196 : f32 to vector<2x128xf32>
    %508 = arith.addf %507, %506 : vector<2x128xf32>
    %509 = arith.divf %507, %508 : vector<2x128xf32>
    %510 = math.tanh %504 : vector<2x128xf32>
    %511 = vector.extract_strided_slice %509 {offsets = [0, 32], sizes = [2, 32], strides = [1, 1]} : vector<2x128xf32> to vector<2x32xf32>
    %512 = arith.mulf %511, %501 : vector<2x32xf32>
    %513 = vector.extract_strided_slice %509 {offsets = [0, 0], sizes = [2, 32], strides = [1, 1]} : vector<2x128xf32> to vector<2x32xf32>
    %514 = vector.extract_strided_slice %510 {offsets = [0, 64], sizes = [2, 32], strides = [1, 1]} : vector<2x128xf32> to vector<2x32xf32>
    %515 = arith.mulf %513, %514 : vector<2x32xf32>
    %516 = arith.addf %512, %515 : vector<2x32xf32>
    %517 = vector.extract_strided_slice %509 {offsets = [0, 96], sizes = [2, 32], strides = [1, 1]} : vector<2x128xf32> to vector<2x32xf32>
    %518 = math.tanh %516 : vector<2x32xf32>
    %519 = arith.mulf %517, %518 : vector<2x32xf32>
    %c14_197 = arith.constant 14 : index
    %c0_198 = arith.constant 0 : index
    %520 = vector.load %arg46[%c14_197, %c0_198] : memref<16x32xf32, #tpu.memory_space<vmem>>, vector<2x32xf32>
    tpu.vector_store %arg46[%c14_197, %c0_198], %519 {strides = array<i32>} : memref<16x32xf32, #tpu.memory_space<vmem>>, vector<2x32xf32>,
    %c12_199 = arith.constant 12 : index
    %c0_200 = arith.constant 0 : index
    %521 = vector.load %arg42[%c12_199, %c0_200] : memref<16x128xf32, #tpu.memory_space<vmem>>, vector<2x128xf32>
    %cst_201 = arith.constant dense<0.000000e+00> : vector<2x128xf32>
    %522 = tpu.matmul %519, %499, %cst_201 {dimension_numbers = #tpu.dot_dimension_numbers<[1], [0], [0], [1], [0, 0, 1, 1], [], []>} : vector<2x32xf32>, vector<32x128xf32>, vector<2x128xf32> -> vector<2x128xf32>
    %523 = arith.addf %521, %522 : vector<2x128xf32>
    %524 = arith.negf %523 : vector<2x128xf32>
    %525 = math.exp %524 : vector<2x128xf32>
    %cst_202 = arith.constant 1.000000e+00 : f32
    %526 = vector.broadcast %cst_202 : f32 to vector<2x128xf32>
    %527 = arith.addf %526, %525 : vector<2x128xf32>
    %528 = arith.divf %526, %527 : vector<2x128xf32>
    %529 = math.tanh %523 : vector<2x128xf32>
    %530 = vector.extract_strided_slice %528 {offsets = [0, 32], sizes = [2, 32], strides = [1, 1]} : vector<2x128xf32> to vector<2x32xf32>
    %531 = arith.mulf %530, %516 : vector<2x32xf32>
    %532 = vector.extract_strided_slice %528 {offsets = [0, 0], sizes = [2, 32], strides = [1, 1]} : vector<2x128xf32> to vector<2x32xf32>
    %533 = vector.extract_strided_slice %529 {offsets = [0, 64], sizes = [2, 32], strides = [1, 1]} : vector<2x128xf32> to vector<2x32xf32>
    %534 = arith.mulf %532, %533 : vector<2x32xf32>
    %535 = arith.addf %531, %534 : vector<2x32xf32>
    %536 = vector.extract_strided_slice %528 {offsets = [0, 96], sizes = [2, 32], strides = [1, 1]} : vector<2x128xf32> to vector<2x32xf32>
    %537 = math.tanh %535 : vector<2x32xf32>
    %538 = arith.mulf %536, %537 : vector<2x32xf32>
    %c12_203 = arith.constant 12 : index
    %c0_204 = arith.constant 0 : index
    %539 = vector.load %arg46[%c12_203, %c0_204] : memref<16x32xf32, #tpu.memory_space<vmem>>, vector<2x32xf32>
    tpu.vector_store %arg46[%c12_203, %c0_204], %538 {strides = array<i32>} : memref<16x32xf32, #tpu.memory_space<vmem>>, vector<2x32xf32>,
    %c10_205 = arith.constant 10 : index
    %c0_206 = arith.constant 0 : index
    %540 = vector.load %arg42[%c10_205, %c0_206] : memref<16x128xf32, #tpu.memory_space<vmem>>, vector<2x128xf32>
    %cst_207 = arith.constant dense<0.000000e+00> : vector<2x128xf32>
    %541 = tpu.matmul %538, %499, %cst_207 {dimension_numbers = #tpu.dot_dimension_numbers<[1], [0], [0], [1], [0, 0, 1, 1], [], []>} : vector<2x32xf32>, vector<32x128xf32>, vector<2x128xf32> -> vector<2x128xf32>
    %542 = arith.addf %540, %541 : vector<2x128xf32>
    %543 = arith.negf %542 : vector<2x128xf32>
    %544 = math.exp %543 : vector<2x128xf32>
    %cst_208 = arith.constant 1.000000e+00 : f32
    %545 = vector.broadcast %cst_208 : f32 to vector<2x128xf32>
    %546 = arith.addf %545, %544 : vector<2x128xf32>
    %547 = arith.divf %545, %546 : vector<2x128xf32>
    %548 = math.tanh %542 : vector<2x128xf32>
    %549 = vector.extract_strided_slice %547 {offsets = [0, 32], sizes = [2, 32], strides = [1, 1]} : vector<2x128xf32> to vector<2x32xf32>
    %550 = arith.mulf %549, %535 : vector<2x32xf32>
    %551 = vector.extract_strided_slice %547 {offsets = [0, 0], sizes = [2, 32], strides = [1, 1]} : vector<2x128xf32> to vector<2x32xf32>
    %552 = vector.extract_strided_slice %548 {offsets = [0, 64], sizes = [2, 32], strides = [1, 1]} : vector<2x128xf32> to vector<2x32xf32>
    %553 = arith.mulf %551, %552 : vector<2x32xf32>
    %554 = arith.addf %550, %553 : vector<2x32xf32>
    %555 = vector.extract_strided_slice %547 {offsets = [0, 96], sizes = [2, 32], strides = [1, 1]} : vector<2x128xf32> to vector<2x32xf32>
    %556 = math.tanh %554 : vector<2x32xf32>
    %557 = arith.mulf %555, %556 : vector<2x32xf32>
    %c10_209 = arith.constant 10 : index
    %c0_210 = arith.constant 0 : index
    %558 = vector.load %arg46[%c10_209, %c0_210] : memref<16x32xf32, #tpu.memory_space<vmem>>, vector<2x32xf32>
    tpu.vector_store %arg46[%c10_209, %c0_210], %557 {strides = array<i32>} : memref<16x32xf32, #tpu.memory_space<vmem>>, vector<2x32xf32>,
    %c8_211 = arith.constant 8 : index
    %c0_212 = arith.constant 0 : index
    %559 = vector.load %arg42[%c8_211, %c0_212] : memref<16x128xf32, #tpu.memory_space<vmem>>, vector<2x128xf32>
    %cst_213 = arith.constant dense<0.000000e+00> : vector<2x128xf32>
    %560 = tpu.matmul %557, %499, %cst_213 {dimension_numbers = #tpu.dot_dimension_numbers<[1], [0], [0], [1], [0, 0, 1, 1], [], []>} : vector<2x32xf32>, vector<32x128xf32>, vector<2x128xf32> -> vector<2x128xf32>
    %561 = arith.addf %559, %560 : vector<2x128xf32>
    %562 = arith.negf %561 : vector<2x128xf32>
    %563 = math.exp %562 : vector<2x128xf32>
    %cst_214 = arith.constant 1.000000e+00 : f32
    %564 = vector.broadcast %cst_214 : f32 to vector<2x128xf32>
    %565 = arith.addf %564, %563 : vector<2x128xf32>
    %566 = arith.divf %564, %565 : vector<2x128xf32>
    %567 = math.tanh %561 : vector<2x128xf32>
    %568 = vector.extract_strided_slice %566 {offsets = [0, 32], sizes = [2, 32], strides = [1, 1]} : vector<2x128xf32> to vector<2x32xf32>
    %569 = arith.mulf %568, %554 : vector<2x32xf32>
    %570 = vector.extract_strided_slice %566 {offsets = [0, 0], sizes = [2, 32], strides = [1, 1]} : vector<2x128xf32> to vector<2x32xf32>
    %571 = vector.extract_strided_slice %567 {offsets = [0, 64], sizes = [2, 32], strides = [1, 1]} : vector<2x128xf32> to vector<2x32xf32>
    %572 = arith.mulf %570, %571 : vector<2x32xf32>
    %573 = arith.addf %569, %572 : vector<2x32xf32>
    %574 = vector.extract_strided_slice %566 {offsets = [0, 96], sizes = [2, 32], strides = [1, 1]} : vector<2x128xf32> to vector<2x32xf32>
    %575 = math.tanh %573 : vector<2x32xf32>
    %576 = arith.mulf %574, %575 : vector<2x32xf32>
    %c8_215 = arith.constant 8 : index
    %c0_216 = arith.constant 0 : index
    %577 = vector.load %arg46[%c8_215, %c0_216] : memref<16x32xf32, #tpu.memory_space<vmem>>, vector<2x32xf32>
    tpu.vector_store %arg46[%c8_215, %c0_216], %576 {strides = array<i32>} : memref<16x32xf32, #tpu.memory_space<vmem>>, vector<2x32xf32>,
    %c6_217 = arith.constant 6 : index
    %c0_218 = arith.constant 0 : index
    %578 = vector.load %arg42[%c6_217, %c0_218] : memref<16x128xf32, #tpu.memory_space<vmem>>, vector<2x128xf32>
    %cst_219 = arith.constant dense<0.000000e+00> : vector<2x128xf32>
    %579 = tpu.matmul %576, %499, %cst_219 {dimension_numbers = #tpu.dot_dimension_numbers<[1], [0], [0], [1], [0, 0, 1, 1], [], []>} : vector<2x32xf32>, vector<32x128xf32>, vector<2x128xf32> -> vector<2x128xf32>
    %580 = arith.addf %578, %579 : vector<2x128xf32>
    %581 = arith.negf %580 : vector<2x128xf32>
    %582 = math.exp %581 : vector<2x128xf32>
    %cst_220 = arith.constant 1.000000e+00 : f32
    %583 = vector.broadcast %cst_220 : f32 to vector<2x128xf32>
    %584 = arith.addf %583, %582 : vector<2x128xf32>
    %585 = arith.divf %583, %584 : vector<2x128xf32>
    %586 = math.tanh %580 : vector<2x128xf32>
    %587 = vector.extract_strided_slice %585 {offsets = [0, 32], sizes = [2, 32], strides = [1, 1]} : vector<2x128xf32> to vector<2x32xf32>
    %588 = arith.mulf %587, %573 : vector<2x32xf32>
    %589 = vector.extract_strided_slice %585 {offsets = [0, 0], sizes = [2, 32], strides = [1, 1]} : vector<2x128xf32> to vector<2x32xf32>
    %590 = vector.extract_strided_slice %586 {offsets = [0, 64], sizes = [2, 32], strides = [1, 1]} : vector<2x128xf32> to vector<2x32xf32>
    %591 = arith.mulf %589, %590 : vector<2x32xf32>
    %592 = arith.addf %588, %591 : vector<2x32xf32>
    %593 = vector.extract_strided_slice %585 {offsets = [0, 96], sizes = [2, 32], strides = [1, 1]} : vector<2x128xf32> to vector<2x32xf32>
    %594 = math.tanh %592 : vector<2x32xf32>
    %595 = arith.mulf %593, %594 : vector<2x32xf32>
    %c6_221 = arith.constant 6 : index
    %c0_222 = arith.constant 0 : index
    %596 = vector.load %arg46[%c6_221, %c0_222] : memref<16x32xf32, #tpu.memory_space<vmem>>, vector<2x32xf32>
    tpu.vector_store %arg46[%c6_221, %c0_222], %595 {strides = array<i32>} : memref<16x32xf32, #tpu.memory_space<vmem>>, vector<2x32xf32>,
    %c4_223 = arith.constant 4 : index
    %c0_224 = arith.constant 0 : index
    %597 = vector.load %arg42[%c4_223, %c0_224] : memref<16x128xf32, #tpu.memory_space<vmem>>, vector<2x128xf32>
    %cst_225 = arith.constant dense<0.000000e+00> : vector<2x128xf32>
    %598 = tpu.matmul %595, %499, %cst_225 {dimension_numbers = #tpu.dot_dimension_numbers<[1], [0], [0], [1], [0, 0, 1, 1], [], []>} : vector<2x32xf32>, vector<32x128xf32>, vector<2x128xf32> -> vector<2x128xf32>
    %599 = arith.addf %597, %598 : vector<2x128xf32>
    %600 = arith.negf %599 : vector<2x128xf32>
    %601 = math.exp %600 : vector<2x128xf32>
    %cst_226 = arith.constant 1.000000e+00 : f32
    %602 = vector.broadcast %cst_226 : f32 to vector<2x128xf32>
    %603 = arith.addf %602, %601 : vector<2x128xf32>
    %604 = arith.divf %602, %603 : vector<2x128xf32>
    %605 = math.tanh %599 : vector<2x128xf32>
    %606 = vector.extract_strided_slice %604 {offsets = [0, 32], sizes = [2, 32], strides = [1, 1]} : vector<2x128xf32> to vector<2x32xf32>
    %607 = arith.mulf %606, %592 : vector<2x32xf32>
    %608 = vector.extract_strided_slice %604 {offsets = [0, 0], sizes = [2, 32], strides = [1, 1]} : vector<2x128xf32> to vector<2x32xf32>
    %609 = vector.extract_strided_slice %605 {offsets = [0, 64], sizes = [2, 32], strides = [1, 1]} : vector<2x128xf32> to vector<2x32xf32>
    %610 = arith.mulf %608, %609 : vector<2x32xf32>
    %611 = arith.addf %607, %610 : vector<2x32xf32>
    %612 = vector.extract_strided_slice %604 {offsets = [0, 96], sizes = [2, 32], strides = [1, 1]} : vector<2x128xf32> to vector<2x32xf32>
    %613 = math.tanh %611 : vector<2x32xf32>
    %614 = arith.mulf %612, %613 : vector<2x32xf32>
    %c4_227 = arith.constant 4 : index
    %c0_228 = arith.constant 0 : index
    %615 = vector.load %arg46[%c4_227, %c0_228] : memref<16x32xf32, #tpu.memory_space<vmem>>, vector<2x32xf32>
    tpu.vector_store %arg46[%c4_227, %c0_228], %614 {strides = array<i32>} : memref<16x32xf32, #tpu.memory_space<vmem>>, vector<2x32xf32>,
    %c2_229 = arith.constant 2 : index
    %c0_230 = arith.constant 0 : index
    %616 = vector.load %arg42[%c2_229, %c0_230] : memref<16x128xf32, #tpu.memory_space<vmem>>, vector<2x128xf32>
    %cst_231 = arith.constant dense<0.000000e+00> : vector<2x128xf32>
    %617 = tpu.matmul %614, %499, %cst_231 {dimension_numbers = #tpu.dot_dimension_numbers<[1], [0], [0], [1], [0, 0, 1, 1], [], []>} : vector<2x32xf32>, vector<32x128xf32>, vector<2x128xf32> -> vector<2x128xf32>
    %618 = arith.addf %616, %617 : vector<2x128xf32>
    %619 = arith.negf %618 : vector<2x128xf32>
    %620 = math.exp %619 : vector<2x128xf32>
    %cst_232 = arith.constant 1.000000e+00 : f32
    %621 = vector.broadcast %cst_232 : f32 to vector<2x128xf32>
    %622 = arith.addf %621, %620 : vector<2x128xf32>
    %623 = arith.divf %621, %622 : vector<2x128xf32>
    %624 = math.tanh %618 : vector<2x128xf32>
    %625 = vector.extract_strided_slice %623 {offsets = [0, 32], sizes = [2, 32], strides = [1, 1]} : vector<2x128xf32> to vector<2x32xf32>
    %626 = arith.mulf %625, %611 : vector<2x32xf32>
    %627 = vector.extract_strided_slice %623 {offsets = [0, 0], sizes = [2, 32], strides = [1, 1]} : vector<2x128xf32> to vector<2x32xf32>
    %628 = vector.extract_strided_slice %624 {offsets = [0, 64], sizes = [2, 32], strides = [1, 1]} : vector<2x128xf32> to vector<2x32xf32>
    %629 = arith.mulf %627, %628 : vector<2x32xf32>
    %630 = arith.addf %626, %629 : vector<2x32xf32>
    %631 = vector.extract_strided_slice %623 {offsets = [0, 96], sizes = [2, 32], strides = [1, 1]} : vector<2x128xf32> to vector<2x32xf32>
    %632 = math.tanh %630 : vector<2x32xf32>
    %633 = arith.mulf %631, %632 : vector<2x32xf32>
    %c2_233 = arith.constant 2 : index
    %c0_234 = arith.constant 0 : index
    %634 = vector.load %arg46[%c2_233, %c0_234] : memref<16x32xf32, #tpu.memory_space<vmem>>, vector<2x32xf32>
    tpu.vector_store %arg46[%c2_233, %c0_234], %633 {strides = array<i32>} : memref<16x32xf32, #tpu.memory_space<vmem>>, vector<2x32xf32>,
    %c0_235 = arith.constant 0 : index
    %c0_236 = arith.constant 0 : index
    %635 = vector.load %arg42[%c0_235, %c0_236] : memref<16x128xf32, #tpu.memory_space<vmem>>, vector<2x128xf32>
    %cst_237 = arith.constant dense<0.000000e+00> : vector<2x128xf32>
    %636 = tpu.matmul %633, %499, %cst_237 {dimension_numbers = #tpu.dot_dimension_numbers<[1], [0], [0], [1], [0, 0, 1, 1], [], []>} : vector<2x32xf32>, vector<32x128xf32>, vector<2x128xf32> -> vector<2x128xf32>
    %637 = arith.addf %635, %636 : vector<2x128xf32>
    %638 = arith.negf %637 : vector<2x128xf32>
    %639 = math.exp %638 : vector<2x128xf32>
    %cst_238 = arith.constant 1.000000e+00 : f32
    %640 = vector.broadcast %cst_238 : f32 to vector<2x128xf32>
    %641 = arith.addf %640, %639 : vector<2x128xf32>
    %642 = arith.divf %640, %641 : vector<2x128xf32>
    %643 = math.tanh %637 : vector<2x128xf32>
    %644 = vector.extract_strided_slice %642 {offsets = [0, 32], sizes = [2, 32], strides = [1, 1]} : vector<2x128xf32> to vector<2x32xf32>
    %645 = arith.mulf %644, %630 : vector<2x32xf32>
    %646 = vector.extract_strided_slice %642 {offsets = [0, 0], sizes = [2, 32], strides = [1, 1]} : vector<2x128xf32> to vector<2x32xf32>
    %647 = vector.extract_strided_slice %643 {offsets = [0, 64], sizes = [2, 32], strides = [1, 1]} : vector<2x128xf32> to vector<2x32xf32>
    %648 = arith.mulf %646, %647 : vector<2x32xf32>
    %649 = arith.addf %645, %648 : vector<2x32xf32>
    %650 = vector.extract_strided_slice %642 {offsets = [0, 96], sizes = [2, 32], strides = [1, 1]} : vector<2x128xf32> to vector<2x32xf32>
    %651 = math.tanh %649 : vector<2x32xf32>
    %652 = arith.mulf %650, %651 : vector<2x32xf32>
    %c0_239 = arith.constant 0 : index
    %c0_240 = arith.constant 0 : index
    %653 = vector.load %arg46[%c0_239, %c0_240] : memref<16x32xf32, #tpu.memory_space<vmem>>, vector<2x32xf32>
    tpu.vector_store %arg46[%c0_239, %c0_240], %652 {strides = array<i32>} : memref<16x32xf32, #tpu.memory_space<vmem>>, vector<2x32xf32>,
    %c0_241 = arith.constant 0 : index
    %c0_242 = arith.constant 0 : index
    %654 = vector.load %arg46[%c0_241, %c0_242] : memref<16x32xf32, #tpu.memory_space<vmem>>, vector<16x32xf32>
    %c0_243 = arith.constant 0 : index
    %c0_244 = arith.constant 0 : index
    %655 = vector.load %arg15[%c0_243, %c0_244] : memref<32x128xf32, #tpu.memory_space<vmem>>, vector<32x128xf32>
    %cst_245 = arith.constant dense<0.000000e+00> : vector<16x128xf32>
    %656 = tpu.matmul %489, %655, %cst_245 {dimension_numbers = #tpu.dot_dimension_numbers<[1], [0], [0], [1], [0, 0, 1, 1], [], []>} : vector<16x32xf32>, vector<32x128xf32>, vector<16x128xf32> -> vector<16x128xf32>
    %c0_246 = arith.constant 0 : index
    %c0_247 = arith.constant 0 : index
    %657 = vector.load %arg16[%c0_246, %c0_247] : memref<32x128xf32, #tpu.memory_space<vmem>>, vector<32x128xf32>
    %cst_248 = arith.constant dense<0.000000e+00> : vector<16x128xf32>
    %658 = tpu.matmul %654, %657, %cst_248 {dimension_numbers = #tpu.dot_dimension_numbers<[1], [0], [0], [1], [0, 0, 1, 1], [], []>} : vector<16x32xf32>, vector<32x128xf32>, vector<16x128xf32> -> vector<16x128xf32>
    %659 = arith.addf %656, %658 : vector<16x128xf32>
    %c0_249 = arith.constant 0 : index
    %c0_250 = arith.constant 0 : index
    %660 = vector.load %arg18[%c0_249, %c0_250] : memref<1x128xf32, #tpu.memory_space<vmem>>, vector<1x128xf32>
    %661 = vector.broadcast %660 : vector<1x128xf32> to vector<16x128xf32>
    %662 = arith.addf %659, %661 : vector<16x128xf32>
    %c0_251 = arith.constant 0 : index
    %c0_252 = arith.constant 0 : index
    %663 = vector.load %arg42[%c0_251, %c0_252] : memref<16x128xf32, #tpu.memory_space<vmem>>, vector<16x128xf32>
    tpu.vector_store %arg42[%c0_251, %c0_252], %662 {strides = array<i32>} : memref<16x128xf32, #tpu.memory_space<vmem>>, vector<16x128xf32>,
    %c0_253 = arith.constant 0 : index
    %c0_254 = arith.constant 0 : index
    %664 = vector.load %arg17[%c0_253, %c0_254] : memref<32x128xf32, #tpu.memory_space<vmem>>, vector<32x128xf32>
    %cst_255 = arith.constant 0.000000e+00 : f32
    %665 = vector.broadcast %cst_255 : f32 to vector<2x32xf32>
    %cst_256 = arith.constant 0.000000e+00 : f32
    %666 = vector.broadcast %cst_256 : f32 to vector<2x32xf32>
    %c0_257 = arith.constant 0 : index
    %c0_258 = arith.constant 0 : index
    %667 = vector.load %arg42[%c0_257, %c0_258] : memref<16x128xf32, #tpu.memory_space<vmem>>, vector<2x128xf32>
    %cst_259 = arith.constant dense<0.000000e+00> : vector<2x128xf32>
    %668 = tpu.matmul %665, %664, %cst_259 {dimension_numbers = #tpu.dot_dimension_numbers<[1], [0], [0], [1], [0, 0, 1, 1], [], []>} : vector<2x32xf32>, vector<32x128xf32>, vector<2x128xf32> -> vector<2x128xf32>
    %669 = arith.addf %667, %668 : vector<2x128xf32>
    %670 = arith.negf %669 : vector<2x128xf32>
    %671 = math.exp %670 : vector<2x128xf32>
    %cst_260 = arith.constant 1.000000e+00 : f32
    %672 = vector.broadcast %cst_260 : f32 to vector<2x128xf32>
    %673 = arith.addf %672, %671 : vector<2x128xf32>
    %674 = arith.divf %672, %673 : vector<2x128xf32>
    %675 = math.tanh %669 : vector<2x128xf32>
    %676 = vector.extract_strided_slice %674 {offsets = [0, 32], sizes = [2, 32], strides = [1, 1]} : vector<2x128xf32> to vector<2x32xf32>
    %677 = arith.mulf %676, %666 : vector<2x32xf32>
    %678 = vector.extract_strided_slice %674 {offsets = [0, 0], sizes = [2, 32], strides = [1, 1]} : vector<2x128xf32> to vector<2x32xf32>
    %679 = vector.extract_strided_slice %675 {offsets = [0, 64], sizes = [2, 32], strides = [1, 1]} : vector<2x128xf32> to vector<2x32xf32>
    %680 = arith.mulf %678, %679 : vector<2x32xf32>
    %681 = arith.addf %677, %680 : vector<2x32xf32>
    %682 = vector.extract_strided_slice %674 {offsets = [0, 96], sizes = [2, 32], strides = [1, 1]} : vector<2x128xf32> to vector<2x32xf32>
    %683 = math.tanh %681 : vector<2x32xf32>
    %684 = arith.mulf %682, %683 : vector<2x32xf32>
    %c0_261 = arith.constant 0 : index
    %c0_262 = arith.constant 0 : index
    %685 = vector.load %arg43[%c0_261, %c0_262] : memref<16x32xf32, #tpu.memory_space<vmem>>, vector<2x32xf32>
    tpu.vector_store %arg43[%c0_261, %c0_262], %684 {strides = array<i32>} : memref<16x32xf32, #tpu.memory_space<vmem>>, vector<2x32xf32>,
    %c2_263 = arith.constant 2 : index
    %c0_264 = arith.constant 0 : index
    %686 = vector.load %arg42[%c2_263, %c0_264] : memref<16x128xf32, #tpu.memory_space<vmem>>, vector<2x128xf32>
    %cst_265 = arith.constant dense<0.000000e+00> : vector<2x128xf32>
    %687 = tpu.matmul %684, %664, %cst_265 {dimension_numbers = #tpu.dot_dimension_numbers<[1], [0], [0], [1], [0, 0, 1, 1], [], []>} : vector<2x32xf32>, vector<32x128xf32>, vector<2x128xf32> -> vector<2x128xf32>
    %688 = arith.addf %686, %687 : vector<2x128xf32>
    %689 = arith.negf %688 : vector<2x128xf32>
    %690 = math.exp %689 : vector<2x128xf32>
    %cst_266 = arith.constant 1.000000e+00 : f32
    %691 = vector.broadcast %cst_266 : f32 to vector<2x128xf32>
    %692 = arith.addf %691, %690 : vector<2x128xf32>
    %693 = arith.divf %691, %692 : vector<2x128xf32>
    %694 = math.tanh %688 : vector<2x128xf32>
    %695 = vector.extract_strided_slice %693 {offsets = [0, 32], sizes = [2, 32], strides = [1, 1]} : vector<2x128xf32> to vector<2x32xf32>
    %696 = arith.mulf %695, %681 : vector<2x32xf32>
    %697 = vector.extract_strided_slice %693 {offsets = [0, 0], sizes = [2, 32], strides = [1, 1]} : vector<2x128xf32> to vector<2x32xf32>
    %698 = vector.extract_strided_slice %694 {offsets = [0, 64], sizes = [2, 32], strides = [1, 1]} : vector<2x128xf32> to vector<2x32xf32>
    %699 = arith.mulf %697, %698 : vector<2x32xf32>
    %700 = arith.addf %696, %699 : vector<2x32xf32>
    %701 = vector.extract_strided_slice %693 {offsets = [0, 96], sizes = [2, 32], strides = [1, 1]} : vector<2x128xf32> to vector<2x32xf32>
    %702 = math.tanh %700 : vector<2x32xf32>
    %703 = arith.mulf %701, %702 : vector<2x32xf32>
    %c2_267 = arith.constant 2 : index
    %c0_268 = arith.constant 0 : index
    %704 = vector.load %arg43[%c2_267, %c0_268] : memref<16x32xf32, #tpu.memory_space<vmem>>, vector<2x32xf32>
    tpu.vector_store %arg43[%c2_267, %c0_268], %703 {strides = array<i32>} : memref<16x32xf32, #tpu.memory_space<vmem>>, vector<2x32xf32>,
    %c4_269 = arith.constant 4 : index
    %c0_270 = arith.constant 0 : index
    %705 = vector.load %arg42[%c4_269, %c0_270] : memref<16x128xf32, #tpu.memory_space<vmem>>, vector<2x128xf32>
    %cst_271 = arith.constant dense<0.000000e+00> : vector<2x128xf32>
    %706 = tpu.matmul %703, %664, %cst_271 {dimension_numbers = #tpu.dot_dimension_numbers<[1], [0], [0], [1], [0, 0, 1, 1], [], []>} : vector<2x32xf32>, vector<32x128xf32>, vector<2x128xf32> -> vector<2x128xf32>
    %707 = arith.addf %705, %706 : vector<2x128xf32>
    %708 = arith.negf %707 : vector<2x128xf32>
    %709 = math.exp %708 : vector<2x128xf32>
    %cst_272 = arith.constant 1.000000e+00 : f32
    %710 = vector.broadcast %cst_272 : f32 to vector<2x128xf32>
    %711 = arith.addf %710, %709 : vector<2x128xf32>
    %712 = arith.divf %710, %711 : vector<2x128xf32>
    %713 = math.tanh %707 : vector<2x128xf32>
    %714 = vector.extract_strided_slice %712 {offsets = [0, 32], sizes = [2, 32], strides = [1, 1]} : vector<2x128xf32> to vector<2x32xf32>
    %715 = arith.mulf %714, %700 : vector<2x32xf32>
    %716 = vector.extract_strided_slice %712 {offsets = [0, 0], sizes = [2, 32], strides = [1, 1]} : vector<2x128xf32> to vector<2x32xf32>
    %717 = vector.extract_strided_slice %713 {offsets = [0, 64], sizes = [2, 32], strides = [1, 1]} : vector<2x128xf32> to vector<2x32xf32>
    %718 = arith.mulf %716, %717 : vector<2x32xf32>
    %719 = arith.addf %715, %718 : vector<2x32xf32>
    %720 = vector.extract_strided_slice %712 {offsets = [0, 96], sizes = [2, 32], strides = [1, 1]} : vector<2x128xf32> to vector<2x32xf32>
    %721 = math.tanh %719 : vector<2x32xf32>
    %722 = arith.mulf %720, %721 : vector<2x32xf32>
    %c4_273 = arith.constant 4 : index
    %c0_274 = arith.constant 0 : index
    %723 = vector.load %arg43[%c4_273, %c0_274] : memref<16x32xf32, #tpu.memory_space<vmem>>, vector<2x32xf32>
    tpu.vector_store %arg43[%c4_273, %c0_274], %722 {strides = array<i32>} : memref<16x32xf32, #tpu.memory_space<vmem>>, vector<2x32xf32>,
    %c6_275 = arith.constant 6 : index
    %c0_276 = arith.constant 0 : index
    %724 = vector.load %arg42[%c6_275, %c0_276] : memref<16x128xf32, #tpu.memory_space<vmem>>, vector<2x128xf32>
    %cst_277 = arith.constant dense<0.000000e+00> : vector<2x128xf32>
    %725 = tpu.matmul %722, %664, %cst_277 {dimension_numbers = #tpu.dot_dimension_numbers<[1], [0], [0], [1], [0, 0, 1, 1], [], []>} : vector<2x32xf32>, vector<32x128xf32>, vector<2x128xf32> -> vector<2x128xf32>
    %726 = arith.addf %724, %725 : vector<2x128xf32>
    %727 = arith.negf %726 : vector<2x128xf32>
    %728 = math.exp %727 : vector<2x128xf32>
    %cst_278 = arith.constant 1.000000e+00 : f32
    %729 = vector.broadcast %cst_278 : f32 to vector<2x128xf32>
    %730 = arith.addf %729, %728 : vector<2x128xf32>
    %731 = arith.divf %729, %730 : vector<2x128xf32>
    %732 = math.tanh %726 : vector<2x128xf32>
    %733 = vector.extract_strided_slice %731 {offsets = [0, 32], sizes = [2, 32], strides = [1, 1]} : vector<2x128xf32> to vector<2x32xf32>
    %734 = arith.mulf %733, %719 : vector<2x32xf32>
    %735 = vector.extract_strided_slice %731 {offsets = [0, 0], sizes = [2, 32], strides = [1, 1]} : vector<2x128xf32> to vector<2x32xf32>
    %736 = vector.extract_strided_slice %732 {offsets = [0, 64], sizes = [2, 32], strides = [1, 1]} : vector<2x128xf32> to vector<2x32xf32>
    %737 = arith.mulf %735, %736 : vector<2x32xf32>
    %738 = arith.addf %734, %737 : vector<2x32xf32>
    %739 = vector.extract_strided_slice %731 {offsets = [0, 96], sizes = [2, 32], strides = [1, 1]} : vector<2x128xf32> to vector<2x32xf32>
    %740 = math.tanh %738 : vector<2x32xf32>
    %741 = arith.mulf %739, %740 : vector<2x32xf32>
    %c6_279 = arith.constant 6 : index
    %c0_280 = arith.constant 0 : index
    %742 = vector.load %arg43[%c6_279, %c0_280] : memref<16x32xf32, #tpu.memory_space<vmem>>, vector<2x32xf32>
    tpu.vector_store %arg43[%c6_279, %c0_280], %741 {strides = array<i32>} : memref<16x32xf32, #tpu.memory_space<vmem>>, vector<2x32xf32>,
    %c8_281 = arith.constant 8 : index
    %c0_282 = arith.constant 0 : index
    %743 = vector.load %arg42[%c8_281, %c0_282] : memref<16x128xf32, #tpu.memory_space<vmem>>, vector<2x128xf32>
    %cst_283 = arith.constant dense<0.000000e+00> : vector<2x128xf32>
    %744 = tpu.matmul %741, %664, %cst_283 {dimension_numbers = #tpu.dot_dimension_numbers<[1], [0], [0], [1], [0, 0, 1, 1], [], []>} : vector<2x32xf32>, vector<32x128xf32>, vector<2x128xf32> -> vector<2x128xf32>
    %745 = arith.addf %743, %744 : vector<2x128xf32>
    %746 = arith.negf %745 : vector<2x128xf32>
    %747 = math.exp %746 : vector<2x128xf32>
    %cst_284 = arith.constant 1.000000e+00 : f32
    %748 = vector.broadcast %cst_284 : f32 to vector<2x128xf32>
    %749 = arith.addf %748, %747 : vector<2x128xf32>
    %750 = arith.divf %748, %749 : vector<2x128xf32>
    %751 = math.tanh %745 : vector<2x128xf32>
    %752 = vector.extract_strided_slice %750 {offsets = [0, 32], sizes = [2, 32], strides = [1, 1]} : vector<2x128xf32> to vector<2x32xf32>
    %753 = arith.mulf %752, %738 : vector<2x32xf32>
    %754 = vector.extract_strided_slice %750 {offsets = [0, 0], sizes = [2, 32], strides = [1, 1]} : vector<2x128xf32> to vector<2x32xf32>
    %755 = vector.extract_strided_slice %751 {offsets = [0, 64], sizes = [2, 32], strides = [1, 1]} : vector<2x128xf32> to vector<2x32xf32>
    %756 = arith.mulf %754, %755 : vector<2x32xf32>
    %757 = arith.addf %753, %756 : vector<2x32xf32>
    %758 = vector.extract_strided_slice %750 {offsets = [0, 96], sizes = [2, 32], strides = [1, 1]} : vector<2x128xf32> to vector<2x32xf32>
    %759 = math.tanh %757 : vector<2x32xf32>
    %760 = arith.mulf %758, %759 : vector<2x32xf32>
    %c8_285 = arith.constant 8 : index
    %c0_286 = arith.constant 0 : index
    %761 = vector.load %arg43[%c8_285, %c0_286] : memref<16x32xf32, #tpu.memory_space<vmem>>, vector<2x32xf32>
    tpu.vector_store %arg43[%c8_285, %c0_286], %760 {strides = array<i32>} : memref<16x32xf32, #tpu.memory_space<vmem>>, vector<2x32xf32>,
    %c10_287 = arith.constant 10 : index
    %c0_288 = arith.constant 0 : index
    %762 = vector.load %arg42[%c10_287, %c0_288] : memref<16x128xf32, #tpu.memory_space<vmem>>, vector<2x128xf32>
    %cst_289 = arith.constant dense<0.000000e+00> : vector<2x128xf32>
    %763 = tpu.matmul %760, %664, %cst_289 {dimension_numbers = #tpu.dot_dimension_numbers<[1], [0], [0], [1], [0, 0, 1, 1], [], []>} : vector<2x32xf32>, vector<32x128xf32>, vector<2x128xf32> -> vector<2x128xf32>
    %764 = arith.addf %762, %763 : vector<2x128xf32>
    %765 = arith.negf %764 : vector<2x128xf32>
    %766 = math.exp %765 : vector<2x128xf32>
    %cst_290 = arith.constant 1.000000e+00 : f32
    %767 = vector.broadcast %cst_290 : f32 to vector<2x128xf32>
    %768 = arith.addf %767, %766 : vector<2x128xf32>
    %769 = arith.divf %767, %768 : vector<2x128xf32>
    %770 = math.tanh %764 : vector<2x128xf32>
    %771 = vector.extract_strided_slice %769 {offsets = [0, 32], sizes = [2, 32], strides = [1, 1]} : vector<2x128xf32> to vector<2x32xf32>
    %772 = arith.mulf %771, %757 : vector<2x32xf32>
    %773 = vector.extract_strided_slice %769 {offsets = [0, 0], sizes = [2, 32], strides = [1, 1]} : vector<2x128xf32> to vector<2x32xf32>
    %774 = vector.extract_strided_slice %770 {offsets = [0, 64], sizes = [2, 32], strides = [1, 1]} : vector<2x128xf32> to vector<2x32xf32>
    %775 = arith.mulf %773, %774 : vector<2x32xf32>
    %776 = arith.addf %772, %775 : vector<2x32xf32>
    %777 = vector.extract_strided_slice %769 {offsets = [0, 96], sizes = [2, 32], strides = [1, 1]} : vector<2x128xf32> to vector<2x32xf32>
    %778 = math.tanh %776 : vector<2x32xf32>
    %779 = arith.mulf %777, %778 : vector<2x32xf32>
    %c10_291 = arith.constant 10 : index
    %c0_292 = arith.constant 0 : index
    %780 = vector.load %arg43[%c10_291, %c0_292] : memref<16x32xf32, #tpu.memory_space<vmem>>, vector<2x32xf32>
    tpu.vector_store %arg43[%c10_291, %c0_292], %779 {strides = array<i32>} : memref<16x32xf32, #tpu.memory_space<vmem>>, vector<2x32xf32>,
    %c12_293 = arith.constant 12 : index
    %c0_294 = arith.constant 0 : index
    %781 = vector.load %arg42[%c12_293, %c0_294] : memref<16x128xf32, #tpu.memory_space<vmem>>, vector<2x128xf32>
    %cst_295 = arith.constant dense<0.000000e+00> : vector<2x128xf32>
    %782 = tpu.matmul %779, %664, %cst_295 {dimension_numbers = #tpu.dot_dimension_numbers<[1], [0], [0], [1], [0, 0, 1, 1], [], []>} : vector<2x32xf32>, vector<32x128xf32>, vector<2x128xf32> -> vector<2x128xf32>
    %783 = arith.addf %781, %782 : vector<2x128xf32>
    %784 = arith.negf %783 : vector<2x128xf32>
    %785 = math.exp %784 : vector<2x128xf32>
    %cst_296 = arith.constant 1.000000e+00 : f32
    %786 = vector.broadcast %cst_296 : f32 to vector<2x128xf32>
    %787 = arith.addf %786, %785 : vector<2x128xf32>
    %788 = arith.divf %786, %787 : vector<2x128xf32>
    %789 = math.tanh %783 : vector<2x128xf32>
    %790 = vector.extract_strided_slice %788 {offsets = [0, 32], sizes = [2, 32], strides = [1, 1]} : vector<2x128xf32> to vector<2x32xf32>
    %791 = arith.mulf %790, %776 : vector<2x32xf32>
    %792 = vector.extract_strided_slice %788 {offsets = [0, 0], sizes = [2, 32], strides = [1, 1]} : vector<2x128xf32> to vector<2x32xf32>
    %793 = vector.extract_strided_slice %789 {offsets = [0, 64], sizes = [2, 32], strides = [1, 1]} : vector<2x128xf32> to vector<2x32xf32>
    %794 = arith.mulf %792, %793 : vector<2x32xf32>
    %795 = arith.addf %791, %794 : vector<2x32xf32>
    %796 = vector.extract_strided_slice %788 {offsets = [0, 96], sizes = [2, 32], strides = [1, 1]} : vector<2x128xf32> to vector<2x32xf32>
    %797 = math.tanh %795 : vector<2x32xf32>
    %798 = arith.mulf %796, %797 : vector<2x32xf32>
    %c12_297 = arith.constant 12 : index
    %c0_298 = arith.constant 0 : index
    %799 = vector.load %arg43[%c12_297, %c0_298] : memref<16x32xf32, #tpu.memory_space<vmem>>, vector<2x32xf32>
    tpu.vector_store %arg43[%c12_297, %c0_298], %798 {strides = array<i32>} : memref<16x32xf32, #tpu.memory_space<vmem>>, vector<2x32xf32>,
    %c14_299 = arith.constant 14 : index
    %c0_300 = arith.constant 0 : index
    %800 = vector.load %arg42[%c14_299, %c0_300] : memref<16x128xf32, #tpu.memory_space<vmem>>, vector<2x128xf32>
    %cst_301 = arith.constant dense<0.000000e+00> : vector<2x128xf32>
    %801 = tpu.matmul %798, %664, %cst_301 {dimension_numbers = #tpu.dot_dimension_numbers<[1], [0], [0], [1], [0, 0, 1, 1], [], []>} : vector<2x32xf32>, vector<32x128xf32>, vector<2x128xf32> -> vector<2x128xf32>
    %802 = arith.addf %800, %801 : vector<2x128xf32>
    %803 = arith.negf %802 : vector<2x128xf32>
    %804 = math.exp %803 : vector<2x128xf32>
    %cst_302 = arith.constant 1.000000e+00 : f32
    %805 = vector.broadcast %cst_302 : f32 to vector<2x128xf32>
    %806 = arith.addf %805, %804 : vector<2x128xf32>
    %807 = arith.divf %805, %806 : vector<2x128xf32>
    %808 = math.tanh %802 : vector<2x128xf32>
    %809 = vector.extract_strided_slice %807 {offsets = [0, 32], sizes = [2, 32], strides = [1, 1]} : vector<2x128xf32> to vector<2x32xf32>
    %810 = arith.mulf %809, %795 : vector<2x32xf32>
    %811 = vector.extract_strided_slice %807 {offsets = [0, 0], sizes = [2, 32], strides = [1, 1]} : vector<2x128xf32> to vector<2x32xf32>
    %812 = vector.extract_strided_slice %808 {offsets = [0, 64], sizes = [2, 32], strides = [1, 1]} : vector<2x128xf32> to vector<2x32xf32>
    %813 = arith.mulf %811, %812 : vector<2x32xf32>
    %814 = arith.addf %810, %813 : vector<2x32xf32>
    %815 = vector.extract_strided_slice %807 {offsets = [0, 96], sizes = [2, 32], strides = [1, 1]} : vector<2x128xf32> to vector<2x32xf32>
    %816 = math.tanh %814 : vector<2x32xf32>
    %817 = arith.mulf %815, %816 : vector<2x32xf32>
    %c14_303 = arith.constant 14 : index
    %c0_304 = arith.constant 0 : index
    %818 = vector.load %arg43[%c14_303, %c0_304] : memref<16x32xf32, #tpu.memory_space<vmem>>, vector<2x32xf32>
    tpu.vector_store %arg43[%c14_303, %c0_304], %817 {strides = array<i32>} : memref<16x32xf32, #tpu.memory_space<vmem>>, vector<2x32xf32>,
    %c0_305 = arith.constant 0 : index
    %c0_306 = arith.constant 0 : index
    %819 = vector.load %arg43[%c0_305, %c0_306] : memref<16x32xf32, #tpu.memory_space<vmem>>, vector<16x32xf32>
    %c0_307 = arith.constant 0 : index
    %c0_308 = arith.constant 0 : index
    %820 = vector.load %arg19[%c0_307, %c0_308] : memref<32x128xf32, #tpu.memory_space<vmem>>, vector<32x128xf32>
    %cst_309 = arith.constant dense<0.000000e+00> : vector<16x128xf32>
    %821 = tpu.matmul %489, %820, %cst_309 {dimension_numbers = #tpu.dot_dimension_numbers<[1], [0], [0], [1], [0, 0, 1, 1], [], []>} : vector<16x32xf32>, vector<32x128xf32>, vector<16x128xf32> -> vector<16x128xf32>
    %c0_310 = arith.constant 0 : index
    %c0_311 = arith.constant 0 : index
    %822 = vector.load %arg20[%c0_310, %c0_311] : memref<32x128xf32, #tpu.memory_space<vmem>>, vector<32x128xf32>
    %cst_312 = arith.constant dense<0.000000e+00> : vector<16x128xf32>
    %823 = tpu.matmul %654, %822, %cst_312 {dimension_numbers = #tpu.dot_dimension_numbers<[1], [0], [0], [1], [0, 0, 1, 1], [], []>} : vector<16x32xf32>, vector<32x128xf32>, vector<16x128xf32> -> vector<16x128xf32>
    %824 = arith.addf %821, %823 : vector<16x128xf32>
    %c0_313 = arith.constant 0 : index
    %c0_314 = arith.constant 0 : index
    %825 = vector.load %arg22[%c0_313, %c0_314] : memref<1x128xf32, #tpu.memory_space<vmem>>, vector<1x128xf32>
    %826 = vector.broadcast %825 : vector<1x128xf32> to vector<16x128xf32>
    %827 = arith.addf %824, %826 : vector<16x128xf32>
    %c0_315 = arith.constant 0 : index
    %c0_316 = arith.constant 0 : index
    %828 = vector.load %arg42[%c0_315, %c0_316] : memref<16x128xf32, #tpu.memory_space<vmem>>, vector<16x128xf32>
    tpu.vector_store %arg42[%c0_315, %c0_316], %827 {strides = array<i32>} : memref<16x128xf32, #tpu.memory_space<vmem>>, vector<16x128xf32>,
    %c0_317 = arith.constant 0 : index
    %c0_318 = arith.constant 0 : index
    %829 = vector.load %arg21[%c0_317, %c0_318] : memref<32x128xf32, #tpu.memory_space<vmem>>, vector<32x128xf32>
    %cst_319 = arith.constant 0.000000e+00 : f32
    %830 = vector.broadcast %cst_319 : f32 to vector<2x32xf32>
    %cst_320 = arith.constant 0.000000e+00 : f32
    %831 = vector.broadcast %cst_320 : f32 to vector<2x32xf32>
    %c14_321 = arith.constant 14 : index
    %c0_322 = arith.constant 0 : index
    %832 = vector.load %arg42[%c14_321, %c0_322] : memref<16x128xf32, #tpu.memory_space<vmem>>, vector<2x128xf32>
    %cst_323 = arith.constant dense<0.000000e+00> : vector<2x128xf32>
    %833 = tpu.matmul %830, %829, %cst_323 {dimension_numbers = #tpu.dot_dimension_numbers<[1], [0], [0], [1], [0, 0, 1, 1], [], []>} : vector<2x32xf32>, vector<32x128xf32>, vector<2x128xf32> -> vector<2x128xf32>
    %834 = arith.addf %832, %833 : vector<2x128xf32>
    %835 = arith.negf %834 : vector<2x128xf32>
    %836 = math.exp %835 : vector<2x128xf32>
    %cst_324 = arith.constant 1.000000e+00 : f32
    %837 = vector.broadcast %cst_324 : f32 to vector<2x128xf32>
    %838 = arith.addf %837, %836 : vector<2x128xf32>
    %839 = arith.divf %837, %838 : vector<2x128xf32>
    %840 = math.tanh %834 : vector<2x128xf32>
    %841 = vector.extract_strided_slice %839 {offsets = [0, 32], sizes = [2, 32], strides = [1, 1]} : vector<2x128xf32> to vector<2x32xf32>
    %842 = arith.mulf %841, %831 : vector<2x32xf32>
    %843 = vector.extract_strided_slice %839 {offsets = [0, 0], sizes = [2, 32], strides = [1, 1]} : vector<2x128xf32> to vector<2x32xf32>
    %844 = vector.extract_strided_slice %840 {offsets = [0, 64], sizes = [2, 32], strides = [1, 1]} : vector<2x128xf32> to vector<2x32xf32>
    %845 = arith.mulf %843, %844 : vector<2x32xf32>
    %846 = arith.addf %842, %845 : vector<2x32xf32>
    %847 = vector.extract_strided_slice %839 {offsets = [0, 96], sizes = [2, 32], strides = [1, 1]} : vector<2x128xf32> to vector<2x32xf32>
    %848 = math.tanh %846 : vector<2x32xf32>
    %849 = arith.mulf %847, %848 : vector<2x32xf32>
    %c14_325 = arith.constant 14 : index
    %c0_326 = arith.constant 0 : index
    %850 = vector.load %arg44[%c14_325, %c0_326] : memref<16x32xf32, #tpu.memory_space<vmem>>, vector<2x32xf32>
    tpu.vector_store %arg44[%c14_325, %c0_326], %849 {strides = array<i32>} : memref<16x32xf32, #tpu.memory_space<vmem>>, vector<2x32xf32>,
    %c12_327 = arith.constant 12 : index
    %c0_328 = arith.constant 0 : index
    %851 = vector.load %arg42[%c12_327, %c0_328] : memref<16x128xf32, #tpu.memory_space<vmem>>, vector<2x128xf32>
    %cst_329 = arith.constant dense<0.000000e+00> : vector<2x128xf32>
    %852 = tpu.matmul %849, %829, %cst_329 {dimension_numbers = #tpu.dot_dimension_numbers<[1], [0], [0], [1], [0, 0, 1, 1], [], []>} : vector<2x32xf32>, vector<32x128xf32>, vector<2x128xf32> -> vector<2x128xf32>
    %853 = arith.addf %851, %852 : vector<2x128xf32>
    %854 = arith.negf %853 : vector<2x128xf32>
    %855 = math.exp %854 : vector<2x128xf32>
    %cst_330 = arith.constant 1.000000e+00 : f32
    %856 = vector.broadcast %cst_330 : f32 to vector<2x128xf32>
    %857 = arith.addf %856, %855 : vector<2x128xf32>
    %858 = arith.divf %856, %857 : vector<2x128xf32>
    %859 = math.tanh %853 : vector<2x128xf32>
    %860 = vector.extract_strided_slice %858 {offsets = [0, 32], sizes = [2, 32], strides = [1, 1]} : vector<2x128xf32> to vector<2x32xf32>
    %861 = arith.mulf %860, %846 : vector<2x32xf32>
    %862 = vector.extract_strided_slice %858 {offsets = [0, 0], sizes = [2, 32], strides = [1, 1]} : vector<2x128xf32> to vector<2x32xf32>
    %863 = vector.extract_strided_slice %859 {offsets = [0, 64], sizes = [2, 32], strides = [1, 1]} : vector<2x128xf32> to vector<2x32xf32>
    %864 = arith.mulf %862, %863 : vector<2x32xf32>
    %865 = arith.addf %861, %864 : vector<2x32xf32>
    %866 = vector.extract_strided_slice %858 {offsets = [0, 96], sizes = [2, 32], strides = [1, 1]} : vector<2x128xf32> to vector<2x32xf32>
    %867 = math.tanh %865 : vector<2x32xf32>
    %868 = arith.mulf %866, %867 : vector<2x32xf32>
    %c12_331 = arith.constant 12 : index
    %c0_332 = arith.constant 0 : index
    %869 = vector.load %arg44[%c12_331, %c0_332] : memref<16x32xf32, #tpu.memory_space<vmem>>, vector<2x32xf32>
    tpu.vector_store %arg44[%c12_331, %c0_332], %868 {strides = array<i32>} : memref<16x32xf32, #tpu.memory_space<vmem>>, vector<2x32xf32>,
    %c10_333 = arith.constant 10 : index
    %c0_334 = arith.constant 0 : index
    %870 = vector.load %arg42[%c10_333, %c0_334] : memref<16x128xf32, #tpu.memory_space<vmem>>, vector<2x128xf32>
    %cst_335 = arith.constant dense<0.000000e+00> : vector<2x128xf32>
    %871 = tpu.matmul %868, %829, %cst_335 {dimension_numbers = #tpu.dot_dimension_numbers<[1], [0], [0], [1], [0, 0, 1, 1], [], []>} : vector<2x32xf32>, vector<32x128xf32>, vector<2x128xf32> -> vector<2x128xf32>
    %872 = arith.addf %870, %871 : vector<2x128xf32>
    %873 = arith.negf %872 : vector<2x128xf32>
    %874 = math.exp %873 : vector<2x128xf32>
    %cst_336 = arith.constant 1.000000e+00 : f32
    %875 = vector.broadcast %cst_336 : f32 to vector<2x128xf32>
    %876 = arith.addf %875, %874 : vector<2x128xf32>
    %877 = arith.divf %875, %876 : vector<2x128xf32>
    %878 = math.tanh %872 : vector<2x128xf32>
    %879 = vector.extract_strided_slice %877 {offsets = [0, 32], sizes = [2, 32], strides = [1, 1]} : vector<2x128xf32> to vector<2x32xf32>
    %880 = arith.mulf %879, %865 : vector<2x32xf32>
    %881 = vector.extract_strided_slice %877 {offsets = [0, 0], sizes = [2, 32], strides = [1, 1]} : vector<2x128xf32> to vector<2x32xf32>
    %882 = vector.extract_strided_slice %878 {offsets = [0, 64], sizes = [2, 32], strides = [1, 1]} : vector<2x128xf32> to vector<2x32xf32>
    %883 = arith.mulf %881, %882 : vector<2x32xf32>
    %884 = arith.addf %880, %883 : vector<2x32xf32>
    %885 = vector.extract_strided_slice %877 {offsets = [0, 96], sizes = [2, 32], strides = [1, 1]} : vector<2x128xf32> to vector<2x32xf32>
    %886 = math.tanh %884 : vector<2x32xf32>
    %887 = arith.mulf %885, %886 : vector<2x32xf32>
    %c10_337 = arith.constant 10 : index
    %c0_338 = arith.constant 0 : index
    %888 = vector.load %arg44[%c10_337, %c0_338] : memref<16x32xf32, #tpu.memory_space<vmem>>, vector<2x32xf32>
    tpu.vector_store %arg44[%c10_337, %c0_338], %887 {strides = array<i32>} : memref<16x32xf32, #tpu.memory_space<vmem>>, vector<2x32xf32>,
    %c8_339 = arith.constant 8 : index
    %c0_340 = arith.constant 0 : index
    %889 = vector.load %arg42[%c8_339, %c0_340] : memref<16x128xf32, #tpu.memory_space<vmem>>, vector<2x128xf32>
    %cst_341 = arith.constant dense<0.000000e+00> : vector<2x128xf32>
    %890 = tpu.matmul %887, %829, %cst_341 {dimension_numbers = #tpu.dot_dimension_numbers<[1], [0], [0], [1], [0, 0, 1, 1], [], []>} : vector<2x32xf32>, vector<32x128xf32>, vector<2x128xf32> -> vector<2x128xf32>
    %891 = arith.addf %889, %890 : vector<2x128xf32>
    %892 = arith.negf %891 : vector<2x128xf32>
    %893 = math.exp %892 : vector<2x128xf32>
    %cst_342 = arith.constant 1.000000e+00 : f32
    %894 = vector.broadcast %cst_342 : f32 to vector<2x128xf32>
    %895 = arith.addf %894, %893 : vector<2x128xf32>
    %896 = arith.divf %894, %895 : vector<2x128xf32>
    %897 = math.tanh %891 : vector<2x128xf32>
    %898 = vector.extract_strided_slice %896 {offsets = [0, 32], sizes = [2, 32], strides = [1, 1]} : vector<2x128xf32> to vector<2x32xf32>
    %899 = arith.mulf %898, %884 : vector<2x32xf32>
    %900 = vector.extract_strided_slice %896 {offsets = [0, 0], sizes = [2, 32], strides = [1, 1]} : vector<2x128xf32> to vector<2x32xf32>
    %901 = vector.extract_strided_slice %897 {offsets = [0, 64], sizes = [2, 32], strides = [1, 1]} : vector<2x128xf32> to vector<2x32xf32>
    %902 = arith.mulf %900, %901 : vector<2x32xf32>
    %903 = arith.addf %899, %902 : vector<2x32xf32>
    %904 = vector.extract_strided_slice %896 {offsets = [0, 96], sizes = [2, 32], strides = [1, 1]} : vector<2x128xf32> to vector<2x32xf32>
    %905 = math.tanh %903 : vector<2x32xf32>
    %906 = arith.mulf %904, %905 : vector<2x32xf32>
    %c8_343 = arith.constant 8 : index
    %c0_344 = arith.constant 0 : index
    %907 = vector.load %arg44[%c8_343, %c0_344] : memref<16x32xf32, #tpu.memory_space<vmem>>, vector<2x32xf32>
    tpu.vector_store %arg44[%c8_343, %c0_344], %906 {strides = array<i32>} : memref<16x32xf32, #tpu.memory_space<vmem>>, vector<2x32xf32>,
    %c6_345 = arith.constant 6 : index
    %c0_346 = arith.constant 0 : index
    %908 = vector.load %arg42[%c6_345, %c0_346] : memref<16x128xf32, #tpu.memory_space<vmem>>, vector<2x128xf32>
    %cst_347 = arith.constant dense<0.000000e+00> : vector<2x128xf32>
    %909 = tpu.matmul %906, %829, %cst_347 {dimension_numbers = #tpu.dot_dimension_numbers<[1], [0], [0], [1], [0, 0, 1, 1], [], []>} : vector<2x32xf32>, vector<32x128xf32>, vector<2x128xf32> -> vector<2x128xf32>
    %910 = arith.addf %908, %909 : vector<2x128xf32>
    %911 = arith.negf %910 : vector<2x128xf32>
    %912 = math.exp %911 : vector<2x128xf32>
    %cst_348 = arith.constant 1.000000e+00 : f32
    %913 = vector.broadcast %cst_348 : f32 to vector<2x128xf32>
    %914 = arith.addf %913, %912 : vector<2x128xf32>
    %915 = arith.divf %913, %914 : vector<2x128xf32>
    %916 = math.tanh %910 : vector<2x128xf32>
    %917 = vector.extract_strided_slice %915 {offsets = [0, 32], sizes = [2, 32], strides = [1, 1]} : vector<2x128xf32> to vector<2x32xf32>
    %918 = arith.mulf %917, %903 : vector<2x32xf32>
    %919 = vector.extract_strided_slice %915 {offsets = [0, 0], sizes = [2, 32], strides = [1, 1]} : vector<2x128xf32> to vector<2x32xf32>
    %920 = vector.extract_strided_slice %916 {offsets = [0, 64], sizes = [2, 32], strides = [1, 1]} : vector<2x128xf32> to vector<2x32xf32>
    %921 = arith.mulf %919, %920 : vector<2x32xf32>
    %922 = arith.addf %918, %921 : vector<2x32xf32>
    %923 = vector.extract_strided_slice %915 {offsets = [0, 96], sizes = [2, 32], strides = [1, 1]} : vector<2x128xf32> to vector<2x32xf32>
    %924 = math.tanh %922 : vector<2x32xf32>
    %925 = arith.mulf %923, %924 : vector<2x32xf32>
    %c6_349 = arith.constant 6 : index
    %c0_350 = arith.constant 0 : index
    %926 = vector.load %arg44[%c6_349, %c0_350] : memref<16x32xf32, #tpu.memory_space<vmem>>, vector<2x32xf32>
    tpu.vector_store %arg44[%c6_349, %c0_350], %925 {strides = array<i32>} : memref<16x32xf32, #tpu.memory_space<vmem>>, vector<2x32xf32>,
    %c4_351 = arith.constant 4 : index
    %c0_352 = arith.constant 0 : index
    %927 = vector.load %arg42[%c4_351, %c0_352] : memref<16x128xf32, #tpu.memory_space<vmem>>, vector<2x128xf32>
    %cst_353 = arith.constant dense<0.000000e+00> : vector<2x128xf32>
    %928 = tpu.matmul %925, %829, %cst_353 {dimension_numbers = #tpu.dot_dimension_numbers<[1], [0], [0], [1], [0, 0, 1, 1], [], []>} : vector<2x32xf32>, vector<32x128xf32>, vector<2x128xf32> -> vector<2x128xf32>
    %929 = arith.addf %927, %928 : vector<2x128xf32>
    %930 = arith.negf %929 : vector<2x128xf32>
    %931 = math.exp %930 : vector<2x128xf32>
    %cst_354 = arith.constant 1.000000e+00 : f32
    %932 = vector.broadcast %cst_354 : f32 to vector<2x128xf32>
    %933 = arith.addf %932, %931 : vector<2x128xf32>
    %934 = arith.divf %932, %933 : vector<2x128xf32>
    %935 = math.tanh %929 : vector<2x128xf32>
    %936 = vector.extract_strided_slice %934 {offsets = [0, 32], sizes = [2, 32], strides = [1, 1]} : vector<2x128xf32> to vector<2x32xf32>
    %937 = arith.mulf %936, %922 : vector<2x32xf32>
    %938 = vector.extract_strided_slice %934 {offsets = [0, 0], sizes = [2, 32], strides = [1, 1]} : vector<2x128xf32> to vector<2x32xf32>
    %939 = vector.extract_strided_slice %935 {offsets = [0, 64], sizes = [2, 32], strides = [1, 1]} : vector<2x128xf32> to vector<2x32xf32>
    %940 = arith.mulf %938, %939 : vector<2x32xf32>
    %941 = arith.addf %937, %940 : vector<2x32xf32>
    %942 = vector.extract_strided_slice %934 {offsets = [0, 96], sizes = [2, 32], strides = [1, 1]} : vector<2x128xf32> to vector<2x32xf32>
    %943 = math.tanh %941 : vector<2x32xf32>
    %944 = arith.mulf %942, %943 : vector<2x32xf32>
    %c4_355 = arith.constant 4 : index
    %c0_356 = arith.constant 0 : index
    %945 = vector.load %arg44[%c4_355, %c0_356] : memref<16x32xf32, #tpu.memory_space<vmem>>, vector<2x32xf32>
    tpu.vector_store %arg44[%c4_355, %c0_356], %944 {strides = array<i32>} : memref<16x32xf32, #tpu.memory_space<vmem>>, vector<2x32xf32>,
    %c2_357 = arith.constant 2 : index
    %c0_358 = arith.constant 0 : index
    %946 = vector.load %arg42[%c2_357, %c0_358] : memref<16x128xf32, #tpu.memory_space<vmem>>, vector<2x128xf32>
    %cst_359 = arith.constant dense<0.000000e+00> : vector<2x128xf32>
    %947 = tpu.matmul %944, %829, %cst_359 {dimension_numbers = #tpu.dot_dimension_numbers<[1], [0], [0], [1], [0, 0, 1, 1], [], []>} : vector<2x32xf32>, vector<32x128xf32>, vector<2x128xf32> -> vector<2x128xf32>
    %948 = arith.addf %946, %947 : vector<2x128xf32>
    %949 = arith.negf %948 : vector<2x128xf32>
    %950 = math.exp %949 : vector<2x128xf32>
    %cst_360 = arith.constant 1.000000e+00 : f32
    %951 = vector.broadcast %cst_360 : f32 to vector<2x128xf32>
    %952 = arith.addf %951, %950 : vector<2x128xf32>
    %953 = arith.divf %951, %952 : vector<2x128xf32>
    %954 = math.tanh %948 : vector<2x128xf32>
    %955 = vector.extract_strided_slice %953 {offsets = [0, 32], sizes = [2, 32], strides = [1, 1]} : vector<2x128xf32> to vector<2x32xf32>
    %956 = arith.mulf %955, %941 : vector<2x32xf32>
    %957 = vector.extract_strided_slice %953 {offsets = [0, 0], sizes = [2, 32], strides = [1, 1]} : vector<2x128xf32> to vector<2x32xf32>
    %958 = vector.extract_strided_slice %954 {offsets = [0, 64], sizes = [2, 32], strides = [1, 1]} : vector<2x128xf32> to vector<2x32xf32>
    %959 = arith.mulf %957, %958 : vector<2x32xf32>
    %960 = arith.addf %956, %959 : vector<2x32xf32>
    %961 = vector.extract_strided_slice %953 {offsets = [0, 96], sizes = [2, 32], strides = [1, 1]} : vector<2x128xf32> to vector<2x32xf32>
    %962 = math.tanh %960 : vector<2x32xf32>
    %963 = arith.mulf %961, %962 : vector<2x32xf32>
    %c2_361 = arith.constant 2 : index
    %c0_362 = arith.constant 0 : index
    %964 = vector.load %arg44[%c2_361, %c0_362] : memref<16x32xf32, #tpu.memory_space<vmem>>, vector<2x32xf32>
    tpu.vector_store %arg44[%c2_361, %c0_362], %963 {strides = array<i32>} : memref<16x32xf32, #tpu.memory_space<vmem>>, vector<2x32xf32>,
    %c0_363 = arith.constant 0 : index
    %c0_364 = arith.constant 0 : index
    %965 = vector.load %arg42[%c0_363, %c0_364] : memref<16x128xf32, #tpu.memory_space<vmem>>, vector<2x128xf32>
    %cst_365 = arith.constant dense<0.000000e+00> : vector<2x128xf32>
    %966 = tpu.matmul %963, %829, %cst_365 {dimension_numbers = #tpu.dot_dimension_numbers<[1], [0], [0], [1], [0, 0, 1, 1], [], []>} : vector<2x32xf32>, vector<32x128xf32>, vector<2x128xf32> -> vector<2x128xf32>
    %967 = arith.addf %965, %966 : vector<2x128xf32>
    %968 = arith.negf %967 : vector<2x128xf32>
    %969 = math.exp %968 : vector<2x128xf32>
    %cst_366 = arith.constant 1.000000e+00 : f32
    %970 = vector.broadcast %cst_366 : f32 to vector<2x128xf32>
    %971 = arith.addf %970, %969 : vector<2x128xf32>
    %972 = arith.divf %970, %971 : vector<2x128xf32>
    %973 = math.tanh %967 : vector<2x128xf32>
    %974 = vector.extract_strided_slice %972 {offsets = [0, 32], sizes = [2, 32], strides = [1, 1]} : vector<2x128xf32> to vector<2x32xf32>
    %975 = arith.mulf %974, %960 : vector<2x32xf32>
    %976 = vector.extract_strided_slice %972 {offsets = [0, 0], sizes = [2, 32], strides = [1, 1]} : vector<2x128xf32> to vector<2x32xf32>
    %977 = vector.extract_strided_slice %973 {offsets = [0, 64], sizes = [2, 32], strides = [1, 1]} : vector<2x128xf32> to vector<2x32xf32>
    %978 = arith.mulf %976, %977 : vector<2x32xf32>
    %979 = arith.addf %975, %978 : vector<2x32xf32>
    %980 = vector.extract_strided_slice %972 {offsets = [0, 96], sizes = [2, 32], strides = [1, 1]} : vector<2x128xf32> to vector<2x32xf32>
    %981 = math.tanh %979 : vector<2x32xf32>
    %982 = arith.mulf %980, %981 : vector<2x32xf32>
    %c0_367 = arith.constant 0 : index
    %c0_368 = arith.constant 0 : index
    %983 = vector.load %arg44[%c0_367, %c0_368] : memref<16x32xf32, #tpu.memory_space<vmem>>, vector<2x32xf32>
    tpu.vector_store %arg44[%c0_367, %c0_368], %982 {strides = array<i32>} : memref<16x32xf32, #tpu.memory_space<vmem>>, vector<2x32xf32>,
    %c0_369 = arith.constant 0 : index
    %c0_370 = arith.constant 0 : index
    %984 = vector.load %arg44[%c0_369, %c0_370] : memref<16x32xf32, #tpu.memory_space<vmem>>, vector<16x32xf32>
    %c0_371 = arith.constant 0 : index
    %c0_372 = arith.constant 0 : index
    %985 = vector.load %arg23[%c0_371, %c0_372] : memref<32x128xf32, #tpu.memory_space<vmem>>, vector<32x128xf32>
    %cst_373 = arith.constant dense<0.000000e+00> : vector<16x128xf32>
    %986 = tpu.matmul %819, %985, %cst_373 {dimension_numbers = #tpu.dot_dimension_numbers<[1], [0], [0], [1], [0, 0, 1, 1], [], []>} : vector<16x32xf32>, vector<32x128xf32>, vector<16x128xf32> -> vector<16x128xf32>
    %c0_374 = arith.constant 0 : index
    %c0_375 = arith.constant 0 : index
    %987 = vector.load %arg24[%c0_374, %c0_375] : memref<32x128xf32, #tpu.memory_space<vmem>>, vector<32x128xf32>
    %cst_376 = arith.constant dense<0.000000e+00> : vector<16x128xf32>
    %988 = tpu.matmul %984, %987, %cst_376 {dimension_numbers = #tpu.dot_dimension_numbers<[1], [0], [0], [1], [0, 0, 1, 1], [], []>} : vector<16x32xf32>, vector<32x128xf32>, vector<16x128xf32> -> vector<16x128xf32>
    %989 = arith.addf %986, %988 : vector<16x128xf32>
    %c0_377 = arith.constant 0 : index
    %c0_378 = arith.constant 0 : index
    %990 = vector.load %arg26[%c0_377, %c0_378] : memref<1x128xf32, #tpu.memory_space<vmem>>, vector<1x128xf32>
    %991 = vector.broadcast %990 : vector<1x128xf32> to vector<16x128xf32>
    %992 = arith.addf %989, %991 : vector<16x128xf32>
    %c0_379 = arith.constant 0 : index
    %c0_380 = arith.constant 0 : index
    %993 = vector.load %arg42[%c0_379, %c0_380] : memref<16x128xf32, #tpu.memory_space<vmem>>, vector<16x128xf32>
    tpu.vector_store %arg42[%c0_379, %c0_380], %992 {strides = array<i32>} : memref<16x128xf32, #tpu.memory_space<vmem>>, vector<16x128xf32>,
    %c0_381 = arith.constant 0 : index
    %c0_382 = arith.constant 0 : index
    %994 = vector.load %arg25[%c0_381, %c0_382] : memref<32x128xf32, #tpu.memory_space<vmem>>, vector<32x128xf32>
    %cst_383 = arith.constant 0.000000e+00 : f32
    %995 = vector.broadcast %cst_383 : f32 to vector<2x32xf32>
    %cst_384 = arith.constant 0.000000e+00 : f32
    %996 = vector.broadcast %cst_384 : f32 to vector<2x32xf32>
    %c0_385 = arith.constant 0 : index
    %c0_386 = arith.constant 0 : index
    %997 = vector.load %arg42[%c0_385, %c0_386] : memref<16x128xf32, #tpu.memory_space<vmem>>, vector<2x128xf32>
    %cst_387 = arith.constant dense<0.000000e+00> : vector<2x128xf32>
    %998 = tpu.matmul %995, %994, %cst_387 {dimension_numbers = #tpu.dot_dimension_numbers<[1], [0], [0], [1], [0, 0, 1, 1], [], []>} : vector<2x32xf32>, vector<32x128xf32>, vector<2x128xf32> -> vector<2x128xf32>
    %999 = arith.addf %997, %998 : vector<2x128xf32>
    %1000 = arith.negf %999 : vector<2x128xf32>
    %1001 = math.exp %1000 : vector<2x128xf32>
    %cst_388 = arith.constant 1.000000e+00 : f32
    %1002 = vector.broadcast %cst_388 : f32 to vector<2x128xf32>
    %1003 = arith.addf %1002, %1001 : vector<2x128xf32>
    %1004 = arith.divf %1002, %1003 : vector<2x128xf32>
    %1005 = math.tanh %999 : vector<2x128xf32>
    %1006 = vector.extract_strided_slice %1004 {offsets = [0, 32], sizes = [2, 32], strides = [1, 1]} : vector<2x128xf32> to vector<2x32xf32>
    %1007 = arith.mulf %1006, %996 : vector<2x32xf32>
    %1008 = vector.extract_strided_slice %1004 {offsets = [0, 0], sizes = [2, 32], strides = [1, 1]} : vector<2x128xf32> to vector<2x32xf32>
    %1009 = vector.extract_strided_slice %1005 {offsets = [0, 64], sizes = [2, 32], strides = [1, 1]} : vector<2x128xf32> to vector<2x32xf32>
    %1010 = arith.mulf %1008, %1009 : vector<2x32xf32>
    %1011 = arith.addf %1007, %1010 : vector<2x32xf32>
    %1012 = vector.extract_strided_slice %1004 {offsets = [0, 96], sizes = [2, 32], strides = [1, 1]} : vector<2x128xf32> to vector<2x32xf32>
    %1013 = math.tanh %1011 : vector<2x32xf32>
    %1014 = arith.mulf %1012, %1013 : vector<2x32xf32>
    %c0_389 = arith.constant 0 : index
    %c0_390 = arith.constant 0 : index
    %1015 = vector.load %arg45[%c0_389, %c0_390] : memref<16x32xf32, #tpu.memory_space<vmem>>, vector<2x32xf32>
    tpu.vector_store %arg45[%c0_389, %c0_390], %1014 {strides = array<i32>} : memref<16x32xf32, #tpu.memory_space<vmem>>, vector<2x32xf32>,
    %c2_391 = arith.constant 2 : index
    %c0_392 = arith.constant 0 : index
    %1016 = vector.load %arg42[%c2_391, %c0_392] : memref<16x128xf32, #tpu.memory_space<vmem>>, vector<2x128xf32>
    %cst_393 = arith.constant dense<0.000000e+00> : vector<2x128xf32>
    %1017 = tpu.matmul %1014, %994, %cst_393 {dimension_numbers = #tpu.dot_dimension_numbers<[1], [0], [0], [1], [0, 0, 1, 1], [], []>} : vector<2x32xf32>, vector<32x128xf32>, vector<2x128xf32> -> vector<2x128xf32>
    %1018 = arith.addf %1016, %1017 : vector<2x128xf32>
    %1019 = arith.negf %1018 : vector<2x128xf32>
    %1020 = math.exp %1019 : vector<2x128xf32>
    %cst_394 = arith.constant 1.000000e+00 : f32
    %1021 = vector.broadcast %cst_394 : f32 to vector<2x128xf32>
    %1022 = arith.addf %1021, %1020 : vector<2x128xf32>
    %1023 = arith.divf %1021, %1022 : vector<2x128xf32>
    %1024 = math.tanh %1018 : vector<2x128xf32>
    %1025 = vector.extract_strided_slice %1023 {offsets = [0, 32], sizes = [2, 32], strides = [1, 1]} : vector<2x128xf32> to vector<2x32xf32>
    %1026 = arith.mulf %1025, %1011 : vector<2x32xf32>
    %1027 = vector.extract_strided_slice %1023 {offsets = [0, 0], sizes = [2, 32], strides = [1, 1]} : vector<2x128xf32> to vector<2x32xf32>
    %1028 = vector.extract_strided_slice %1024 {offsets = [0, 64], sizes = [2, 32], strides = [1, 1]} : vector<2x128xf32> to vector<2x32xf32>
    %1029 = arith.mulf %1027, %1028 : vector<2x32xf32>
    %1030 = arith.addf %1026, %1029 : vector<2x32xf32>
    %1031 = vector.extract_strided_slice %1023 {offsets = [0, 96], sizes = [2, 32], strides = [1, 1]} : vector<2x128xf32> to vector<2x32xf32>
    %1032 = math.tanh %1030 : vector<2x32xf32>
    %1033 = arith.mulf %1031, %1032 : vector<2x32xf32>
    %c2_395 = arith.constant 2 : index
    %c0_396 = arith.constant 0 : index
    %1034 = vector.load %arg45[%c2_395, %c0_396] : memref<16x32xf32, #tpu.memory_space<vmem>>, vector<2x32xf32>
    tpu.vector_store %arg45[%c2_395, %c0_396], %1033 {strides = array<i32>} : memref<16x32xf32, #tpu.memory_space<vmem>>, vector<2x32xf32>,
    %c4_397 = arith.constant 4 : index
    %c0_398 = arith.constant 0 : index
    %1035 = vector.load %arg42[%c4_397, %c0_398] : memref<16x128xf32, #tpu.memory_space<vmem>>, vector<2x128xf32>
    %cst_399 = arith.constant dense<0.000000e+00> : vector<2x128xf32>
    %1036 = tpu.matmul %1033, %994, %cst_399 {dimension_numbers = #tpu.dot_dimension_numbers<[1], [0], [0], [1], [0, 0, 1, 1], [], []>} : vector<2x32xf32>, vector<32x128xf32>, vector<2x128xf32> -> vector<2x128xf32>
    %1037 = arith.addf %1035, %1036 : vector<2x128xf32>
    %1038 = arith.negf %1037 : vector<2x128xf32>
    %1039 = math.exp %1038 : vector<2x128xf32>
    %cst_400 = arith.constant 1.000000e+00 : f32
    %1040 = vector.broadcast %cst_400 : f32 to vector<2x128xf32>
    %1041 = arith.addf %1040, %1039 : vector<2x128xf32>
    %1042 = arith.divf %1040, %1041 : vector<2x128xf32>
    %1043 = math.tanh %1037 : vector<2x128xf32>
    %1044 = vector.extract_strided_slice %1042 {offsets = [0, 32], sizes = [2, 32], strides = [1, 1]} : vector<2x128xf32> to vector<2x32xf32>
    %1045 = arith.mulf %1044, %1030 : vector<2x32xf32>
    %1046 = vector.extract_strided_slice %1042 {offsets = [0, 0], sizes = [2, 32], strides = [1, 1]} : vector<2x128xf32> to vector<2x32xf32>
    %1047 = vector.extract_strided_slice %1043 {offsets = [0, 64], sizes = [2, 32], strides = [1, 1]} : vector<2x128xf32> to vector<2x32xf32>
    %1048 = arith.mulf %1046, %1047 : vector<2x32xf32>
    %1049 = arith.addf %1045, %1048 : vector<2x32xf32>
    %1050 = vector.extract_strided_slice %1042 {offsets = [0, 96], sizes = [2, 32], strides = [1, 1]} : vector<2x128xf32> to vector<2x32xf32>
    %1051 = math.tanh %1049 : vector<2x32xf32>
    %1052 = arith.mulf %1050, %1051 : vector<2x32xf32>
    %c4_401 = arith.constant 4 : index
    %c0_402 = arith.constant 0 : index
    %1053 = vector.load %arg45[%c4_401, %c0_402] : memref<16x32xf32, #tpu.memory_space<vmem>>, vector<2x32xf32>
    tpu.vector_store %arg45[%c4_401, %c0_402], %1052 {strides = array<i32>} : memref<16x32xf32, #tpu.memory_space<vmem>>, vector<2x32xf32>,
    %c6_403 = arith.constant 6 : index
    %c0_404 = arith.constant 0 : index
    %1054 = vector.load %arg42[%c6_403, %c0_404] : memref<16x128xf32, #tpu.memory_space<vmem>>, vector<2x128xf32>
    %cst_405 = arith.constant dense<0.000000e+00> : vector<2x128xf32>
    %1055 = tpu.matmul %1052, %994, %cst_405 {dimension_numbers = #tpu.dot_dimension_numbers<[1], [0], [0], [1], [0, 0, 1, 1], [], []>} : vector<2x32xf32>, vector<32x128xf32>, vector<2x128xf32> -> vector<2x128xf32>
    %1056 = arith.addf %1054, %1055 : vector<2x128xf32>
    %1057 = arith.negf %1056 : vector<2x128xf32>
    %1058 = math.exp %1057 : vector<2x128xf32>
    %cst_406 = arith.constant 1.000000e+00 : f32
    %1059 = vector.broadcast %cst_406 : f32 to vector<2x128xf32>
    %1060 = arith.addf %1059, %1058 : vector<2x128xf32>
    %1061 = arith.divf %1059, %1060 : vector<2x128xf32>
    %1062 = math.tanh %1056 : vector<2x128xf32>
    %1063 = vector.extract_strided_slice %1061 {offsets = [0, 32], sizes = [2, 32], strides = [1, 1]} : vector<2x128xf32> to vector<2x32xf32>
    %1064 = arith.mulf %1063, %1049 : vector<2x32xf32>
    %1065 = vector.extract_strided_slice %1061 {offsets = [0, 0], sizes = [2, 32], strides = [1, 1]} : vector<2x128xf32> to vector<2x32xf32>
    %1066 = vector.extract_strided_slice %1062 {offsets = [0, 64], sizes = [2, 32], strides = [1, 1]} : vector<2x128xf32> to vector<2x32xf32>
    %1067 = arith.mulf %1065, %1066 : vector<2x32xf32>
    %1068 = arith.addf %1064, %1067 : vector<2x32xf32>
    %1069 = vector.extract_strided_slice %1061 {offsets = [0, 96], sizes = [2, 32], strides = [1, 1]} : vector<2x128xf32> to vector<2x32xf32>
    %1070 = math.tanh %1068 : vector<2x32xf32>
    %1071 = arith.mulf %1069, %1070 : vector<2x32xf32>
    %c6_407 = arith.constant 6 : index
    %c0_408 = arith.constant 0 : index
    %1072 = vector.load %arg45[%c6_407, %c0_408] : memref<16x32xf32, #tpu.memory_space<vmem>>, vector<2x32xf32>
    tpu.vector_store %arg45[%c6_407, %c0_408], %1071 {strides = array<i32>} : memref<16x32xf32, #tpu.memory_space<vmem>>, vector<2x32xf32>,
    %c8_409 = arith.constant 8 : index
    %c0_410 = arith.constant 0 : index
    %1073 = vector.load %arg42[%c8_409, %c0_410] : memref<16x128xf32, #tpu.memory_space<vmem>>, vector<2x128xf32>
    %cst_411 = arith.constant dense<0.000000e+00> : vector<2x128xf32>
    %1074 = tpu.matmul %1071, %994, %cst_411 {dimension_numbers = #tpu.dot_dimension_numbers<[1], [0], [0], [1], [0, 0, 1, 1], [], []>} : vector<2x32xf32>, vector<32x128xf32>, vector<2x128xf32> -> vector<2x128xf32>
    %1075 = arith.addf %1073, %1074 : vector<2x128xf32>
    %1076 = arith.negf %1075 : vector<2x128xf32>
    %1077 = math.exp %1076 : vector<2x128xf32>
    %cst_412 = arith.constant 1.000000e+00 : f32
    %1078 = vector.broadcast %cst_412 : f32 to vector<2x128xf32>
    %1079 = arith.addf %1078, %1077 : vector<2x128xf32>
    %1080 = arith.divf %1078, %1079 : vector<2x128xf32>
    %1081 = math.tanh %1075 : vector<2x128xf32>
    %1082 = vector.extract_strided_slice %1080 {offsets = [0, 32], sizes = [2, 32], strides = [1, 1]} : vector<2x128xf32> to vector<2x32xf32>
    %1083 = arith.mulf %1082, %1068 : vector<2x32xf32>
    %1084 = vector.extract_strided_slice %1080 {offsets = [0, 0], sizes = [2, 32], strides = [1, 1]} : vector<2x128xf32> to vector<2x32xf32>
    %1085 = vector.extract_strided_slice %1081 {offsets = [0, 64], sizes = [2, 32], strides = [1, 1]} : vector<2x128xf32> to vector<2x32xf32>
    %1086 = arith.mulf %1084, %1085 : vector<2x32xf32>
    %1087 = arith.addf %1083, %1086 : vector<2x32xf32>
    %1088 = vector.extract_strided_slice %1080 {offsets = [0, 96], sizes = [2, 32], strides = [1, 1]} : vector<2x128xf32> to vector<2x32xf32>
    %1089 = math.tanh %1087 : vector<2x32xf32>
    %1090 = arith.mulf %1088, %1089 : vector<2x32xf32>
    %c8_413 = arith.constant 8 : index
    %c0_414 = arith.constant 0 : index
    %1091 = vector.load %arg45[%c8_413, %c0_414] : memref<16x32xf32, #tpu.memory_space<vmem>>, vector<2x32xf32>
    tpu.vector_store %arg45[%c8_413, %c0_414], %1090 {strides = array<i32>} : memref<16x32xf32, #tpu.memory_space<vmem>>, vector<2x32xf32>,
    %c10_415 = arith.constant 10 : index
    %c0_416 = arith.constant 0 : index
    %1092 = vector.load %arg42[%c10_415, %c0_416] : memref<16x128xf32, #tpu.memory_space<vmem>>, vector<2x128xf32>
    %cst_417 = arith.constant dense<0.000000e+00> : vector<2x128xf32>
    %1093 = tpu.matmul %1090, %994, %cst_417 {dimension_numbers = #tpu.dot_dimension_numbers<[1], [0], [0], [1], [0, 0, 1, 1], [], []>} : vector<2x32xf32>, vector<32x128xf32>, vector<2x128xf32> -> vector<2x128xf32>
    %1094 = arith.addf %1092, %1093 : vector<2x128xf32>
    %1095 = arith.negf %1094 : vector<2x128xf32>
    %1096 = math.exp %1095 : vector<2x128xf32>
    %cst_418 = arith.constant 1.000000e+00 : f32
    %1097 = vector.broadcast %cst_418 : f32 to vector<2x128xf32>
    %1098 = arith.addf %1097, %1096 : vector<2x128xf32>
    %1099 = arith.divf %1097, %1098 : vector<2x128xf32>
    %1100 = math.tanh %1094 : vector<2x128xf32>
    %1101 = vector.extract_strided_slice %1099 {offsets = [0, 32], sizes = [2, 32], strides = [1, 1]} : vector<2x128xf32> to vector<2x32xf32>
    %1102 = arith.mulf %1101, %1087 : vector<2x32xf32>
    %1103 = vector.extract_strided_slice %1099 {offsets = [0, 0], sizes = [2, 32], strides = [1, 1]} : vector<2x128xf32> to vector<2x32xf32>
    %1104 = vector.extract_strided_slice %1100 {offsets = [0, 64], sizes = [2, 32], strides = [1, 1]} : vector<2x128xf32> to vector<2x32xf32>
    %1105 = arith.mulf %1103, %1104 : vector<2x32xf32>
    %1106 = arith.addf %1102, %1105 : vector<2x32xf32>
    %1107 = vector.extract_strided_slice %1099 {offsets = [0, 96], sizes = [2, 32], strides = [1, 1]} : vector<2x128xf32> to vector<2x32xf32>
    %1108 = math.tanh %1106 : vector<2x32xf32>
    %1109 = arith.mulf %1107, %1108 : vector<2x32xf32>
    %c10_419 = arith.constant 10 : index
    %c0_420 = arith.constant 0 : index
    %1110 = vector.load %arg45[%c10_419, %c0_420] : memref<16x32xf32, #tpu.memory_space<vmem>>, vector<2x32xf32>
    tpu.vector_store %arg45[%c10_419, %c0_420], %1109 {strides = array<i32>} : memref<16x32xf32, #tpu.memory_space<vmem>>, vector<2x32xf32>,
    %c12_421 = arith.constant 12 : index
    %c0_422 = arith.constant 0 : index
    %1111 = vector.load %arg42[%c12_421, %c0_422] : memref<16x128xf32, #tpu.memory_space<vmem>>, vector<2x128xf32>
    %cst_423 = arith.constant dense<0.000000e+00> : vector<2x128xf32>
    %1112 = tpu.matmul %1109, %994, %cst_423 {dimension_numbers = #tpu.dot_dimension_numbers<[1], [0], [0], [1], [0, 0, 1, 1], [], []>} : vector<2x32xf32>, vector<32x128xf32>, vector<2x128xf32> -> vector<2x128xf32>
    %1113 = arith.addf %1111, %1112 : vector<2x128xf32>
    %1114 = arith.negf %1113 : vector<2x128xf32>
    %1115 = math.exp %1114 : vector<2x128xf32>
    %cst_424 = arith.constant 1.000000e+00 : f32
    %1116 = vector.broadcast %cst_424 : f32 to vector<2x128xf32>
    %1117 = arith.addf %1116, %1115 : vector<2x128xf32>
    %1118 = arith.divf %1116, %1117 : vector<2x128xf32>
    %1119 = math.tanh %1113 : vector<2x128xf32>
    %1120 = vector.extract_strided_slice %1118 {offsets = [0, 32], sizes = [2, 32], strides = [1, 1]} : vector<2x128xf32> to vector<2x32xf32>
    %1121 = arith.mulf %1120, %1106 : vector<2x32xf32>
    %1122 = vector.extract_strided_slice %1118 {offsets = [0, 0], sizes = [2, 32], strides = [1, 1]} : vector<2x128xf32> to vector<2x32xf32>
    %1123 = vector.extract_strided_slice %1119 {offsets = [0, 64], sizes = [2, 32], strides = [1, 1]} : vector<2x128xf32> to vector<2x32xf32>
    %1124 = arith.mulf %1122, %1123 : vector<2x32xf32>
    %1125 = arith.addf %1121, %1124 : vector<2x32xf32>
    %1126 = vector.extract_strided_slice %1118 {offsets = [0, 96], sizes = [2, 32], strides = [1, 1]} : vector<2x128xf32> to vector<2x32xf32>
    %1127 = math.tanh %1125 : vector<2x32xf32>
    %1128 = arith.mulf %1126, %1127 : vector<2x32xf32>
    %c12_425 = arith.constant 12 : index
    %c0_426 = arith.constant 0 : index
    %1129 = vector.load %arg45[%c12_425, %c0_426] : memref<16x32xf32, #tpu.memory_space<vmem>>, vector<2x32xf32>
    tpu.vector_store %arg45[%c12_425, %c0_426], %1128 {strides = array<i32>} : memref<16x32xf32, #tpu.memory_space<vmem>>, vector<2x32xf32>,
    %c14_427 = arith.constant 14 : index
    %c0_428 = arith.constant 0 : index
    %1130 = vector.load %arg42[%c14_427, %c0_428] : memref<16x128xf32, #tpu.memory_space<vmem>>, vector<2x128xf32>
    %cst_429 = arith.constant dense<0.000000e+00> : vector<2x128xf32>
    %1131 = tpu.matmul %1128, %994, %cst_429 {dimension_numbers = #tpu.dot_dimension_numbers<[1], [0], [0], [1], [0, 0, 1, 1], [], []>} : vector<2x32xf32>, vector<32x128xf32>, vector<2x128xf32> -> vector<2x128xf32>
    %1132 = arith.addf %1130, %1131 : vector<2x128xf32>
    %1133 = arith.negf %1132 : vector<2x128xf32>
    %1134 = math.exp %1133 : vector<2x128xf32>
    %cst_430 = arith.constant 1.000000e+00 : f32
    %1135 = vector.broadcast %cst_430 : f32 to vector<2x128xf32>
    %1136 = arith.addf %1135, %1134 : vector<2x128xf32>
    %1137 = arith.divf %1135, %1136 : vector<2x128xf32>
    %1138 = math.tanh %1132 : vector<2x128xf32>
    %1139 = vector.extract_strided_slice %1137 {offsets = [0, 32], sizes = [2, 32], strides = [1, 1]} : vector<2x128xf32> to vector<2x32xf32>
    %1140 = arith.mulf %1139, %1125 : vector<2x32xf32>
    %1141 = vector.extract_strided_slice %1137 {offsets = [0, 0], sizes = [2, 32], strides = [1, 1]} : vector<2x128xf32> to vector<2x32xf32>
    %1142 = vector.extract_strided_slice %1138 {offsets = [0, 64], sizes = [2, 32], strides = [1, 1]} : vector<2x128xf32> to vector<2x32xf32>
    %1143 = arith.mulf %1141, %1142 : vector<2x32xf32>
    %1144 = arith.addf %1140, %1143 : vector<2x32xf32>
    %1145 = vector.extract_strided_slice %1137 {offsets = [0, 96], sizes = [2, 32], strides = [1, 1]} : vector<2x128xf32> to vector<2x32xf32>
    %1146 = math.tanh %1144 : vector<2x32xf32>
    %1147 = arith.mulf %1145, %1146 : vector<2x32xf32>
    %c14_431 = arith.constant 14 : index
    %c0_432 = arith.constant 0 : index
    %1148 = vector.load %arg45[%c14_431, %c0_432] : memref<16x32xf32, #tpu.memory_space<vmem>>, vector<2x32xf32>
    tpu.vector_store %arg45[%c14_431, %c0_432], %1147 {strides = array<i32>} : memref<16x32xf32, #tpu.memory_space<vmem>>, vector<2x32xf32>,
    %c0_433 = arith.constant 0 : index
    %c0_434 = arith.constant 0 : index
    %1149 = vector.load %arg45[%c0_433, %c0_434] : memref<16x32xf32, #tpu.memory_space<vmem>>, vector<16x32xf32>
    %c0_435 = arith.constant 0 : index
    %c0_436 = arith.constant 0 : index
    %1150 = vector.load %arg27[%c0_435, %c0_436] : memref<32x128xf32, #tpu.memory_space<vmem>>, vector<32x128xf32>
    %cst_437 = arith.constant dense<0.000000e+00> : vector<16x128xf32>
    %1151 = tpu.matmul %819, %1150, %cst_437 {dimension_numbers = #tpu.dot_dimension_numbers<[1], [0], [0], [1], [0, 0, 1, 1], [], []>} : vector<16x32xf32>, vector<32x128xf32>, vector<16x128xf32> -> vector<16x128xf32>
    %c0_438 = arith.constant 0 : index
    %c0_439 = arith.constant 0 : index
    %1152 = vector.load %arg28[%c0_438, %c0_439] : memref<32x128xf32, #tpu.memory_space<vmem>>, vector<32x128xf32>
    %cst_440 = arith.constant dense<0.000000e+00> : vector<16x128xf32>
    %1153 = tpu.matmul %984, %1152, %cst_440 {dimension_numbers = #tpu.dot_dimension_numbers<[1], [0], [0], [1], [0, 0, 1, 1], [], []>} : vector<16x32xf32>, vector<32x128xf32>, vector<16x128xf32> -> vector<16x128xf32>
    %1154 = arith.addf %1151, %1153 : vector<16x128xf32>
    %c0_441 = arith.constant 0 : index
    %c0_442 = arith.constant 0 : index
    %1155 = vector.load %arg30[%c0_441, %c0_442] : memref<1x128xf32, #tpu.memory_space<vmem>>, vector<1x128xf32>
    %1156 = vector.broadcast %1155 : vector<1x128xf32> to vector<16x128xf32>
    %1157 = arith.addf %1154, %1156 : vector<16x128xf32>
    %c0_443 = arith.constant 0 : index
    %c0_444 = arith.constant 0 : index
    %1158 = vector.load %arg42[%c0_443, %c0_444] : memref<16x128xf32, #tpu.memory_space<vmem>>, vector<16x128xf32>
    tpu.vector_store %arg42[%c0_443, %c0_444], %1157 {strides = array<i32>} : memref<16x128xf32, #tpu.memory_space<vmem>>, vector<16x128xf32>,
    %c0_445 = arith.constant 0 : index
    %c0_446 = arith.constant 0 : index
    %1159 = vector.load %arg29[%c0_445, %c0_446] : memref<32x128xf32, #tpu.memory_space<vmem>>, vector<32x128xf32>
    %cst_447 = arith.constant 0.000000e+00 : f32
    %1160 = vector.broadcast %cst_447 : f32 to vector<2x32xf32>
    %cst_448 = arith.constant 0.000000e+00 : f32
    %1161 = vector.broadcast %cst_448 : f32 to vector<2x32xf32>
    %c14_449 = arith.constant 14 : index
    %c0_450 = arith.constant 0 : index
    %1162 = vector.load %arg42[%c14_449, %c0_450] : memref<16x128xf32, #tpu.memory_space<vmem>>, vector<2x128xf32>
    %cst_451 = arith.constant dense<0.000000e+00> : vector<2x128xf32>
    %1163 = tpu.matmul %1160, %1159, %cst_451 {dimension_numbers = #tpu.dot_dimension_numbers<[1], [0], [0], [1], [0, 0, 1, 1], [], []>} : vector<2x32xf32>, vector<32x128xf32>, vector<2x128xf32> -> vector<2x128xf32>
    %1164 = arith.addf %1162, %1163 : vector<2x128xf32>
    %1165 = arith.negf %1164 : vector<2x128xf32>
    %1166 = math.exp %1165 : vector<2x128xf32>
    %cst_452 = arith.constant 1.000000e+00 : f32
    %1167 = vector.broadcast %cst_452 : f32 to vector<2x128xf32>
    %1168 = arith.addf %1167, %1166 : vector<2x128xf32>
    %1169 = arith.divf %1167, %1168 : vector<2x128xf32>
    %1170 = math.tanh %1164 : vector<2x128xf32>
    %1171 = vector.extract_strided_slice %1169 {offsets = [0, 32], sizes = [2, 32], strides = [1, 1]} : vector<2x128xf32> to vector<2x32xf32>
    %1172 = arith.mulf %1171, %1161 : vector<2x32xf32>
    %1173 = vector.extract_strided_slice %1169 {offsets = [0, 0], sizes = [2, 32], strides = [1, 1]} : vector<2x128xf32> to vector<2x32xf32>
    %1174 = vector.extract_strided_slice %1170 {offsets = [0, 64], sizes = [2, 32], strides = [1, 1]} : vector<2x128xf32> to vector<2x32xf32>
    %1175 = arith.mulf %1173, %1174 : vector<2x32xf32>
    %1176 = arith.addf %1172, %1175 : vector<2x32xf32>
    %1177 = vector.extract_strided_slice %1169 {offsets = [0, 96], sizes = [2, 32], strides = [1, 1]} : vector<2x128xf32> to vector<2x32xf32>
    %1178 = math.tanh %1176 : vector<2x32xf32>
    %1179 = arith.mulf %1177, %1178 : vector<2x32xf32>
    %c14_453 = arith.constant 14 : index
    %c0_454 = arith.constant 0 : index
    %1180 = vector.load %arg46[%c14_453, %c0_454] : memref<16x32xf32, #tpu.memory_space<vmem>>, vector<2x32xf32>
    tpu.vector_store %arg46[%c14_453, %c0_454], %1179 {strides = array<i32>} : memref<16x32xf32, #tpu.memory_space<vmem>>, vector<2x32xf32>,
    %c12_455 = arith.constant 12 : index
    %c0_456 = arith.constant 0 : index
    %1181 = vector.load %arg42[%c12_455, %c0_456] : memref<16x128xf32, #tpu.memory_space<vmem>>, vector<2x128xf32>
    %cst_457 = arith.constant dense<0.000000e+00> : vector<2x128xf32>
    %1182 = tpu.matmul %1179, %1159, %cst_457 {dimension_numbers = #tpu.dot_dimension_numbers<[1], [0], [0], [1], [0, 0, 1, 1], [], []>} : vector<2x32xf32>, vector<32x128xf32>, vector<2x128xf32> -> vector<2x128xf32>
    %1183 = arith.addf %1181, %1182 : vector<2x128xf32>
    %1184 = arith.negf %1183 : vector<2x128xf32>
    %1185 = math.exp %1184 : vector<2x128xf32>
    %cst_458 = arith.constant 1.000000e+00 : f32
    %1186 = vector.broadcast %cst_458 : f32 to vector<2x128xf32>
    %1187 = arith.addf %1186, %1185 : vector<2x128xf32>
    %1188 = arith.divf %1186, %1187 : vector<2x128xf32>
    %1189 = math.tanh %1183 : vector<2x128xf32>
    %1190 = vector.extract_strided_slice %1188 {offsets = [0, 32], sizes = [2, 32], strides = [1, 1]} : vector<2x128xf32> to vector<2x32xf32>
    %1191 = arith.mulf %1190, %1176 : vector<2x32xf32>
    %1192 = vector.extract_strided_slice %1188 {offsets = [0, 0], sizes = [2, 32], strides = [1, 1]} : vector<2x128xf32> to vector<2x32xf32>
    %1193 = vector.extract_strided_slice %1189 {offsets = [0, 64], sizes = [2, 32], strides = [1, 1]} : vector<2x128xf32> to vector<2x32xf32>
    %1194 = arith.mulf %1192, %1193 : vector<2x32xf32>
    %1195 = arith.addf %1191, %1194 : vector<2x32xf32>
    %1196 = vector.extract_strided_slice %1188 {offsets = [0, 96], sizes = [2, 32], strides = [1, 1]} : vector<2x128xf32> to vector<2x32xf32>
    %1197 = math.tanh %1195 : vector<2x32xf32>
    %1198 = arith.mulf %1196, %1197 : vector<2x32xf32>
    %c12_459 = arith.constant 12 : index
    %c0_460 = arith.constant 0 : index
    %1199 = vector.load %arg46[%c12_459, %c0_460] : memref<16x32xf32, #tpu.memory_space<vmem>>, vector<2x32xf32>
    tpu.vector_store %arg46[%c12_459, %c0_460], %1198 {strides = array<i32>} : memref<16x32xf32, #tpu.memory_space<vmem>>, vector<2x32xf32>,
    %c10_461 = arith.constant 10 : index
    %c0_462 = arith.constant 0 : index
    %1200 = vector.load %arg42[%c10_461, %c0_462] : memref<16x128xf32, #tpu.memory_space<vmem>>, vector<2x128xf32>
    %cst_463 = arith.constant dense<0.000000e+00> : vector<2x128xf32>
    %1201 = tpu.matmul %1198, %1159, %cst_463 {dimension_numbers = #tpu.dot_dimension_numbers<[1], [0], [0], [1], [0, 0, 1, 1], [], []>} : vector<2x32xf32>, vector<32x128xf32>, vector<2x128xf32> -> vector<2x128xf32>
    %1202 = arith.addf %1200, %1201 : vector<2x128xf32>
    %1203 = arith.negf %1202 : vector<2x128xf32>
    %1204 = math.exp %1203 : vector<2x128xf32>
    %cst_464 = arith.constant 1.000000e+00 : f32
    %1205 = vector.broadcast %cst_464 : f32 to vector<2x128xf32>
    %1206 = arith.addf %1205, %1204 : vector<2x128xf32>
    %1207 = arith.divf %1205, %1206 : vector<2x128xf32>
    %1208 = math.tanh %1202 : vector<2x128xf32>
    %1209 = vector.extract_strided_slice %1207 {offsets = [0, 32], sizes = [2, 32], strides = [1, 1]} : vector<2x128xf32> to vector<2x32xf32>
    %1210 = arith.mulf %1209, %1195 : vector<2x32xf32>
    %1211 = vector.extract_strided_slice %1207 {offsets = [0, 0], sizes = [2, 32], strides = [1, 1]} : vector<2x128xf32> to vector<2x32xf32>
    %1212 = vector.extract_strided_slice %1208 {offsets = [0, 64], sizes = [2, 32], strides = [1, 1]} : vector<2x128xf32> to vector<2x32xf32>
    %1213 = arith.mulf %1211, %1212 : vector<2x32xf32>
    %1214 = arith.addf %1210, %1213 : vector<2x32xf32>
    %1215 = vector.extract_strided_slice %1207 {offsets = [0, 96], sizes = [2, 32], strides = [1, 1]} : vector<2x128xf32> to vector<2x32xf32>
    %1216 = math.tanh %1214 : vector<2x32xf32>
    %1217 = arith.mulf %1215, %1216 : vector<2x32xf32>
    %c10_465 = arith.constant 10 : index
    %c0_466 = arith.constant 0 : index
    %1218 = vector.load %arg46[%c10_465, %c0_466] : memref<16x32xf32, #tpu.memory_space<vmem>>, vector<2x32xf32>
    tpu.vector_store %arg46[%c10_465, %c0_466], %1217 {strides = array<i32>} : memref<16x32xf32, #tpu.memory_space<vmem>>, vector<2x32xf32>,
    %c8_467 = arith.constant 8 : index
    %c0_468 = arith.constant 0 : index
    %1219 = vector.load %arg42[%c8_467, %c0_468] : memref<16x128xf32, #tpu.memory_space<vmem>>, vector<2x128xf32>
    %cst_469 = arith.constant dense<0.000000e+00> : vector<2x128xf32>
    %1220 = tpu.matmul %1217, %1159, %cst_469 {dimension_numbers = #tpu.dot_dimension_numbers<[1], [0], [0], [1], [0, 0, 1, 1], [], []>} : vector<2x32xf32>, vector<32x128xf32>, vector<2x128xf32> -> vector<2x128xf32>
    %1221 = arith.addf %1219, %1220 : vector<2x128xf32>
    %1222 = arith.negf %1221 : vector<2x128xf32>
    %1223 = math.exp %1222 : vector<2x128xf32>
    %cst_470 = arith.constant 1.000000e+00 : f32
    %1224 = vector.broadcast %cst_470 : f32 to vector<2x128xf32>
    %1225 = arith.addf %1224, %1223 : vector<2x128xf32>
    %1226 = arith.divf %1224, %1225 : vector<2x128xf32>
    %1227 = math.tanh %1221 : vector<2x128xf32>
    %1228 = vector.extract_strided_slice %1226 {offsets = [0, 32], sizes = [2, 32], strides = [1, 1]} : vector<2x128xf32> to vector<2x32xf32>
    %1229 = arith.mulf %1228, %1214 : vector<2x32xf32>
    %1230 = vector.extract_strided_slice %1226 {offsets = [0, 0], sizes = [2, 32], strides = [1, 1]} : vector<2x128xf32> to vector<2x32xf32>
    %1231 = vector.extract_strided_slice %1227 {offsets = [0, 64], sizes = [2, 32], strides = [1, 1]} : vector<2x128xf32> to vector<2x32xf32>
    %1232 = arith.mulf %1230, %1231 : vector<2x32xf32>
    %1233 = arith.addf %1229, %1232 : vector<2x32xf32>
    %1234 = vector.extract_strided_slice %1226 {offsets = [0, 96], sizes = [2, 32], strides = [1, 1]} : vector<2x128xf32> to vector<2x32xf32>
    %1235 = math.tanh %1233 : vector<2x32xf32>
    %1236 = arith.mulf %1234, %1235 : vector<2x32xf32>
    %c8_471 = arith.constant 8 : index
    %c0_472 = arith.constant 0 : index
    %1237 = vector.load %arg46[%c8_471, %c0_472] : memref<16x32xf32, #tpu.memory_space<vmem>>, vector<2x32xf32>
    tpu.vector_store %arg46[%c8_471, %c0_472], %1236 {strides = array<i32>} : memref<16x32xf32, #tpu.memory_space<vmem>>, vector<2x32xf32>,
    %c6_473 = arith.constant 6 : index
    %c0_474 = arith.constant 0 : index
    %1238 = vector.load %arg42[%c6_473, %c0_474] : memref<16x128xf32, #tpu.memory_space<vmem>>, vector<2x128xf32>
    %cst_475 = arith.constant dense<0.000000e+00> : vector<2x128xf32>
    %1239 = tpu.matmul %1236, %1159, %cst_475 {dimension_numbers = #tpu.dot_dimension_numbers<[1], [0], [0], [1], [0, 0, 1, 1], [], []>} : vector<2x32xf32>, vector<32x128xf32>, vector<2x128xf32> -> vector<2x128xf32>
    %1240 = arith.addf %1238, %1239 : vector<2x128xf32>
    %1241 = arith.negf %1240 : vector<2x128xf32>
    %1242 = math.exp %1241 : vector<2x128xf32>
    %cst_476 = arith.constant 1.000000e+00 : f32
    %1243 = vector.broadcast %cst_476 : f32 to vector<2x128xf32>
    %1244 = arith.addf %1243, %1242 : vector<2x128xf32>
    %1245 = arith.divf %1243, %1244 : vector<2x128xf32>
    %1246 = math.tanh %1240 : vector<2x128xf32>
    %1247 = vector.extract_strided_slice %1245 {offsets = [0, 32], sizes = [2, 32], strides = [1, 1]} : vector<2x128xf32> to vector<2x32xf32>
    %1248 = arith.mulf %1247, %1233 : vector<2x32xf32>
    %1249 = vector.extract_strided_slice %1245 {offsets = [0, 0], sizes = [2, 32], strides = [1, 1]} : vector<2x128xf32> to vector<2x32xf32>
    %1250 = vector.extract_strided_slice %1246 {offsets = [0, 64], sizes = [2, 32], strides = [1, 1]} : vector<2x128xf32> to vector<2x32xf32>
    %1251 = arith.mulf %1249, %1250 : vector<2x32xf32>
    %1252 = arith.addf %1248, %1251 : vector<2x32xf32>
    %1253 = vector.extract_strided_slice %1245 {offsets = [0, 96], sizes = [2, 32], strides = [1, 1]} : vector<2x128xf32> to vector<2x32xf32>
    %1254 = math.tanh %1252 : vector<2x32xf32>
    %1255 = arith.mulf %1253, %1254 : vector<2x32xf32>
    %c6_477 = arith.constant 6 : index
    %c0_478 = arith.constant 0 : index
    %1256 = vector.load %arg46[%c6_477, %c0_478] : memref<16x32xf32, #tpu.memory_space<vmem>>, vector<2x32xf32>
    tpu.vector_store %arg46[%c6_477, %c0_478], %1255 {strides = array<i32>} : memref<16x32xf32, #tpu.memory_space<vmem>>, vector<2x32xf32>,
    %c4_479 = arith.constant 4 : index
    %c0_480 = arith.constant 0 : index
    %1257 = vector.load %arg42[%c4_479, %c0_480] : memref<16x128xf32, #tpu.memory_space<vmem>>, vector<2x128xf32>
    %cst_481 = arith.constant dense<0.000000e+00> : vector<2x128xf32>
    %1258 = tpu.matmul %1255, %1159, %cst_481 {dimension_numbers = #tpu.dot_dimension_numbers<[1], [0], [0], [1], [0, 0, 1, 1], [], []>} : vector<2x32xf32>, vector<32x128xf32>, vector<2x128xf32> -> vector<2x128xf32>
    %1259 = arith.addf %1257, %1258 : vector<2x128xf32>
    %1260 = arith.negf %1259 : vector<2x128xf32>
    %1261 = math.exp %1260 : vector<2x128xf32>
    %cst_482 = arith.constant 1.000000e+00 : f32
    %1262 = vector.broadcast %cst_482 : f32 to vector<2x128xf32>
    %1263 = arith.addf %1262, %1261 : vector<2x128xf32>
    %1264 = arith.divf %1262, %1263 : vector<2x128xf32>
    %1265 = math.tanh %1259 : vector<2x128xf32>
    %1266 = vector.extract_strided_slice %1264 {offsets = [0, 32], sizes = [2, 32], strides = [1, 1]} : vector<2x128xf32> to vector<2x32xf32>
    %1267 = arith.mulf %1266, %1252 : vector<2x32xf32>
    %1268 = vector.extract_strided_slice %1264 {offsets = [0, 0], sizes = [2, 32], strides = [1, 1]} : vector<2x128xf32> to vector<2x32xf32>
    %1269 = vector.extract_strided_slice %1265 {offsets = [0, 64], sizes = [2, 32], strides = [1, 1]} : vector<2x128xf32> to vector<2x32xf32>
    %1270 = arith.mulf %1268, %1269 : vector<2x32xf32>
    %1271 = arith.addf %1267, %1270 : vector<2x32xf32>
    %1272 = vector.extract_strided_slice %1264 {offsets = [0, 96], sizes = [2, 32], strides = [1, 1]} : vector<2x128xf32> to vector<2x32xf32>
    %1273 = math.tanh %1271 : vector<2x32xf32>
    %1274 = arith.mulf %1272, %1273 : vector<2x32xf32>
    %c4_483 = arith.constant 4 : index
    %c0_484 = arith.constant 0 : index
    %1275 = vector.load %arg46[%c4_483, %c0_484] : memref<16x32xf32, #tpu.memory_space<vmem>>, vector<2x32xf32>
    tpu.vector_store %arg46[%c4_483, %c0_484], %1274 {strides = array<i32>} : memref<16x32xf32, #tpu.memory_space<vmem>>, vector<2x32xf32>,
    %c2_485 = arith.constant 2 : index
    %c0_486 = arith.constant 0 : index
    %1276 = vector.load %arg42[%c2_485, %c0_486] : memref<16x128xf32, #tpu.memory_space<vmem>>, vector<2x128xf32>
    %cst_487 = arith.constant dense<0.000000e+00> : vector<2x128xf32>
    %1277 = tpu.matmul %1274, %1159, %cst_487 {dimension_numbers = #tpu.dot_dimension_numbers<[1], [0], [0], [1], [0, 0, 1, 1], [], []>} : vector<2x32xf32>, vector<32x128xf32>, vector<2x128xf32> -> vector<2x128xf32>
    %1278 = arith.addf %1276, %1277 : vector<2x128xf32>
    %1279 = arith.negf %1278 : vector<2x128xf32>
    %1280 = math.exp %1279 : vector<2x128xf32>
    %cst_488 = arith.constant 1.000000e+00 : f32
    %1281 = vector.broadcast %cst_488 : f32 to vector<2x128xf32>
    %1282 = arith.addf %1281, %1280 : vector<2x128xf32>
    %1283 = arith.divf %1281, %1282 : vector<2x128xf32>
    %1284 = math.tanh %1278 : vector<2x128xf32>
    %1285 = vector.extract_strided_slice %1283 {offsets = [0, 32], sizes = [2, 32], strides = [1, 1]} : vector<2x128xf32> to vector<2x32xf32>
    %1286 = arith.mulf %1285, %1271 : vector<2x32xf32>
    %1287 = vector.extract_strided_slice %1283 {offsets = [0, 0], sizes = [2, 32], strides = [1, 1]} : vector<2x128xf32> to vector<2x32xf32>
    %1288 = vector.extract_strided_slice %1284 {offsets = [0, 64], sizes = [2, 32], strides = [1, 1]} : vector<2x128xf32> to vector<2x32xf32>
    %1289 = arith.mulf %1287, %1288 : vector<2x32xf32>
    %1290 = arith.addf %1286, %1289 : vector<2x32xf32>
    %1291 = vector.extract_strided_slice %1283 {offsets = [0, 96], sizes = [2, 32], strides = [1, 1]} : vector<2x128xf32> to vector<2x32xf32>
    %1292 = math.tanh %1290 : vector<2x32xf32>
    %1293 = arith.mulf %1291, %1292 : vector<2x32xf32>
    %c2_489 = arith.constant 2 : index
    %c0_490 = arith.constant 0 : index
    %1294 = vector.load %arg46[%c2_489, %c0_490] : memref<16x32xf32, #tpu.memory_space<vmem>>, vector<2x32xf32>
    tpu.vector_store %arg46[%c2_489, %c0_490], %1293 {strides = array<i32>} : memref<16x32xf32, #tpu.memory_space<vmem>>, vector<2x32xf32>,
    %c0_491 = arith.constant 0 : index
    %c0_492 = arith.constant 0 : index
    %1295 = vector.load %arg42[%c0_491, %c0_492] : memref<16x128xf32, #tpu.memory_space<vmem>>, vector<2x128xf32>
    %cst_493 = arith.constant dense<0.000000e+00> : vector<2x128xf32>
    %1296 = tpu.matmul %1293, %1159, %cst_493 {dimension_numbers = #tpu.dot_dimension_numbers<[1], [0], [0], [1], [0, 0, 1, 1], [], []>} : vector<2x32xf32>, vector<32x128xf32>, vector<2x128xf32> -> vector<2x128xf32>
    %1297 = arith.addf %1295, %1296 : vector<2x128xf32>
    %1298 = arith.negf %1297 : vector<2x128xf32>
    %1299 = math.exp %1298 : vector<2x128xf32>
    %cst_494 = arith.constant 1.000000e+00 : f32
    %1300 = vector.broadcast %cst_494 : f32 to vector<2x128xf32>
    %1301 = arith.addf %1300, %1299 : vector<2x128xf32>
    %1302 = arith.divf %1300, %1301 : vector<2x128xf32>
    %1303 = math.tanh %1297 : vector<2x128xf32>
    %1304 = vector.extract_strided_slice %1302 {offsets = [0, 32], sizes = [2, 32], strides = [1, 1]} : vector<2x128xf32> to vector<2x32xf32>
    %1305 = arith.mulf %1304, %1290 : vector<2x32xf32>
    %1306 = vector.extract_strided_slice %1302 {offsets = [0, 0], sizes = [2, 32], strides = [1, 1]} : vector<2x128xf32> to vector<2x32xf32>
    %1307 = vector.extract_strided_slice %1303 {offsets = [0, 64], sizes = [2, 32], strides = [1, 1]} : vector<2x128xf32> to vector<2x32xf32>
    %1308 = arith.mulf %1306, %1307 : vector<2x32xf32>
    %1309 = arith.addf %1305, %1308 : vector<2x32xf32>
    %1310 = vector.extract_strided_slice %1302 {offsets = [0, 96], sizes = [2, 32], strides = [1, 1]} : vector<2x128xf32> to vector<2x32xf32>
    %1311 = math.tanh %1309 : vector<2x32xf32>
    %1312 = arith.mulf %1310, %1311 : vector<2x32xf32>
    %c0_495 = arith.constant 0 : index
    %c0_496 = arith.constant 0 : index
    %1313 = vector.load %arg46[%c0_495, %c0_496] : memref<16x32xf32, #tpu.memory_space<vmem>>, vector<2x32xf32>
    tpu.vector_store %arg46[%c0_495, %c0_496], %1312 {strides = array<i32>} : memref<16x32xf32, #tpu.memory_space<vmem>>, vector<2x32xf32>,
    %c0_497 = arith.constant 0 : index
    %c0_498 = arith.constant 0 : index
    %1314 = vector.load %arg46[%c0_497, %c0_498] : memref<16x32xf32, #tpu.memory_space<vmem>>, vector<16x32xf32>
    %c0_499 = arith.constant 0 : index
    %c0_500 = arith.constant 0 : index
    %1315 = vector.load %arg31[%c0_499, %c0_500] : memref<16x128xf32, #tpu.memory_space<vmem>>, vector<16x128xf32>
    %cst_501 = arith.constant dense<0.000000e+00> : vector<16x128xf32>
    %1316 = tpu.matmul %0, %1315, %cst_501 {dimension_numbers = #tpu.dot_dimension_numbers<[1], [0], [0], [1], [0, 0, 1, 1], [], []>} : vector<16x16xf32>, vector<16x128xf32>, vector<16x128xf32> -> vector<16x128xf32>
    %c0_502 = arith.constant 0 : index
    %c0_503 = arith.constant 0 : index
    %1317 = vector.load %arg32[%c0_502, %c0_503] : memref<32x128xf32, #tpu.memory_space<vmem>>, vector<32x128xf32>
    %cst_504 = arith.constant dense<0.000000e+00> : vector<16x128xf32>
    %1318 = tpu.matmul %1149, %1317, %cst_504 {dimension_numbers = #tpu.dot_dimension_numbers<[1], [0], [0], [1], [0, 0, 1, 1], [], []>} : vector<16x32xf32>, vector<32x128xf32>, vector<16x128xf32> -> vector<16x128xf32>
    %1319 = arith.addf %1316, %1318 : vector<16x128xf32>
    %c0_505 = arith.constant 0 : index
    %c0_506 = arith.constant 0 : index
    %1320 = vector.load %arg33[%c0_505, %c0_506] : memref<32x128xf32, #tpu.memory_space<vmem>>, vector<32x128xf32>
    %cst_507 = arith.constant dense<0.000000e+00> : vector<16x128xf32>
    %1321 = tpu.matmul %1314, %1320, %cst_507 {dimension_numbers = #tpu.dot_dimension_numbers<[1], [0], [0], [1], [0, 0, 1, 1], [], []>} : vector<16x32xf32>, vector<32x128xf32>, vector<16x128xf32> -> vector<16x128xf32>
    %1322 = arith.addf %1319, %1321 : vector<16x128xf32>
    %c0_508 = arith.constant 0 : index
    %c0_509 = arith.constant 0 : index
    %1323 = vector.load %arg35[%c0_508, %c0_509] : memref<1x128xf32, #tpu.memory_space<vmem>>, vector<1x128xf32>
    %1324 = vector.broadcast %1323 : vector<1x128xf32> to vector<16x128xf32>
    %1325 = arith.addf %1322, %1324 : vector<16x128xf32>
    %c0_510 = arith.constant 0 : index
    %c0_511 = arith.constant 0 : index
    %1326 = vector.load %arg42[%c0_510, %c0_511] : memref<16x128xf32, #tpu.memory_space<vmem>>, vector<16x128xf32>
    tpu.vector_store %arg42[%c0_510, %c0_511], %1325 {strides = array<i32>} : memref<16x128xf32, #tpu.memory_space<vmem>>, vector<16x128xf32>,
    %c0_512 = arith.constant 0 : index
    %c0_513 = arith.constant 0 : index
    %1327 = vector.load %arg34[%c0_512, %c0_513] : memref<32x128xf32, #tpu.memory_space<vmem>>, vector<32x128xf32>
    %cst_514 = arith.constant 0.000000e+00 : f32
    %1328 = vector.broadcast %cst_514 : f32 to vector<2x32xf32>
    %cst_515 = arith.constant 0.000000e+00 : f32
    %1329 = vector.broadcast %cst_515 : f32 to vector<2x32xf32>
    %c0_516 = arith.constant 0 : index
    %c0_517 = arith.constant 0 : index
    %1330 = vector.load %arg42[%c0_516, %c0_517] : memref<16x128xf32, #tpu.memory_space<vmem>>, vector<2x128xf32>
    %cst_518 = arith.constant dense<0.000000e+00> : vector<2x128xf32>
    %1331 = tpu.matmul %1328, %1327, %cst_518 {dimension_numbers = #tpu.dot_dimension_numbers<[1], [0], [0], [1], [0, 0, 1, 1], [], []>} : vector<2x32xf32>, vector<32x128xf32>, vector<2x128xf32> -> vector<2x128xf32>
    %1332 = arith.addf %1330, %1331 : vector<2x128xf32>
    %1333 = arith.negf %1332 : vector<2x128xf32>
    %1334 = math.exp %1333 : vector<2x128xf32>
    %cst_519 = arith.constant 1.000000e+00 : f32
    %1335 = vector.broadcast %cst_519 : f32 to vector<2x128xf32>
    %1336 = arith.addf %1335, %1334 : vector<2x128xf32>
    %1337 = arith.divf %1335, %1336 : vector<2x128xf32>
    %1338 = math.tanh %1332 : vector<2x128xf32>
    %1339 = vector.extract_strided_slice %1337 {offsets = [0, 32], sizes = [2, 32], strides = [1, 1]} : vector<2x128xf32> to vector<2x32xf32>
    %1340 = arith.mulf %1339, %1329 : vector<2x32xf32>
    %1341 = vector.extract_strided_slice %1337 {offsets = [0, 0], sizes = [2, 32], strides = [1, 1]} : vector<2x128xf32> to vector<2x32xf32>
    %1342 = vector.extract_strided_slice %1338 {offsets = [0, 64], sizes = [2, 32], strides = [1, 1]} : vector<2x128xf32> to vector<2x32xf32>
    %1343 = arith.mulf %1341, %1342 : vector<2x32xf32>
    %1344 = arith.addf %1340, %1343 : vector<2x32xf32>
    %1345 = vector.extract_strided_slice %1337 {offsets = [0, 96], sizes = [2, 32], strides = [1, 1]} : vector<2x128xf32> to vector<2x32xf32>
    %1346 = math.tanh %1344 : vector<2x32xf32>
    %1347 = arith.mulf %1345, %1346 : vector<2x32xf32>
    %c0_520 = arith.constant 0 : index
    %c0_521 = arith.constant 0 : index
    %1348 = vector.load %arg43[%c0_520, %c0_521] : memref<16x32xf32, #tpu.memory_space<vmem>>, vector<2x32xf32>
    tpu.vector_store %arg43[%c0_520, %c0_521], %1347 {strides = array<i32>} : memref<16x32xf32, #tpu.memory_space<vmem>>, vector<2x32xf32>,
    %c2_522 = arith.constant 2 : index
    %c0_523 = arith.constant 0 : index
    %1349 = vector.load %arg42[%c2_522, %c0_523] : memref<16x128xf32, #tpu.memory_space<vmem>>, vector<2x128xf32>
    %cst_524 = arith.constant dense<0.000000e+00> : vector<2x128xf32>
    %1350 = tpu.matmul %1347, %1327, %cst_524 {dimension_numbers = #tpu.dot_dimension_numbers<[1], [0], [0], [1], [0, 0, 1, 1], [], []>} : vector<2x32xf32>, vector<32x128xf32>, vector<2x128xf32> -> vector<2x128xf32>
    %1351 = arith.addf %1349, %1350 : vector<2x128xf32>
    %1352 = arith.negf %1351 : vector<2x128xf32>
    %1353 = math.exp %1352 : vector<2x128xf32>
    %cst_525 = arith.constant 1.000000e+00 : f32
    %1354 = vector.broadcast %cst_525 : f32 to vector<2x128xf32>
    %1355 = arith.addf %1354, %1353 : vector<2x128xf32>
    %1356 = arith.divf %1354, %1355 : vector<2x128xf32>
    %1357 = math.tanh %1351 : vector<2x128xf32>
    %1358 = vector.extract_strided_slice %1356 {offsets = [0, 32], sizes = [2, 32], strides = [1, 1]} : vector<2x128xf32> to vector<2x32xf32>
    %1359 = arith.mulf %1358, %1344 : vector<2x32xf32>
    %1360 = vector.extract_strided_slice %1356 {offsets = [0, 0], sizes = [2, 32], strides = [1, 1]} : vector<2x128xf32> to vector<2x32xf32>
    %1361 = vector.extract_strided_slice %1357 {offsets = [0, 64], sizes = [2, 32], strides = [1, 1]} : vector<2x128xf32> to vector<2x32xf32>
    %1362 = arith.mulf %1360, %1361 : vector<2x32xf32>
    %1363 = arith.addf %1359, %1362 : vector<2x32xf32>
    %1364 = vector.extract_strided_slice %1356 {offsets = [0, 96], sizes = [2, 32], strides = [1, 1]} : vector<2x128xf32> to vector<2x32xf32>
    %1365 = math.tanh %1363 : vector<2x32xf32>
    %1366 = arith.mulf %1364, %1365 : vector<2x32xf32>
    %c2_526 = arith.constant 2 : index
    %c0_527 = arith.constant 0 : index
    %1367 = vector.load %arg43[%c2_526, %c0_527] : memref<16x32xf32, #tpu.memory_space<vmem>>, vector<2x32xf32>
    tpu.vector_store %arg43[%c2_526, %c0_527], %1366 {strides = array<i32>} : memref<16x32xf32, #tpu.memory_space<vmem>>, vector<2x32xf32>,
    %c4_528 = arith.constant 4 : index
    %c0_529 = arith.constant 0 : index
    %1368 = vector.load %arg42[%c4_528, %c0_529] : memref<16x128xf32, #tpu.memory_space<vmem>>, vector<2x128xf32>
    %cst_530 = arith.constant dense<0.000000e+00> : vector<2x128xf32>
    %1369 = tpu.matmul %1366, %1327, %cst_530 {dimension_numbers = #tpu.dot_dimension_numbers<[1], [0], [0], [1], [0, 0, 1, 1], [], []>} : vector<2x32xf32>, vector<32x128xf32>, vector<2x128xf32> -> vector<2x128xf32>
    %1370 = arith.addf %1368, %1369 : vector<2x128xf32>
    %1371 = arith.negf %1370 : vector<2x128xf32>
    %1372 = math.exp %1371 : vector<2x128xf32>
    %cst_531 = arith.constant 1.000000e+00 : f32
    %1373 = vector.broadcast %cst_531 : f32 to vector<2x128xf32>
    %1374 = arith.addf %1373, %1372 : vector<2x128xf32>
    %1375 = arith.divf %1373, %1374 : vector<2x128xf32>
    %1376 = math.tanh %1370 : vector<2x128xf32>
    %1377 = vector.extract_strided_slice %1375 {offsets = [0, 32], sizes = [2, 32], strides = [1, 1]} : vector<2x128xf32> to vector<2x32xf32>
    %1378 = arith.mulf %1377, %1363 : vector<2x32xf32>
    %1379 = vector.extract_strided_slice %1375 {offsets = [0, 0], sizes = [2, 32], strides = [1, 1]} : vector<2x128xf32> to vector<2x32xf32>
    %1380 = vector.extract_strided_slice %1376 {offsets = [0, 64], sizes = [2, 32], strides = [1, 1]} : vector<2x128xf32> to vector<2x32xf32>
    %1381 = arith.mulf %1379, %1380 : vector<2x32xf32>
    %1382 = arith.addf %1378, %1381 : vector<2x32xf32>
    %1383 = vector.extract_strided_slice %1375 {offsets = [0, 96], sizes = [2, 32], strides = [1, 1]} : vector<2x128xf32> to vector<2x32xf32>
    %1384 = math.tanh %1382 : vector<2x32xf32>
    %1385 = arith.mulf %1383, %1384 : vector<2x32xf32>
    %c4_532 = arith.constant 4 : index
    %c0_533 = arith.constant 0 : index
    %1386 = vector.load %arg43[%c4_532, %c0_533] : memref<16x32xf32, #tpu.memory_space<vmem>>, vector<2x32xf32>
    tpu.vector_store %arg43[%c4_532, %c0_533], %1385 {strides = array<i32>} : memref<16x32xf32, #tpu.memory_space<vmem>>, vector<2x32xf32>,
    %c6_534 = arith.constant 6 : index
    %c0_535 = arith.constant 0 : index
    %1387 = vector.load %arg42[%c6_534, %c0_535] : memref<16x128xf32, #tpu.memory_space<vmem>>, vector<2x128xf32>
    %cst_536 = arith.constant dense<0.000000e+00> : vector<2x128xf32>
    %1388 = tpu.matmul %1385, %1327, %cst_536 {dimension_numbers = #tpu.dot_dimension_numbers<[1], [0], [0], [1], [0, 0, 1, 1], [], []>} : vector<2x32xf32>, vector<32x128xf32>, vector<2x128xf32> -> vector<2x128xf32>
    %1389 = arith.addf %1387, %1388 : vector<2x128xf32>
    %1390 = arith.negf %1389 : vector<2x128xf32>
    %1391 = math.exp %1390 : vector<2x128xf32>
    %cst_537 = arith.constant 1.000000e+00 : f32
    %1392 = vector.broadcast %cst_537 : f32 to vector<2x128xf32>
    %1393 = arith.addf %1392, %1391 : vector<2x128xf32>
    %1394 = arith.divf %1392, %1393 : vector<2x128xf32>
    %1395 = math.tanh %1389 : vector<2x128xf32>
    %1396 = vector.extract_strided_slice %1394 {offsets = [0, 32], sizes = [2, 32], strides = [1, 1]} : vector<2x128xf32> to vector<2x32xf32>
    %1397 = arith.mulf %1396, %1382 : vector<2x32xf32>
    %1398 = vector.extract_strided_slice %1394 {offsets = [0, 0], sizes = [2, 32], strides = [1, 1]} : vector<2x128xf32> to vector<2x32xf32>
    %1399 = vector.extract_strided_slice %1395 {offsets = [0, 64], sizes = [2, 32], strides = [1, 1]} : vector<2x128xf32> to vector<2x32xf32>
    %1400 = arith.mulf %1398, %1399 : vector<2x32xf32>
    %1401 = arith.addf %1397, %1400 : vector<2x32xf32>
    %1402 = vector.extract_strided_slice %1394 {offsets = [0, 96], sizes = [2, 32], strides = [1, 1]} : vector<2x128xf32> to vector<2x32xf32>
    %1403 = math.tanh %1401 : vector<2x32xf32>
    %1404 = arith.mulf %1402, %1403 : vector<2x32xf32>
    %c6_538 = arith.constant 6 : index
    %c0_539 = arith.constant 0 : index
    %1405 = vector.load %arg43[%c6_538, %c0_539] : memref<16x32xf32, #tpu.memory_space<vmem>>, vector<2x32xf32>
    tpu.vector_store %arg43[%c6_538, %c0_539], %1404 {strides = array<i32>} : memref<16x32xf32, #tpu.memory_space<vmem>>, vector<2x32xf32>,
    %c8_540 = arith.constant 8 : index
    %c0_541 = arith.constant 0 : index
    %1406 = vector.load %arg42[%c8_540, %c0_541] : memref<16x128xf32, #tpu.memory_space<vmem>>, vector<2x128xf32>
    %cst_542 = arith.constant dense<0.000000e+00> : vector<2x128xf32>
    %1407 = tpu.matmul %1404, %1327, %cst_542 {dimension_numbers = #tpu.dot_dimension_numbers<[1], [0], [0], [1], [0, 0, 1, 1], [], []>} : vector<2x32xf32>, vector<32x128xf32>, vector<2x128xf32> -> vector<2x128xf32>
    %1408 = arith.addf %1406, %1407 : vector<2x128xf32>
    %1409 = arith.negf %1408 : vector<2x128xf32>
    %1410 = math.exp %1409 : vector<2x128xf32>
    %cst_543 = arith.constant 1.000000e+00 : f32
    %1411 = vector.broadcast %cst_543 : f32 to vector<2x128xf32>
    %1412 = arith.addf %1411, %1410 : vector<2x128xf32>
    %1413 = arith.divf %1411, %1412 : vector<2x128xf32>
    %1414 = math.tanh %1408 : vector<2x128xf32>
    %1415 = vector.extract_strided_slice %1413 {offsets = [0, 32], sizes = [2, 32], strides = [1, 1]} : vector<2x128xf32> to vector<2x32xf32>
    %1416 = arith.mulf %1415, %1401 : vector<2x32xf32>
    %1417 = vector.extract_strided_slice %1413 {offsets = [0, 0], sizes = [2, 32], strides = [1, 1]} : vector<2x128xf32> to vector<2x32xf32>
    %1418 = vector.extract_strided_slice %1414 {offsets = [0, 64], sizes = [2, 32], strides = [1, 1]} : vector<2x128xf32> to vector<2x32xf32>
    %1419 = arith.mulf %1417, %1418 : vector<2x32xf32>
    %1420 = arith.addf %1416, %1419 : vector<2x32xf32>
    %1421 = vector.extract_strided_slice %1413 {offsets = [0, 96], sizes = [2, 32], strides = [1, 1]} : vector<2x128xf32> to vector<2x32xf32>
    %1422 = math.tanh %1420 : vector<2x32xf32>
    %1423 = arith.mulf %1421, %1422 : vector<2x32xf32>
    %c8_544 = arith.constant 8 : index
    %c0_545 = arith.constant 0 : index
    %1424 = vector.load %arg43[%c8_544, %c0_545] : memref<16x32xf32, #tpu.memory_space<vmem>>, vector<2x32xf32>
    tpu.vector_store %arg43[%c8_544, %c0_545], %1423 {strides = array<i32>} : memref<16x32xf32, #tpu.memory_space<vmem>>, vector<2x32xf32>,
    %c10_546 = arith.constant 10 : index
    %c0_547 = arith.constant 0 : index
    %1425 = vector.load %arg42[%c10_546, %c0_547] : memref<16x128xf32, #tpu.memory_space<vmem>>, vector<2x128xf32>
    %cst_548 = arith.constant dense<0.000000e+00> : vector<2x128xf32>
    %1426 = tpu.matmul %1423, %1327, %cst_548 {dimension_numbers = #tpu.dot_dimension_numbers<[1], [0], [0], [1], [0, 0, 1, 1], [], []>} : vector<2x32xf32>, vector<32x128xf32>, vector<2x128xf32> -> vector<2x128xf32>
    %1427 = arith.addf %1425, %1426 : vector<2x128xf32>
    %1428 = arith.negf %1427 : vector<2x128xf32>
    %1429 = math.exp %1428 : vector<2x128xf32>
    %cst_549 = arith.constant 1.000000e+00 : f32
    %1430 = vector.broadcast %cst_549 : f32 to vector<2x128xf32>
    %1431 = arith.addf %1430, %1429 : vector<2x128xf32>
    %1432 = arith.divf %1430, %1431 : vector<2x128xf32>
    %1433 = math.tanh %1427 : vector<2x128xf32>
    %1434 = vector.extract_strided_slice %1432 {offsets = [0, 32], sizes = [2, 32], strides = [1, 1]} : vector<2x128xf32> to vector<2x32xf32>
    %1435 = arith.mulf %1434, %1420 : vector<2x32xf32>
    %1436 = vector.extract_strided_slice %1432 {offsets = [0, 0], sizes = [2, 32], strides = [1, 1]} : vector<2x128xf32> to vector<2x32xf32>
    %1437 = vector.extract_strided_slice %1433 {offsets = [0, 64], sizes = [2, 32], strides = [1, 1]} : vector<2x128xf32> to vector<2x32xf32>
    %1438 = arith.mulf %1436, %1437 : vector<2x32xf32>
    %1439 = arith.addf %1435, %1438 : vector<2x32xf32>
    %1440 = vector.extract_strided_slice %1432 {offsets = [0, 96], sizes = [2, 32], strides = [1, 1]} : vector<2x128xf32> to vector<2x32xf32>
    %1441 = math.tanh %1439 : vector<2x32xf32>
    %1442 = arith.mulf %1440, %1441 : vector<2x32xf32>
    %c10_550 = arith.constant 10 : index
    %c0_551 = arith.constant 0 : index
    %1443 = vector.load %arg43[%c10_550, %c0_551] : memref<16x32xf32, #tpu.memory_space<vmem>>, vector<2x32xf32>
    tpu.vector_store %arg43[%c10_550, %c0_551], %1442 {strides = array<i32>} : memref<16x32xf32, #tpu.memory_space<vmem>>, vector<2x32xf32>,
    %c12_552 = arith.constant 12 : index
    %c0_553 = arith.constant 0 : index
    %1444 = vector.load %arg42[%c12_552, %c0_553] : memref<16x128xf32, #tpu.memory_space<vmem>>, vector<2x128xf32>
    %cst_554 = arith.constant dense<0.000000e+00> : vector<2x128xf32>
    %1445 = tpu.matmul %1442, %1327, %cst_554 {dimension_numbers = #tpu.dot_dimension_numbers<[1], [0], [0], [1], [0, 0, 1, 1], [], []>} : vector<2x32xf32>, vector<32x128xf32>, vector<2x128xf32> -> vector<2x128xf32>
    %1446 = arith.addf %1444, %1445 : vector<2x128xf32>
    %1447 = arith.negf %1446 : vector<2x128xf32>
    %1448 = math.exp %1447 : vector<2x128xf32>
    %cst_555 = arith.constant 1.000000e+00 : f32
    %1449 = vector.broadcast %cst_555 : f32 to vector<2x128xf32>
    %1450 = arith.addf %1449, %1448 : vector<2x128xf32>
    %1451 = arith.divf %1449, %1450 : vector<2x128xf32>
    %1452 = math.tanh %1446 : vector<2x128xf32>
    %1453 = vector.extract_strided_slice %1451 {offsets = [0, 32], sizes = [2, 32], strides = [1, 1]} : vector<2x128xf32> to vector<2x32xf32>
    %1454 = arith.mulf %1453, %1439 : vector<2x32xf32>
    %1455 = vector.extract_strided_slice %1451 {offsets = [0, 0], sizes = [2, 32], strides = [1, 1]} : vector<2x128xf32> to vector<2x32xf32>
    %1456 = vector.extract_strided_slice %1452 {offsets = [0, 64], sizes = [2, 32], strides = [1, 1]} : vector<2x128xf32> to vector<2x32xf32>
    %1457 = arith.mulf %1455, %1456 : vector<2x32xf32>
    %1458 = arith.addf %1454, %1457 : vector<2x32xf32>
    %1459 = vector.extract_strided_slice %1451 {offsets = [0, 96], sizes = [2, 32], strides = [1, 1]} : vector<2x128xf32> to vector<2x32xf32>
    %1460 = math.tanh %1458 : vector<2x32xf32>
    %1461 = arith.mulf %1459, %1460 : vector<2x32xf32>
    %c12_556 = arith.constant 12 : index
    %c0_557 = arith.constant 0 : index
    %1462 = vector.load %arg43[%c12_556, %c0_557] : memref<16x32xf32, #tpu.memory_space<vmem>>, vector<2x32xf32>
    tpu.vector_store %arg43[%c12_556, %c0_557], %1461 {strides = array<i32>} : memref<16x32xf32, #tpu.memory_space<vmem>>, vector<2x32xf32>,
    %c14_558 = arith.constant 14 : index
    %c0_559 = arith.constant 0 : index
    %1463 = vector.load %arg42[%c14_558, %c0_559] : memref<16x128xf32, #tpu.memory_space<vmem>>, vector<2x128xf32>
    %cst_560 = arith.constant dense<0.000000e+00> : vector<2x128xf32>
    %1464 = tpu.matmul %1461, %1327, %cst_560 {dimension_numbers = #tpu.dot_dimension_numbers<[1], [0], [0], [1], [0, 0, 1, 1], [], []>} : vector<2x32xf32>, vector<32x128xf32>, vector<2x128xf32> -> vector<2x128xf32>
    %1465 = arith.addf %1463, %1464 : vector<2x128xf32>
    %1466 = arith.negf %1465 : vector<2x128xf32>
    %1467 = math.exp %1466 : vector<2x128xf32>
    %cst_561 = arith.constant 1.000000e+00 : f32
    %1468 = vector.broadcast %cst_561 : f32 to vector<2x128xf32>
    %1469 = arith.addf %1468, %1467 : vector<2x128xf32>
    %1470 = arith.divf %1468, %1469 : vector<2x128xf32>
    %1471 = math.tanh %1465 : vector<2x128xf32>
    %1472 = vector.extract_strided_slice %1470 {offsets = [0, 32], sizes = [2, 32], strides = [1, 1]} : vector<2x128xf32> to vector<2x32xf32>
    %1473 = arith.mulf %1472, %1458 : vector<2x32xf32>
    %1474 = vector.extract_strided_slice %1470 {offsets = [0, 0], sizes = [2, 32], strides = [1, 1]} : vector<2x128xf32> to vector<2x32xf32>
    %1475 = vector.extract_strided_slice %1471 {offsets = [0, 64], sizes = [2, 32], strides = [1, 1]} : vector<2x128xf32> to vector<2x32xf32>
    %1476 = arith.mulf %1474, %1475 : vector<2x32xf32>
    %1477 = arith.addf %1473, %1476 : vector<2x32xf32>
    %1478 = vector.extract_strided_slice %1470 {offsets = [0, 96], sizes = [2, 32], strides = [1, 1]} : vector<2x128xf32> to vector<2x32xf32>
    %1479 = math.tanh %1477 : vector<2x32xf32>
    %1480 = arith.mulf %1478, %1479 : vector<2x32xf32>
    %c14_562 = arith.constant 14 : index
    %c0_563 = arith.constant 0 : index
    %1481 = vector.load %arg43[%c14_562, %c0_563] : memref<16x32xf32, #tpu.memory_space<vmem>>, vector<2x32xf32>
    tpu.vector_store %arg43[%c14_562, %c0_563], %1480 {strides = array<i32>} : memref<16x32xf32, #tpu.memory_space<vmem>>, vector<2x32xf32>,
    %c0_564 = arith.constant 0 : index
    %c0_565 = arith.constant 0 : index
    %1482 = vector.load %arg43[%c0_564, %c0_565] : memref<16x32xf32, #tpu.memory_space<vmem>>, vector<16x32xf32>
    %c0_566 = arith.constant 0 : index
    %c0_567 = arith.constant 0 : index
    %1483 = vector.load %arg36[%c0_566, %c0_567] : memref<32x128xf32, #tpu.memory_space<vmem>>, vector<32x128xf32>
    %cst_568 = arith.constant dense<0.000000e+00> : vector<16x128xf32>
    %1484 = tpu.matmul %1482, %1483, %cst_568 {dimension_numbers = #tpu.dot_dimension_numbers<[1], [0], [0], [1], [0, 0, 1, 1], [], []>} : vector<16x32xf32>, vector<32x128xf32>, vector<16x128xf32> -> vector<16x128xf32>
    %c0_569 = arith.constant 0 : index
    %c0_570 = arith.constant 0 : index
    %1485 = vector.load %arg38[%c0_569, %c0_570] : memref<1x128xf32, #tpu.memory_space<vmem>>, vector<1x128xf32>
    %1486 = vector.broadcast %1485 : vector<1x128xf32> to vector<16x128xf32>
    %1487 = arith.addf %1484, %1486 : vector<16x128xf32>
    %c0_571 = arith.constant 0 : index
    %c0_572 = arith.constant 0 : index
    %1488 = vector.load %arg42[%c0_571, %c0_572] : memref<16x128xf32, #tpu.memory_space<vmem>>, vector<16x128xf32>
    tpu.vector_store %arg42[%c0_571, %c0_572], %1487 {strides = array<i32>} : memref<16x128xf32, #tpu.memory_space<vmem>>, vector<16x128xf32>,
    %c0_573 = arith.constant 0 : index
    %c0_574 = arith.constant 0 : index
    %1489 = vector.load %arg37[%c0_573, %c0_574] : memref<32x128xf32, #tpu.memory_space<vmem>>, vector<32x128xf32>
    %cst_575 = arith.constant 0.000000e+00 : f32
    %1490 = vector.broadcast %cst_575 : f32 to vector<2x32xf32>
    %cst_576 = arith.constant 0.000000e+00 : f32
    %1491 = vector.broadcast %cst_576 : f32 to vector<2x32xf32>
    %c0_577 = arith.constant 0 : index
    %c0_578 = arith.constant 0 : index
    %1492 = vector.load %arg42[%c0_577, %c0_578] : memref<16x128xf32, #tpu.memory_space<vmem>>, vector<2x128xf32>
    %cst_579 = arith.constant dense<0.000000e+00> : vector<2x128xf32>
    %1493 = tpu.matmul %1490, %1489, %cst_579 {dimension_numbers = #tpu.dot_dimension_numbers<[1], [0], [0], [1], [0, 0, 1, 1], [], []>} : vector<2x32xf32>, vector<32x128xf32>, vector<2x128xf32> -> vector<2x128xf32>
    %1494 = arith.addf %1492, %1493 : vector<2x128xf32>
    %1495 = arith.negf %1494 : vector<2x128xf32>
    %1496 = math.exp %1495 : vector<2x128xf32>
    %cst_580 = arith.constant 1.000000e+00 : f32
    %1497 = vector.broadcast %cst_580 : f32 to vector<2x128xf32>
    %1498 = arith.addf %1497, %1496 : vector<2x128xf32>
    %1499 = arith.divf %1497, %1498 : vector<2x128xf32>
    %1500 = math.tanh %1494 : vector<2x128xf32>
    %1501 = vector.extract_strided_slice %1499 {offsets = [0, 32], sizes = [2, 32], strides = [1, 1]} : vector<2x128xf32> to vector<2x32xf32>
    %1502 = arith.mulf %1501, %1491 : vector<2x32xf32>
    %1503 = vector.extract_strided_slice %1499 {offsets = [0, 0], sizes = [2, 32], strides = [1, 1]} : vector<2x128xf32> to vector<2x32xf32>
    %1504 = vector.extract_strided_slice %1500 {offsets = [0, 64], sizes = [2, 32], strides = [1, 1]} : vector<2x128xf32> to vector<2x32xf32>
    %1505 = arith.mulf %1503, %1504 : vector<2x32xf32>
    %1506 = arith.addf %1502, %1505 : vector<2x32xf32>
    %1507 = vector.extract_strided_slice %1499 {offsets = [0, 96], sizes = [2, 32], strides = [1, 1]} : vector<2x128xf32> to vector<2x32xf32>
    %1508 = math.tanh %1506 : vector<2x32xf32>
    %1509 = arith.mulf %1507, %1508 : vector<2x32xf32>
    %c0_581 = arith.constant 0 : index
    %c0_582 = arith.constant 0 : index
    %1510 = vector.load %arg44[%c0_581, %c0_582] : memref<16x32xf32, #tpu.memory_space<vmem>>, vector<2x32xf32>
    tpu.vector_store %arg44[%c0_581, %c0_582], %1509 {strides = array<i32>} : memref<16x32xf32, #tpu.memory_space<vmem>>, vector<2x32xf32>,
    %c2_583 = arith.constant 2 : index
    %c0_584 = arith.constant 0 : index
    %1511 = vector.load %arg42[%c2_583, %c0_584] : memref<16x128xf32, #tpu.memory_space<vmem>>, vector<2x128xf32>
    %cst_585 = arith.constant dense<0.000000e+00> : vector<2x128xf32>
    %1512 = tpu.matmul %1509, %1489, %cst_585 {dimension_numbers = #tpu.dot_dimension_numbers<[1], [0], [0], [1], [0, 0, 1, 1], [], []>} : vector<2x32xf32>, vector<32x128xf32>, vector<2x128xf32> -> vector<2x128xf32>
    %1513 = arith.addf %1511, %1512 : vector<2x128xf32>
    %1514 = arith.negf %1513 : vector<2x128xf32>
    %1515 = math.exp %1514 : vector<2x128xf32>
    %cst_586 = arith.constant 1.000000e+00 : f32
    %1516 = vector.broadcast %cst_586 : f32 to vector<2x128xf32>
    %1517 = arith.addf %1516, %1515 : vector<2x128xf32>
    %1518 = arith.divf %1516, %1517 : vector<2x128xf32>
    %1519 = math.tanh %1513 : vector<2x128xf32>
    %1520 = vector.extract_strided_slice %1518 {offsets = [0, 32], sizes = [2, 32], strides = [1, 1]} : vector<2x128xf32> to vector<2x32xf32>
    %1521 = arith.mulf %1520, %1506 : vector<2x32xf32>
    %1522 = vector.extract_strided_slice %1518 {offsets = [0, 0], sizes = [2, 32], strides = [1, 1]} : vector<2x128xf32> to vector<2x32xf32>
    %1523 = vector.extract_strided_slice %1519 {offsets = [0, 64], sizes = [2, 32], strides = [1, 1]} : vector<2x128xf32> to vector<2x32xf32>
    %1524 = arith.mulf %1522, %1523 : vector<2x32xf32>
    %1525 = arith.addf %1521, %1524 : vector<2x32xf32>
    %1526 = vector.extract_strided_slice %1518 {offsets = [0, 96], sizes = [2, 32], strides = [1, 1]} : vector<2x128xf32> to vector<2x32xf32>
    %1527 = math.tanh %1525 : vector<2x32xf32>
    %1528 = arith.mulf %1526, %1527 : vector<2x32xf32>
    %c2_587 = arith.constant 2 : index
    %c0_588 = arith.constant 0 : index
    %1529 = vector.load %arg44[%c2_587, %c0_588] : memref<16x32xf32, #tpu.memory_space<vmem>>, vector<2x32xf32>
    tpu.vector_store %arg44[%c2_587, %c0_588], %1528 {strides = array<i32>} : memref<16x32xf32, #tpu.memory_space<vmem>>, vector<2x32xf32>,
    %c4_589 = arith.constant 4 : index
    %c0_590 = arith.constant 0 : index
    %1530 = vector.load %arg42[%c4_589, %c0_590] : memref<16x128xf32, #tpu.memory_space<vmem>>, vector<2x128xf32>
    %cst_591 = arith.constant dense<0.000000e+00> : vector<2x128xf32>
    %1531 = tpu.matmul %1528, %1489, %cst_591 {dimension_numbers = #tpu.dot_dimension_numbers<[1], [0], [0], [1], [0, 0, 1, 1], [], []>} : vector<2x32xf32>, vector<32x128xf32>, vector<2x128xf32> -> vector<2x128xf32>
    %1532 = arith.addf %1530, %1531 : vector<2x128xf32>
    %1533 = arith.negf %1532 : vector<2x128xf32>
    %1534 = math.exp %1533 : vector<2x128xf32>
    %cst_592 = arith.constant 1.000000e+00 : f32
    %1535 = vector.broadcast %cst_592 : f32 to vector<2x128xf32>
    %1536 = arith.addf %1535, %1534 : vector<2x128xf32>
    %1537 = arith.divf %1535, %1536 : vector<2x128xf32>
    %1538 = math.tanh %1532 : vector<2x128xf32>
    %1539 = vector.extract_strided_slice %1537 {offsets = [0, 32], sizes = [2, 32], strides = [1, 1]} : vector<2x128xf32> to vector<2x32xf32>
    %1540 = arith.mulf %1539, %1525 : vector<2x32xf32>
    %1541 = vector.extract_strided_slice %1537 {offsets = [0, 0], sizes = [2, 32], strides = [1, 1]} : vector<2x128xf32> to vector<2x32xf32>
    %1542 = vector.extract_strided_slice %1538 {offsets = [0, 64], sizes = [2, 32], strides = [1, 1]} : vector<2x128xf32> to vector<2x32xf32>
    %1543 = arith.mulf %1541, %1542 : vector<2x32xf32>
    %1544 = arith.addf %1540, %1543 : vector<2x32xf32>
    %1545 = vector.extract_strided_slice %1537 {offsets = [0, 96], sizes = [2, 32], strides = [1, 1]} : vector<2x128xf32> to vector<2x32xf32>
    %1546 = math.tanh %1544 : vector<2x32xf32>
    %1547 = arith.mulf %1545, %1546 : vector<2x32xf32>
    %c4_593 = arith.constant 4 : index
    %c0_594 = arith.constant 0 : index
    %1548 = vector.load %arg44[%c4_593, %c0_594] : memref<16x32xf32, #tpu.memory_space<vmem>>, vector<2x32xf32>
    tpu.vector_store %arg44[%c4_593, %c0_594], %1547 {strides = array<i32>} : memref<16x32xf32, #tpu.memory_space<vmem>>, vector<2x32xf32>,
    %c6_595 = arith.constant 6 : index
    %c0_596 = arith.constant 0 : index
    %1549 = vector.load %arg42[%c6_595, %c0_596] : memref<16x128xf32, #tpu.memory_space<vmem>>, vector<2x128xf32>
    %cst_597 = arith.constant dense<0.000000e+00> : vector<2x128xf32>
    %1550 = tpu.matmul %1547, %1489, %cst_597 {dimension_numbers = #tpu.dot_dimension_numbers<[1], [0], [0], [1], [0, 0, 1, 1], [], []>} : vector<2x32xf32>, vector<32x128xf32>, vector<2x128xf32> -> vector<2x128xf32>
    %1551 = arith.addf %1549, %1550 : vector<2x128xf32>
    %1552 = arith.negf %1551 : vector<2x128xf32>
    %1553 = math.exp %1552 : vector<2x128xf32>
    %cst_598 = arith.constant 1.000000e+00 : f32
    %1554 = vector.broadcast %cst_598 : f32 to vector<2x128xf32>
    %1555 = arith.addf %1554, %1553 : vector<2x128xf32>
    %1556 = arith.divf %1554, %1555 : vector<2x128xf32>
    %1557 = math.tanh %1551 : vector<2x128xf32>
    %1558 = vector.extract_strided_slice %1556 {offsets = [0, 32], sizes = [2, 32], strides = [1, 1]} : vector<2x128xf32> to vector<2x32xf32>
    %1559 = arith.mulf %1558, %1544 : vector<2x32xf32>
    %1560 = vector.extract_strided_slice %1556 {offsets = [0, 0], sizes = [2, 32], strides = [1, 1]} : vector<2x128xf32> to vector<2x32xf32>
    %1561 = vector.extract_strided_slice %1557 {offsets = [0, 64], sizes = [2, 32], strides = [1, 1]} : vector<2x128xf32> to vector<2x32xf32>
    %1562 = arith.mulf %1560, %1561 : vector<2x32xf32>
    %1563 = arith.addf %1559, %1562 : vector<2x32xf32>
    %1564 = vector.extract_strided_slice %1556 {offsets = [0, 96], sizes = [2, 32], strides = [1, 1]} : vector<2x128xf32> to vector<2x32xf32>
    %1565 = math.tanh %1563 : vector<2x32xf32>
    %1566 = arith.mulf %1564, %1565 : vector<2x32xf32>
    %c6_599 = arith.constant 6 : index
    %c0_600 = arith.constant 0 : index
    %1567 = vector.load %arg44[%c6_599, %c0_600] : memref<16x32xf32, #tpu.memory_space<vmem>>, vector<2x32xf32>
    tpu.vector_store %arg44[%c6_599, %c0_600], %1566 {strides = array<i32>} : memref<16x32xf32, #tpu.memory_space<vmem>>, vector<2x32xf32>,
    %c8_601 = arith.constant 8 : index
    %c0_602 = arith.constant 0 : index
    %1568 = vector.load %arg42[%c8_601, %c0_602] : memref<16x128xf32, #tpu.memory_space<vmem>>, vector<2x128xf32>
    %cst_603 = arith.constant dense<0.000000e+00> : vector<2x128xf32>
    %1569 = tpu.matmul %1566, %1489, %cst_603 {dimension_numbers = #tpu.dot_dimension_numbers<[1], [0], [0], [1], [0, 0, 1, 1], [], []>} : vector<2x32xf32>, vector<32x128xf32>, vector<2x128xf32> -> vector<2x128xf32>
    %1570 = arith.addf %1568, %1569 : vector<2x128xf32>
    %1571 = arith.negf %1570 : vector<2x128xf32>
    %1572 = math.exp %1571 : vector<2x128xf32>
    %cst_604 = arith.constant 1.000000e+00 : f32
    %1573 = vector.broadcast %cst_604 : f32 to vector<2x128xf32>
    %1574 = arith.addf %1573, %1572 : vector<2x128xf32>
    %1575 = arith.divf %1573, %1574 : vector<2x128xf32>
    %1576 = math.tanh %1570 : vector<2x128xf32>
    %1577 = vector.extract_strided_slice %1575 {offsets = [0, 32], sizes = [2, 32], strides = [1, 1]} : vector<2x128xf32> to vector<2x32xf32>
    %1578 = arith.mulf %1577, %1563 : vector<2x32xf32>
    %1579 = vector.extract_strided_slice %1575 {offsets = [0, 0], sizes = [2, 32], strides = [1, 1]} : vector<2x128xf32> to vector<2x32xf32>
    %1580 = vector.extract_strided_slice %1576 {offsets = [0, 64], sizes = [2, 32], strides = [1, 1]} : vector<2x128xf32> to vector<2x32xf32>
    %1581 = arith.mulf %1579, %1580 : vector<2x32xf32>
    %1582 = arith.addf %1578, %1581 : vector<2x32xf32>
    %1583 = vector.extract_strided_slice %1575 {offsets = [0, 96], sizes = [2, 32], strides = [1, 1]} : vector<2x128xf32> to vector<2x32xf32>
    %1584 = math.tanh %1582 : vector<2x32xf32>
    %1585 = arith.mulf %1583, %1584 : vector<2x32xf32>
    %c8_605 = arith.constant 8 : index
    %c0_606 = arith.constant 0 : index
    %1586 = vector.load %arg44[%c8_605, %c0_606] : memref<16x32xf32, #tpu.memory_space<vmem>>, vector<2x32xf32>
    tpu.vector_store %arg44[%c8_605, %c0_606], %1585 {strides = array<i32>} : memref<16x32xf32, #tpu.memory_space<vmem>>, vector<2x32xf32>,
    %c10_607 = arith.constant 10 : index
    %c0_608 = arith.constant 0 : index
    %1587 = vector.load %arg42[%c10_607, %c0_608] : memref<16x128xf32, #tpu.memory_space<vmem>>, vector<2x128xf32>
    %cst_609 = arith.constant dense<0.000000e+00> : vector<2x128xf32>
    %1588 = tpu.matmul %1585, %1489, %cst_609 {dimension_numbers = #tpu.dot_dimension_numbers<[1], [0], [0], [1], [0, 0, 1, 1], [], []>} : vector<2x32xf32>, vector<32x128xf32>, vector<2x128xf32> -> vector<2x128xf32>
    %1589 = arith.addf %1587, %1588 : vector<2x128xf32>
    %1590 = arith.negf %1589 : vector<2x128xf32>
    %1591 = math.exp %1590 : vector<2x128xf32>
    %cst_610 = arith.constant 1.000000e+00 : f32
    %1592 = vector.broadcast %cst_610 : f32 to vector<2x128xf32>
    %1593 = arith.addf %1592, %1591 : vector<2x128xf32>
    %1594 = arith.divf %1592, %1593 : vector<2x128xf32>
    %1595 = math.tanh %1589 : vector<2x128xf32>
    %1596 = vector.extract_strided_slice %1594 {offsets = [0, 32], sizes = [2, 32], strides = [1, 1]} : vector<2x128xf32> to vector<2x32xf32>
    %1597 = arith.mulf %1596, %1582 : vector<2x32xf32>
    %1598 = vector.extract_strided_slice %1594 {offsets = [0, 0], sizes = [2, 32], strides = [1, 1]} : vector<2x128xf32> to vector<2x32xf32>
    %1599 = vector.extract_strided_slice %1595 {offsets = [0, 64], sizes = [2, 32], strides = [1, 1]} : vector<2x128xf32> to vector<2x32xf32>
    %1600 = arith.mulf %1598, %1599 : vector<2x32xf32>
    %1601 = arith.addf %1597, %1600 : vector<2x32xf32>
    %1602 = vector.extract_strided_slice %1594 {offsets = [0, 96], sizes = [2, 32], strides = [1, 1]} : vector<2x128xf32> to vector<2x32xf32>
    %1603 = math.tanh %1601 : vector<2x32xf32>
    %1604 = arith.mulf %1602, %1603 : vector<2x32xf32>
    %c10_611 = arith.constant 10 : index
    %c0_612 = arith.constant 0 : index
    %1605 = vector.load %arg44[%c10_611, %c0_612] : memref<16x32xf32, #tpu.memory_space<vmem>>, vector<2x32xf32>
    tpu.vector_store %arg44[%c10_611, %c0_612], %1604 {strides = array<i32>} : memref<16x32xf32, #tpu.memory_space<vmem>>, vector<2x32xf32>,
    %c12_613 = arith.constant 12 : index
    %c0_614 = arith.constant 0 : index
    %1606 = vector.load %arg42[%c12_613, %c0_614] : memref<16x128xf32, #tpu.memory_space<vmem>>, vector<2x128xf32>
    %cst_615 = arith.constant dense<0.000000e+00> : vector<2x128xf32>
    %1607 = tpu.matmul %1604, %1489, %cst_615 {dimension_numbers = #tpu.dot_dimension_numbers<[1], [0], [0], [1], [0, 0, 1, 1], [], []>} : vector<2x32xf32>, vector<32x128xf32>, vector<2x128xf32> -> vector<2x128xf32>
    %1608 = arith.addf %1606, %1607 : vector<2x128xf32>
    %1609 = arith.negf %1608 : vector<2x128xf32>
    %1610 = math.exp %1609 : vector<2x128xf32>
    %cst_616 = arith.constant 1.000000e+00 : f32
    %1611 = vector.broadcast %cst_616 : f32 to vector<2x128xf32>
    %1612 = arith.addf %1611, %1610 : vector<2x128xf32>
    %1613 = arith.divf %1611, %1612 : vector<2x128xf32>
    %1614 = math.tanh %1608 : vector<2x128xf32>
    %1615 = vector.extract_strided_slice %1613 {offsets = [0, 32], sizes = [2, 32], strides = [1, 1]} : vector<2x128xf32> to vector<2x32xf32>
    %1616 = arith.mulf %1615, %1601 : vector<2x32xf32>
    %1617 = vector.extract_strided_slice %1613 {offsets = [0, 0], sizes = [2, 32], strides = [1, 1]} : vector<2x128xf32> to vector<2x32xf32>
    %1618 = vector.extract_strided_slice %1614 {offsets = [0, 64], sizes = [2, 32], strides = [1, 1]} : vector<2x128xf32> to vector<2x32xf32>
    %1619 = arith.mulf %1617, %1618 : vector<2x32xf32>
    %1620 = arith.addf %1616, %1619 : vector<2x32xf32>
    %1621 = vector.extract_strided_slice %1613 {offsets = [0, 96], sizes = [2, 32], strides = [1, 1]} : vector<2x128xf32> to vector<2x32xf32>
    %1622 = math.tanh %1620 : vector<2x32xf32>
    %1623 = arith.mulf %1621, %1622 : vector<2x32xf32>
    %c12_617 = arith.constant 12 : index
    %c0_618 = arith.constant 0 : index
    %1624 = vector.load %arg44[%c12_617, %c0_618] : memref<16x32xf32, #tpu.memory_space<vmem>>, vector<2x32xf32>
    tpu.vector_store %arg44[%c12_617, %c0_618], %1623 {strides = array<i32>} : memref<16x32xf32, #tpu.memory_space<vmem>>, vector<2x32xf32>,
    %c14_619 = arith.constant 14 : index
    %c0_620 = arith.constant 0 : index
    %1625 = vector.load %arg42[%c14_619, %c0_620] : memref<16x128xf32, #tpu.memory_space<vmem>>, vector<2x128xf32>
    %cst_621 = arith.constant dense<0.000000e+00> : vector<2x128xf32>
    %1626 = tpu.matmul %1623, %1489, %cst_621 {dimension_numbers = #tpu.dot_dimension_numbers<[1], [0], [0], [1], [0, 0, 1, 1], [], []>} : vector<2x32xf32>, vector<32x128xf32>, vector<2x128xf32> -> vector<2x128xf32>
    %1627 = arith.addf %1625, %1626 : vector<2x128xf32>
    %1628 = arith.negf %1627 : vector<2x128xf32>
    %1629 = math.exp %1628 : vector<2x128xf32>
    %cst_622 = arith.constant 1.000000e+00 : f32
    %1630 = vector.broadcast %cst_622 : f32 to vector<2x128xf32>
    %1631 = arith.addf %1630, %1629 : vector<2x128xf32>
    %1632 = arith.divf %1630, %1631 : vector<2x128xf32>
    %1633 = math.tanh %1627 : vector<2x128xf32>
    %1634 = vector.extract_strided_slice %1632 {offsets = [0, 32], sizes = [2, 32], strides = [1, 1]} : vector<2x128xf32> to vector<2x32xf32>
    %1635 = arith.mulf %1634, %1620 : vector<2x32xf32>
    %1636 = vector.extract_strided_slice %1632 {offsets = [0, 0], sizes = [2, 32], strides = [1, 1]} : vector<2x128xf32> to vector<2x32xf32>
    %1637 = vector.extract_strided_slice %1633 {offsets = [0, 64], sizes = [2, 32], strides = [1, 1]} : vector<2x128xf32> to vector<2x32xf32>
    %1638 = arith.mulf %1636, %1637 : vector<2x32xf32>
    %1639 = arith.addf %1635, %1638 : vector<2x32xf32>
    %1640 = vector.extract_strided_slice %1632 {offsets = [0, 96], sizes = [2, 32], strides = [1, 1]} : vector<2x128xf32> to vector<2x32xf32>
    %1641 = math.tanh %1639 : vector<2x32xf32>
    %1642 = arith.mulf %1640, %1641 : vector<2x32xf32>
    %c14_623 = arith.constant 14 : index
    %c0_624 = arith.constant 0 : index
    %1643 = vector.load %arg44[%c14_623, %c0_624] : memref<16x32xf32, #tpu.memory_space<vmem>>, vector<2x32xf32>
    tpu.vector_store %arg44[%c14_623, %c0_624], %1642 {strides = array<i32>} : memref<16x32xf32, #tpu.memory_space<vmem>>, vector<2x32xf32>,
    %c0_625 = arith.constant 0 : index
    %c0_626 = arith.constant 0 : index
    %1644 = vector.load %arg44[%c0_625, %c0_626] : memref<16x32xf32, #tpu.memory_space<vmem>>, vector<16x32xf32>
    %c0_627 = arith.constant 0 : index
    %c0_628 = arith.constant 0 : index
    %1645 = vector.load %arg39[%c0_627, %c0_628] : memref<32x16xf32, #tpu.memory_space<vmem>>, vector<32x16xf32>
    %cst_629 = arith.constant dense<0.000000e+00> : vector<16x16xf32>
    %1646 = tpu.matmul %1644, %1645, %cst_629 {dimension_numbers = #tpu.dot_dimension_numbers<[1], [0], [0], [1], [0, 0, 1, 1], [], []>} : vector<16x32xf32>, vector<32x16xf32>, vector<16x16xf32> -> vector<16x16xf32>
    %c0_630 = arith.constant 0 : index
    %c0_631 = arith.constant 0 : index
    %1647 = vector.load %arg40[%c0_630, %c0_631] : memref<1x16xf32, #tpu.memory_space<vmem>>, vector<1x16xf32>
    %1648 = vector.broadcast %1647 : vector<1x16xf32> to vector<16x16xf32>
    %1649 = arith.addf %1646, %1648 : vector<16x16xf32>
    %c0_632 = arith.constant 0 : index
    %c0_633 = arith.constant 0 : index
    %1650 = vector.load %arg41[%c0_632, %c0_633] : memref<16x16xf32, #tpu.memory_space<vmem>>, vector<16x16xf32>
    tpu.vector_store %arg41[%c0_632, %c0_633], %1649 {strides = array<i32>} : memref<16x16xf32, #tpu.memory_space<vmem>>, vector<16x16xf32>,
    return
  }
}

</mosaic_0001>

<bundles_post_ra>
// kernel: forward.1
= control target key start
LH: loop header
LB: loop body
LE: loop exit
PB: predicated region body
PF: predicated region fallthrough
CT: control target
= control target key end

     0   :  { %s8265_s6 = smov 1   ;;  %s8266_s10 = smov 2   ;;  %s9873_s0 = inlined_call_operand.smem [shape: u32[42], index: -1, kind: input, shape index: {}] }
   0x1   :  { %s8347_s5 = sld [smem:[%s9873_s0]]   ;;  %s8267_s14 = smov 3  }
   0x2   :  { %s8352_s9 = sld [smem:[%s9873_s0 + %s8265_s6]]   ;;  %s8268_s18 = smov 4  }
   0x3   :  { %s8357_s13 = sld [smem:[%s9873_s0 + %s8266_s10]]   ;;  %s8269_s22 = smov 5  }
   0x4   :  { %s8362_s17 = sld [smem:[%s9873_s0 + %s8267_s14]]   ;;  %s8270_s26 = smov 6  }
   0x5   :  { %s8367_s21 = sld [smem:[%s9873_s0 + %s8268_s18]]   ;;  %s8271_s30 = smov 7  }
   0x6   :  { %s8372_s25 = sld [smem:[%s9873_s0 + %s8269_s22]]   ;;  %s8272_s4 = smov 8  }
   0x7   :  { %9889 = sst [smem:[#allocation65_spill]] %s8347_s5  ;;  %s8273_s10 = smov 9  }
   0x8   :  { %s8377_s29 = sld [smem:[%s9873_s0 + %s8270_s26]]   ;;  %s8274_s15 = smov 10  }
   0x9   :  { %9890 = sst [smem:[#allocation66_spill]] %s8357_s13  ;;  %s8275_s20 = smov 11  }
   0xa   :  { %9891 = sst [smem:[#allocation67_spill]] %s8362_s17  ;;  %s8276_s26 = smov 12  }
   0xb   :  { %s8382_s3 = sld [smem:[%s9873_s0 + %s8271_s30]]   ;;  %s8277_s1 = smov 13  }
   0xc   :  { %9892 = sst [smem:[#allocation68_spill]] %s8372_s25  ;;  %s8278_s7 = smov 14  }
   0xd   :  { %s8387_s8 = sld [smem:[%s9873_s0 + %s8272_s4]]   ;;  %s8280_s22 = smov 16  }
   0xe   :  { %9893 = sst [smem:[#allocation69_spill]] %s8377_s29  ;;  %s8281_s28 = smov 17  }
   0xf   :  { %s8392_s14 = sld [smem:[%s9873_s0 + %s8273_s10]]  }
  0x10   :  { %s8397_s19 = sld [smem:[%s9873_s0 + %s8274_s15]]   ;;  %s8279_s15 = smov 15  }
  0x11   :  { %s8402_s24 = sld [smem:[%s9873_s0 + %s8275_s20]]  }
  0x12   :  { %s8407_s30 = sld [smem:[%s9873_s0 + %s8276_s26]]  }
  0x13   :  { %9894 = sst [smem:[#allocation70_spill]] %s8387_s8 }
  0x14   :  { %s8412_s6 = sld [smem:[%s9873_s0 + %s8277_s1]]  }
  0x15   :  { %s8417_s12 = sld [smem:[%s9873_s0 + %s8278_s7]]   ;;  %s8282_s7 = smov 18  }
  0x16   :  { %9895 = sst [smem:[#allocation71_spill]] %s8397_s19 }
  0x17   :  { %9896 = sst [smem:[#allocation72_spill]] %s8402_s24 }
  0x18   :  { %s8422_s20 = sld [smem:[%s9873_s0 + %s8279_s15]]   ;;  %s8283_s15 = smov 19  }
  0x19   :  { %s8427_s27 = sld [smem:[%s9873_s0 + %s8280_s22]]   ;;  %s8284_s22 = smov 20  }
  0x1a   :  { %9897 = sst [smem:[#allocation73_spill]] %s8412_s6 }
  0x1b   :  { %9898 = sst [smem:[#allocation74_spill]] %s8417_s12 }
  0x1c   :  { %s8432_s4 = sld [smem:[%s9873_s0 + %s8281_s28]]   ;;  %s8285_s28 = smov 21  }
  0x1d   :  { %s8437_s12 = sld [smem:[%s9873_s0 + %s8282_s7]]   ;;  %s8286_s7 = smov 22  }
  0x1e   :  { %s8442_s19 = sld [smem:[%s9873_s0 + %s8283_s15]]   ;;  %s8287_s15 = smov 23  }
  0x1f   :  { %9899 = sst [smem:[#allocation75_spill]] %s8427_s27 }
  0x20   :  { %s8447_s29 = sld [smem:[%s9873_s0 + %s8284_s22]]   ;;  %s8288_s22 = smov 24  }
  0x21   :  { %s8452_s17 = sld [smem:[%s9873_s0 + %s8285_s28]]   ;;  %s8289_s28 = smov 25  }
  0x22   :  { %s8462_s13 = sld [smem:[%s9873_s0 + %s8287_s15]]   ;;  %s8291_s15 = smov 27  }
  0x23   :  { %9900 = sst [smem:[#allocation76_spill]] %s8437_s12 }
  0x24   :  { %9901 = sst [smem:[#allocation77_spill]] %s8442_s19 }
  0x25   :  { %s8457_s12 = sld [smem:[%s9873_s0 + %s8286_s7]]   ;;  %s8290_s7 = smov 26  }
  0x26   :  { %s8467_s5 = sld [smem:[%s9873_s0 + %s8288_s22]]   ;;  %s8292_s22 = smov 28  }
  0x27   :  { %9902 = sst [smem:[#allocation78_spill]] %s8452_s17 }
  0x28   :  { %s8472_s17 = sld [smem:[%s9873_s0 + %s8289_s28]]   ;;  %s8293_s28 = smov 29  }
  0x29   :  { %s8482_s19 = sld [smem:[%s9873_s0 + %s8291_s15]]   ;;  %s8295_s15 = smov 31  }
  0x2a   :  { %s8492_s27 = sld [smem:[%s9873_s0 + %s8293_s28]]   ;;  %s8297_s28 = smov 33  }
  0x2b   :  { %9903 = sst [smem:[#allocation79_spill]] %s8457_s12 }
  0x2c   :  { %9904 = sst [smem:[#allocation80_spill]] %s8467_s5 }
  0x2d   :  { %s8477_s12 = sld [smem:[%s9873_s0 + %s8290_s7]]   ;;  %s8294_s7 = smov 30  }
  0x2e   :  { %s8487_s5 = sld [smem:[%s9873_s0 + %s8292_s22]]   ;;  %s8296_s22 = smov 32  }
  0x2f   :  { %9906 = sst [smem:[#allocation82_spill]] %s8482_s19 }
  0x30   :  { %9907 = sst [smem:[#allocation83_spill]] %s8492_s27 }
  0x31   :  { %s8502_s19 = sld [smem:[%s9873_s0 + %s8295_s15]]   ;;  %s8299_s15 = smov 35  }
  0x32   :  { %s8507_s6 = sld [smem:[%s9873_s0 + %s8296_s22]]   ;;  %s8300_s22 = smov 36  }
  0x33   :  { %9905 = sst [smem:[#allocation81_spill]] %s8477_s12 }
  0x34   :  { %s8497_s12 = sld [smem:[%s9873_s0 + %s8294_s7]]   ;;  %s8298_s7 = smov 34  }
  0x35   :  { %s8512_s27 = sld [smem:[%s9873_s0 + %s8297_s28]]   ;;  %s8301_s28 = smov 37  }
  0x36   :  { %s8522_s24 = sld [smem:[%s9873_s0 + %s8299_s15]]   ;;  %s8303_s15 = smov 39  }
  0x37   :  { %s8532_s8 = sld [smem:[%s9873_s0 + %s8301_s28]]   ;;  %s8305_s28 = smov 41  }
  0x38   :  { %9909 = sst [smem:[#allocation85_spill]] %s8507_s6 }
  0x39   :  { %s8527_s6 = sld [smem:[%s9873_s0 + %s8300_s22]]   ;;  %s8304_s22 = smov 40  }
  0x3a   :  { %9908 = sst [smem:[#allocation84_spill]] %s8497_s12 }
  0x3b   :  { %s8517_s12 = sld [smem:[%s9873_s0 + %s8298_s7]]   ;;  %s8302_s7 = smov 38  }
  0x3c   :  { %9911 = sst [smem:[#allocation87_spill]] %s8522_s24 }
  0x3d   :  { %9912 = sst [smem:[#allocation88_spill]] %s8532_s8 }
  0x3e   :  { %s8542_s24 = sld [smem:[%s9873_s0 + %s8303_s15]]  }
  0x3f   :  { %s8547_s25 = sld [smem:[%s9873_s0 + %s8304_s22]]  }
  0x40   :  { %s8552_s8 = sld [smem:[%s9873_s0 + %s8305_s28]]  }
  0x41   :  { %9910 = sst [smem:[#allocation86_spill]] %s8517_s12 }
  0x42   :  { %s8537_s12 = sld [smem:[%s9873_s0 + %s8302_s7]]  }
  0x43   :  { %88 = vsyncpa [#allocation8], 0 }
  0x44   :  { %89 = vsyncpa [#allocation11], 0 }
  0x45   :  { %90 = vsyncpa [#allocation14], 0 }
  0x46   :  { %91 = vsyncpa [#allocation17], 0 }
  0x47   :  { %92 = vsyncpa [#allocation20], 0 }
  0x48   :  { %93 = vsyncpa [#allocation23], 0 }
  0x49   :  { %94 = vsyncpa [#allocation26], 0 }
  0x4a   :  { %95 = vsyncpa [#allocation29], 0 }
  0x4b   :  { %96 = vsyncpa [#allocation32], 0 }
  0x4c   :  { %97 = vsyncpa [#allocation35], 0 }
  0x4d   :  { %98 = vsyncpa [#allocation38], 0 }
  0x4e   :  { %99 = vsyncpa [#allocation41], 0 }
  0x4f   :  { %100 = vsyncpa [#allocation44], 0 }
  0x50   :  { %101 = vsyncpa [#allocation47], 0 }
  0x51   :  { %102 = vsyncpa [#allocation9], 0  ;;  %s126_s0 = sshll.u32 %s8367_s21, 4  ;;  %s8306_s7 = smov [#allocation10]   ;;  %s127_s0 = int_to_ptr.hbm [resolvable:$true] %s126_s0 }
  0x52   :  { %s128_s10 = sshll.u32 %s8306_s7, 4  ;;  %s154_s11 = sshll.u32 %s8382_s3, 4  ;;  %s129_s10 = int_to_ptr.vmem [resolvable:$true] %s128_s10  ;;  %s155_s11 = int_to_ptr.hbm [resolvable:$true] %s154_s11 }
  0x53   :  { %s7563_s15 = sshra.s32 %s127_s0, 4  ;;  %s7567_s18 = scalar_lea.hbm %s8367_s21, 16  ;;  %s7564_s15 = int_to_ptr.hbm [resolvable:$true] %s7563_s15 }
  0x54   :  { %s7565_s16 = scalar_lea.hbm %s7564_s15, 16  ;;  %p7568_p1 = scmp.lt.s32.totalorder %s7564_s15, %s8367_s21 }
  0x55   :  { %p7566_p0 = scmp.ne.s32.totalorder %s7564_s15, %s7565_s16  ;;  %p7569_p2 = scmp.lt.s32.totalorder %s7567_s18, %s7565_s16 }
  0x57   :  { %p7570_p3 = por %p7569_p2, %p7568_p1 }
  0x59   :  { %p7571_p4 = pnand %p7570_p3, %p7566_p0 }
  0x5b   :  { %7574 = shalt.err (!%p7571_p4)
}
  0x5c   :  { %s8307_s22 = smov 128   ;;  %s8308_s23 = smov 8  }
  0x5d   :  { %134 = dma.hbm_to_vmem [thread:$0]  %s127_s0, 256, %s129_s10, [#allocation11], %s8307_s22, %s8307_s22, %s8308_s23  }
  0x5e   :  { %s8309_s26 = smov [#allocation13]   ;;  %s180_s1 = sshll.u32 %s8392_s14, 4  ;;  %s8562_s1 = int_to_ptr.hbm [resolvable:$true] %s180_s1 }
  0x5f   :  { %s156_s28 = sshll.u32 %s8309_s26, 4  ;;  %s7587_s21 = sshra.s32 %s155_s11, 4  ;;  %s157_s28 = int_to_ptr.vmem [resolvable:$true] %s156_s28  ;;  %s7588_s21 = int_to_ptr.hbm [resolvable:$true] %s7587_s21 }
  0x60   :  { %s7589_s2 = scalar_lea.hbm %s7588_s21, 32  ;;  %s7591_s7 = scalar_lea.hbm %s8382_s3, 32 }
  0x61   :  { %p7590_p5 = scmp.ne.s32.totalorder %s7588_s21, %s7589_s2  ;;  %p7592_p6 = scmp.lt.s32.totalorder %s7588_s21, %s8382_s3 }
  0x62   :  { %p7593_p7 = scmp.lt.s32.totalorder %s7591_s7, %s7589_s2 }
  0x64   :  { %p7594_p8 = por %p7593_p7, %p7592_p6 }
  0x66   :  { %p7595_p9 = pnand %p7594_p8, %p7590_p5 }
  0x68   :  { %7598 = shalt.err (!%p7595_p9)
}
  0x69   :  { %162 = dma.hbm_to_vmem [thread:$0]  %s155_s11, 512, %s157_s28, [#allocation14], %s8307_s22, %s8307_s22, %s8308_s23  }
  0x6a   :  { %s208_s0 = sshll.u32 %s8407_s30, 4  ;;  %s8310_s10 = smov [#allocation16]   ;;  %s8570_s0 = int_to_ptr.hbm [resolvable:$true] %s208_s0 }
  0x6b   :  { %s182_s15 = sshll.u32 %s8310_s10, 4  ;;  %s7611_s16 = sshra.s32 %s8562_s1, 4  ;;  %s183_s15 = int_to_ptr.vmem [resolvable:$true] %s182_s15  ;;  %s7612_s16 = int_to_ptr.hbm [resolvable:$true] %s7611_s16 }
  0x6c   :  { %s7613_s3 = scalar_lea.hbm %s7612_s16, 32  ;;  %s7615_s18 = scalar_lea.hbm %s8392_s14, 32 }
  0x6d   :  { %p7614_p10 = scmp.ne.s32.totalorder %s7612_s16, %s7613_s3  ;;  %p7616_p11 = scmp.lt.s32.totalorder %s7612_s16, %s8392_s14 }
  0x6e   :  { %p7617_p12 = scmp.lt.s32.totalorder %s7615_s18, %s7613_s3 }
  0x70   :  { %p7618_p13 = por %p7617_p12, %p7616_p11 }
  0x72   :  { %p7619_p0 = pnand %p7618_p13, %p7614_p10 }
  0x74   :  { %7622 = shalt.err (!%p7619_p0)
}
  0x75   :  { %188 = dma.hbm_to_vmem [thread:$0]  %s8562_s1, 512, %s183_s15, [#allocation17], %s8307_s22, %s8307_s22, %s8308_s23  }
  0x76   :  { %s8311_s11 = smov [#allocation19]   ;;  %s236_s28 = sshll.u32 %s8422_s20, 4  ;;  %s8580_s28 = int_to_ptr.hbm [resolvable:$true] %s236_s28 }
  0x77   :  { %s210_s26 = sshll.u32 %s8311_s11, 4  ;;  %s7635_s14 = sshra.s32 %s8570_s0, 4  ;;  %s211_s26 = int_to_ptr.vmem [resolvable:$true] %s210_s26  ;;  %s7636_s14 = int_to_ptr.hbm [resolvable:$true] %s7635_s14 }
  0x78   :  { %s7637_s21 = scalar_lea.hbm %s7636_s14, 32  ;;  %s7639_s2 = scalar_lea.hbm %s8407_s30, 32 }
  0x79   :  { %p7638_p1 = scmp.ne.s32.totalorder %s7636_s14, %s7637_s21  ;;  %p7640_p2 = scmp.lt.s32.totalorder %s7636_s14, %s8407_s30 }
  0x7a   :  { %p7641_p3 = scmp.lt.s32.totalorder %s7639_s2, %s7637_s21 }
  0x7c   :  { %p7642_p4 = por %p7641_p3, %p7640_p2 }
  0x7e   :  { %p7643_p5 = pnand %p7642_p4, %p7638_p1 }
  0x80   :  { %7646 = shalt.err (!%p7643_p5)
}
  0x81   :  { %216 = dma.hbm_to_vmem [thread:$0]  %s8570_s0, 512, %s211_s26, [#allocation20], %s8307_s22, %s8307_s22, %s8308_s23  }
  0x82   :  { %s262_s1 = sshll.u32 %s8432_s4, 4  ;;  %s8312_s7 = smov [#allocation22]   ;;  %s8590_s1 = int_to_ptr.hbm [resolvable:$true] %s262_s1 }
  0x83   :  { %s238_s10 = sshll.u32 %s8312_s7, 4  ;;  %s7659_s30 = sshra.s32 %s8580_s28, 4  ;;  %s239_s10 = int_to_ptr.vmem [resolvable:$true] %s238_s10  ;;  %s7660_s30 = int_to_ptr.hbm [resolvable:$true] %s7659_s30 }
  0x84   :  { %s7661_s15 = scalar_lea.hbm %s7660_s30, 32  ;;  %s7663_s16 = scalar_lea.hbm %s8422_s20, 32 }
  0x85   :  { %p7662_p6 = scmp.ne.s32.totalorder %s7660_s30, %s7661_s15  ;;  %p7664_p7 = scmp.lt.s32.totalorder %s7660_s30, %s8422_s20 }
  0x86   :  { %p7665_p8 = scmp.lt.s32.totalorder %s7663_s16, %s7661_s15 }
  0x88   :  { %p7666_p9 = por %p7665_p8, %p7664_p7 }
  0x8a   :  { %p7667_p10 = pnand %p7666_p9, %p7662_p6 }
  0x8c   :  { %7670 = shalt.err (!%p7667_p10)
}
  0x8d   :  { %244 = dma.hbm_to_vmem [thread:$0]  %s8580_s28, 512, %s239_s10, [#allocation23], %s8307_s22, %s8307_s22, %s8308_s23  }
  0x8e   :  { %s8313_s0 = smov [#allocation25]   ;;  %s290_s18 = sshll.u32 %s8447_s29, 4  ;;  %s8600_s18 = int_to_ptr.hbm [resolvable:$true] %s290_s18 }
  0x8f   :  { %s264_s3 = sshll.u32 %s8313_s0, 4  ;;  %s7683_s20 = sshra.s32 %s8590_s1, 4  ;;  %s265_s3 = int_to_ptr.vmem [resolvable:$true] %s264_s3  ;;  %s7684_s20 = int_to_ptr.hbm [resolvable:$true] %s7683_s20 }
  0x90   :  { %s7685_s11 = scalar_lea.hbm %s7684_s20, 32  ;;  %s7687_s26 = scalar_lea.hbm %s8432_s4, 32 }
  0x91   :  { %p7686_p11 = scmp.ne.s32.totalorder %s7684_s20, %s7685_s11  ;;  %p7688_p12 = scmp.lt.s32.totalorder %s7684_s20, %s8432_s4 }
  0x92   :  { %p7689_p13 = scmp.lt.s32.totalorder %s7687_s26, %s7685_s11 }
  0x94   :  { %p7690_p0 = por %p7689_p13, %p7688_p12 }
  0x96   :  { %p7691_p1 = pnand %p7690_p0, %p7686_p11 }
  0x98   :  { %7694 = shalt.err (!%p7691_p1)
}
  0x99   :  { %270 = dma.hbm_to_vmem [thread:$0]  %s8590_s1, 512, %s265_s3, [#allocation26], %s8307_s22, %s8307_s22, %s8308_s23  }
  0x9a   :  { %s318_s28 = sshll.u32 %s8462_s13, 4  ;;  %s8314_s14 = smov [#allocation28]   ;;  %s8610_s28 = int_to_ptr.hbm [resolvable:$true] %s318_s28 }
  0x9b   :  { %s292_s21 = sshll.u32 %s8314_s14, 4  ;;  %s7707_s4 = sshra.s32 %s8600_s18, 4  ;;  %s293_s21 = int_to_ptr.vmem [resolvable:$true] %s292_s21  ;;  %s7708_s4 = int_to_ptr.hbm [resolvable:$true] %s7707_s4 }
  0x9c   :  { %s7709_s2 = scalar_lea.hbm %s7708_s4, 32  ;;  %s7711_s7 = scalar_lea.hbm %s8447_s29, 32 }
  0x9d   :  { %p7710_p2 = scmp.ne.s32.totalorder %s7708_s4, %s7709_s2  ;;  %p7712_p3 = scmp.lt.s32.totalorder %s7708_s4, %s8447_s29 }
  0x9e   :  { %p7713_p4 = scmp.lt.s32.totalorder %s7711_s7, %s7709_s2 }
  0xa0   :  { %p7714_p5 = por %p7713_p4, %p7712_p3 }
  0xa2   :  { %p7715_p6 = pnand %p7714_p5, %p7710_p2 }
  0xa4   :  { %7718 = shalt.err (!%p7715_p6)
}
  0xa5   :  { %298 = dma.hbm_to_vmem [thread:$0]  %s8600_s18, 512, %s293_s21, [#allocation29], %s8307_s22, %s8307_s22, %s8308_s23  }
  0xa6   :  { %s8315_s1 = smov [#allocation31]   ;;  %s344_s30 = sshll.u32 %s8472_s17, 4  ;;  %s8620_s30 = int_to_ptr.hbm [resolvable:$true] %s344_s30 }
  0xa7   :  { %s320_s10 = sshll.u32 %s8315_s1, 4  ;;  %s7731_s29 = sshra.s32 %s8610_s28, 4  ;;  %s321_s10 = int_to_ptr.vmem [resolvable:$true] %s320_s10  ;;  %s7732_s29 = int_to_ptr.hbm [resolvable:$true] %s7731_s29 }
  0xa8   :  { %s7733_s15 = scalar_lea.hbm %s7732_s29, 32  ;;  %s7735_s16 = scalar_lea.hbm %s8462_s13, 32 }
  0xa9   :  { %p7734_p7 = scmp.ne.s32.totalorder %s7732_s29, %s7733_s15  ;;  %p7736_p8 = scmp.lt.s32.totalorder %s7732_s29, %s8462_s13 }
  0xaa   :  { %p7737_p9 = scmp.lt.s32.totalorder %s7735_s16, %s7733_s15 }
  0xac   :  { %p7738_p10 = por %p7737_p9, %p7736_p8 }
  0xae   :  { %p7739_p11 = pnand %p7738_p10, %p7734_p7 }
  0xb0   :  { %7742 = shalt.err (!%p7739_p11)
}
  0xb1   :  { %326 = dma.hbm_to_vmem [thread:$0]  %s8610_s28, 512, %s321_s10, [#allocation32], %s8307_s22, %s8307_s22, %s8308_s23  }
  0xb2   :  { %s372_s0 = sshll.u32 %s8487_s5, 4  ;;  %s8316_s3 = smov [#allocation34]   ;;  %s8630_s0 = int_to_ptr.hbm [resolvable:$true] %s372_s0 }
  0xb3   :  { %s346_s18 = sshll.u32 %s8316_s3, 4  ;;  %s7755_s13 = sshra.s32 %s8620_s30, 4  ;;  %s347_s18 = int_to_ptr.vmem [resolvable:$true] %s346_s18  ;;  %s7756_s13 = int_to_ptr.hbm [resolvable:$true] %s7755_s13 }
  0xb4   :  { %s7757_s20 = scalar_lea.hbm %s7756_s13, 32  ;;  %s7759_s11 = scalar_lea.hbm %s8472_s17, 32 }
  0xb5   :  { %p7758_p12 = scmp.ne.s32.totalorder %s7756_s13, %s7757_s20  ;;  %p7760_p13 = scmp.lt.s32.totalorder %s7756_s13, %s8472_s17 }
  0xb6   :  { %p7761_p0 = scmp.lt.s32.totalorder %s7759_s11, %s7757_s20 }
  0xb8   :  { %p7762_p1 = por %p7761_p0, %p7760_p13 }
  0xba   :  { %p7763_p2 = pnand %p7762_p1, %p7758_p12 }
  0xbc   :  { %7766 = shalt.err (!%p7763_p2)
}
  0xbd   :  { %352 = dma.hbm_to_vmem [thread:$0]  %s8620_s30, 512, %s347_s18, [#allocation35], %s8307_s22, %s8307_s22, %s8308_s23  }
  0xbe   :  { %s8317_s26 = smov [#allocation37]   ;;  %s400_s14 = sshll.u32 %s8502_s19, 4  ;;  %s8640_s14 = int_to_ptr.hbm [resolvable:$true] %s400_s14 }
  0xbf   :  { %s374_s28 = sshll.u32 %s8317_s26, 4  ;;  %s7779_s17 = sshra.s32 %s8630_s0, 4  ;;  %s375_s28 = int_to_ptr.vmem [resolvable:$true] %s374_s28  ;;  %s7780_s17 = int_to_ptr.hbm [resolvable:$true] %s7779_s17 }
  0xc0   :  { %s7781_s21 = scalar_lea.hbm %s7780_s17, 32  ;;  %s7783_s4 = scalar_lea.hbm %s8487_s5, 32 }
  0xc1   :  { %p7782_p3 = scmp.ne.s32.totalorder %s7780_s17, %s7781_s21  ;;  %p7784_p4 = scmp.lt.s32.totalorder %s7780_s17, %s8487_s5 }
  0xc2   :  { %p7785_p5 = scmp.lt.s32.totalorder %s7783_s4, %s7781_s21 }
  0xc4   :  { %p7786_p6 = por %p7785_p5, %p7784_p4 }
  0xc6   :  { %p7787_p7 = pnand %p7786_p6, %p7782_p3 }
  0xc8   :  { %7790 = shalt.err (!%p7787_p7)
}
  0xc9   :  { %380 = dma.hbm_to_vmem [thread:$0]  %s8630_s0, 512, %s375_s28, [#allocation38], %s8307_s22, %s8307_s22, %s8308_s23  }
  0xca   :  { %s426_s2 = sshll.u32 %s8512_s27, 4  ;;  %s8318_s7 = smov [#allocation40]   ;;  %s8650_s2 = int_to_ptr.hbm [resolvable:$true] %s426_s2 }
  0xcb   :  { %s402_s1 = sshll.u32 %s8318_s7, 4  ;;  %s7803_s5 = sshra.s32 %s8640_s14, 4  ;;  %s403_s1 = int_to_ptr.vmem [resolvable:$true] %s402_s1  ;;  %s7804_s5 = int_to_ptr.hbm [resolvable:$true] %s7803_s5 }
  0xcc   :  { %s7805_s10 = scalar_lea.hbm %s7804_s5, 16  ;;  %s7807_s30 = scalar_lea.hbm %s8502_s19, 16 }
  0xcd   :  { %p7806_p8 = scmp.ne.s32.totalorder %s7804_s5, %s7805_s10  ;;  %p7808_p9 = scmp.lt.s32.totalorder %s7804_s5, %s8502_s19 }
  0xce   :  { %p7809_p10 = scmp.lt.s32.totalorder %s7807_s30, %s7805_s10 }
  0xd0   :  { %p7810_p11 = por %p7809_p10, %p7808_p9 }
  0xd2   :  { %p7811_p12 = pnand %p7810_p11, %p7806_p8 }
  0xd4   :  { %7814 = shalt.err (!%p7811_p12)
}
  0xd5   :  { %408 = dma.hbm_to_vmem [thread:$0]  %s8640_s14, 256, %s403_s1, [#allocation41], %s8307_s22, %s8307_s22, %s8308_s23  }
  0xd6   :  { %s8319_s29 = smov [#allocation43]   ;;  %s454_s16 = sshll.u32 %s8527_s6, 4  ;;  %s8660_s16 = int_to_ptr.hbm [resolvable:$true] %s454_s16 }
  0xd7   :  { %s428_s15 = sshll.u32 %s8319_s29, 4  ;;  %s7827_s19 = sshra.s32 %s8650_s2, 4  ;;  %s429_s15 = int_to_ptr.vmem [resolvable:$true] %s428_s15  ;;  %s7828_s19 = int_to_ptr.hbm [resolvable:$true] %s7827_s19 }
  0xd8   :  { %s7829_s0 = scalar_lea.hbm %s7828_s19, 32  ;;  %s7831_s3 = scalar_lea.hbm %s8512_s27, 32 }
  0xd9   :  { %p7830_p13 = scmp.ne.s32.totalorder %s7828_s19, %s7829_s0  ;;  %p7832_p0 = scmp.lt.s32.totalorder %s7828_s19, %s8512_s27 }
  0xda   :  { %p7833_p1 = scmp.lt.s32.totalorder %s7831_s3, %s7829_s0 }
  0xdc   :  { %p7834_p2 = por %p7833_p1, %p7832_p0 }
  0xde   :  { %p7835_p3 = pnand %p7834_p2, %p7830_p13 }
  0xe0   :  { %7838 = shalt.err (!%p7835_p3)
}
  0xe1   :  { %434 = dma.hbm_to_vmem [thread:$0]  %s8650_s2, 512, %s429_s15, [#allocation44], %s8307_s22, %s8307_s22, %s8308_s23  }
  0xe2   :  { %s109_s18 = sshll.u32 %s8352_s9, 4  ;;  %s8320_s13 = smov [#allocation46]   ;;  %s8670_s18 = int_to_ptr.hbm [resolvable:$true] %s109_s18 }
  0xe3   :  { %s456_s20 = sshll.u32 %s8320_s13, 4  ;;  %s7851_s27 = sshra.s32 %s8660_s16, 4  ;;  %s457_s20 = int_to_ptr.vmem [resolvable:$true] %s456_s20  ;;  %s7852_s27 = int_to_ptr.hbm [resolvable:$true] %s7851_s27 }
  0xe4   :  { %s7853_s11 = scalar_lea.hbm %s7852_s27, 32  ;;  %s7855_s26 = scalar_lea.hbm %s8527_s6, 32 }
  0xe5   :  { %p7854_p4 = scmp.ne.s32.totalorder %s7852_s27, %s7853_s11  ;;  %p7856_p5 = scmp.lt.s32.totalorder %s7852_s27, %s8527_s6 }
  0xe6   :  { %p7857_p6 = scmp.lt.s32.totalorder %s7855_s26, %s7853_s11 }
  0xe8   :  { %p7858_p7 = por %p7857_p6, %p7856_p5 }
  0xea   :  { %p7859_p8 = pnand %p7858_p7, %p7854_p4 }
  0xec   :  { %7862 = shalt.err (!%p7859_p8)
}
  0xed   :  { %s9913_s28 = sld [smem:[#allocation68_spill]]  ;;  %s8321_s14 = smov [#allocation7]  }
  0xee   :  { %462 = dma.hbm_to_vmem [thread:$0]  %s8660_s16, 512, %s457_s20, [#allocation47], %s8307_s22, %s8307_s22, %s8308_s23  }
  0xef   :  { %s111_s17 = sshll.u32 %s8321_s14, 4  ;;  %s7875_s6 = sshra.s32 %s8670_s18, 4  ;;  %s112_s17 = int_to_ptr.vmem [resolvable:$true] %s111_s17  ;;  %s7876_s6 = int_to_ptr.hbm [resolvable:$true] %s7875_s6 }
  0xf0   :  { %s7877_s4 = scalar_lea.hbm %s7876_s6, 16  ;;  %s7879_s2 = scalar_lea.hbm %s8352_s9, 16 }
  0xf1   :  { %p7878_p9 = scmp.ne.s32.totalorder %s7876_s6, %s7877_s4  ;;  %p7880_p10 = scmp.lt.s32.totalorder %s7876_s6, %s8352_s9 }
  0xf2   :  { %p7881_p11 = scmp.lt.s32.totalorder %s7879_s2, %s7877_s4 }
  0xf3   :  { %s139_s21 = sshll.u32 %s9913_s28, 4  ;;  %s8680_s21 = int_to_ptr.hbm [resolvable:$true] %s139_s21 }
  0xf4   :  { %p7882_p12 = por %p7881_p11, %p7880_p10 }
  0xf6   :  { %p7883_p13 = pnand %p7882_p12, %p7878_p9 }
  0xf8   :  { %7886 = shalt.err (!%p7883_p13)
}
  0xf9   :  { %s9914_s7 = sld [smem:[#allocation70_spill]]  ;;  %s8322_s5 = smov [#allocation12]  }
  0xfa   :  { %117 = dma.hbm_to_vmem [thread:$0]  %s8670_s18, 256, %s112_s17, [#allocation8], %s8307_s22, %s8307_s22, %s8308_s23  }
  0xfb   :  { %s141_s10 = sshll.u32 %s8322_s5, 4  ;;  %s7899_s9 = sshra.s32 %s8680_s21, 4  ;;  %s142_s10 = int_to_ptr.vmem [resolvable:$true] %s141_s10  ;;  %s7900_s9 = int_to_ptr.hbm [resolvable:$true] %s7899_s9 }
  0xfc   :  { %s7901_s30 = scalar_lea.hbm %s7900_s9, 32  ;;  %s7903_s29 = scalar_lea.hbm %s9913_s28, 32 }
  0xfd   :  { %p7902_p0 = scmp.ne.s32.totalorder %s7900_s9, %s7901_s30  ;;  %p7904_p1 = scmp.lt.s32.totalorder %s7900_s9, %s9913_s28 }
  0xfe   :  { %p7905_p2 = scmp.lt.s32.totalorder %s7903_s29, %s7901_s30 }
  0xff   :  { %s167_s1 = sshll.u32 %s9914_s7, 4  ;;  %s8690_s1 = int_to_ptr.hbm [resolvable:$true] %s167_s1 }
 0x100   :  { %p7906_p3 = por %p7905_p2, %p7904_p1 }
 0x102   :  { %p7907_p4 = pnand %p7906_p3, %p7902_p0 }
 0x104   :  { %7910 = shalt.err (!%p7907_p4)
}
 0x105   :  { %s9915_s15 = sld [smem:[#allocation72_spill]]  ;;  %s8323_s16 = smov [#allocation15]  }
 0x106   :  { %147 = dma.hbm_to_vmem [thread:$0]  %s8680_s21, 512, %s142_s10, [#allocation11], %s8307_s22, %s8307_s22, %s8308_s23  }
 0x107   :  { %s169_s19 = sshll.u32 %s8323_s16, 4  ;;  %s7923_s3 = sshra.s32 %s8690_s1, 4  ;;  %s170_s19 = int_to_ptr.vmem [resolvable:$true] %s169_s19  ;;  %s7924_s3 = int_to_ptr.hbm [resolvable:$true] %s7923_s3 }
 0x108   :  { %s7925_s18 = scalar_lea.hbm %s7924_s3, 32  ;;  %s7927_s13 = scalar_lea.hbm %s9914_s7, 32 }
 0x109   :  { %p7926_p5 = scmp.ne.s32.totalorder %s7924_s3, %s7925_s18  ;;  %p7928_p6 = scmp.lt.s32.totalorder %s7924_s3, %s9914_s7 }
 0x10a   :  { %p7929_p7 = scmp.lt.s32.totalorder %s7927_s13, %s7925_s18 }
 0x10b   :  { %s195_s0 = sshll.u32 %s9915_s15, 4  ;;  %s8700_s0 = int_to_ptr.hbm [resolvable:$true] %s195_s0 }
 0x10c   :  { %p7930_p8 = por %p7929_p7, %p7928_p6 }
 0x10e   :  { %p7931_p9 = pnand %p7930_p8, %p7926_p5 }
 0x110   :  { %7934 = shalt.err (!%p7931_p9)
}
 0x111   :  { %s9916_s20 = sld [smem:[#allocation73_spill]]  ;;  %s8324_s11 = smov [#allocation18]  }
 0x112   :  { %175 = dma.hbm_to_vmem [thread:$0]  %s8690_s1, 512, %s170_s19, [#allocation14], %s8307_s22, %s8307_s22, %s8308_s23  }
 0x113   :  { %s197_s26 = sshll.u32 %s8324_s11, 4  ;;  %s7947_s28 = sshra.s32 %s8700_s0, 4  ;;  %s198_s26 = int_to_ptr.vmem [resolvable:$true] %s197_s26  ;;  %s7948_s28 = int_to_ptr.hbm [resolvable:$true] %s7947_s28 }
 0x114   :  { %s7949_s14 = scalar_lea.hbm %s7948_s28, 32  ;;  %s7951_s17 = scalar_lea.hbm %s9915_s15, 32 }
 0x115   :  { %p7950_p10 = scmp.ne.s32.totalorder %s7948_s28, %s7949_s14  ;;  %p7952_p11 = scmp.lt.s32.totalorder %s7948_s28, %s9915_s15 }
 0x116   :  { %p7953_p12 = scmp.lt.s32.totalorder %s7951_s17, %s7949_s14 }
 0x117   :  { %s221_s27 = sshll.u32 %s9916_s20, 4  ;;  %s8710_s27 = int_to_ptr.hbm [resolvable:$true] %s221_s27 }
 0x118   :  { %p7954_p13 = por %p7953_p12, %p7952_p11 }
 0x11a   :  { %p7955_p0 = pnand %p7954_p13, %p7950_p10 }
 0x11c   :  { %7958 = shalt.err (!%p7955_p0)
}
 0x11d   :  { %s9917_s21 = sld [smem:[#allocation75_spill]]  ;;  %s8325_s6 = smov [#allocation21]  }
 0x11e   :  { %203 = dma.hbm_to_vmem [thread:$0]  %s8700_s0, 512, %s198_s26, [#allocation17], %s8307_s22, %s8307_s22, %s8308_s23  }
 0x11f   :  { %s223_s4 = sshll.u32 %s8325_s6, 4  ;;  %s7971_s7 = sshra.s32 %s8710_s27, 4  ;;  %s224_s4 = int_to_ptr.vmem [resolvable:$true] %s223_s4  ;;  %s7972_s7 = int_to_ptr.hbm [resolvable:$true] %s7971_s7 }
 0x120   :  { %s7973_s1 = scalar_lea.hbm %s7972_s7, 32  ;;  %s7975_s5 = scalar_lea.hbm %s9916_s20, 32 }
 0x121   :  { %p7974_p1 = scmp.ne.s32.totalorder %s7972_s7, %s7973_s1  ;;  %p7976_p2 = scmp.lt.s32.totalorder %s7972_s7, %s9916_s20 }
 0x122   :  { %p7977_p3 = scmp.lt.s32.totalorder %s7975_s5, %s7973_s1 }
 0x123   :  { %s249_s2 = sshll.u32 %s9917_s21, 4  ;;  %s8720_s2 = int_to_ptr.hbm [resolvable:$true] %s249_s2 }
 0x124   :  { %p7978_p4 = por %p7977_p3, %p7976_p2 }
 0x126   :  { %p7979_p5 = pnand %p7978_p4, %p7974_p1 }
 0x128   :  { %7982 = shalt.err (!%p7979_p5)
}
 0x129   :  { %s9918_s10 = sld [smem:[#allocation77_spill]]  ;;  %s8326_s30 = smov [#allocation24]  }
 0x12a   :  { %229 = dma.hbm_to_vmem [thread:$0]  %s8710_s27, 512, %s224_s4, [#allocation20], %s8307_s22, %s8307_s22, %s8308_s23  }
 0x12b   :  { %s251_s29 = sshll.u32 %s8326_s30, 4  ;;  %s7995_s15 = sshra.s32 %s8720_s2, 4  ;;  %s252_s29 = int_to_ptr.vmem [resolvable:$true] %s251_s29  ;;  %s7996_s15 = int_to_ptr.hbm [resolvable:$true] %s7995_s15 }
 0x12c   :  { %s7997_s16 = scalar_lea.hbm %s7996_s15, 32  ;;  %s7999_s19 = scalar_lea.hbm %s9917_s21, 32 }
 0x12d   :  { %p7998_p6 = scmp.ne.s32.totalorder %s7996_s15, %s7997_s16  ;;  %p8000_p7 = scmp.lt.s32.totalorder %s7996_s15, %s9917_s21 }
 0x12e   :  { %p8001_p8 = scmp.lt.s32.totalorder %s7999_s19, %s7997_s16 }
 0x12f   :  { %s277_s9 = sshll.u32 %s9918_s10, 4  ;;  %s8730_s9 = int_to_ptr.hbm [resolvable:$true] %s277_s9 }
 0x130   :  { %p8002_p9 = por %p8001_p8, %p8000_p7 }
 0x132   :  { %p8003_p10 = pnand %p8002_p9, %p7998_p6 }
 0x134   :  { %8006 = shalt.err (!%p8003_p10)
}
 0x135   :  { %s9919_s0 = sld [smem:[#allocation78_spill]]  ;;  %s8327_s3 = smov [#allocation27]  }
 0x136   :  { %257 = dma.hbm_to_vmem [thread:$0]  %s8720_s2, 512, %s252_s29, [#allocation23], %s8307_s22, %s8307_s22, %s8308_s23  }
 0x137   :  { %s279_s18 = sshll.u32 %s8327_s3, 4  ;;  %s8019_s20 = sshra.s32 %s8730_s9, 4  ;;  %s280_s18 = int_to_ptr.vmem [resolvable:$true] %s279_s18  ;;  %s8020_s20 = int_to_ptr.hbm [resolvable:$true] %s8019_s20 }
 0x138   :  { %s8021_s27 = scalar_lea.hbm %s8020_s20, 32  ;;  %s8023_s11 = scalar_lea.hbm %s9918_s10, 32 }
 0x139   :  { %p8022_p11 = scmp.ne.s32.totalorder %s8020_s20, %s8021_s27  ;;  %p8024_p12 = scmp.lt.s32.totalorder %s8020_s20, %s9918_s10 }
 0x13a   :  { %p8025_p13 = scmp.lt.s32.totalorder %s8023_s11, %s8021_s27 }
 0x13b   :  { %s303_s13 = sshll.u32 %s9919_s0, 4  ;;  %s8740_s13 = int_to_ptr.hbm [resolvable:$true] %s303_s13 }
 0x13c   :  { %p8026_p0 = por %p8025_p13, %p8024_p12 }
 0x13e   :  { %p8027_p1 = pnand %p8026_p0, %p8022_p11 }
 0x140   :  { %8030 = shalt.err (!%p8027_p1)
}
 0x141   :  { %s9920_s26 = sld [smem:[#allocation80_spill]]  ;;  %s8328_s14 = smov [#allocation30]  }
 0x142   :  { %285 = dma.hbm_to_vmem [thread:$0]  %s8730_s9, 512, %s280_s18, [#allocation26], %s8307_s22, %s8307_s22, %s8308_s23  }
 0x143   :  { %s305_s17 = sshll.u32 %s8328_s14, 4  ;;  %s8043_s21 = sshra.s32 %s8740_s13, 4  ;;  %s306_s17 = int_to_ptr.vmem [resolvable:$true] %s305_s17  ;;  %s8044_s21 = int_to_ptr.hbm [resolvable:$true] %s8043_s21 }
 0x144   :  { %s8045_s6 = scalar_lea.hbm %s8044_s21, 32  ;;  %s8047_s4 = scalar_lea.hbm %s9919_s0, 32 }
 0x145   :  { %p8046_p2 = scmp.ne.s32.totalorder %s8044_s21, %s8045_s6  ;;  %p8048_p3 = scmp.lt.s32.totalorder %s8044_s21, %s9919_s0 }
 0x146   :  { %p8049_p4 = scmp.lt.s32.totalorder %s8047_s4, %s8045_s6 }
 0x147   :  { %s331_s28 = sshll.u32 %s9920_s26, 4  ;;  %s8750_s28 = int_to_ptr.hbm [resolvable:$true] %s331_s28 }
 0x148   :  { %p8050_p5 = por %p8049_p4, %p8048_p3 }
 0x14a   :  { %p8051_p6 = pnand %p8050_p5, %p8046_p2 }
 0x14c   :  { %8054 = shalt.err (!%p8051_p6)
}
 0x14d   :  { %s9921_s2 = sld [smem:[#allocation82_spill]]  ;;  %s8329_s7 = smov [#allocation33]  }
 0x14e   :  { %311 = dma.hbm_to_vmem [thread:$0]  %s8740_s13, 512, %s306_s17, [#allocation29], %s8307_s22, %s8307_s22, %s8308_s23  }
 0x14f   :  { %s333_s1 = sshll.u32 %s8329_s7, 4  ;;  %s8067_s10 = sshra.s32 %s8750_s28, 4  ;;  %s334_s1 = int_to_ptr.vmem [resolvable:$true] %s333_s1  ;;  %s8068_s10 = int_to_ptr.hbm [resolvable:$true] %s8067_s10 }
 0x150   :  { %s8069_s9 = scalar_lea.hbm %s8068_s10, 32  ;;  %s8071_s30 = scalar_lea.hbm %s9920_s26, 32 }
 0x151   :  { %p8070_p7 = scmp.ne.s32.totalorder %s8068_s10, %s8069_s9  ;;  %p8072_p8 = scmp.lt.s32.totalorder %s8068_s10, %s9920_s26 }
 0x152   :  { %p8073_p9 = scmp.lt.s32.totalorder %s8071_s30, %s8069_s9 }
 0x153   :  { %s359_s5 = sshll.u32 %s9921_s2, 4  ;;  %s8760_s5 = int_to_ptr.hbm [resolvable:$true] %s359_s5 }
 0x154   :  { %p8074_p10 = por %p8073_p9, %p8072_p8 }
 0x156   :  { %p8075_p11 = pnand %p8074_p10, %p8070_p7 }
 0x158   :  { %8078 = shalt.err (!%p8075_p11)
}
 0x159   :  { %s9922_s29 = sld [smem:[#allocation83_spill]]  ;;  %s8330_s16 = smov [#allocation36]  }
 0x15a   :  { %339 = dma.hbm_to_vmem [thread:$0]  %s8750_s28, 512, %s334_s1, [#allocation32], %s8307_s22, %s8307_s22, %s8308_s23  }
 0x15b   :  { %s361_s19 = sshll.u32 %s8330_s16, 4  ;;  %s8091_s0 = sshra.s32 %s8760_s5, 4  ;;  %s362_s19 = int_to_ptr.vmem [resolvable:$true] %s361_s19  ;;  %s8092_s0 = int_to_ptr.hbm [resolvable:$true] %s8091_s0 }
 0x15c   :  { %s8093_s3 = scalar_lea.hbm %s8092_s0, 32  ;;  %s8095_s18 = scalar_lea.hbm %s9921_s2, 32 }
 0x15d   :  { %p8094_p12 = scmp.ne.s32.totalorder %s8092_s0, %s8093_s3  ;;  %p8096_p13 = scmp.lt.s32.totalorder %s8092_s0, %s9921_s2 }
 0x15e   :  { %p8097_p0 = scmp.lt.s32.totalorder %s8095_s18, %s8093_s3 }
 0x15f   :  { %s385_s15 = sshll.u32 %s9922_s29, 4  ;;  %s8770_s15 = int_to_ptr.hbm [resolvable:$true] %s385_s15 }
 0x160   :  { %p8098_p1 = por %p8097_p0, %p8096_p13 }
 0x162   :  { %p8099_p2 = pnand %p8098_p1, %p8094_p12 }
 0x164   :  { %8102 = shalt.err (!%p8099_p2)
}
 0x165   :  { %s9923_s13 = sld [smem:[#allocation85_spill]]  ;;  %s8331_s20 = smov [#allocation39]  }
 0x166   :  { %367 = dma.hbm_to_vmem [thread:$0]  %s8760_s5, 512, %s362_s19, [#allocation35], %s8307_s22, %s8307_s22, %s8308_s23  }
 0x167   :  { %s387_s27 = sshll.u32 %s8331_s20, 4  ;;  %s8115_s26 = sshra.s32 %s8770_s15, 4  ;;  %s388_s27 = int_to_ptr.vmem [resolvable:$true] %s387_s27  ;;  %s8116_s26 = int_to_ptr.hbm [resolvable:$true] %s8115_s26 }
 0x168   :  { %s8117_s28 = scalar_lea.hbm %s8116_s26, 32  ;;  %s8119_s14 = scalar_lea.hbm %s9922_s29, 32 }
 0x169   :  { %p8118_p3 = scmp.ne.s32.totalorder %s8116_s26, %s8117_s28  ;;  %p8120_p4 = scmp.lt.s32.totalorder %s8116_s26, %s9922_s29 }
 0x16a   :  { %p8121_p5 = scmp.lt.s32.totalorder %s8119_s14, %s8117_s28 }
 0x16b   :  { %s413_s11 = sshll.u32 %s9923_s13, 4  ;;  %s8780_s11 = int_to_ptr.hbm [resolvable:$true] %s413_s11 }
 0x16c   :  { %p8122_p6 = por %p8121_p5, %p8120_p4 }
 0x16e   :  { %p8123_p7 = pnand %p8122_p6, %p8118_p3 }
 0x170   :  { %8126 = shalt.err (!%p8123_p7)
}
 0x171   :  { %s9924_s17 = sld [smem:[#allocation86_spill]]  ;;  %s8332_s6 = smov [#allocation42]  }
 0x172   :  { %393 = dma.hbm_to_vmem [thread:$0]  %s8770_s15, 512, %s388_s27, [#allocation38], %s8307_s22, %s8307_s22, %s8308_s23  }
 0x173   :  { %s415_s4 = sshll.u32 %s8332_s6, 4  ;;  %s8139_s2 = sshra.s32 %s8780_s11, 4  ;;  %s416_s4 = int_to_ptr.vmem [resolvable:$true] %s415_s4  ;;  %s8140_s2 = int_to_ptr.hbm [resolvable:$true] %s8139_s2 }
 0x174   :  { %s8141_s7 = scalar_lea.hbm %s8140_s2, 32  ;;  %s8143_s1 = scalar_lea.hbm %s9923_s13, 32 }
 0x175   :  { %p8142_p8 = scmp.ne.s32.totalorder %s8140_s2, %s8141_s7  ;;  %p8144_p9 = scmp.lt.s32.totalorder %s8140_s2, %s9923_s13 }
 0x176   :  { %p8145_p10 = scmp.lt.s32.totalorder %s8143_s1, %s8141_s7 }
 0x177   :  { %s439_s21 = sshll.u32 %s9924_s17, 4  ;;  %s8790_s21 = int_to_ptr.hbm [resolvable:$true] %s439_s21 }
 0x178   :  { %p8146_p11 = por %p8145_p10, %p8144_p9 }
 0x17a   :  { %p8147_p12 = pnand %p8146_p11, %p8142_p8 }
 0x17c   :  { %8150 = shalt.err (!%p8147_p12)
}
 0x17d   :  { %s9925_s5 = sld [smem:[#allocation88_spill]]  ;;  %s8333_s10 = smov [#allocation45]  }
 0x17e   :  { %421 = dma.hbm_to_vmem [thread:$0]  %s8780_s11, 512, %s416_s4, [#allocation41], %s8307_s22, %s8307_s22, %s8308_s23  }
 0x17f   :  { %s441_s9 = sshll.u32 %s8333_s10, 4  ;;  %s8163_s29 = sshra.s32 %s8790_s21, 4  ;;  %s442_s9 = int_to_ptr.vmem [resolvable:$true] %s441_s9  ;;  %s8164_s29 = int_to_ptr.hbm [resolvable:$true] %s8163_s29 }
 0x180   :  { %s8165_s15 = scalar_lea.hbm %s8164_s29, 32  ;;  %s8167_s16 = scalar_lea.hbm %s9924_s17, 32 }
 0x181   :  { %p8166_p13 = scmp.ne.s32.totalorder %s8164_s29, %s8165_s15  ;;  %p8168_p0 = scmp.lt.s32.totalorder %s8164_s29, %s9924_s17 }
 0x182   :  { %p8169_p1 = scmp.lt.s32.totalorder %s8167_s16, %s8165_s15 }
 0x183   :  { %s467_s30 = sshll.u32 %s9925_s5, 4  ;;  %s468_s30 = int_to_ptr.hbm [resolvable:$true] %s467_s30 }
 0x184   :  { %p8170_p2 = por %p8169_p1, %p8168_p0 }
 0x186   :  { %p8171_p3 = pnand %p8170_p2, %p8166_p13 }
 0x188   :  { %8174 = shalt.err (!%p8171_p3)
}
 0x189   :  { %447 = dma.hbm_to_vmem [thread:$0]  %s8790_s21, 512, %s442_s9, [#allocation44], %s8307_s22, %s8307_s22, %s8308_s23  }
 0x18a   :  { %s8334_s19 = smov [#allocation48]   ;;  %s8187_s3 = sshra.s32 %s468_s30, 4  ;;  %s8188_s3 = int_to_ptr.hbm [resolvable:$true] %s8187_s3 }
 0x18b   :  { %s469_s0 = sshll.u32 %s8334_s19, 4  ;;  %s8189_s18 = scalar_lea.hbm %s8188_s3, 32  ;;  %s470_s0 = int_to_ptr.vmem [resolvable:$true] %s469_s0 }
 0x18c   :  { %p8190_p4 = scmp.ne.s32.totalorder %s8188_s3, %s8189_s18  ;;  %s8191_s13 = scalar_lea.hbm %s9925_s5, 32 }
 0x18d   :  { %p8192_p5 = scmp.lt.s32.totalorder %s8188_s3, %s9925_s5  ;;  %p8193_p6 = scmp.lt.s32.totalorder %s8191_s13, %s8189_s18 }
 0x18f   :  { %p8194_p7 = por %p8193_p6, %p8192_p5 }
 0x191   :  { %p8195_p8 = pnand %p8194_p7, %p8190_p4 }
 0x193   :  { %8198 = shalt.err (!%p8195_p8)
}
 0x194   :  { %475 = dma.hbm_to_vmem [thread:$0]  %s468_s30, 512, %s470_s0, [#allocation47], %s8307_s22, %s8307_s22, %s8308_s23  }
 0x195   :  { %8235 = dma.done.wait [#allocation8], 256  }
 0x196   :  { %8236 = vsyncadd [#allocation8], 4294967040 }
 0x197   :  { %8237 = dma.done.wait [#allocation11], 768  }
 0x198   :  { %8238 = vsyncadd [#allocation11], 4294966528 }
 0x199   :  { %8239 = dma.done.wait [#allocation14], 1024  }
 0x19a   :  { %8240 = vsyncadd [#allocation14], 4294966272 }
 0x19b   :  { %8241 = dma.done.wait [#allocation17], 1024  }
 0x19c   :  { %8242 = vsyncadd [#allocation17], 4294966272 }
 0x19d   :  { %8243 = dma.done.wait [#allocation20], 1024  }
 0x19e   :  { %8244 = vsyncadd [#allocation20], 4294966272 }
 0x19f   :  { %8245 = dma.done.wait [#allocation23], 1024  }
 0x1a0   :  { %8246 = vsyncadd [#allocation23], 4294966272 }
 0x1a1   :  { %8247 = dma.done.wait [#allocation26], 1024  }
 0x1a2   :  { %8248 = vsyncadd [#allocation26], 4294966272 }
 0x1a3   :  { %8249 = dma.done.wait [#allocation29], 1024  }
 0x1a4   :  { %8250 = vsyncadd [#allocation29], 4294966272 }
 0x1a5   :  { %8251 = dma.done.wait [#allocation32], 1024  }
 0x1a6   :  { %8252 = vsyncadd [#allocation32], 4294966272 }
 0x1a7   :  { %8253 = dma.done.wait [#allocation35], 1024  }
 0x1a8   :  { %8254 = vsyncadd [#allocation35], 4294966272 }
 0x1a9   :  { %8255 = dma.done.wait [#allocation38], 1024  }
 0x1aa   :  { %8256 = vsyncadd [#allocation38], 4294966272 }
 0x1ab   :  { %8257 = dma.done.wait [#allocation41], 768  }
 0x1ac   :  { %8258 = vsyncadd [#allocation41], 4294966528 }
 0x1ad   :  { %8259 = dma.done.wait [#allocation44], 1024  }
 0x1ae   :  { %8260 = vsyncadd [#allocation44], 4294966272 }
 0x1af   :  { %8261 = dma.done.wait [#allocation47], 1024  }
 0x1b0   :  { %8262 = vsyncadd [#allocation47], 4294966272  ;;  %s9926_s20 = sld [smem:[#allocation65_spill]]  ;;  %v593_v0 = vld [vmem:[#allocation7 + $0x8] sm:$0xff]  ;;  %v592_v1 = vld [vmem:[#allocation7] sm:$0xff]  ;;  %vm598_vm0 = vcmask 130048  }
 0x1b1   :  { %s9927_s27 = sld [smem:[#allocation66_spill]]  ;;  %619 = vmatpush.msra.mxu0 %v593_v0  ;;  %6834 = vmatpush.msra.mxu1 %v593_v0  ;;  %v8335_v8 = vmov 0.0   ;;  %s8336_s26 = smov 64   ;;  %vm701_vm5 = vcmask 254976   ;;  %vm635_vm6 = vcmask 261120  }
 0x1b2   :  { %s9928_s11 = sld [smem:[#allocation67_spill]]  ;;  %s8337_s28 = smov 32  }
 0x1b3   :  { %620 = vmatpush.msra.mxu0 %v592_v1  ;;  %6835 = vmatpush.msra.mxu1 %v592_v1  ;;  %s9929_s14 = sld [smem:[#allocation69_spill]]  ;;  %s8227_s9 = scalar_lea.hbm %s8552_s8, 16 }
 0x1b4   :  { %s9930_s17 = sld [smem:[#allocation71_spill]] }
 0x1b5   :  { %s9931_s21 = sld [smem:[#allocation74_spill]] }
 0x1b6   :  { %v8813_v2 = vld [vmem:[%s9926_s20] sm:$0xff]  ;;  %v8816_v3 = vld [vmem:[%s9926_s20 + $0x8] sm:$0xff]  ;;  %s9932_s6 = sld [smem:[#allocation76_spill]] }
 0x1b7   :  { %v633_v4 = vld [vmem:[%s9927_s27 + $0x18] sm:$0xff]  ;;  %v632_v5 = vld [vmem:[%s9927_s27 + $0x10] sm:$0xff]  ;;  %6646 = vmatmul.msk.f32.vlgmr.msra.gmra.mxu0 %vm598_vm0, %v8813_v2  ;;  %6647 = vmatmul.msk.f32.vlgmr.msra.gmra.mxu1 %vm598_vm0, %v8816_v3  ;;  %v631_v6 = vld [vmem:[%s9927_s27 + $0x8] sm:$0xff]  ;;  %s9933_s4 = sld [smem:[#allocation79_spill]] }
 0x1b8   :  { %718 = vmatpush.msra.mxu2 %v633_v4  ;;  %784 = vmatpush.msra.mxu3 %v633_v4  ;;  %v630_v7 = vld [vmem:[%s9927_s27] sm:$0xff]  ;;  %s9934_s2 = sld [smem:[#allocation81_spill]] }
 0x1b9   :  { %651 = vmatpush.msrb.mxu1 %v633_v4  ;;  %1048 = vmatpush.msrb.mxu0 %v633_v4  ;;  %v6910_v9 = vld [vmem:[%s9928_s11] ss:$0 sm:$0xff]  ;;  %s9935_s7 = sld [smem:[#allocation84_spill]] }
 0x1ba   :  { %719 = vmatpush.msra.mxu2 %v632_v5  ;;  %785 = vmatpush.msra.mxu3 %v632_v5  ;;  %s9936_s1 = sld [smem:[#allocation87_spill]] }
 0x1bb   :  { %652 = vmatpush.msrb.mxu1 %v632_v5  ;;  %1049 = vmatpush.msrb.mxu0 %v632_v5 }
 0x1bc   :  { %720 = vmatpush.msra.mxu2 %v631_v6  ;;  %786 = vmatpush.msra.mxu3 %v631_v6 }
 0x1bd   :  { %653 = vmatpush.msrb.mxu1 %v631_v6  ;;  %1050 = vmatpush.msrb.mxu0 %v631_v6 }
 0x1be   :  { %721 = vmatpush.msra.mxu2 %v630_v7  ;;  %787 = vmatpush.msra.mxu3 %v630_v7 }
 0x1bf   :  { %654 = vmatpush.msrb.mxu1 %v630_v7  ;;  %1051 = vmatpush.msrb.mxu0 %v630_v7 }
 0x1c0   :  { %916 = vmatpush.msrb.mxu2 %v633_v4  ;;  %982 = vmatpush.msrb.mxu3 %v633_v4 }
 0x1c1   :  { %655 = vmatmul.f32.vlgmr.msrb.gmra.mxu1 %v8335_v8 }
 0x1c2   :  { %917 = vmatpush.msrb.mxu2 %v632_v5  ;;  %850 = vmatpush.msra.mxu1 %v633_v4 }
 0x1c3   :  { %983 = vmatpush.msrb.mxu3 %v632_v5 }
 0x1c4   :  { %918 = vmatpush.msrb.mxu2 %v631_v6  ;;  %851 = vmatpush.msra.mxu1 %v632_v5 }
 0x1c5   :  { %984 = vmatpush.msrb.mxu3 %v631_v6 }
 0x1c6   :  { %919 = vmatpush.msrb.mxu2 %v630_v7  ;;  %852 = vmatpush.msra.mxu1 %v631_v6 }
 0x1c7   :  { %985 = vmatpush.msrb.mxu3 %v630_v7 }
 0x1c8   :  { %853 = vmatpush.msra.mxu1 %v630_v7 }
 0x1ca   :  { %1114 = vmatpush.msrb.mxu1 %v633_v4 }
 0x1cc   :  { %1115 = vmatpush.msrb.mxu1 %v632_v5 }
 0x1ce   :  { %1116 = vmatpush.msrb.mxu1 %v631_v6 }
 0x1d0   :  { %1117 = vmatpush.msrb.mxu1 %v630_v7 }
 0x234   :  { %v622_v10 = vpop.f32.mrf.mxu0  ;;  %v625_v11 = vpop.f32.mrf.mxu1 }
 0x235   :  { %v623_v12 = vadd.f32 %v6910_v9, %v622_v10  ;;  %v626_v13 = vadd.f32 %v6910_v9, %v625_v11 }
 0x237   :  { %628 = vst [vmem:[#allocation2] sm:$0xff] %v623_v12 }
 0x238   :  { %629 = vst [vmem:[#allocation2 + $0x8] sm:$0xff] %v626_v13 }
 0x23e   :  { %v656_v14 = vpop.f32.mrf.mxu1  ;;  %v634_v15 = vld [vmem:[#allocation2] sm:$0x3]  ;;  %v703_v40 = vld [vmem:[#allocation2 + $0x2] sm:$0x3]  ;;  %v769_v4 = vld [vmem:[#allocation2 + $0x4] sm:$0x3] }
 0x23f   :  { %v659_v16 = vadd.f32 %v656_v14, %v634_v15 }
 0x241   :  { %6921 = vtanh.f32 %v659_v16  ;;  %v6648_v18 = vmul.f32 -1.442695, %v659_v16 }
 0x243   :  { %6923 = vpow2.f32 %v6648_v18 }
 0x247   :  { %v6922_v17 = vpop.eup %6921 }
 0x248   :  { %682 = vrot.lane.b32.xlu0 %v6922_v17, %s8336_s26 }
 0x249   :  { %v6924_v19 = vpop.eup %6923 }
 0x24a   :  { %v663_v20 = vadd.f32 1.0, %v6924_v19 }
 0x24c   :  { %6925 = vrcp.f32 %v663_v20  ;;  %v675_v26 = vand.u32 2147483648, %v663_v20  ;;  %vm669_vm2 = vweird.f32 %v663_v20  ;;  %v673_v27 = vand.u32 2147483647, %v663_v20 }
 0x24e   :  { %v676_v29 = vor.u32 1.1754944e-38, %v675_v26  ;;  %vm674_vm4 = vcmp.eq.f32.partialorder %v673_v27, 8.507059e+37 }
 0x252   :  { %v6926_v21 = vpop.eup %6925 }
 0x253   :  { %v665_v22 = vmul.f32 %v6926_v21, %v663_v20  ;;  %vm670_vm1 = vweird.f32 %v6926_v21 }
 0x254   :  { %vm671_vm3 = vmor %vm669_vm2, %vm670_vm1 }
 0x255   :  { %v666_v23 = vsub.f32 1.0, %v665_v22 }
 0x257   :  { %v667_v24 = vmul.f32 %v6926_v21, %v666_v23 }
 0x259   :  { %v668_v25 = vadd.f32 %v6926_v21, %v667_v24 }
 0x25b   :  { %v672_v28 = vsel %vm671_vm3, %v6926_v21, %v668_v25 }
 0x25c   :  { %v677_v31 = vsel %vm674_vm4, %v676_v29, %v672_v28 }
 0x25d   :  { %v680_v33 = vmul.f32 0.0, %v677_v31 }
 0x2ba   :  { %v683_v30 = vpop.permute.xlu0 %682 }
 0x2bb   :  { %v685_v32 = vmul.f32 %v683_v30, %v677_v31 }
 0x2bd   :  { %687 = vrot.lane.b32.xlu0 %v685_v32, %s8337_s28 }
 0x32f   :  { %v688_v34 = vpop.permute.xlu0 %687 }
 0x330   :  { %v690_v35 = vadd.f32 %v688_v34, %v680_v33 }
 0x332   :  { %6927 = vtanh.f32 %v690_v35 }
 0x338   :  { %v6928_v36 = vpop.eup %6927 }
 0x339   :  { %693 = vrot.lane.b32.xlu1 %v6928_v36, %s8336_s26 }
 0x3ab   :  { %v694_v37 = vpop.permute.xlu1 %693 }
 0x3ac   :  { %v696_v38 = vmul.f32 %v694_v37, %v677_v31  ;;  %v835_v31 = vld [vmem:[#allocation2 + $0x6] sm:$0x3] }
 0x3ae   :  { %698 = vrot.lane.b32.xlu1 %v696_v38, %s8337_s28 }
 0x420   :  { %v699_v39 = vpop.permute.xlu1 %698 }
 0x421   :  { %702 = vst.msk [vmem:[#allocation3] sm:$0x3] %vm701_vm5, %v699_v39  ;;  %6649 = vmatmul.msk.f32.vlgmr.msra.gmra.mxu2 %vm635_vm6, %v699_v39 }
 0x4a4   :  { %v723_v41 = vpop.f32.mrf.mxu2 }
 0x4a5   :  { %v726_v42 = vadd.f32 %v723_v41, %v703_v40 }
 0x4a7   :  { %6929 = vtanh.f32 %v726_v42  ;;  %v6650_v44 = vmul.f32 -1.442695, %v726_v42 }
 0x4a9   :  { %6931 = vpow2.f32 %v6650_v44 }
 0x4ad   :  { %v6930_v43 = vpop.eup %6929 }
 0x4ae   :  { %749 = vrot.lane.b32.xlu2 %v6930_v43, %s8336_s26 }
 0x4af   :  { %v6932_v45 = vpop.eup %6931 }
 0x4b0   :  { %v730_v46 = vadd.f32 1.0, %v6932_v45 }
 0x4b2   :  { %6933 = vrcp.f32 %v730_v46  ;;  %v742_v52 = vand.u32 2147483648, %v730_v46  ;;  %vm736_vm8 = vweird.f32 %v730_v46  ;;  %v740_v53 = vand.u32 2147483647, %v730_v46 }
 0x4b4   :  { %v743_v55 = vor.u32 1.1754944e-38, %v742_v52  ;;  %vm741_vm10 = vcmp.eq.f32.partialorder %v740_v53, 8.507059e+37 }
 0x4b8   :  { %v6934_v47 = vpop.eup %6933 }
 0x4b9   :  { %v732_v48 = vmul.f32 %v6934_v47, %v730_v46  ;;  %vm737_vm7 = vweird.f32 %v6934_v47 }
 0x4ba   :  { %vm738_vm9 = vmor %vm736_vm8, %vm737_vm7 }
 0x4bb   :  { %v733_v49 = vsub.f32 1.0, %v732_v48 }
 0x4bd   :  { %v734_v50 = vmul.f32 %v6934_v47, %v733_v49 }
 0x4bf   :  { %v735_v51 = vadd.f32 %v6934_v47, %v734_v50 }
 0x4c1   :  { %v739_v54 = vsel %vm738_vm9, %v6934_v47, %v735_v51 }
 0x4c2   :  { %v744_v57 = vsel %vm741_vm10, %v743_v55, %v739_v54 }
 0x4c3   :  { %v747_v59 = vmul.f32 %v744_v57, %v690_v35 }
 0x508   :  { %v750_v56 = vpop.permute.xlu2 %749 }
 0x509   :  { %v752_v58 = vmul.f32 %v750_v56, %v744_v57 }
 0x50b   :  { %754 = vrot.lane.b32.xlu2 %v752_v58, %s8337_s28 }
 0x565   :  { %v755_v60 = vpop.permute.xlu2 %754 }
 0x566   :  { %v757_v61 = vadd.f32 %v755_v60, %v747_v59 }
 0x568   :  { %6935 = vtanh.f32 %v757_v61 }
 0x56e   :  { %v6936_v62 = vpop.eup %6935 }
 0x56f   :  { %760 = vrot.lane.b32.xlu0 %v6936_v62, %s8336_s26 }
 0x5e1   :  { %v761_v63 = vpop.permute.xlu0 %760 }
 0x5e2   :  { %v763_v0 = vmul.f32 %v761_v63, %v744_v57  ;;  %v901_v57 = vld [vmem:[#allocation2 + $0x8] sm:$0x3] }
 0x5e4   :  { %765 = vrot.lane.b32.xlu1 %v763_v0, %s8337_s28 }
 0x656   :  { %v766_v1 = vpop.permute.xlu1 %765 }
 0x657   :  { %768 = vst.msk [vmem:[#allocation3 + $0x2] sm:$0x3] %vm701_vm5, %v766_v1  ;;  %6651 = vmatmul.msk.f32.vlgmr.msra.gmra.mxu3 %vm635_vm6, %v766_v1 }
 0x6da   :  { %v789_v5 = vpop.f32.mrf.mxu3 }
 0x6db   :  { %v792_v6 = vadd.f32 %v789_v5, %v769_v4 }
 0x6dd   :  { %6937 = vtanh.f32 %v792_v6  ;;  %v6652_v9 = vmul.f32 -1.442695, %v792_v6 }
 0x6df   :  { %6939 = vpow2.f32 %v6652_v9 }
 0x6e3   :  { %v6938_v7 = vpop.eup %6937 }
 0x6e4   :  { %815 = vrot.lane.b32.xlu2 %v6938_v7, %s8336_s26 }
 0x6e5   :  { %v6940_v10 = vpop.eup %6939 }
 0x6e6   :  { %v796_v11 = vadd.f32 1.0, %v6940_v10 }
 0x6e8   :  { %6941 = vrcp.f32 %v796_v11  ;;  %v808_v17 = vand.u32 2147483648, %v796_v11  ;;  %vm802_vm12 = vweird.f32 %v796_v11  ;;  %v806_v18 = vand.u32 2147483647, %v796_v11 }
 0x6ea   :  { %v809_v20 = vor.u32 1.1754944e-38, %v808_v17  ;;  %vm807_vm14 = vcmp.eq.f32.partialorder %v806_v18, 8.507059e+37 }
 0x6ee   :  { %v6942_v12 = vpop.eup %6941 }
 0x6ef   :  { %v798_v13 = vmul.f32 %v6942_v12, %v796_v11  ;;  %vm803_vm11 = vweird.f32 %v6942_v12 }
 0x6f0   :  { %vm804_vm13 = vmor %vm802_vm12, %vm803_vm11 }
 0x6f1   :  { %v799_v14 = vsub.f32 1.0, %v798_v13 }
 0x6f3   :  { %v800_v15 = vmul.f32 %v6942_v12, %v799_v14 }
 0x6f5   :  { %v801_v16 = vadd.f32 %v6942_v12, %v800_v15 }
 0x6f7   :  { %v805_v19 = vsel %vm804_vm13, %v6942_v12, %v801_v16 }
 0x6f8   :  { %v810_v22 = vsel %vm807_vm14, %v809_v20, %v805_v19  ;;  %v1168_v19 = vld [vmem:[#allocation10 + $0x8] sm:$0xff]  ;;  %v1167_v20 = vld [vmem:[#allocation10] sm:$0xff] }
 0x6f9   :  { %v813_v24 = vmul.f32 %v810_v22, %v757_v61  ;;  %1187 = vmatpush.msra.mxu2 %v1168_v19 }
 0x6fb   :  { %1188 = vmatpush.msra.mxu2 %v1167_v20 }
 0x73e   :  { %v816_v21 = vpop.permute.xlu2 %815 }
 0x73f   :  { %v818_v23 = vmul.f32 %v816_v21, %v810_v22 }
 0x741   :  { %820 = vrot.lane.b32.xlu0 %v818_v23, %s8337_s28  ;;  %v8863_v23 = vld [vmem:[#allocation12 + $0x18] sm:$0xff] }
 0x742   :  { %1215 = vmatpush.msra.mxu3 %v8863_v23  ;;  %1281 = vmatpush.msra.mxu0 %v8863_v23 }
 0x7b3   :  { %v821_v25 = vpop.permute.xlu0 %820 }
 0x7b4   :  { %v823_v26 = vadd.f32 %v821_v25, %v813_v24  ;;  %v8865_v24 = vld [vmem:[#allocation12 + $0x10] sm:$0xff]  ;;  %v8869_v25 = vld [vmem:[#allocation12 + $0x8] sm:$0xff] }
 0x7b5   :  { %1216 = vmatpush.msra.mxu3 %v8865_v24  ;;  %1282 = vmatpush.msra.mxu0 %v8865_v24 }
 0x7b6   :  { %6943 = vtanh.f32 %v823_v26 }
 0x7b7   :  { %1217 = vmatpush.msra.mxu3 %v8869_v25  ;;  %1283 = vmatpush.msra.mxu0 %v8869_v25 }
 0x7bc   :  { %v6944_v27 = vpop.eup %6943 }
 0x7bd   :  { %826 = vrot.lane.b32.xlu1 %v6944_v27, %s8336_s26 }
 0x82f   :  { %v827_v28 = vpop.permute.xlu1 %826 }
 0x830   :  { %v829_v29 = vmul.f32 %v827_v28, %v810_v22 }
 0x832   :  { %831 = vrot.lane.b32.xlu2 %v829_v29, %s8337_s28 }
 0x88c   :  { %v832_v30 = vpop.permute.xlu2 %831 }
 0x88d   :  { %834 = vst.msk [vmem:[#allocation3 + $0x4] sm:$0x3] %vm701_vm5, %v832_v30  ;;  %6653 = vmatmul.msk.f32.vlgmr.msra.gmra.mxu1 %vm635_vm6, %v832_v30  ;;  %v967_v30 = vld [vmem:[#allocation2 + $0xa] sm:$0x3] }
 0x88e   :  { %1347 = vmatpush.msra.mxu1 %v8863_v23 }
 0x890   :  { %1348 = vmatpush.msra.mxu1 %v8865_v24 }
 0x892   :  { %1349 = vmatpush.msra.mxu1 %v8869_v25 }
 0x90a   :  { %v855_v32 = vpop.f32.mrf.mxu1 }
 0x90b   :  { %v858_v33 = vadd.f32 %v855_v32, %v835_v31  ;;  %v8888_v31 = vld [vmem:[#allocation2 + $0xc] sm:$0x3]  ;;  %v8890_v32 = vld [vmem:[#allocation2 + $0xe] sm:$0x3] }
 0x90d   :  { %6945 = vtanh.f32 %v858_v33  ;;  %v6654_v35 = vmul.f32 -1.442695, %v858_v33 }
 0x90f   :  { %6947 = vpow2.f32 %v6654_v35 }
 0x913   :  { %v6946_v34 = vpop.eup %6945 }
 0x914   :  { %881 = vrot.lane.b32.xlu0 %v6946_v34, %s8336_s26 }
 0x915   :  { %v6948_v36 = vpop.eup %6947 }
 0x916   :  { %v862_v37 = vadd.f32 1.0, %v6948_v36 }
 0x918   :  { %6949 = vrcp.f32 %v862_v37  ;;  %v874_v43 = vand.u32 2147483648, %v862_v37  ;;  %vm868_vm1 = vweird.f32 %v862_v37  ;;  %v872_v44 = vand.u32 2147483647, %v862_v37 }
 0x91a   :  { %v875_v46 = vor.u32 1.1754944e-38, %v874_v43  ;;  %vm873_vm3 = vcmp.eq.f32.partialorder %v872_v44, 8.507059e+37 }
 0x91e   :  { %v6950_v38 = vpop.eup %6949 }
 0x91f   :  { %v864_v39 = vmul.f32 %v6950_v38, %v862_v37  ;;  %vm869_vm15 = vweird.f32 %v6950_v38 }
 0x920   :  { %vm870_vm2 = vmor %vm868_vm1, %vm869_vm15 }
 0x921   :  { %v865_v40 = vsub.f32 1.0, %v864_v39 }
 0x923   :  { %v866_v41 = vmul.f32 %v6950_v38, %v865_v40 }
 0x925   :  { %v867_v42 = vadd.f32 %v6950_v38, %v866_v41 }
 0x927   :  { %v871_v45 = vsel %vm870_vm2, %v6950_v38, %v867_v42 }
 0x928   :  { %v876_v48 = vsel %vm873_vm3, %v875_v46, %v871_v45 }
 0x929   :  { %v879_v50 = vmul.f32 %v876_v48, %v823_v26 }
 0x986   :  { %v882_v47 = vpop.permute.xlu0 %881 }
 0x987   :  { %v884_v49 = vmul.f32 %v882_v47, %v876_v48 }
 0x989   :  { %886 = vrot.lane.b32.xlu1 %v884_v49, %s8337_s28 }
 0x9fb   :  { %v887_v51 = vpop.permute.xlu1 %886 }
 0x9fc   :  { %v889_v52 = vadd.f32 %v887_v51, %v879_v50 }
 0x9fe   :  { %6951 = vtanh.f32 %v889_v52 }
 0xa04   :  { %v6952_v53 = vpop.eup %6951 }
 0xa05   :  { %892 = vrot.lane.b32.xlu2 %v6952_v53, %s8336_s26 }
 0xa5f   :  { %v893_v54 = vpop.permute.xlu2 %892 }
 0xa60   :  { %v895_v55 = vmul.f32 %v893_v54, %v876_v48 }
 0xa62   :  { %897 = vrot.lane.b32.xlu0 %v895_v55, %s8337_s28 }
 0xad4   :  { %v898_v56 = vpop.permute.xlu0 %897 }
 0xad5   :  { %900 = vst.msk [vmem:[#allocation3 + $0x6] sm:$0x3] %vm701_vm5, %v898_v56  ;;  %6655 = vmatmul.msk.f32.vlgmr.msrb.gmra.mxu2 %vm635_vm6, %v898_v56 }
 0xad6   :  { %1611 = vmatpush.msrb.mxu2 %v8863_v23 }
 0xad8   :  { %1612 = vmatpush.msrb.mxu2 %v8865_v24 }
 0xada   :  { %1613 = vmatpush.msrb.mxu2 %v8869_v25 }
 0xadd   :  { %6663 = vmatmul.msk.f32.vlgmr.msra.gmra.mxu2 %vm598_vm0, %v8813_v2  ;;  %v8875_v2 = vld [vmem:[#allocation12] sm:$0xff] }
 0xade   :  { %1218 = vmatpush.msra.mxu3 %v8875_v2  ;;  %1284 = vmatpush.msra.mxu0 %v8875_v2 }
 0xadf   :  { %1350 = vmatpush.msra.mxu1 %v8875_v2  ;;  %1614 = vmatpush.msrb.mxu2 %v8875_v2 }
 0xae5   :  { %6664 = vmatmul.msk.f32.gmra.mxu2 %vm598_vm0, %v8816_v3  ;;  %v6911_v3 = vld [vmem:[%s9929_s14] ss:$0 sm:$0xff] }
 0xb58   :  { %v921_v58 = vpop.f32.mrf.mxu2 }
 0xb59   :  { %v924_v59 = vadd.f32 %v921_v58, %v901_v57 }
 0xb5b   :  { %6953 = vtanh.f32 %v924_v59  ;;  %v6656_v61 = vmul.f32 -1.442695, %v924_v59 }
 0xb5d   :  { %6955 = vpow2.f32 %v6656_v61 }
 0xb60   :  { %v1190_v26 = vpop.f32.mrf.mxu2 }
 0xb61   :  { %v6954_v60 = vpop.eup %6953  ;;  %v1191_v27 = vadd.f32 %v6911_v3, %v1190_v26 }
 0xb62   :  { %947 = vrot.lane.b32.xlu1 %v6954_v60, %s8336_s26 }
 0xb63   :  { %v6956_v62 = vpop.eup %6955  ;;  %1196 = vst [vmem:[#allocation2] sm:$0xff] %v1191_v27 }
 0xb64   :  { %v928_v63 = vadd.f32 1.0, %v6956_v62 }
 0xb66   :  { %6957 = vrcp.f32 %v928_v63  ;;  %v940_v7 = vand.u32 2147483648, %v928_v63  ;;  %vm934_vm7 = vweird.f32 %v928_v63  ;;  %v938_v9 = vand.u32 2147483647, %v928_v63 }
 0xb68   :  { %v941_v11 = vor.u32 1.1754944e-38, %v940_v7  ;;  %vm939_vm9 = vcmp.eq.f32.partialorder %v938_v9, 8.507059e+37  ;;  %v1193_v28 = vpop.f32.mrf.mxu2 }
 0xb69   :  { %v1194_v29 = vadd.f32 %v6911_v3, %v1193_v28 }
 0xb6b   :  { %1197 = vst [vmem:[#allocation2 + $0x8] sm:$0xff] %v1194_v29 }
 0xb6c   :  { %v6958_v0 = vpop.eup %6957 }
 0xb6d   :  { %v930_v1 = vmul.f32 %v6958_v0, %v928_v63  ;;  %vm935_vm4 = vweird.f32 %v6958_v0 }
 0xb6e   :  { %vm936_vm8 = vmor %vm934_vm7, %vm935_vm4 }
 0xb6f   :  { %v931_v4 = vsub.f32 1.0, %v930_v1 }
 0xb71   :  { %v932_v5 = vmul.f32 %v6958_v0, %v931_v4 }
 0xb72   :  { %v1202_v36 = vld [vmem:[#allocation2 + $0xe] sm:$0x3]  ;;  %v1266_v29 = vld [vmem:[#allocation2 + $0xc] sm:$0x3] }
 0xb73   :  { %v933_v6 = vadd.f32 %v6958_v0, %v932_v5 }
 0xb75   :  { %v937_v10 = vsel %vm936_vm8, %v6958_v0, %v933_v6 }
 0xb76   :  { %v942_v13 = vsel %vm939_vm9, %v941_v11, %v937_v10 }
 0xb77   :  { %v945_v15 = vmul.f32 %v942_v13, %v889_v52 }
 0xbd4   :  { %v948_v12 = vpop.permute.xlu1 %947 }
 0xbd5   :  { %v950_v14 = vmul.f32 %v948_v12, %v942_v13 }
 0xbd7   :  { %952 = vrot.lane.b32.xlu2 %v950_v14, %s8337_s28 }
 0xc31   :  { %v953_v16 = vpop.permute.xlu2 %952 }
 0xc32   :  { %v8854_v17 = vadd.f32 %v953_v16, %v945_v15 }
 0xc34   :  { %6959 = vtanh.f32 %v8854_v17 }
 0xc3a   :  { %v6960_v18 = vpop.eup %6959 }
 0xc3b   :  { %958 = vrot.lane.b32.xlu0 %v6960_v18, %s8336_s26 }
 0xcad   :  { %v959_v21 = vpop.permute.xlu0 %958 }
 0xcae   :  { %v961_v22 = vmul.f32 %v959_v21, %v942_v13 }
 0xcb0   :  { %963 = vrot.lane.b32.xlu1 %v961_v22, %s8337_s28 }
 0xd22   :  { %v964_v33 = vpop.permute.xlu1 %963 }
 0xd23   :  { %966 = vst.msk [vmem:[#allocation3 + $0x8] sm:$0x3] %vm701_vm5, %v964_v33  ;;  %6657 = vmatmul.msk.f32.vlgmr.msrb.gmra.mxu3 %vm635_vm6, %v964_v33 }
 0xd24   :  { %1413 = vmatpush.msrb.mxu3 %v8863_v23 }
 0xd26   :  { %1414 = vmatpush.msrb.mxu3 %v8865_v24 }
 0xd28   :  { %1415 = vmatpush.msrb.mxu3 %v8869_v25 }
 0xd2a   :  { %1416 = vmatpush.msrb.mxu3 %v8875_v2 }
 0xd2b   :  { %1219 = vmatmul.f32.vlgmr.msra.gmra.mxu3 %v8335_v8 }
 0xd2c   :  { %1677 = vmatpush.msra.mxu3 %v8863_v23 }
 0xd2e   :  { %1678 = vmatpush.msra.mxu3 %v8865_v24 }
 0xd30   :  { %1679 = vmatpush.msra.mxu3 %v8869_v25 }
 0xd32   :  { %1680 = vmatpush.msra.mxu3 %v8875_v2 }
 0xda6   :  { %v987_v34 = vpop.f32.mrf.mxu3 }
 0xda7   :  { %v990_v35 = vadd.f32 %v987_v34, %v967_v30 }
 0xda9   :  { %6961 = vtanh.f32 %v990_v35  ;;  %v6658_v41 = vmul.f32 -1.442695, %v990_v35 }
 0xdae   :  { %v1220_v37 = vpop.f32.mrf.mxu3 }
 0xdaf   :  { %v6962_v38 = vpop.eup %6961  ;;  %v1223_v39 = vadd.f32 %v1220_v37, %v1202_v36 }
 0xdb0   :  { %1013 = vrot.lane.b32.xlu2 %v6962_v38, %s8336_s26 }
 0xdb1   :  { %6963 = vtanh.f32 %v1223_v39  ;;  %v6665_v47 = vmul.f32 -1.442695, %v1223_v39 }
 0xdb2   :  { %6965 = vpow2.f32 %v6658_v41 }
 0xdb7   :  { %v6964_v40 = vpop.eup %6963 }
 0xdb8   :  { %1246 = vrot.lane.b32.xlu0 %v6964_v40, %s8336_s26  ;;  %v6966_v42 = vpop.eup %6965 }
 0xdb9   :  { %v994_v43 = vadd.f32 1.0, %v6966_v42 }
 0xdbb   :  { %6967 = vrcp.f32 %v994_v43  ;;  %v1006_v50 = vand.u32 2147483648, %v994_v43  ;;  %vm1000_vm11 = vweird.f32 %v994_v43  ;;  %v1004_v51 = vand.u32 2147483647, %v994_v43 }
 0xdbc   :  { %6969 = vpow2.f32 %v6665_v47 }
 0xdbd   :  { %v1007_v54 = vor.u32 1.1754944e-38, %v1006_v50  ;;  %vm1005_vm13 = vcmp.eq.f32.partialorder %v1004_v51, 8.507059e+37 }
 0xdc1   :  { %v6968_v44 = vpop.eup %6967 }
 0xdc2   :  { %v996_v45 = vmul.f32 %v6968_v44, %v994_v43  ;;  %vm1001_vm10 = vweird.f32 %v6968_v44  ;;  %v6970_v52 = vpop.eup %6969 }
 0xdc3   :  { %vm1002_vm12 = vmor %vm1000_vm11, %vm1001_vm10  ;;  %v1227_v55 = vadd.f32 1.0, %v6970_v52 }
 0xdc4   :  { %v997_v46 = vsub.f32 1.0, %v996_v45 }
 0xdc5   :  { %6971 = vrcp.f32 %v1227_v55  ;;  %v1239_v0 = vand.u32 2147483648, %v1227_v55  ;;  %vm1233_vm15 = vweird.f32 %v1227_v55  ;;  %v1237_v1 = vand.u32 2147483647, %v1227_v55 }
 0xdc6   :  { %v998_v48 = vmul.f32 %v6968_v44, %v997_v46 }
 0xdc7   :  { %v1240_v5 = vor.u32 1.1754944e-38, %v1239_v0  ;;  %vm1238_vm2 = vcmp.eq.f32.partialorder %v1237_v1, 8.507059e+37 }
 0xdc8   :  { %v999_v49 = vadd.f32 %v6968_v44, %v998_v48 }
 0xdca   :  { %v1003_v53 = vsel %vm1002_vm12, %v6968_v44, %v999_v49 }
 0xdcb   :  { %v1008_v57 = vsel %vm1005_vm13, %v1007_v54, %v1003_v53  ;;  %v6972_v59 = vpop.eup %6971 }
 0xdcc   :  { %v1229_v60 = vmul.f32 %v6972_v59, %v1227_v55  ;;  %vm1234_vm14 = vweird.f32 %v6972_v59  ;;  %v1011_v10 = vmul.f32 %v1008_v57, %v8854_v17 }
 0xdcd   :  { %vm1235_vm1 = vmor %vm1233_vm15, %vm1234_vm14 }
 0xdce   :  { %v1230_v61 = vsub.f32 1.0, %v1229_v60 }
 0xdd0   :  { %v1231_v62 = vmul.f32 %v6972_v59, %v1230_v61 }
 0xdd2   :  { %v1232_v63 = vadd.f32 %v6972_v59, %v1231_v62 }
 0xdd4   :  { %v1236_v4 = vsel %vm1235_vm1, %v6972_v59, %v1232_v63 }
 0xdd5   :  { %v1241_v7 = vsel %vm1238_vm2, %v1240_v5, %v1236_v4 }
 0xdd6   :  { %v1244_v13 = vmul.f32 0.0, %v1241_v7 }
 0xe0a   :  { %v1014_v56 = vpop.permute.xlu2 %1013 }
 0xe0b   :  { %v1016_v58 = vmul.f32 %v1014_v56, %v1008_v57 }
 0xe0d   :  { %1018 = vrot.lane.b32.xlu1 %v1016_v58, %s8337_s28 }
 0xe2a   :  { %v1247_v6 = vpop.permute.xlu0 %1246 }
 0xe2b   :  { %v1249_v9 = vmul.f32 %v1247_v6, %v1241_v7 }
 0xe2d   :  { %1251 = vrot.lane.b32.xlu2 %v1249_v9, %s8337_s28 }
 0xe7f   :  { %v1019_v11 = vpop.permute.xlu1 %1018 }
 0xe80   :  { %v8908_v12 = vadd.f32 %v1019_v11, %v1011_v10 }
 0xe82   :  { %6973 = vtanh.f32 %v8908_v12 }
 0xe87   :  { %v1252_v14 = vpop.permute.xlu2 %1251 }
 0xe88   :  { %v6974_v15 = vpop.eup %6973  ;;  %v8911_v16 = vadd.f32 %v1252_v14, %v1244_v13 }
 0xe89   :  { %1024 = vrot.lane.b32.xlu0 %v6974_v15, %s8336_s26 }
 0xe8a   :  { %6975 = vtanh.f32 %v8911_v16 }
 0xe90   :  { %v6976_v18 = vpop.eup %6975 }
 0xe91   :  { %1257 = vrot.lane.b32.xlu1 %v6976_v18, %s8336_s26 }
 0xefb   :  { %v1025_v19 = vpop.permute.xlu0 %1024 }
 0xefc   :  { %v1027_v20 = vmul.f32 %v1025_v19, %v1008_v57  ;;  %v1332_v19 = vld [vmem:[#allocation2 + $0xa] sm:$0x3] }
 0xefe   :  { %1029 = vrot.lane.b32.xlu2 %v1027_v20, %s8337_s28 }
 0xf03   :  { %v1258_v17 = vpop.permute.xlu1 %1257 }
 0xf04   :  { %v1260_v21 = vmul.f32 %v1258_v17, %v1241_v7 }
 0xf06   :  { %1262 = vrot.lane.b32.xlu0 %v1260_v21, %s8337_s28 }
 0xf58   :  { %v1030_v22 = vpop.permute.xlu2 %1029 }
 0xf59   :  { %1032 = vst.msk [vmem:[#allocation3 + $0xa] sm:$0x3] %vm701_vm5, %v1030_v22  ;;  %6659 = vmatmul.msk.f32.vlgmr.msrb.gmra.mxu0 %vm635_vm6, %v1030_v22 }
 0xf5a   :  { %1479 = vmatpush.msrb.mxu0 %v8863_v23 }
 0xf5c   :  { %1480 = vmatpush.msrb.mxu0 %v8865_v24 }
 0xf5e   :  { %1481 = vmatpush.msrb.mxu0 %v8869_v25 }
 0xf60   :  { %1482 = vmatpush.msrb.mxu0 %v8875_v2 }
 0xf78   :  { %v1263_v3 = vpop.permute.xlu0 %1262 }
 0xf79   :  { %1265 = vst.msk [vmem:[#allocation4 + $0xe] sm:$0x3] %vm701_vm5, %v1263_v3  ;;  %6666 = vmatmul.msk.f32.vlgmr.msra.gmra.mxu0 %vm635_vm6, %v1263_v3 }
 0xfd6   :  { %v1053_v26 = vpop.f32.mrf.mxu0 }
 0xfd7   :  { %v1056_v27 = vadd.f32 %v1053_v26, %v8888_v31 }
 0xfd9   :  { %6977 = vtanh.f32 %v1056_v27  ;;  %v6660_v35 = vmul.f32 -1.442695, %v1056_v27 }
 0xfdf   :  { %v6978_v28 = vpop.eup %6977 }
 0xfe0   :  { %1079 = vrot.lane.b32.xlu1 %v6978_v28, %s8336_s26 }
 0xff6   :  { %v1286_v30 = vpop.f32.mrf.mxu0 }
 0xff7   :  { %v1289_v33 = vadd.f32 %v1286_v30, %v1266_v29 }
 0xff9   :  { %6979 = vtanh.f32 %v1289_v33  ;;  %v6667_v36 = vmul.f32 -1.442695, %v1289_v33 }
 0xffa   :  { %6981 = vpow2.f32 %v6660_v35 }
 0xffb   :  { %6983 = vpow2.f32 %v6667_v36 }
 0xfff   :  { %v6980_v34 = vpop.eup %6979 }
0x1000   :  { %1312 = vrot.lane.b32.xlu2 %v6980_v34, %s8336_s26  ;;  %v6982_v37 = vpop.eup %6981 }
0x1001   :  { %v1060_v38 = vadd.f32 1.0, %v6982_v37  ;;  %v6984_v39 = vpop.eup %6983 }
0x1002   :  { %v1293_v31 = vadd.f32 1.0, %v6984_v39 }
0x1003   :  { %6985 = vrcp.f32 %v1060_v38  ;;  %v1072_v48 = vand.u32 2147483648, %v1060_v38  ;;  %vm1066_vm4 = vweird.f32 %v1060_v38  ;;  %v1070_v49 = vand.u32 2147483647, %v1060_v38 }
0x1004   :  { %6987 = vrcp.f32 %v1293_v31  ;;  %v1305_v57 = vand.u32 2147483648, %v1293_v31  ;;  %vm1299_vm10 = vweird.f32 %v1293_v31  ;;  %v1303_v58 = vand.u32 2147483647, %v1293_v31 }
0x1005   :  { %v1073_v52 = vor.u32 1.1754944e-38, %v1072_v48  ;;  %vm1071_vm8 = vcmp.eq.f32.partialorder %v1070_v49, 8.507059e+37 }
0x1006   :  { %v1306_v60 = vor.u32 1.1754944e-38, %v1305_v57  ;;  %vm1304_vm12 = vcmp.eq.f32.partialorder %v1303_v58, 8.507059e+37 }
0x1009   :  { %v6986_v40 = vpop.eup %6985 }
0x100a   :  { %v1062_v41 = vmul.f32 %v6986_v40, %v1060_v38  ;;  %v6988_v43 = vpop.eup %6987  ;;  %vm1067_vm3 = vweird.f32 %v6986_v40 }
0x100b   :  { %v1295_v45 = vmul.f32 %v6988_v43, %v1293_v31  ;;  %vm1068_vm7 = vmor %vm1066_vm4, %vm1067_vm3  ;;  %vm1300_vm9 = vweird.f32 %v6988_v43 }
0x100c   :  { %v1063_v42 = vsub.f32 1.0, %v1062_v41  ;;  %vm1301_vm11 = vmor %vm1299_vm10, %vm1300_vm9 }
0x100d   :  { %v1296_v47 = vsub.f32 1.0, %v1295_v45 }
0x100e   :  { %v1064_v44 = vmul.f32 %v6986_v40, %v1063_v42 }
0x100f   :  { %v1297_v51 = vmul.f32 %v6988_v43, %v1296_v47 }
0x1010   :  { %v1065_v46 = vadd.f32 %v6986_v40, %v1064_v44 }
0x1011   :  { %v1298_v56 = vadd.f32 %v6988_v43, %v1297_v51 }
0x1012   :  { %v1069_v50 = vsel %vm1068_vm7, %v6986_v40, %v1065_v46 }
0x1013   :  { %v1074_v54 = vsel %vm1071_vm8, %v1073_v52, %v1069_v50  ;;  %v1302_v59 = vsel %vm1301_vm11, %v6988_v43, %v1298_v56  ;;  %v1398_v43 = vld [vmem:[#allocation2 + $0x8] sm:$0x3] }
0x1014   :  { %v1307_v62 = vsel %vm1304_vm12, %v1306_v60, %v1302_v59  ;;  %v1077_v0 = vmul.f32 %v1074_v54, %v8908_v12 }
0x1015   :  { %v1310_v5 = vmul.f32 %v1307_v62, %v8911_v16 }
0x1052   :  { %v1080_v53 = vpop.permute.xlu1 %1079 }
0x1053   :  { %v1082_v55 = vmul.f32 %v1080_v53, %v1074_v54 }
0x1055   :  { %1084 = vrot.lane.b32.xlu0 %v1082_v55, %s8337_s28 }
0x105a   :  { %v1313_v61 = vpop.permute.xlu2 %1312 }
0x105b   :  { %v1315_v63 = vmul.f32 %v1313_v61, %v1307_v62 }
0x105d   :  { %1317 = vrot.lane.b32.xlu1 %v1315_v63, %s8337_s28 }
0x10c7   :  { %v1085_v1 = vpop.permute.xlu0 %1084 }
0x10c8   :  { %v8932_v4 = vadd.f32 %v1085_v1, %v1077_v0 }
0x10ca   :  { %6989 = vtanh.f32 %v8932_v4 }
0x10cf   :  { %v1318_v6 = vpop.permute.xlu1 %1317 }
0x10d0   :  { %v6990_v7 = vpop.eup %6989  ;;  %v1320_v9 = vadd.f32 %v1318_v6, %v1310_v5 }
0x10d1   :  { %1090 = vrot.lane.b32.xlu2 %v6990_v7, %s8336_s26 }
0x10d2   :  { %6991 = vtanh.f32 %v1320_v9 }
0x10d8   :  { %v6992_v10 = vpop.eup %6991 }
0x10d9   :  { %1323 = vrot.lane.b32.xlu0 %v6992_v10, %s8336_s26 }
0x112b   :  { %v1091_v11 = vpop.permute.xlu2 %1090 }
0x112c   :  { %v1093_v13 = vmul.f32 %v1091_v11, %v1074_v54 }
0x112e   :  { %1095 = vrot.lane.b32.xlu1 %v1093_v13, %s8337_s28 }
0x114b   :  { %v1324_v12 = vpop.permute.xlu0 %1323 }
0x114c   :  { %v1326_v14 = vmul.f32 %v1324_v12, %v1307_v62 }
0x114e   :  { %1328 = vrot.lane.b32.xlu2 %v1326_v14, %s8337_s28 }
0x11a0   :  { %v1096_v15 = vpop.permute.xlu1 %1095 }
0x11a1   :  { %1098 = vst.msk [vmem:[#allocation3 + $0xc] sm:$0x3] %vm701_vm5, %v1096_v15  ;;  %6661 = vmatmul.msk.f32.vlgmr.msrb.gmra.mxu1 %vm635_vm6, %v1096_v15 }
0x11a2   :  { %1545 = vmatpush.msrb.mxu1 %v8863_v23 }
0x11a4   :  { %1546 = vmatpush.msrb.mxu1 %v8865_v24 }
0x11a6   :  { %1547 = vmatpush.msrb.mxu1 %v8869_v25 }
0x11a8   :  { %v1329_v16 = vpop.permute.xlu2 %1328  ;;  %1548 = vmatpush.msrb.mxu1 %v8875_v2 }
0x11a9   :  { %1331 = vst.msk [vmem:[#allocation4 + $0xc] sm:$0x3] %vm701_vm5, %v1329_v16  ;;  %6668 = vmatmul.msk.f32.vlgmr.msra.gmra.mxu1 %vm635_vm6, %v1329_v16 }
0x121e   :  { %v8948_v18 = vpop.f32.mrf.mxu1 }
0x1226   :  { %v1352_v20 = vpop.f32.mrf.mxu1 }
0x1227   :  { %v1355_v17 = vadd.f32 %v1352_v20, %v1332_v19 }
0x1229   :  { %6993 = vtanh.f32 %v1355_v17  ;;  %v6669_v23 = vmul.f32 -1.442695, %v1355_v17 }
0x122b   :  { %6995 = vpow2.f32 %v6669_v23 }
0x122f   :  { %v6994_v21 = vpop.eup %6993 }
0x1230   :  { %1378 = vrot.lane.b32.xlu0 %v6994_v21, %s8336_s26 }
0x1231   :  { %v6996_v24 = vpop.eup %6995 }
0x1232   :  { %v1359_v25 = vadd.f32 1.0, %v6996_v24 }
0x1234   :  { %6997 = vrcp.f32 %v1359_v25  ;;  %v1371_v28 = vand.u32 2147483648, %v1359_v25  ;;  %vm1365_vm14 = vweird.f32 %v1359_v25  ;;  %v1369_v29 = vand.u32 2147483647, %v1359_v25 }
0x1236   :  { %v1372_v33 = vor.u32 1.1754944e-38, %v1371_v28  ;;  %vm1370_vm1 = vcmp.eq.f32.partialorder %v1369_v29, 8.507059e+37 }
0x123a   :  { %v6998_v22 = vpop.eup %6997 }
0x123b   :  { %v1361_v2 = vmul.f32 %v6998_v22, %v1359_v25  ;;  %vm1366_vm13 = vweird.f32 %v6998_v22 }
0x123c   :  { %vm1367_vm15 = vmor %vm1365_vm14, %vm1366_vm13 }
0x123d   :  { %v1362_v3 = vsub.f32 1.0, %v1361_v2 }
0x123f   :  { %v1363_v26 = vmul.f32 %v6998_v22, %v1362_v3 }
0x1241   :  { %v1364_v27 = vadd.f32 %v6998_v22, %v1363_v26 }
0x1243   :  { %v1368_v30 = vsel %vm1367_vm15, %v6998_v22, %v1364_v27 }
0x1244   :  { %v1373_v35 = vsel %vm1370_vm1, %v1372_v33, %v1368_v30 }
0x1245   :  { %v1376_v37 = vmul.f32 %v1373_v35, %v1320_v9  ;;  %v1464_v9 = vld [vmem:[#allocation2 + $0x6] sm:$0x3] }
0x12a2   :  { %v1379_v34 = vpop.permute.xlu0 %1378 }
0x12a3   :  { %v1381_v36 = vmul.f32 %v1379_v34, %v1373_v35 }
0x12a5   :  { %1383 = vrot.lane.b32.xlu1 %v1381_v36, %s8337_s28  ;;  %v1732_v36 = vld [vmem:[#allocation13 + $0x10] sm:$0xff] }
0x1317   :  { %v1384_v38 = vpop.permute.xlu1 %1383 }
0x1318   :  { %v1386_v39 = vadd.f32 %v1384_v38, %v1376_v37  ;;  %v1731_v37 = vld [vmem:[#allocation13 + $0x8] sm:$0xff]  ;;  %v1730_v38 = vld [vmem:[#allocation13] sm:$0xff] }
0x131a   :  { %6999 = vtanh.f32 %v1386_v39 }
0x1320   :  { %v7000_v31 = vpop.eup %6999 }
0x1321   :  { %1389 = vrot.lane.b32.xlu2 %v7000_v31, %s8336_s26  ;;  %v8968_v31 = vld [vmem:[#allocation3] sm:$0xff] }
0x137b   :  { %v1390_v40 = vpop.permute.xlu2 %1389 }
0x137c   :  { %v1392_v41 = vmul.f32 %v1390_v40, %v1373_v35  ;;  %v1733_v35 = vld [vmem:[#allocation13 + $0x18] sm:$0xff]  ;;  %v1530_v40 = vld [vmem:[#allocation2 + $0x4] sm:$0x3] }
0x137d   :  { %1785 = vmatpush.msra.mxu1 %v1733_v35 }
0x137e   :  { %1394 = vrot.lane.b32.xlu0 %v1392_v41, %s8337_s28 }
0x137f   :  { %1786 = vmatpush.msra.mxu1 %v1732_v36 }
0x1381   :  { %1787 = vmatpush.msra.mxu1 %v1731_v37 }
0x1383   :  { %1788 = vmatpush.msra.mxu1 %v1730_v38 }
0x13f0   :  { %v1395_v42 = vpop.permute.xlu0 %1394 }
0x13f1   :  { %1397 = vst.msk [vmem:[#allocation4 + $0xa] sm:$0x3] %vm701_vm5, %v1395_v42  ;;  %6670 = vmatmul.msk.f32.vlgmr.msrb.gmra.mxu3 %vm635_vm6, %v1395_v42 }
0x1474   :  { %v1418_v44 = vpop.f32.mrf.mxu3 }
0x1475   :  { %v1421_v45 = vadd.f32 %v1418_v44, %v1398_v43 }
0x1477   :  { %7001 = vtanh.f32 %v1421_v45  ;;  %v6671_v47 = vmul.f32 -1.442695, %v1421_v45 }
0x1479   :  { %7003 = vpow2.f32 %v6671_v47 }
0x147d   :  { %v7002_v46 = vpop.eup %7001 }
0x147e   :  { %1444 = vrot.lane.b32.xlu1 %v7002_v46, %s8336_s26 }
0x147f   :  { %v7004_v48 = vpop.eup %7003 }
0x1480   :  { %v1425_v49 = vadd.f32 1.0, %v7004_v48 }
0x1482   :  { %7005 = vrcp.f32 %v1425_v49  ;;  %v1437_v55 = vand.u32 2147483648, %v1425_v49  ;;  %vm1431_vm3 = vweird.f32 %v1425_v49  ;;  %v1435_v56 = vand.u32 2147483647, %v1425_v49 }
0x1484   :  { %v1438_v58 = vor.u32 1.1754944e-38, %v1437_v55  ;;  %vm1436_vm7 = vcmp.eq.f32.partialorder %v1435_v56, 8.507059e+37 }
0x1488   :  { %v7006_v50 = vpop.eup %7005 }
0x1489   :  { %v1427_v51 = vmul.f32 %v7006_v50, %v1425_v49  ;;  %vm1432_vm2 = vweird.f32 %v7006_v50 }
0x148a   :  { %vm1433_vm4 = vmor %vm1431_vm3, %vm1432_vm2 }
0x148b   :  { %v1428_v52 = vsub.f32 1.0, %v1427_v51 }
0x148d   :  { %v1429_v53 = vmul.f32 %v7006_v50, %v1428_v52 }
0x148f   :  { %v1430_v54 = vadd.f32 %v7006_v50, %v1429_v53 }
0x1491   :  { %v1434_v57 = vsel %vm1433_vm4, %v7006_v50, %v1430_v54 }
0x1492   :  { %v1439_v60 = vsel %vm1436_vm7, %v1438_v58, %v1434_v57 }
0x1493   :  { %v1442_v62 = vmul.f32 %v1439_v60, %v1386_v39 }
0x14f0   :  { %v1445_v59 = vpop.permute.xlu1 %1444 }
0x14f1   :  { %v1447_v61 = vmul.f32 %v1445_v59, %v1439_v60 }
0x14f3   :  { %1449 = vrot.lane.b32.xlu2 %v1447_v61, %s8337_s28 }
0x154d   :  { %v1450_v63 = vpop.permute.xlu2 %1449 }
0x154e   :  { %v1452_v0 = vadd.f32 %v1450_v63, %v1442_v62 }
0x1550   :  { %7007 = vtanh.f32 %v1452_v0 }
0x1556   :  { %v7008_v1 = vpop.eup %7007 }
0x1557   :  { %1455 = vrot.lane.b32.xlu0 %v7008_v1, %s8336_s26 }
0x15c9   :  { %v1456_v5 = vpop.permute.xlu0 %1455 }
0x15ca   :  { %v1458_v6 = vmul.f32 %v1456_v5, %v1439_v60  ;;  %v1596_v5 = vld [vmem:[#allocation2 + $0x2] sm:$0x3] }
0x15cc   :  { %1460 = vrot.lane.b32.xlu1 %v1458_v6, %s8337_s28 }
0x163e   :  { %v1461_v7 = vpop.permute.xlu1 %1460 }
0x163f   :  { %1463 = vst.msk [vmem:[#allocation4 + $0x8] sm:$0x3] %vm701_vm5, %v1461_v7  ;;  %6672 = vmatmul.msk.f32.vlgmr.msrb.gmra.mxu0 %vm635_vm6, %v1461_v7 }
0x16bc   :  { %v1484_v10 = vpop.f32.mrf.mxu0 }
0x16bd   :  { %v1487_v11 = vadd.f32 %v1484_v10, %v1464_v9 }
0x16bf   :  { %7009 = vtanh.f32 %v1487_v11  ;;  %v6673_v12 = vmul.f32 -1.442695, %v1487_v11 }
0x16c1   :  { %7011 = vpow2.f32 %v6673_v12 }
0x16c5   :  { %v7010_v13 = vpop.eup %7009 }
0x16c6   :  { %1510 = vrot.lane.b32.xlu2 %v7010_v13, %s8336_s26 }
0x16c7   :  { %v7012_v14 = vpop.eup %7011 }
0x16c8   :  { %v1491_v15 = vadd.f32 1.0, %v7012_v14 }
0x16ca   :  { %7013 = vrcp.f32 %v1491_v15  ;;  %v1503_v23 = vand.u32 2147483648, %v1491_v15  ;;  %vm1497_vm9 = vweird.f32 %v1491_v15  ;;  %v1501_v24 = vand.u32 2147483647, %v1491_v15 }
0x16cc   :  { %v1504_v22 = vor.u32 1.1754944e-38, %v1503_v23  ;;  %vm1502_vm11 = vcmp.eq.f32.partialorder %v1501_v24, 8.507059e+37 }
0x16d0   :  { %v7014_v16 = vpop.eup %7013 }
0x16d1   :  { %v1493_v19 = vmul.f32 %v7014_v16, %v1491_v15  ;;  %vm1498_vm8 = vweird.f32 %v7014_v16 }
0x16d2   :  { %vm1499_vm10 = vmor %vm1497_vm9, %vm1498_vm8 }
0x16d3   :  { %v1494_v20 = vsub.f32 1.0, %v1493_v19 }
0x16d5   :  { %v1495_v17 = vmul.f32 %v7014_v16, %v1494_v20 }
0x16d7   :  { %v1496_v21 = vadd.f32 %v7014_v16, %v1495_v17 }
0x16d9   :  { %v1500_v25 = vsel %vm1499_vm10, %v7014_v16, %v1496_v21 }
0x16da   :  { %v1505_v3 = vsel %vm1502_vm11, %v1504_v22, %v1500_v25 }
0x16db   :  { %v1508_v27 = vmul.f32 %v1505_v3, %v1452_v0 }
0x1720   :  { %v1511_v2 = vpop.permute.xlu2 %1510 }
0x1721   :  { %v1513_v26 = vmul.f32 %v1511_v2, %v1505_v3 }
0x1723   :  { %1515 = vrot.lane.b32.xlu0 %v1513_v26, %s8337_s28 }
0x1795   :  { %v1516_v28 = vpop.permute.xlu0 %1515 }
0x1796   :  { %v1518_v29 = vadd.f32 %v1516_v28, %v1508_v27 }
0x1798   :  { %7015 = vtanh.f32 %v1518_v29 }
0x179e   :  { %v7016_v30 = vpop.eup %7015 }
0x179f   :  { %1521 = vrot.lane.b32.xlu1 %v7016_v30, %s8336_s26 }
0x1811   :  { %v1522_v33 = vpop.permute.xlu1 %1521 }
0x1812   :  { %v1524_v34 = vmul.f32 %v1522_v33, %v1505_v3  ;;  %v1662_v33 = vld [vmem:[#allocation2] sm:$0x3] }
0x1814   :  { %1526 = vrot.lane.b32.xlu2 %v1524_v34, %s8337_s28 }
0x186e   :  { %v1527_v39 = vpop.permute.xlu2 %1526 }
0x186f   :  { %1529 = vst.msk [vmem:[#allocation4 + $0x6] sm:$0x3] %vm701_vm5, %v1527_v39  ;;  %6674 = vmatmul.msk.f32.vlgmr.msrb.gmra.mxu1 %vm635_vm6, %v1527_v39 }
0x1877   :  { %6682 = vmatmul.msk.f32.vlgmr.msra.gmra.mxu1 %vm635_vm6, %v8968_v31 }
0x18ec   :  { %v1550_v41 = vpop.f32.mrf.mxu1 }
0x18ed   :  { %v1553_v42 = vadd.f32 %v1550_v41, %v1530_v40 }
0x18ef   :  { %7017 = vtanh.f32 %v1553_v42  ;;  %v6675_v44 = vmul.f32 -1.442695, %v1553_v42 }
0x18f1   :  { %7019 = vpow2.f32 %v6675_v44 }
0x18f5   :  { %v7018_v43 = vpop.eup %7017 }
0x18f6   :  { %1576 = vrot.lane.b32.xlu0 %v7018_v43, %s8336_s26 }
0x18f7   :  { %v7020_v45 = vpop.eup %7019 }
0x18f8   :  { %v1557_v46 = vadd.f32 1.0, %v7020_v45 }
0x18fa   :  { %7021 = vrcp.f32 %v1557_v46  ;;  %v1569_v52 = vand.u32 2147483648, %v1557_v46  ;;  %vm1563_vm13 = vweird.f32 %v1557_v46  ;;  %v1567_v53 = vand.u32 2147483647, %v1557_v46 }
0x18fc   :  { %v1570_v55 = vor.u32 1.1754944e-38, %v1569_v52  ;;  %vm1568_vm15 = vcmp.eq.f32.partialorder %v1567_v53, 8.507059e+37 }
0x1900   :  { %v7022_v47 = vpop.eup %7021 }
0x1901   :  { %v1559_v48 = vmul.f32 %v7022_v47, %v1557_v46  ;;  %vm1564_vm12 = vweird.f32 %v7022_v47 }
0x1902   :  { %vm1565_vm14 = vmor %vm1563_vm13, %vm1564_vm12 }
0x1903   :  { %v1560_v49 = vsub.f32 1.0, %v1559_v48 }
0x1905   :  { %v1561_v50 = vmul.f32 %v7022_v47, %v1560_v49 }
0x1907   :  { %v1562_v51 = vadd.f32 %v7022_v47, %v1561_v50 }
0x1909   :  { %v1566_v54 = vsel %vm1565_vm14, %v7022_v47, %v1562_v51 }
0x190a   :  { %v1571_v57 = vsel %vm1568_vm15, %v1570_v55, %v1566_v54 }
0x190b   :  { %v1574_v59 = vmul.f32 %v1571_v57, %v1518_v29 }
0x1968   :  { %v1577_v56 = vpop.permute.xlu0 %1576 }
0x1969   :  { %v1579_v58 = vmul.f32 %v1577_v56, %v1571_v57 }
0x196b   :  { %1581 = vrot.lane.b32.xlu1 %v1579_v58, %s8337_s28  ;;  %v1737_v58 = vld [vmem:[#allocation15 + $0x18] sm:$0xff] }
0x196c   :  { %1756 = vmatpush.msra.mxu0 %v1737_v58 }
0x19dd   :  { %v1582_v60 = vpop.permute.xlu1 %1581 }
0x19de   :  { %v1584_v61 = vadd.f32 %v1582_v60, %v1574_v59  ;;  %v1736_v59 = vld [vmem:[#allocation15 + $0x10] sm:$0xff]  ;;  %v8988_v60 = vld [vmem:[#allocation16 + $0x18] sm:$0xff] }
0x19df   :  { %1821 = vmatpush.msra.mxu2 %v8988_v60  ;;  %1887 = vmatpush.msrb.mxu3 %v8988_v60 }
0x19e0   :  { %7023 = vtanh.f32 %v1584_v61  ;;  %1757 = vmatpush.msra.mxu0 %v1736_v59  ;;  %2151 = vmatpush.msrb.mxu1 %v8988_v60 }
0x19e6   :  { %v7024_v62 = vpop.eup %7023 }
0x19e7   :  { %1587 = vrot.lane.b32.xlu2 %v7024_v62, %s8336_s26  ;;  %v1734_v62 = vld [vmem:[#allocation15] sm:$0xff] }
0x1a41   :  { %v1588_v63 = vpop.permute.xlu2 %1587 }
0x1a42   :  { %v1590_v0 = vmul.f32 %v1588_v63, %v1571_v57  ;;  %v8993_v63 = vld [vmem:[#allocation16 + $0x10] sm:$0xff] }
0x1a43   :  { %1822 = vmatpush.msra.mxu2 %v8993_v63  ;;  %1888 = vmatpush.msrb.mxu3 %v8993_v63 }
0x1a44   :  { %1592 = vrot.lane.b32.xlu0 %v1590_v0, %s8337_s28  ;;  %v8995_v0 = vld [vmem:[#allocation16 + $0x8] sm:$0xff]  ;;  %2152 = vmatpush.msrb.mxu1 %v8993_v63 }
0x1a45   :  { %1823 = vmatpush.msra.mxu2 %v8995_v0  ;;  %1889 = vmatpush.msrb.mxu3 %v8995_v0 }
0x1a46   :  { %2153 = vmatpush.msrb.mxu1 %v8995_v0 }
0x1ab6   :  { %v1593_v1 = vpop.permute.xlu0 %1592 }
0x1ab7   :  { %1595 = vst.msk [vmem:[#allocation4 + $0x4] sm:$0x3] %vm701_vm5, %v1593_v1  ;;  %6676 = vmatmul.msk.f32.vlgmr.msrb.gmra.mxu2 %vm635_vm6, %v1593_v1  ;;  %v9000_v1 = vld [vmem:[#allocation16] sm:$0xff] }
0x1ab8   :  { %1824 = vmatpush.msra.mxu2 %v9000_v1  ;;  %1890 = vmatpush.msrb.mxu3 %v9000_v1 }
0x1ab9   :  { %2154 = vmatpush.msrb.mxu1 %v9000_v1 }
0x1aba   :  { %1953 = vmatpush.msrb.mxu2 %v8988_v60 }
0x1abc   :  { %1954 = vmatpush.msrb.mxu2 %v8993_v63 }
0x1abe   :  { %1955 = vmatpush.msrb.mxu2 %v8995_v0 }
0x1abf   :  { %1825 = vmatmul.f32.vlgmr.msra.gmra.mxu2 %v8335_v8 }
0x1ac0   :  { %1956 = vmatpush.msrb.mxu2 %v9000_v1 }
0x1ac2   :  { %2217 = vmatpush.msra.mxu2 %v8988_v60 }
0x1ac4   :  { %2218 = vmatpush.msra.mxu2 %v8993_v63 }
0x1ac6   :  { %2219 = vmatpush.msra.mxu2 %v8995_v0 }
0x1ac8   :  { %2220 = vmatpush.msra.mxu2 %v9000_v1 }
0x1b3a   :  { %v1616_v6 = vpop.f32.mrf.mxu2 }
0x1b3b   :  { %v1619_v7 = vadd.f32 %v1616_v6, %v1596_v5 }
0x1b3d   :  { %7025 = vtanh.f32 %v1619_v7  ;;  %v6677_v10 = vmul.f32 -1.442695, %v1619_v7  ;;  %v9030_v7 = vld [vmem:[#allocation4 + $0x8] sm:$0xff] }
0x1b3f   :  { %7027 = vpow2.f32 %v6677_v10  ;;  %v1790_v10 = vpop.f32.mrf.mxu1 }
0x1b43   :  { %v7026_v9 = vpop.eup %7025 }
0x1b44   :  { %1642 = vrot.lane.b32.xlu1 %v7026_v9, %s8336_s26  ;;  %v9035_v9 = vld [vmem:[%s9930_s17] ss:$0 sm:$0xff] }
0x1b45   :  { %v7028_v11 = vpop.eup %7027 }
0x1b46   :  { %v1623_v13 = vadd.f32 1.0, %v7028_v11 }
0x1b48   :  { %7029 = vrcp.f32 %v1623_v13  ;;  %v1635_v20 = vand.u32 2147483648, %v1623_v13  ;;  %vm1629_vm2 = vweird.f32 %v1623_v13  ;;  %v1633_v17 = vand.u32 2147483647, %v1623_v13 }
0x1b4a   :  { %v1636_v23 = vor.u32 1.1754944e-38, %v1635_v20  ;;  %vm1634_vm4 = vcmp.eq.f32.partialorder %v1633_v17, 8.507059e+37 }
0x1b4e   :  { %v7030_v12 = vpop.eup %7029 }
0x1b4f   :  { %v1625_v14 = vmul.f32 %v7030_v12, %v1623_v13  ;;  %vm1630_vm1 = vweird.f32 %v7030_v12 }
0x1b50   :  { %vm1631_vm3 = vmor %vm1629_vm2, %vm1630_vm1 }
0x1b51   :  { %v1626_v15 = vsub.f32 1.0, %v1625_v14  ;;  %v1826_v14 = vpop.f32.mrf.mxu2 }
0x1b53   :  { %v1627_v16 = vmul.f32 %v7030_v12, %v1626_v15 }
0x1b55   :  { %v1628_v19 = vadd.f32 %v7030_v12, %v1627_v16 }
0x1b57   :  { %v1632_v21 = vsel %vm1631_vm3, %v7030_v12, %v1628_v19 }
0x1b58   :  { %v1637_v25 = vsel %vm1634_vm4, %v1636_v23, %v1632_v21 }
0x1b59   :  { %v1640_v2 = vmul.f32 %v1637_v25, %v1584_v61  ;;  %v1735_v61 = vld [vmem:[#allocation15 + $0x8] sm:$0xff] }
0x1b5a   :  { %1758 = vmatpush.msra.mxu0 %v1735_v61 }
0x1b5c   :  { %1759 = vmatpush.msra.mxu0 %v1734_v62 }
0x1b5e   :  { %2085 = vmatpush.msrb.mxu0 %v8988_v60 }
0x1b60   :  { %2086 = vmatpush.msrb.mxu0 %v8993_v63 }
0x1b62   :  { %2087 = vmatpush.msrb.mxu0 %v8995_v0 }
0x1b64   :  { %2088 = vmatpush.msrb.mxu0 %v9000_v1 }
0x1bb6   :  { %v1643_v24 = vpop.permute.xlu1 %1642 }
0x1bb7   :  { %v1645_v22 = vmul.f32 %v1643_v24, %v1637_v25 }
0x1bb9   :  { %1647 = vrot.lane.b32.xlu2 %v1645_v22, %s8337_s28 }
0x1c13   :  { %v1648_v3 = vpop.permute.xlu2 %1647 }
0x1c14   :  { %v1650_v26 = vadd.f32 %v1648_v3, %v1640_v2 }
0x1c16   :  { %7031 = vtanh.f32 %v1650_v26 }
0x1c1c   :  { %v7032_v27 = vpop.eup %7031 }
0x1c1d   :  { %1653 = vrot.lane.b32.xlu0 %v7032_v27, %s8336_s26 }
0x1c8f   :  { %v1654_v28 = vpop.permute.xlu0 %1653 }
0x1c90   :  { %v1656_v29 = vmul.f32 %v1654_v28, %v1637_v25 }
0x1c92   :  { %1658 = vrot.lane.b32.xlu1 %v1656_v29, %s8337_s28 }
0x1d04   :  { %v1659_v30 = vpop.permute.xlu1 %1658 }
0x1d05   :  { %1661 = vst.msk [vmem:[#allocation4 + $0x2] sm:$0x3] %vm701_vm5, %v1659_v30  ;;  %6678 = vmatmul.msk.f32.vlgmr.msra.gmra.mxu3 %vm635_vm6, %v1659_v30 }
0x1d06   :  { %2019 = vmatpush.msra.mxu3 %v8988_v60 }
0x1d08   :  { %2020 = vmatpush.msra.mxu3 %v8993_v63 }
0x1d0a   :  { %2021 = vmatpush.msra.mxu3 %v8995_v0 }
0x1d0c   :  { %2022 = vmatpush.msra.mxu3 %v9000_v1 }
0x1d88   :  { %v1682_v34 = vpop.f32.mrf.mxu3 }
0x1d89   :  { %v1685_v35 = vadd.f32 %v1682_v34, %v1662_v33 }
0x1d8b   :  { %7033 = vtanh.f32 %v1685_v35  ;;  %v6679_v37 = vmul.f32 -1.442695, %v1685_v35 }
0x1d8d   :  { %7035 = vpow2.f32 %v6679_v37 }
0x1d91   :  { %v7034_v36 = vpop.eup %7033 }
0x1d92   :  { %1708 = vrot.lane.b32.xlu2 %v7034_v36, %s8336_s26 }
0x1d93   :  { %v7036_v38 = vpop.eup %7035 }
0x1d94   :  { %v1689_v39 = vadd.f32 1.0, %v7036_v38 }
0x1d96   :  { %7037 = vrcp.f32 %v1689_v39  ;;  %v1701_v45 = vand.u32 2147483648, %v1689_v39  ;;  %vm1695_vm8 = vweird.f32 %v1689_v39  ;;  %v1699_v46 = vand.u32 2147483647, %v1689_v39 }
0x1d98   :  { %v1702_v48 = vor.u32 1.1754944e-38, %v1701_v45  ;;  %vm1700_vm10 = vcmp.eq.f32.partialorder %v1699_v46, 8.507059e+37 }
0x1d9c   :  { %v7038_v40 = vpop.eup %7037 }
0x1d9d   :  { %v1691_v41 = vmul.f32 %v7038_v40, %v1689_v39  ;;  %vm1696_vm7 = vweird.f32 %v7038_v40 }
0x1d9e   :  { %vm1697_vm9 = vmor %vm1695_vm8, %vm1696_vm7 }
0x1d9f   :  { %v1692_v42 = vsub.f32 1.0, %v1691_v41 }
0x1da1   :  { %v1693_v43 = vmul.f32 %v7038_v40, %v1692_v42 }
0x1da3   :  { %v1694_v44 = vadd.f32 %v7038_v40, %v1693_v43 }
0x1da5   :  { %v1698_v47 = vsel %vm1697_vm9, %v7038_v40, %v1694_v44 }
0x1da6   :  { %v1703_v50 = vsel %vm1700_vm10, %v1702_v48, %v1698_v47 }
0x1da7   :  { %v1706_v52 = vmul.f32 %v1703_v50, %v1650_v26 }
0x1dec   :  { %v1709_v49 = vpop.permute.xlu2 %1708 }
0x1ded   :  { %v1711_v51 = vmul.f32 %v1709_v49, %v1703_v50 }
0x1def   :  { %1713 = vrot.lane.b32.xlu0 %v1711_v51, %s8337_s28 }
0x1e61   :  { %v1714_v53 = vpop.permute.xlu0 %1713 }
0x1e62   :  { %v1716_v54 = vadd.f32 %v1714_v53, %v1706_v52 }
0x1e64   :  { %7039 = vtanh.f32 %v1716_v54 }
0x1e6a   :  { %v7040_v55 = vpop.eup %7039 }
0x1e6b   :  { %1719 = vrot.lane.b32.xlu1 %v7040_v55, %s8336_s26 }
0x1edd   :  { %v1720_v56 = vpop.permute.xlu1 %1719 }
0x1ede   :  { %v1722_v57 = vmul.f32 %v1720_v56, %v1703_v50 }
0x1ee0   :  { %1724 = vrot.lane.b32.xlu2 %v1722_v57, %s8337_s28 }
0x1f3a   :  { %v1725_v5 = vpop.permute.xlu2 %1724 }
0x1f3b   :  { %1727 = vst.msk [vmem:[#allocation4] sm:$0x3] %vm701_vm5, %v1725_v5 }
0x1f42   :  { %v9026_v6 = vld [vmem:[#allocation4] sm:$0xff] }
0x1f43   :  { %6680 = vmatmul.msk.f32.vlgmr.msra.gmra.mxu0 %vm635_vm6, %v9026_v6 }
0x1f4b   :  { %6681 = vmatmul.msk.f32.gmra.mxu0 %vm635_vm6, %v9030_v7 }
0x1fc0   :  { %v1761_v11 = vpop.f32.mrf.mxu0 }
0x1fc1   :  { %v1791_v13 = vadd.f32 %v1790_v10, %v1761_v11 }
0x1fc3   :  { %v1800_v12 = vadd.f32 %v9035_v9, %v1791_v13 }
0x1fc5   :  { %1802 = vst [vmem:[#allocation2] sm:$0xff] %v1800_v12 }
0x1fcc   :  { %v1808_v15 = vld [vmem:[#allocation2] sm:$0x3]  ;;  %v1872_v41 = vld [vmem:[#allocation2 + $0x2] sm:$0x3]  ;;  %v1938_v10 = vld [vmem:[#allocation2 + $0x4] sm:$0x3] }
0x1fcd   :  { %v1829_v16 = vadd.f32 %v1826_v14, %v1808_v15 }
0x1fcf   :  { %7041 = vtanh.f32 %v1829_v16  ;;  %v6684_v20 = vmul.f32 -1.442695, %v1829_v16 }
0x1fd1   :  { %7043 = vpow2.f32 %v6684_v20 }
0x1fd5   :  { %v7042_v19 = vpop.eup %7041 }
0x1fd6   :  { %1852 = vrot.lane.b32.xlu0 %v7042_v19, %s8336_s26 }
0x1fd7   :  { %v7044_v17 = vpop.eup %7043 }
0x1fd8   :  { %v1833_v21 = vadd.f32 1.0, %v7044_v17 }
0x1fda   :  { %7045 = vrcp.f32 %v1833_v21  ;;  %v1845_v3 = vand.u32 2147483648, %v1833_v21  ;;  %vm1839_vm12 = vweird.f32 %v1833_v21  ;;  %v1843_v26 = vand.u32 2147483647, %v1833_v21 }
0x1fdc   :  { %v1846_v28 = vor.u32 1.1754944e-38, %v1845_v3  ;;  %vm1844_vm14 = vcmp.eq.f32.partialorder %v1843_v26, 8.507059e+37  ;;  %v1122_v3 = vadd.f32 %v8948_v18, %v8890_v32 }
0x1fe0   :  { %v7046_v23 = vpop.eup %7045 }
0x1fe1   :  { %v1835_v24 = vmul.f32 %v7046_v23, %v1833_v21  ;;  %vm1840_vm11 = vweird.f32 %v7046_v23 }
0x1fe2   :  { %vm1841_vm13 = vmor %vm1839_vm12, %vm1840_vm11 }
0x1fe3   :  { %v1836_v25 = vsub.f32 1.0, %v1835_v24 }
0x1fe5   :  { %v1837_v22 = vmul.f32 %v7046_v23, %v1836_v25 }
0x1fe7   :  { %v1838_v2 = vadd.f32 %v7046_v23, %v1837_v22 }
0x1fe9   :  { %v1842_v27 = vsel %vm1841_vm13, %v7046_v23, %v1838_v2 }
0x1fea   :  { %v1847_v30 = vsel %vm1844_vm14, %v1846_v28, %v1842_v27 }
0x1feb   :  { %v1850_v34 = vmul.f32 0.0, %v1847_v30 }
0x2048   :  { %v1853_v29 = vpop.permute.xlu0 %1852 }
0x2049   :  { %v1855_v33 = vmul.f32 %v1853_v29, %v1847_v30 }
0x204b   :  { %1857 = vrot.lane.b32.xlu1 %v1855_v33, %s8337_s28 }
0x20bd   :  { %v1858_v35 = vpop.permute.xlu1 %1857 }
0x20be   :  { %v1860_v36 = vadd.f32 %v1858_v35, %v1850_v34 }
0x20c0   :  { %7047 = vtanh.f32 %v1860_v36 }
0x20c6   :  { %v7048_v37 = vpop.eup %7047 }
0x20c7   :  { %1863 = vrot.lane.b32.xlu2 %v7048_v37, %s8336_s26 }
0x2121   :  { %v1864_v38 = vpop.permute.xlu2 %1863 }
0x2122   :  { %v1866_v39 = vmul.f32 %v1864_v38, %v1847_v30 }
0x2124   :  { %1868 = vrot.lane.b32.xlu0 %v1866_v39, %s8337_s28 }
0x2196   :  { %v1869_v40 = vpop.permute.xlu0 %1868 }
0x2197   :  { %1871 = vst.msk [vmem:[#allocation5] sm:$0x3] %vm701_vm5, %v1869_v40  ;;  %6685 = vmatmul.msk.f32.vlgmr.msrb.gmra.mxu3 %vm635_vm6, %v1869_v40 }
0x2198   :  { %2283 = vmatpush.msrb.mxu3 %v8988_v60 }
0x219a   :  { %2284 = vmatpush.msrb.mxu3 %v8993_v63 }
0x219c   :  { %2285 = vmatpush.msrb.mxu3 %v8995_v0 }
0x219e   :  { %2286 = vmatpush.msrb.mxu3 %v9000_v1 }
0x221a   :  { %v1892_v42 = vpop.f32.mrf.mxu3 }
0x221b   :  { %v1895_v43 = vadd.f32 %v1892_v42, %v1872_v41 }
0x221d   :  { %7049 = vtanh.f32 %v1895_v43  ;;  %v6686_v45 = vmul.f32 -1.442695, %v1895_v43 }
0x221f   :  { %7051 = vpow2.f32 %v6686_v45 }
0x2223   :  { %v7050_v44 = vpop.eup %7049 }
0x2224   :  { %1918 = vrot.lane.b32.xlu1 %v7050_v44, %s8336_s26 }
0x2225   :  { %v7052_v46 = vpop.eup %7051 }
0x2226   :  { %v1899_v47 = vadd.f32 1.0, %v7052_v46 }
0x2228   :  { %7053 = vrcp.f32 %v1899_v47  ;;  %v1911_v53 = vand.u32 2147483648, %v1899_v47  ;;  %vm1905_vm1 = vweird.f32 %v1899_v47  ;;  %v1909_v54 = vand.u32 2147483647, %v1899_v47 }
0x222a   :  { %v1912_v56 = vor.u32 1.1754944e-38, %v1911_v53  ;;  %vm1910_vm3 = vcmp.eq.f32.partialorder %v1909_v54, 8.507059e+37 }
0x222e   :  { %v7054_v48 = vpop.eup %7053 }
0x222f   :  { %v1901_v49 = vmul.f32 %v7054_v48, %v1899_v47  ;;  %vm1906_vm15 = vweird.f32 %v7054_v48 }
0x2230   :  { %vm1907_vm2 = vmor %vm1905_vm1, %vm1906_vm15 }
0x2231   :  { %v1902_v50 = vsub.f32 1.0, %v1901_v49 }
0x2233   :  { %v1903_v51 = vmul.f32 %v7054_v48, %v1902_v50 }
0x2235   :  { %v1904_v52 = vadd.f32 %v7054_v48, %v1903_v51 }
0x2237   :  { %v1908_v55 = vsel %vm1907_vm2, %v7054_v48, %v1904_v52  ;;  %v2004_v52 = vld [vmem:[#allocation2 + $0x6] sm:$0x3] }
0x2238   :  { %v1913_v58 = vsel %vm1910_vm3, %v1912_v56, %v1908_v55 }
0x2239   :  { %v1916_v60 = vmul.f32 %v1913_v58, %v1860_v36  ;;  %v6662_v36 = vmul.f32 -1.442695, %v1122_v3 }
0x2296   :  { %v1919_v57 = vpop.permute.xlu1 %1918 }
0x2297   :  { %v1921_v59 = vmul.f32 %v1919_v57, %v1913_v58 }
0x2299   :  { %1923 = vrot.lane.b32.xlu2 %v1921_v59, %s8337_s28 }
0x22f3   :  { %v1924_v61 = vpop.permute.xlu2 %1923 }
0x22f4   :  { %v1926_v62 = vadd.f32 %v1924_v61, %v1916_v60 }
0x22f6   :  { %7055 = vtanh.f32 %v1926_v62 }
0x22fc   :  { %v7056_v63 = vpop.eup %7055 }
0x22fd   :  { %1929 = vrot.lane.b32.xlu0 %v7056_v63, %s8336_s26 }
0x236f   :  { %v1930_v0 = vpop.permute.xlu0 %1929 }
0x2370   :  { %v1932_v1 = vmul.f32 %v1930_v0, %v1913_v58 }
0x2372   :  { %1934 = vrot.lane.b32.xlu1 %v1932_v1, %s8337_s28 }
0x23e4   :  { %v1935_v5 = vpop.permute.xlu1 %1934 }
0x23e5   :  { %1937 = vst.msk [vmem:[#allocation5 + $0x2] sm:$0x3] %vm701_vm5, %v1935_v5  ;;  %6687 = vmatmul.msk.f32.vlgmr.msrb.gmra.mxu2 %vm635_vm6, %v1935_v5 }
0x2468   :  { %v1958_v11 = vpop.f32.mrf.mxu2 }
0x2469   :  { %v1961_v13 = vadd.f32 %v1958_v11, %v1938_v10 }
0x246b   :  { %7057 = vtanh.f32 %v1961_v13  ;;  %v6688_v14 = vmul.f32 -1.442695, %v1961_v13 }
0x246d   :  { %7059 = vpow2.f32 %v6688_v14 }
0x2471   :  { %v7058_v12 = vpop.eup %7057 }
0x2472   :  { %1984 = vrot.lane.b32.xlu2 %v7058_v12, %s8336_s26 }
0x2473   :  { %v7060_v15 = vpop.eup %7059 }
0x2474   :  { %v1965_v16 = vadd.f32 1.0, %v7060_v15 }
0x2476   :  { %7061 = vrcp.f32 %v1965_v16  ;;  %v1977_v24 = vand.u32 2147483648, %v1965_v16  ;;  %vm1971_vm7 = vweird.f32 %v1965_v16  ;;  %v1975_v25 = vand.u32 2147483647, %v1965_v16 }
0x2477   :  { %7063 = vtanh.f32 %v1122_v3 }
0x2478   :  { %v1978_v2 = vor.u32 1.1754944e-38, %v1977_v24  ;;  %vm1976_vm9 = vcmp.eq.f32.partialorder %v1975_v25, 8.507059e+37 }
0x247c   :  { %v7062_v19 = vpop.eup %7061 }
0x247d   :  { %v1967_v20 = vmul.f32 %v7062_v19, %v1965_v16  ;;  %vm1972_vm4 = vweird.f32 %v7062_v19  ;;  %v7064_v29 = vpop.eup %7063 }
0x247e   :  { %vm1973_vm8 = vmor %vm1971_vm7, %vm1972_vm4 }
0x247f   :  { %v1968_v17 = vsub.f32 1.0, %v1967_v20 }
0x2481   :  { %v1969_v21 = vmul.f32 %v7062_v19, %v1968_v17 }
0x2483   :  { %v1970_v23 = vadd.f32 %v7062_v19, %v1969_v21 }
0x2485   :  { %v1974_v22 = vsel %vm1973_vm8, %v7062_v19, %v1970_v23 }
0x2486   :  { %v1979_v27 = vsel %vm1976_vm9, %v1978_v2, %v1974_v22 }
0x2487   :  { %v1982_v30 = vmul.f32 %v1979_v27, %v1926_v62 }
0x24cc   :  { %v1985_v26 = vpop.permute.xlu2 %1984 }
0x24cd   :  { %v1987_v28 = vmul.f32 %v1985_v26, %v1979_v27  ;;  %v1764_v26 = vpop.f32.mrf.mxu0 }
0x24cf   :  { %1989 = vrot.lane.b32.xlu0 %v1987_v28, %s8337_s28 }
0x24d7   :  { %1145 = vrot.lane.b32.xlu0 %v7064_v29, %s8336_s26 }
0x2541   :  { %v1990_v33 = vpop.permute.xlu0 %1989 }
0x2542   :  { %v9059_v34 = vadd.f32 %v1990_v33, %v1982_v30  ;;  %v2343_v30 = vld [vmem:[#allocation19 + $0x18] sm:$0xff]  ;;  %v2342_v33 = vld [vmem:[#allocation19 + $0x10] sm:$0xff] }
0x2543   :  { %2356 = vmatpush.msra.mxu0 %v2343_v30 }
0x2544   :  { %7065 = vtanh.f32 %v9059_v34 }
0x2545   :  { %7067 = vpow2.f32 %v6662_v36  ;;  %2357 = vmatpush.msra.mxu0 %v2342_v33 }
0x2549   :  { %v1146_v48 = vpop.permute.xlu0 %1145 }
0x254a   :  { %v7066_v35 = vpop.eup %7065 }
0x254b   :  { %1995 = vrot.lane.b32.xlu1 %v7066_v35, %s8336_s26  ;;  %v7068_v32 = vpop.eup %7067  ;;  %v2340_v35 = vld [vmem:[#allocation19] sm:$0xff] }
0x254c   :  { %v1126_v18 = vadd.f32 1.0, %v7068_v32 }
0x254e   :  { %7069 = vrcp.f32 %v1126_v18  ;;  %v1138_v44 = vand.u32 2147483648, %v1126_v18  ;;  %vm1132_vm11 = vweird.f32 %v1126_v18  ;;  %v1136_v45 = vand.u32 2147483647, %v1126_v18 }
0x2550   :  { %v1139_v47 = vor.u32 1.1754944e-38, %v1138_v44  ;;  %vm1137_vm13 = vcmp.eq.f32.partialorder %v1136_v45, 8.507059e+37 }
0x2554   :  { %v7070_v37 = vpop.eup %7069 }
0x2555   :  { %v1128_v38 = vmul.f32 %v7070_v37, %v1126_v18  ;;  %vm1133_vm10 = vweird.f32 %v7070_v37 }
0x2556   :  { %vm1134_vm12 = vmor %vm1132_vm11, %vm1133_vm10 }
0x2557   :  { %v1129_v39 = vsub.f32 1.0, %v1128_v38 }
0x2559   :  { %v1130_v40 = vmul.f32 %v7070_v37, %v1129_v39 }
0x255b   :  { %v1131_v42 = vadd.f32 %v7070_v37, %v1130_v40 }
0x255d   :  { %v1135_v46 = vsel %vm1134_vm12, %v7070_v37, %v1131_v42 }
0x255e   :  { %v1140_v49 = vsel %vm1137_vm13, %v1139_v47, %v1135_v46 }
0x255f   :  { %v1148_v50 = vmul.f32 %v1146_v48, %v1140_v49  ;;  %v1143_v56 = vmul.f32 %v1140_v49, %v8932_v4 }
0x25bd   :  { %v1996_v41 = vpop.permute.xlu1 %1995 }
0x25be   :  { %v1998_v43 = vmul.f32 %v1996_v41, %v1979_v27 }
0x25c0   :  { %2000 = vrot.lane.b32.xlu2 %v1998_v43, %s8337_s28 }
0x25c8   :  { %1150 = vrot.lane.b32.xlu2 %v1148_v50, %s8337_s28 }
0x261a   :  { %v2001_v51 = vpop.permute.xlu2 %2000 }
0x261b   :  { %2003 = vst.msk [vmem:[#allocation5 + $0x4] sm:$0x3] %vm701_vm5, %v2001_v51  ;;  %6689 = vmatmul.msk.f32.vlgmr.msra.gmra.mxu3 %vm635_vm6, %v2001_v51 }
0x2622   :  { %v1151_v55 = vpop.permute.xlu2 %1150 }
0x2623   :  { %v1153_v57 = vadd.f32 %v1151_v55, %v1143_v56 }
0x269e   :  { %v2024_v53 = vpop.f32.mrf.mxu3 }
0x269f   :  { %v2027_v54 = vadd.f32 %v2024_v53, %v2004_v52 }
0x26a1   :  { %7071 = vtanh.f32 %v2027_v54  ;;  %v6690_v60 = vmul.f32 -1.442695, %v2027_v54 }
0x26a2   :  { %7073 = vtanh.f32 %v1153_v57  ;;  %v2339_v57 = vld [vmem:[#allocation18 + $0x18] sm:$0xff] }
0x26a3   :  { %7075 = vpow2.f32 %v6690_v60  ;;  %2379 = vmatpush.msra.mxu1 %v2339_v57  ;;  %v2336_v60 = vld [vmem:[#allocation18] sm:$0xff] }
0x26a7   :  { %v7072_v58 = vpop.eup %7071 }
0x26a8   :  { %2050 = vrot.lane.b32.xlu1 %v7072_v58, %s8336_s26  ;;  %v7074_v59 = vpop.eup %7073  ;;  %v2338_v58 = vld [vmem:[#allocation18 + $0x10] sm:$0xff] }
0x26a9   :  { %v7076_v61 = vpop.eup %7075  ;;  %2380 = vmatpush.msra.mxu1 %v2338_v58 }
0x26aa   :  { %v2031_v62 = vadd.f32 1.0, %v7076_v61 }
0x26ac   :  { %7077 = vrcp.f32 %v2031_v62  ;;  %v2043_v4 = vand.u32 2147483648, %v2031_v62  ;;  %vm2037_vm15 = vweird.f32 %v2031_v62  ;;  %v2041_v11 = vand.u32 2147483647, %v2031_v62 }
0x26ae   :  { %v2044_v12 = vor.u32 1.1754944e-38, %v2043_v4  ;;  %vm2042_vm2 = vcmp.eq.f32.partialorder %v2041_v11, 8.507059e+37 }
0x26b0   :  { %1156 = vrot.lane.b32.xlu1 %v7074_v59, %s8336_s26  ;;  %v2337_v59 = vld [vmem:[#allocation18 + $0x8] sm:$0xff] }
0x26b1   :  { %2381 = vmatpush.msra.mxu1 %v2337_v59 }
0x26b2   :  { %v7078_v63 = vpop.eup %7077 }
0x26b3   :  { %v2033_v0 = vmul.f32 %v7078_v63, %v2031_v62  ;;  %vm2038_vm14 = vweird.f32 %v7078_v63  ;;  %2382 = vmatpush.msra.mxu1 %v2336_v60 }
0x26b4   :  { %vm2039_vm1 = vmor %vm2037_vm15, %vm2038_vm14 }
0x26b5   :  { %v2034_v1 = vsub.f32 1.0, %v2033_v0 }
0x26b7   :  { %v2035_v5 = vmul.f32 %v7078_v63, %v2034_v1 }
0x26b9   :  { %v2036_v10 = vadd.f32 %v7078_v63, %v2035_v5  ;;  %v6913_v5 = vld [vmem:[%s9931_s21] ss:$0 sm:$0xff] }
0x26bb   :  { %v2040_v13 = vsel %vm2039_vm1, %v7078_v63, %v2036_v10 }
0x26bc   :  { %v2045_v15 = vsel %vm2042_vm2, %v2044_v12, %v2040_v13 }
0x26bd   :  { %v2048_v17 = vmul.f32 %v2045_v15, %v9059_v34  ;;  %v2341_v34 = vld [vmem:[#allocation19 + $0x8] sm:$0xff] }
0x26be   :  { %2358 = vmatpush.msra.mxu0 %v2341_v34 }
0x26c0   :  { %2359 = vmatpush.msra.mxu0 %v2340_v35 }
0x271a   :  { %v2051_v14 = vpop.permute.xlu1 %2050 }
0x271b   :  { %v2053_v16 = vmul.f32 %v2051_v14, %v2045_v15 }
0x271d   :  { %2055 = vrot.lane.b32.xlu0 %v2053_v16, %s8337_s28 }
0x2722   :  { %v1157_v19 = vpop.permute.xlu1 %1156 }
0x2723   :  { %v1159_v20 = vmul.f32 %v1157_v19, %v1140_v49 }
0x2725   :  { %1161 = vrot.lane.b32.xlu0 %v1159_v20, %s8337_s28 }
0x278f   :  { %v2056_v21 = vpop.permute.xlu0 %2055 }
0x2790   :  { %v2058_v23 = vadd.f32 %v2056_v21, %v2048_v17 }
0x2792   :  { %7079 = vtanh.f32 %v2058_v23 }
0x2797   :  { %v1162_v24 = vpop.permute.xlu0 %1161 }
0x2798   :  { %v7080_v25 = vpop.eup %7079  ;;  %1164 = vst.msk [vmem:[#allocation3 + $0xe] sm:$0x3] %vm701_vm5, %v1162_v24 }
0x2799   :  { %2061 = vrot.lane.b32.xlu2 %v7080_v25, %s8336_s26 }
0x279f   :  { %v9075_v22 = vld [vmem:[#allocation3 + $0x8] sm:$0xff] }
0x27a0   :  { %6683 = vmatmul.msk.f32.gmra.mxu1 %vm635_vm6, %v9075_v22 }
0x27f3   :  { %v2062_v2 = vpop.permute.xlu2 %2061 }
0x27f4   :  { %v2064_v3 = vmul.f32 %v2062_v2, %v2045_v15 }
0x27f6   :  { %2066 = vrot.lane.b32.xlu1 %v2064_v3, %s8337_s28 }
0x281d   :  { %v1793_v27 = vpop.f32.mrf.mxu1 }
0x281e   :  { %v1794_v28 = vadd.f32 %v1793_v27, %v1764_v26 }
0x2820   :  { %v1801_v29 = vadd.f32 %v9035_v9, %v1794_v28 }
0x2822   :  { %1803 = vst [vmem:[#allocation2 + $0x8] sm:$0xff] %v1801_v29 }
0x2829   :  { %v2070_v9 = vld [vmem:[#allocation2 + $0x8] sm:$0x3]  ;;  %v2136_v62 = vld [vmem:[#allocation2 + $0xa] sm:$0x3]  ;;  %v9099_v16 = vld [vmem:[#allocation2 + $0xe] sm:$0x3] }
0x282a   :  { %v9101_v19 = vld [vmem:[#allocation2 + $0xc] sm:$0x3] }
0x2868   :  { %v2067_v36 = vpop.permute.xlu1 %2066 }
0x2869   :  { %2069 = vst.msk [vmem:[#allocation5 + $0x6] sm:$0x3] %vm701_vm5, %v2067_v36  ;;  %6691 = vmatmul.msk.f32.vlgmr.msrb.gmra.mxu0 %vm635_vm6, %v2067_v36 }
0x2871   :  { %6699 = vmatmul.msk.f32.vlgmr.msra.gmra.mxu0 %vm635_vm6, %v9026_v6 }
0x2879   :  { %6700 = vmatmul.msk.f32.gmra.mxu0 %vm635_vm6, %v9030_v7 }
0x28e6   :  { %v2090_v32 = vpop.f32.mrf.mxu0 }
0x28e7   :  { %v2093_v18 = vadd.f32 %v2090_v32, %v2070_v9 }
0x28e9   :  { %7081 = vtanh.f32 %v2093_v18  ;;  %v6692_v38 = vmul.f32 -1.442695, %v2093_v18 }
0x28eb   :  { %7083 = vpow2.f32 %v6692_v38  ;;  %v9111_v38 = vld [vmem:[#allocation21 + $0x10] sm:$0xff] }
0x28ee   :  { %v2361_v1 = vpop.f32.mrf.mxu0 }
0x28ef   :  { %v7082_v37 = vpop.eup %7081 }
0x28f0   :  { %2116 = vrot.lane.b32.xlu2 %v7082_v37, %s8336_s26  ;;  %v9109_v37 = vld [vmem:[#allocation21 + $0x18] sm:$0xff] }
0x28f1   :  { %v7084_v39 = vpop.eup %7083  ;;  %2415 = vmatpush.msrb.mxu2 %v9109_v37  ;;  %2481 = vmatpush.msra.mxu3 %v9109_v37 }
0x28f2   :  { %v2097_v40 = vadd.f32 1.0, %v7084_v39  ;;  %v9115_v39 = vld [vmem:[#allocation21 + $0x8] sm:$0xff]  ;;  %2679 = vmatpush.msrb.mxu0 %v9109_v37 }
0x28f3   :  { %2416 = vmatpush.msrb.mxu2 %v9111_v38  ;;  %2482 = vmatpush.msra.mxu3 %v9111_v38 }
0x28f4   :  { %7085 = vrcp.f32 %v2097_v40  ;;  %v2109_v45 = vand.u32 2147483648, %v2097_v40  ;;  %vm2103_vm4 = vweird.f32 %v2097_v40  ;;  %v2107_v7 = vand.u32 2147483647, %v2097_v40  ;;  %2680 = vmatpush.msrb.mxu0 %v9111_v38 }
0x28f5   :  { %2417 = vmatpush.msrb.mxu2 %v9115_v39  ;;  %2483 = vmatpush.msra.mxu3 %v9115_v39 }
0x28f6   :  { %v2110_v47 = vor.u32 1.1754944e-38, %v2109_v45  ;;  %vm2108_vm8 = vcmp.eq.f32.partialorder %v2107_v7, 8.507059e+37  ;;  %v2364_v12 = vpop.f32.mrf.mxu0  ;;  %2681 = vmatpush.msrb.mxu0 %v9115_v39 }
0x28fa   :  { %v7086_v41 = vpop.eup %7085 }
0x28fb   :  { %v2099_v42 = vmul.f32 %v7086_v41, %v2097_v40  ;;  %vm2104_vm3 = vweird.f32 %v7086_v41  ;;  %v9121_v40 = vld [vmem:[#allocation21] sm:$0xff] }
0x28fc   :  { %vm2105_vm7 = vmor %vm2103_vm4, %vm2104_vm3  ;;  %2418 = vmatpush.msrb.mxu2 %v9121_v40  ;;  %2484 = vmatpush.msra.mxu3 %v9121_v40 }
0x28fd   :  { %v2100_v43 = vsub.f32 1.0, %v2099_v42  ;;  %2682 = vmatpush.msrb.mxu0 %v9121_v40 }
0x28ff   :  { %v2101_v44 = vmul.f32 %v7086_v41, %v2100_v43 }
0x2901   :  { %v2102_v6 = vadd.f32 %v7086_v41, %v2101_v44 }
0x2903   :  { %v2106_v46 = vsel %vm2105_vm7, %v7086_v41, %v2102_v6 }
0x2904   :  { %v2111_v49 = vsel %vm2108_vm8, %v2110_v47, %v2106_v46 }
0x2905   :  { %v2114_v51 = vmul.f32 %v2111_v49, %v2058_v23 }
0x294a   :  { %v2117_v48 = vpop.permute.xlu2 %2116 }
0x294b   :  { %v2119_v50 = vmul.f32 %v2117_v48, %v2111_v49 }
0x294d   :  { %2121 = vrot.lane.b32.xlu0 %v2119_v50, %s8337_s28 }
0x29bf   :  { %v2122_v52 = vpop.permute.xlu0 %2121 }
0x29c0   :  { %v2124_v53 = vadd.f32 %v2122_v52, %v2114_v51 }
0x29c2   :  { %7087 = vtanh.f32 %v2124_v53 }
0x29c8   :  { %v7088_v54 = vpop.eup %7087 }
0x29c9   :  { %2127 = vrot.lane.b32.xlu1 %v7088_v54, %s8336_s26 }
0x2a3b   :  { %v2128_v55 = vpop.permute.xlu1 %2127 }
0x2a3c   :  { %v2130_v56 = vmul.f32 %v2128_v55, %v2111_v49 }
0x2a3e   :  { %2132 = vrot.lane.b32.xlu2 %v2130_v56, %s8337_s28 }
0x2a98   :  { %v2133_v61 = vpop.permute.xlu2 %2132 }
0x2a99   :  { %2135 = vst.msk [vmem:[#allocation5 + $0x8] sm:$0x3] %vm701_vm5, %v2133_v61  ;;  %6693 = vmatmul.msk.f32.vlgmr.msrb.gmra.mxu1 %vm635_vm6, %v2133_v61 }
0x2a9a   :  { %2745 = vmatpush.msrb.mxu1 %v9109_v37 }
0x2a9c   :  { %2746 = vmatpush.msrb.mxu1 %v9111_v38 }
0x2a9e   :  { %2747 = vmatpush.msrb.mxu1 %v9115_v39 }
0x2aa0   :  { %2748 = vmatpush.msrb.mxu1 %v9121_v40 }
0x2aa1   :  { %6701 = vmatmul.msk.f32.vlgmr.msra.gmra.mxu1 %vm635_vm6, %v8968_v31 }
0x2aa9   :  { %6702 = vmatmul.msk.f32.gmra.mxu1 %vm635_vm6, %v9075_v22 }
0x2b16   :  { %v2156_v63 = vpop.f32.mrf.mxu1 }
0x2b17   :  { %v2159_v0 = vadd.f32 %v2156_v63, %v2136_v62 }
0x2b19   :  { %7089 = vtanh.f32 %v2159_v0  ;;  %v6694_v20 = vmul.f32 -1.442695, %v2159_v0 }
0x2b1b   :  { %7091 = vpow2.f32 %v6694_v20 }
0x2b1e   :  { %v2384_v10 = vpop.f32.mrf.mxu1 }
0x2b1f   :  { %v7090_v4 = vpop.eup %7089  ;;  %v2385_v11 = vadd.f32 %v2384_v10, %v2361_v1 }
0x2b20   :  { %2182 = vrot.lane.b32.xlu0 %v7090_v4, %s8336_s26 }
0x2b21   :  { %v2394_v13 = vadd.f32 %v6913_v5, %v2385_v11  ;;  %v7092_v17 = vpop.eup %7091 }
0x2b22   :  { %v2163_v21 = vadd.f32 1.0, %v7092_v17 }
0x2b23   :  { %2396 = vst [vmem:[#allocation2] sm:$0xff] %v2394_v13 }
0x2b24   :  { %7093 = vrcp.f32 %v2163_v21  ;;  %v2175_v3 = vand.u32 2147483648, %v2163_v21  ;;  %vm2169_vm10 = vweird.f32 %v2163_v21  ;;  %v2173_v26 = vand.u32 2147483647, %v2163_v21 }
0x2b26   :  { %v2387_v14 = vpop.f32.mrf.mxu1  ;;  %v2176_v28 = vor.u32 1.1754944e-38, %v2175_v3  ;;  %vm2174_vm12 = vcmp.eq.f32.partialorder %v2173_v26, 8.507059e+37 }
0x2b27   :  { %v2388_v15 = vadd.f32 %v2387_v14, %v2364_v12 }
0x2b29   :  { %v2395_v31 = vadd.f32 %v6913_v5, %v2388_v15 }
0x2b2a   :  { %v7094_v23 = vpop.eup %7093 }
0x2b2b   :  { %2397 = vst [vmem:[#allocation2 + $0x8] sm:$0xff] %v2395_v31  ;;  %v2165_v24 = vmul.f32 %v7094_v23, %v2163_v21  ;;  %vm2170_vm9 = vweird.f32 %v7094_v23 }
0x2b2c   :  { %vm2171_vm11 = vmor %vm2169_vm10, %vm2170_vm9 }
0x2b2d   :  { %v2166_v25 = vsub.f32 1.0, %v2165_v24 }
0x2b2f   :  { %v2167_v22 = vmul.f32 %v7094_v23, %v2166_v25 }
0x2b31   :  { %v2168_v2 = vadd.f32 %v7094_v23, %v2167_v22 }
0x2b32   :  { %v2402_v44 = vld [vmem:[#allocation2 + $0xe] sm:$0x3] }
0x2b33   :  { %v2172_v27 = vsel %vm2171_vm11, %v7094_v23, %v2168_v2 }
0x2b34   :  { %v2177_v30 = vsel %vm2174_vm12, %v2176_v28, %v2172_v27 }
0x2b35   :  { %v2180_v34 = vmul.f32 %v2177_v30, %v2124_v53 }
0x2b92   :  { %v2183_v29 = vpop.permute.xlu0 %2182 }
0x2b93   :  { %v2185_v33 = vmul.f32 %v2183_v29, %v2177_v30 }
0x2b95   :  { %2187 = vrot.lane.b32.xlu1 %v2185_v33, %s8337_s28 }
0x2c07   :  { %v2188_v35 = vpop.permute.xlu1 %2187 }
0x2c08   :  { %v9104_v36 = vadd.f32 %v2188_v35, %v2180_v34  ;;  %v2466_v35 = vld [vmem:[#allocation2 + $0xc] sm:$0x3] }
0x2c0a   :  { %7095 = vtanh.f32 %v9104_v36 }
0x2c10   :  { %v7096_v9 = vpop.eup %7095 }
0x2c11   :  { %2193 = vrot.lane.b32.xlu2 %v7096_v9, %s8336_s26 }
0x2c6b   :  { %v2194_v32 = vpop.permute.xlu2 %2193 }
0x2c6c   :  { %v2196_v18 = vmul.f32 %v2194_v32, %v2177_v30 }
0x2c6e   :  { %2198 = vrot.lane.b32.xlu0 %v2196_v18, %s8337_s28 }
0x2ce0   :  { %v2199_v41 = vpop.permute.xlu0 %2198 }
0x2ce1   :  { %2201 = vst.msk [vmem:[#allocation5 + $0xa] sm:$0x3] %vm701_vm5, %v2199_v41  ;;  %6695 = vmatmul.msk.f32.vlgmr.msra.gmra.mxu2 %vm635_vm6, %v2199_v41 }
0x2ce2   :  { %2547 = vmatpush.msra.mxu2 %v9109_v37 }
0x2ce4   :  { %2548 = vmatpush.msra.mxu2 %v9111_v38 }
0x2ce6   :  { %2549 = vmatpush.msra.mxu2 %v9115_v39 }
0x2ce8   :  { %2550 = vmatpush.msra.mxu2 %v9121_v40 }
0x2ce9   :  { %2419 = vmatmul.f32.vlgmr.msrb.gmra.mxu2 %v8335_v8 }
0x2cea   :  { %2811 = vmatpush.msrb.mxu2 %v9109_v37 }
0x2cec   :  { %2812 = vmatpush.msrb.mxu2 %v9111_v38 }
0x2cee   :  { %2813 = vmatpush.msrb.mxu2 %v9115_v39 }
0x2cf0   :  { %2814 = vmatpush.msrb.mxu2 %v9121_v40 }
0x2d64   :  { %v2222_v42 = vpop.f32.mrf.mxu2 }
0x2d65   :  { %v2225_v43 = vadd.f32 %v2222_v42, %v9101_v19 }
0x2d67   :  { %7097 = vtanh.f32 %v2225_v43  ;;  %v6696_v50 = vmul.f32 -1.442695, %v2225_v43 }
0x2d6c   :  { %v2420_v6 = vpop.f32.mrf.mxu2 }
0x2d6d   :  { %v7098_v45 = vpop.eup %7097  ;;  %v2423_v7 = vadd.f32 %v2420_v6, %v2402_v44 }
0x2d6e   :  { %2248 = vrot.lane.b32.xlu1 %v7098_v45, %s8336_s26 }
0x2d6f   :  { %7099 = vtanh.f32 %v2423_v7  ;;  %v6703_v47 = vmul.f32 -1.442695, %v2423_v7 }
0x2d71   :  { %7101 = vpow2.f32 %v6703_v47 }
0x2d75   :  { %v7100_v46 = vpop.eup %7099 }
0x2d76   :  { %2446 = vrot.lane.b32.xlu2 %v7100_v46, %s8336_s26 }
0x2d77   :  { %v7102_v48 = vpop.eup %7101 }
0x2d78   :  { %v2427_v49 = vadd.f32 1.0, %v7102_v48 }
0x2d7a   :  { %7103 = vrcp.f32 %v2427_v49  ;;  %v2439_v59 = vand.u32 2147483648, %v2427_v49  ;;  %vm2433_vm14 = vweird.f32 %v2427_v49  ;;  %v2437_v60 = vand.u32 2147483647, %v2427_v49 }
0x2d7b   :  { %7105 = vpow2.f32 %v6696_v50 }
0x2d7c   :  { %v2440_v63 = vor.u32 1.1754944e-38, %v2439_v59  ;;  %vm2438_vm1 = vcmp.eq.f32.partialorder %v2437_v60, 8.507059e+37 }
0x2d80   :  { %v7104_v51 = vpop.eup %7103 }
0x2d81   :  { %v7106_v52 = vpop.eup %7105  ;;  %v2429_v53 = vmul.f32 %v7104_v51, %v2427_v49  ;;  %vm2434_vm13 = vweird.f32 %v7104_v51 }
0x2d82   :  { %v2229_v54 = vadd.f32 1.0, %v7106_v52  ;;  %vm2435_vm15 = vmor %vm2433_vm14, %vm2434_vm13 }
0x2d83   :  { %v2430_v55 = vsub.f32 1.0, %v2429_v53 }
0x2d84   :  { %7107 = vrcp.f32 %v2229_v54  ;;  %v2241_v13 = vand.u32 2147483648, %v2229_v54  ;;  %vm2235_vm3 = vweird.f32 %v2229_v54  ;;  %v2239_v12 = vand.u32 2147483647, %v2229_v54 }
0x2d85   :  { %v2431_v56 = vmul.f32 %v7104_v51, %v2430_v55 }
0x2d86   :  { %v2242_v15 = vor.u32 1.1754944e-38, %v2241_v13  ;;  %vm2240_vm7 = vcmp.eq.f32.partialorder %v2239_v12, 8.507059e+37 }
0x2d87   :  { %v2432_v57 = vadd.f32 %v7104_v51, %v2431_v56  ;;  %v2532_v56 = vld [vmem:[#allocation2 + $0xa] sm:$0x3] }
0x2d89   :  { %v2436_v61 = vsel %vm2435_vm15, %v7104_v51, %v2432_v57 }
0x2d8a   :  { %v7108_v58 = vpop.eup %7107  ;;  %v2441_v1 = vsel %vm2438_vm1, %v2440_v63, %v2436_v61 }
0x2d8b   :  { %v2231_v62 = vmul.f32 %v7108_v58, %v2229_v54  ;;  %vm2236_vm2 = vweird.f32 %v7108_v58  ;;  %v2444_v17 = vmul.f32 0.0, %v2441_v1 }
0x2d8c   :  { %vm2237_vm4 = vmor %vm2235_vm3, %vm2236_vm2 }
0x2d8d   :  { %v2232_v10 = vsub.f32 1.0, %v2231_v62 }
0x2d8f   :  { %v2233_v4 = vmul.f32 %v7108_v58, %v2232_v10 }
0x2d91   :  { %v2234_v11 = vadd.f32 %v7108_v58, %v2233_v4 }
0x2d93   :  { %v2238_v14 = vsel %vm2237_vm4, %v7108_v58, %v2234_v11 }
0x2d94   :  { %v2243_v19 = vsel %vm2240_vm7, %v2242_v15, %v2238_v14 }
0x2d95   :  { %v2246_v25 = vmul.f32 %v2243_v19, %v9104_v36 }
0x2dd0   :  { %v2447_v0 = vpop.permute.xlu2 %2446 }
0x2dd1   :  { %v2449_v5 = vmul.f32 %v2447_v0, %v2441_v1 }
0x2dd3   :  { %2451 = vrot.lane.b32.xlu1 %v2449_v5, %s8337_s28 }
0x2de0   :  { %v2249_v31 = vpop.permute.xlu1 %2248 }
0x2de1   :  { %v2251_v20 = vmul.f32 %v2249_v31, %v2243_v19 }
0x2de3   :  { %2253 = vrot.lane.b32.xlu0 %v2251_v20, %s8337_s28 }
0x2e45   :  { %v2452_v21 = vpop.permute.xlu1 %2451 }
0x2e46   :  { %v2454_v23 = vadd.f32 %v2452_v21, %v2444_v17 }
0x2e48   :  { %7109 = vtanh.f32 %v2454_v23 }
0x2e4e   :  { %v7110_v24 = vpop.eup %7109 }
0x2e4f   :  { %2457 = vrot.lane.b32.xlu0 %v7110_v24, %s8336_s26 }
0x2e55   :  { %v2254_v22 = vpop.permute.xlu0 %2253 }
0x2e56   :  { %v9151_v2 = vadd.f32 %v2254_v22, %v2246_v25  ;;  %v2598_v22 = vld [vmem:[#allocation2 + $0x8] sm:$0x3] }
0x2e58   :  { %7111 = vtanh.f32 %v9151_v2 }
0x2e5e   :  { %v7112_v3 = vpop.eup %7111 }
0x2e5f   :  { %2259 = vrot.lane.b32.xlu2 %v7112_v3, %s8336_s26 }
0x2eb9   :  { %v2260_v26 = vpop.permute.xlu2 %2259 }
0x2eba   :  { %v2262_v27 = vmul.f32 %v2260_v26, %v2243_v19 }
0x2ebc   :  { %2264 = vrot.lane.b32.xlu1 %v2262_v27, %s8337_s28 }
0x2ec1   :  { %v2458_v28 = vpop.permute.xlu0 %2457 }
0x2ec2   :  { %v2460_v29 = vmul.f32 %v2458_v28, %v2441_v1 }
0x2ec4   :  { %2462 = vrot.lane.b32.xlu2 %v2460_v29, %s8337_s28 }
0x2f1e   :  { %v2463_v30 = vpop.permute.xlu2 %2462 }
0x2f1f   :  { %2465 = vst.msk [vmem:[#allocation6 + $0xe] sm:$0x3] %vm701_vm5, %v2463_v30 }
0x2f2e   :  { %v2265_v33 = vpop.permute.xlu1 %2264 }
0x2f2f   :  { %2267 = vst.msk [vmem:[#allocation5 + $0xc] sm:$0x3] %vm701_vm5, %v2265_v33  ;;  %6697 = vmatmul.msk.f32.vlgmr.msrb.gmra.mxu3 %vm635_vm6, %v2265_v33 }
0x2f30   :  { %2613 = vmatpush.msrb.mxu3 %v9109_v37 }
0x2f32   :  { %2614 = vmatpush.msrb.mxu3 %v9111_v38 }
0x2f34   :  { %2615 = vmatpush.msrb.mxu3 %v9115_v39 }
0x2f36   :  { %2616 = vmatpush.msrb.mxu3 %v9121_v40 }
0x2f37   :  { %6704 = vmatmul.msk.f32.vlgmr.msra.gmra.mxu3 %vm635_vm6, %v2463_v30 }
0x2f38   :  { %2877 = vmatpush.msra.mxu3 %v9109_v37 }
0x2f3a   :  { %2878 = vmatpush.msra.mxu3 %v9111_v38 }
0x2f3c   :  { %2879 = vmatpush.msra.mxu3 %v9115_v39 }
0x2f3e   :  { %2880 = vmatpush.msra.mxu3 %v9121_v40 }
0x2fb2   :  { %v9169_v34 = vpop.f32.mrf.mxu3 }
0x2fba   :  { %v2486_v36 = vpop.f32.mrf.mxu3 }
0x2fbb   :  { %v2489_v9 = vadd.f32 %v2486_v36, %v2466_v35 }
0x2fbd   :  { %7113 = vtanh.f32 %v2489_v9  ;;  %v6705_v18 = vmul.f32 -1.442695, %v2489_v9 }
0x2fbf   :  { %7115 = vpow2.f32 %v6705_v18 }
0x2fc3   :  { %v7114_v32 = vpop.eup %7113 }
0x2fc4   :  { %2512 = vrot.lane.b32.xlu0 %v7114_v32, %s8336_s26 }
0x2fc5   :  { %v7116_v41 = vpop.eup %7115 }
0x2fc6   :  { %v2493_v42 = vadd.f32 1.0, %v7116_v41 }
0x2fc8   :  { %7117 = vrcp.f32 %v2493_v42  ;;  %v2505_v40 = vand.u32 2147483648, %v2493_v42  ;;  %vm2499_vm9 = vweird.f32 %v2493_v42  ;;  %v2503_v6 = vand.u32 2147483647, %v2493_v42 }
0x2fca   :  { %v2506_v7 = vor.u32 1.1754944e-38, %v2505_v40  ;;  %vm2504_vm11 = vcmp.eq.f32.partialorder %v2503_v6, 8.507059e+37 }
0x2fce   :  { %v7118_v37 = vpop.eup %7117 }
0x2fcf   :  { %v2495_v38 = vmul.f32 %v7118_v37, %v2493_v42  ;;  %vm2500_vm8 = vweird.f32 %v7118_v37 }
0x2fd0   :  { %vm2501_vm10 = vmor %vm2499_vm9, %vm2500_vm8 }
0x2fd1   :  { %v2496_v43 = vsub.f32 1.0, %v2495_v38 }
0x2fd3   :  { %v2497_v39 = vmul.f32 %v7118_v37, %v2496_v43 }
0x2fd5   :  { %v2498_v44 = vadd.f32 %v7118_v37, %v2497_v39 }
0x2fd7   :  { %v2502_v45 = vsel %vm2501_vm10, %v7118_v37, %v2498_v44 }
0x2fd8   :  { %v2507_v47 = vsel %vm2504_vm11, %v2506_v7, %v2502_v45 }
0x2fd9   :  { %v2510_v49 = vmul.f32 %v2507_v47, %v2454_v23 }
0x3036   :  { %v2513_v46 = vpop.permute.xlu0 %2512 }
0x3037   :  { %v2515_v48 = vmul.f32 %v2513_v46, %v2507_v47 }
0x3039   :  { %2517 = vrot.lane.b32.xlu1 %v2515_v48, %s8337_s28  ;;  %v2664_v48 = vld [vmem:[#allocation2 + $0x6] sm:$0x3] }
0x30ab   :  { %v2518_v50 = vpop.permute.xlu1 %2517 }
0x30ac   :  { %v2520_v51 = vadd.f32 %v2518_v50, %v2510_v49 }
0x30ae   :  { %7119 = vtanh.f32 %v2520_v51 }
0x30b4   :  { %v7120_v52 = vpop.eup %7119 }
0x30b5   :  { %2523 = vrot.lane.b32.xlu2 %v7120_v52, %s8336_s26 }
0x310f   :  { %v2524_v53 = vpop.permute.xlu2 %2523 }
0x3110   :  { %v2526_v54 = vmul.f32 %v2524_v53, %v2507_v47 }
0x3112   :  { %2528 = vrot.lane.b32.xlu0 %v2526_v54, %s8337_s28 }
0x3184   :  { %v2529_v55 = vpop.permute.xlu0 %2528 }
0x3185   :  { %2531 = vst.msk [vmem:[#allocation6 + $0xc] sm:$0x3] %vm701_vm5, %v2529_v55  ;;  %6706 = vmatmul.msk.f32.vlgmr.msra.gmra.mxu2 %vm635_vm6, %v2529_v55 }
0x3208   :  { %v2552_v57 = vpop.f32.mrf.mxu2 }
0x3209   :  { %v2555_v58 = vadd.f32 %v2552_v57, %v2532_v56 }
0x320b   :  { %7121 = vtanh.f32 %v2555_v58  ;;  %v6707_v60 = vmul.f32 -1.442695, %v2555_v58 }
0x320d   :  { %7123 = vpow2.f32 %v6707_v60 }
0x3211   :  { %v7122_v59 = vpop.eup %7121 }
0x3212   :  { %2578 = vrot.lane.b32.xlu1 %v7122_v59, %s8336_s26 }
0x3213   :  { %v7124_v61 = vpop.eup %7123 }
0x3214   :  { %v2559_v62 = vadd.f32 1.0, %v7124_v61 }
0x3216   :  { %7125 = vrcp.f32 %v2559_v62  ;;  %v2571_v4 = vand.u32 2147483648, %v2559_v62  ;;  %vm2565_vm13 = vweird.f32 %v2559_v62  ;;  %v2569_v11 = vand.u32 2147483647, %v2559_v62 }
0x3218   :  { %v2572_v12 = vor.u32 1.1754944e-38, %v2571_v4  ;;  %vm2570_vm15 = vcmp.eq.f32.partialorder %v2569_v11, 8.507059e+37 }
0x321c   :  { %v7126_v63 = vpop.eup %7125 }
0x321d   :  { %v2561_v0 = vmul.f32 %v7126_v63, %v2559_v62  ;;  %vm2566_vm12 = vweird.f32 %v7126_v63 }
0x321e   :  { %vm2567_vm14 = vmor %vm2565_vm13, %vm2566_vm12 }
0x321f   :  { %v2562_v1 = vsub.f32 1.0, %v2561_v0 }
0x3221   :  { %v2563_v5 = vmul.f32 %v7126_v63, %v2562_v1 }
0x3223   :  { %v2564_v10 = vadd.f32 %v7126_v63, %v2563_v5 }
0x3225   :  { %v2568_v13 = vsel %vm2567_vm14, %v7126_v63, %v2564_v10 }
0x3226   :  { %v2573_v15 = vsel %vm2570_vm15, %v2572_v12, %v2568_v13 }
0x3227   :  { %v2576_v19 = vmul.f32 %v2573_v15, %v2520_v51 }
0x3284   :  { %v2579_v14 = vpop.permute.xlu1 %2578 }
0x3285   :  { %v2581_v31 = vmul.f32 %v2579_v14, %v2573_v15 }
0x3287   :  { %2583 = vrot.lane.b32.xlu2 %v2581_v31, %s8337_s28  ;;  %v2932_v31 = vld [vmem:[#allocation22 + $0x10] sm:$0xff] }
0x32e1   :  { %v2584_v20 = vpop.permute.xlu2 %2583 }
0x32e2   :  { %v2586_v17 = vadd.f32 %v2584_v20, %v2576_v19  ;;  %v2931_v19 = vld [vmem:[#allocation22 + $0x8] sm:$0xff]  ;;  %v2930_v20 = vld [vmem:[#allocation22] sm:$0xff] }
0x32e4   :  { %7127 = vtanh.f32 %v2586_v17 }
0x32ea   :  { %v7128_v21 = vpop.eup %7127 }
0x32eb   :  { %2589 = vrot.lane.b32.xlu0 %v7128_v21, %s8336_s26  ;;  %v9195_v21 = vld [vmem:[#allocation5] sm:$0xff] }
0x335d   :  { %v2590_v23 = vpop.permute.xlu0 %2589 }
0x335e   :  { %v2592_v24 = vmul.f32 %v2590_v23, %v2573_v15  ;;  %v2933_v15 = vld [vmem:[#allocation22 + $0x18] sm:$0xff]  ;;  %v2730_v23 = vld [vmem:[#allocation2 + $0x4] sm:$0x3] }
0x335f   :  { %2985 = vmatpush.msra.mxu1 %v2933_v15 }
0x3360   :  { %2594 = vrot.lane.b32.xlu1 %v2592_v24, %s8337_s28 }
0x3361   :  { %2986 = vmatpush.msra.mxu1 %v2932_v31 }
0x3363   :  { %2987 = vmatpush.msra.mxu1 %v2931_v19 }
0x3365   :  { %2988 = vmatpush.msra.mxu1 %v2930_v20 }
0x33d2   :  { %v2595_v25 = vpop.permute.xlu1 %2594 }
0x33d3   :  { %2597 = vst.msk [vmem:[#allocation6 + $0xa] sm:$0x3] %vm701_vm5, %v2595_v25  ;;  %6708 = vmatmul.msk.f32.vlgmr.msrb.gmra.mxu3 %vm635_vm6, %v2595_v25 }
0x3456   :  { %v2618_v3 = vpop.f32.mrf.mxu3 }
0x3457   :  { %v2621_v26 = vadd.f32 %v2618_v3, %v2598_v22 }
0x3459   :  { %7129 = vtanh.f32 %v2621_v26  ;;  %v6709_v28 = vmul.f32 -1.442695, %v2621_v26 }
0x345b   :  { %7131 = vpow2.f32 %v6709_v28 }
0x345f   :  { %v7130_v27 = vpop.eup %7129 }
0x3460   :  { %2644 = vrot.lane.b32.xlu2 %v7130_v27, %s8336_s26 }
0x3461   :  { %v7132_v29 = vpop.eup %7131 }
0x3462   :  { %v2625_v30 = vadd.f32 1.0, %v7132_v29 }
0x3464   :  { %7133 = vrcp.f32 %v2625_v30  ;;  %v2637_v18 = vand.u32 2147483648, %v2625_v30  ;;  %vm2631_vm2 = vweird.f32 %v2625_v30  ;;  %v2635_v41 = vand.u32 2147483647, %v2625_v30 }
0x3466   :  { %v2638_v37 = vor.u32 1.1754944e-38, %v2637_v18  ;;  %vm2636_vm4 = vcmp.eq.f32.partialorder %v2635_v41, 8.507059e+37 }
0x346a   :  { %v7134_v33 = vpop.eup %7133 }
0x346b   :  { %v2627_v35 = vmul.f32 %v7134_v33, %v2625_v30  ;;  %vm2632_vm1 = vweird.f32 %v7134_v33 }
0x346c   :  { %vm2633_vm3 = vmor %vm2631_vm2, %vm2632_vm1 }
0x346d   :  { %v2628_v36 = vsub.f32 1.0, %v2627_v35 }
0x346f   :  { %v2629_v9 = vmul.f32 %v7134_v33, %v2628_v36 }
0x3471   :  { %v2630_v32 = vadd.f32 %v7134_v33, %v2629_v9 }
0x3473   :  { %v2634_v42 = vsel %vm2633_vm3, %v7134_v33, %v2630_v32 }
0x3474   :  { %v2639_v43 = vsel %vm2636_vm4, %v2638_v37, %v2634_v42 }
0x3475   :  { %v2642_v44 = vmul.f32 %v2639_v43, %v2586_v17 }
0x34ba   :  { %v2645_v38 = vpop.permute.xlu2 %2644 }
0x34bb   :  { %v2647_v39 = vmul.f32 %v2645_v38, %v2639_v43 }
0x34bd   :  { %2649 = vrot.lane.b32.xlu0 %v2647_v39, %s8337_s28 }
0x352f   :  { %v2650_v40 = vpop.permute.xlu0 %2649 }
0x3530   :  { %v2652_v6 = vadd.f32 %v2650_v40, %v2642_v44 }
0x3532   :  { %7135 = vtanh.f32 %v2652_v6 }
0x3538   :  { %v7136_v45 = vpop.eup %7135 }
0x3539   :  { %2655 = vrot.lane.b32.xlu1 %v7136_v45, %s8336_s26 }
0x35ab   :  { %v2656_v7 = vpop.permute.xlu1 %2655 }
0x35ac   :  { %v2658_v46 = vmul.f32 %v2656_v7, %v2639_v43  ;;  %v2796_v7 = vld [vmem:[#allocation2 + $0x2] sm:$0x3] }
0x35ae   :  { %2660 = vrot.lane.b32.xlu2 %v2658_v46, %s8337_s28 }
0x3608   :  { %v2661_v47 = vpop.permute.xlu2 %2660 }
0x3609   :  { %2663 = vst.msk [vmem:[#allocation6 + $0x8] sm:$0x3] %vm701_vm5, %v2661_v47  ;;  %6710 = vmatmul.msk.f32.vlgmr.msrb.gmra.mxu0 %vm635_vm6, %v2661_v47 }
0x3686   :  { %v2684_v49 = vpop.f32.mrf.mxu0 }
0x3687   :  { %v2687_v50 = vadd.f32 %v2684_v49, %v2664_v48 }
0x3689   :  { %7137 = vtanh.f32 %v2687_v50  ;;  %v6711_v52 = vmul.f32 -1.442695, %v2687_v50 }
0x368b   :  { %7139 = vpow2.f32 %v6711_v52 }
0x368f   :  { %v7138_v51 = vpop.eup %7137 }
0x3690   :  { %2710 = vrot.lane.b32.xlu0 %v7138_v51, %s8336_s26 }
0x3691   :  { %v7140_v53 = vpop.eup %7139 }
0x3692   :  { %v2691_v54 = vadd.f32 1.0, %v7140_v53 }
0x3694   :  { %7141 = vrcp.f32 %v2691_v54  ;;  %v2703_v60 = vand.u32 2147483648, %v2691_v54  ;;  %vm2697_vm8 = vweird.f32 %v2691_v54  ;;  %v2701_v61 = vand.u32 2147483647, %v2691_v54 }
0x3696   :  { %v2704_v63 = vor.u32 1.1754944e-38, %v2703_v60  ;;  %vm2702_vm10 = vcmp.eq.f32.partialorder %v2701_v61, 8.507059e+37 }
0x369a   :  { %v7142_v55 = vpop.eup %7141 }
0x369b   :  { %v2693_v56 = vmul.f32 %v7142_v55, %v2691_v54  ;;  %vm2698_vm7 = vweird.f32 %v7142_v55 }
0x369c   :  { %vm2699_vm9 = vmor %vm2697_vm8, %vm2698_vm7 }
0x369d   :  { %v2694_v57 = vsub.f32 1.0, %v2693_v56 }
0x369f   :  { %v2695_v58 = vmul.f32 %v7142_v55, %v2694_v57 }
0x36a1   :  { %v2696_v59 = vadd.f32 %v7142_v55, %v2695_v58 }
0x36a3   :  { %v2700_v62 = vsel %vm2699_vm9, %v7142_v55, %v2696_v59 }
0x36a4   :  { %v2705_v1 = vsel %vm2702_vm10, %v2704_v63, %v2700_v62 }
0x36a5   :  { %v2708_v10 = vmul.f32 %v2705_v1, %v2652_v6 }
0x3702   :  { %v2711_v0 = vpop.permute.xlu0 %2710 }
0x3703   :  { %v2713_v5 = vmul.f32 %v2711_v0, %v2705_v1 }
0x3705   :  { %2715 = vrot.lane.b32.xlu1 %v2713_v5, %s8337_s28 }
0x3777   :  { %v2716_v4 = vpop.permute.xlu1 %2715 }
0x3778   :  { %v2718_v11 = vadd.f32 %v2716_v4, %v2708_v10 }
0x377a   :  { %7143 = vtanh.f32 %v2718_v11 }
0x3780   :  { %v7144_v13 = vpop.eup %7143 }
0x3781   :  { %2721 = vrot.lane.b32.xlu2 %v7144_v13, %s8336_s26 }
0x37db   :  { %v2722_v12 = vpop.permute.xlu2 %2721 }
0x37dc   :  { %v2724_v14 = vmul.f32 %v2722_v12, %v2705_v1  ;;  %v2862_v12 = vld [vmem:[#allocation2] sm:$0x3] }
0x37de   :  { %2726 = vrot.lane.b32.xlu0 %v2724_v14, %s8337_s28 }
0x3850   :  { %v2727_v17 = vpop.permute.xlu0 %2726 }
0x3851   :  { %2729 = vst.msk [vmem:[#allocation6 + $0x6] sm:$0x3] %vm701_vm5, %v2727_v17  ;;  %6712 = vmatmul.msk.f32.vlgmr.msrb.gmra.mxu1 %vm635_vm6, %v2727_v17 }
0x3859   :  { %6720 = vmatmul.msk.f32.vlgmr.msra.gmra.mxu1 %vm635_vm6, %v9195_v21 }
0x38ce   :  { %v2750_v24 = vpop.f32.mrf.mxu1 }
0x38cf   :  { %v2753_v25 = vadd.f32 %v2750_v24, %v2730_v23 }
0x38d1   :  { %7145 = vtanh.f32 %v2753_v25  ;;  %v6713_v3 = vmul.f32 -1.442695, %v2753_v25 }
0x38d3   :  { %7147 = vpow2.f32 %v6713_v3 }
0x38d7   :  { %v7146_v22 = vpop.eup %7145 }
0x38d8   :  { %2776 = vrot.lane.b32.xlu1 %v7146_v22, %s8336_s26 }
0x38d9   :  { %v7148_v26 = vpop.eup %7147 }
0x38da   :  { %v2757_v27 = vadd.f32 1.0, %v7148_v26 }
0x38dc   :  { %7149 = vrcp.f32 %v2757_v27  ;;  %v2769_v36 = vand.u32 2147483648, %v2757_v27  ;;  %vm2763_vm12 = vweird.f32 %v2757_v27  ;;  %v2767_v9 = vand.u32 2147483647, %v2757_v27 }
0x38de   :  { %v2770_v18 = vor.u32 1.1754944e-38, %v2769_v36  ;;  %vm2768_vm14 = vcmp.eq.f32.partialorder %v2767_v9, 8.507059e+37 }
0x38e2   :  { %v7150_v28 = vpop.eup %7149 }
0x38e3   :  { %v2759_v29 = vmul.f32 %v7150_v28, %v2757_v27  ;;  %vm2764_vm11 = vweird.f32 %v7150_v28 }
0x38e4   :  { %vm2765_vm13 = vmor %vm2763_vm12, %vm2764_vm11 }
0x38e5   :  { %v2760_v30 = vsub.f32 1.0, %v2759_v29 }
0x38e7   :  { %v2761_v33 = vmul.f32 %v7150_v28, %v2760_v30 }
0x38e9   :  { %v2762_v35 = vadd.f32 %v7150_v28, %v2761_v33 }
0x38eb   :  { %v2766_v32 = vsel %vm2765_vm13, %v7150_v28, %v2762_v35 }
0x38ec   :  { %v2771_v42 = vsel %vm2768_vm14, %v2770_v18, %v2766_v32 }
0x38ed   :  { %v2774_v38 = vmul.f32 %v2771_v42, %v2718_v11 }
0x394a   :  { %v2777_v41 = vpop.permute.xlu1 %2776 }
0x394b   :  { %v2779_v37 = vmul.f32 %v2777_v41, %v2771_v42 }
0x394d   :  { %2781 = vrot.lane.b32.xlu2 %v2779_v37, %s8337_s28  ;;  %v2937_v37 = vld [vmem:[#allocation24 + $0x18] sm:$0xff] }
0x394e   :  { %2956 = vmatpush.msra.mxu0 %v2937_v37 }
0x39a7   :  { %v2782_v43 = vpop.permute.xlu2 %2781 }
0x39a8   :  { %v2784_v39 = vadd.f32 %v2782_v43, %v2774_v38  ;;  %v2936_v38 = vld [vmem:[#allocation24 + $0x10] sm:$0xff]  ;;  %v9215_v43 = vld [vmem:[#allocation25 + $0x18] sm:$0xff] }
0x39a9   :  { %3021 = vmatpush.msra.mxu2 %v9215_v43  ;;  %3087 = vmatpush.msrb.mxu3 %v9215_v43 }
0x39aa   :  { %7151 = vtanh.f32 %v2784_v39  ;;  %2957 = vmatpush.msra.mxu0 %v2936_v38  ;;  %3351 = vmatpush.msrb.mxu1 %v9215_v43 }
0x39b0   :  { %v7152_v44 = vpop.eup %7151 }
0x39b1   :  { %2787 = vrot.lane.b32.xlu0 %v7152_v44, %s8336_s26  ;;  %v2934_v44 = vld [vmem:[#allocation24] sm:$0xff] }
0x3a23   :  { %v2788_v40 = vpop.permute.xlu0 %2787 }
0x3a24   :  { %v2790_v6 = vmul.f32 %v2788_v40, %v2771_v42  ;;  %v9220_v40 = vld [vmem:[#allocation25 + $0x10] sm:$0xff] }
0x3a25   :  { %3022 = vmatpush.msra.mxu2 %v9220_v40  ;;  %3088 = vmatpush.msrb.mxu3 %v9220_v40 }
0x3a26   :  { %2792 = vrot.lane.b32.xlu1 %v2790_v6, %s8337_s28  ;;  %v9222_v6 = vld [vmem:[#allocation25 + $0x8] sm:$0xff]  ;;  %3352 = vmatpush.msrb.mxu1 %v9220_v40 }
0x3a27   :  { %3023 = vmatpush.msra.mxu2 %v9222_v6  ;;  %3089 = vmatpush.msrb.mxu3 %v9222_v6 }
0x3a28   :  { %3353 = vmatpush.msrb.mxu1 %v9222_v6 }
0x3a98   :  { %v2793_v45 = vpop.permute.xlu1 %2792 }
0x3a99   :  { %2795 = vst.msk [vmem:[#allocation6 + $0x4] sm:$0x3] %vm701_vm5, %v2793_v45  ;;  %6714 = vmatmul.msk.f32.vlgmr.msrb.gmra.mxu2 %vm635_vm6, %v2793_v45  ;;  %v9227_v45 = vld [vmem:[#allocation25] sm:$0xff] }
0x3a9a   :  { %3024 = vmatpush.msra.mxu2 %v9227_v45  ;;  %3090 = vmatpush.msrb.mxu3 %v9227_v45 }
0x3a9b   :  { %3354 = vmatpush.msrb.mxu1 %v9227_v45 }
0x3a9c   :  { %3153 = vmatpush.msrb.mxu2 %v9215_v43 }
0x3a9e   :  { %3154 = vmatpush.msrb.mxu2 %v9220_v40 }
0x3aa0   :  { %3155 = vmatpush.msrb.mxu2 %v9222_v6 }
0x3aa1   :  { %3025 = vmatmul.f32.vlgmr.msra.gmra.mxu2 %v8335_v8 }
0x3aa2   :  { %3156 = vmatpush.msrb.mxu2 %v9227_v45 }
0x3aa4   :  { %3417 = vmatpush.msra.mxu2 %v9215_v43 }
0x3aa6   :  { %3418 = vmatpush.msra.mxu2 %v9220_v40 }
0x3aa8   :  { %3419 = vmatpush.msra.mxu2 %v9222_v6 }
0x3aaa   :  { %3420 = vmatpush.msra.mxu2 %v9227_v45 }
0x3b1c   :  { %v2816_v46 = vpop.f32.mrf.mxu2 }
0x3b1d   :  { %v2819_v47 = vadd.f32 %v2816_v46, %v2796_v7 }
0x3b1f   :  { %7153 = vtanh.f32 %v2819_v47  ;;  %v6715_v49 = vmul.f32 -1.442695, %v2819_v47  ;;  %v9257_v47 = vld [vmem:[#allocation6 + $0x8] sm:$0xff] }
0x3b21   :  { %7155 = vpow2.f32 %v6715_v49  ;;  %v2990_v49 = vpop.f32.mrf.mxu1 }
0x3b25   :  { %v7154_v48 = vpop.eup %7153 }
0x3b26   :  { %2842 = vrot.lane.b32.xlu2 %v7154_v48, %s8336_s26  ;;  %v9262_v48 = vld [vmem:[%s9932_s6] ss:$0 sm:$0xff] }
0x3b27   :  { %v7156_v50 = vpop.eup %7155 }
0x3b28   :  { %v2823_v51 = vadd.f32 1.0, %v7156_v50 }
0x3b2a   :  { %7157 = vrcp.f32 %v2823_v51  ;;  %v2835_v57 = vand.u32 2147483648, %v2823_v51  ;;  %vm2829_vm1 = vweird.f32 %v2823_v51  ;;  %v2833_v58 = vand.u32 2147483647, %v2823_v51 }
0x3b2c   :  { %v2836_v60 = vor.u32 1.1754944e-38, %v2835_v57  ;;  %vm2834_vm3 = vcmp.eq.f32.partialorder %v2833_v58, 8.507059e+37 }
0x3b30   :  { %v7158_v52 = vpop.eup %7157 }
0x3b31   :  { %v2825_v53 = vmul.f32 %v7158_v52, %v2823_v51  ;;  %vm2830_vm15 = vweird.f32 %v7158_v52 }
0x3b32   :  { %vm2831_vm2 = vmor %vm2829_vm1, %vm2830_vm15 }
0x3b33   :  { %v2826_v54 = vsub.f32 1.0, %v2825_v53  ;;  %v3026_v53 = vpop.f32.mrf.mxu2 }
0x3b35   :  { %v2827_v55 = vmul.f32 %v7158_v52, %v2826_v54 }
0x3b37   :  { %v2828_v56 = vadd.f32 %v7158_v52, %v2827_v55 }
0x3b39   :  { %v2832_v59 = vsel %vm2831_vm2, %v7158_v52, %v2828_v56 }
0x3b3a   :  { %v2837_v62 = vsel %vm2834_vm3, %v2836_v60, %v2832_v59 }
0x3b3b   :  { %v2840_v0 = vmul.f32 %v2837_v62, %v2784_v39  ;;  %v2935_v39 = vld [vmem:[#allocation24 + $0x8] sm:$0xff] }
0x3b3c   :  { %2958 = vmatpush.msra.mxu0 %v2935_v39 }
0x3b3e   :  { %2959 = vmatpush.msra.mxu0 %v2934_v44 }
0x3b40   :  { %3285 = vmatpush.msrb.mxu0 %v9215_v43 }
0x3b42   :  { %3286 = vmatpush.msrb.mxu0 %v9220_v40 }
0x3b44   :  { %3287 = vmatpush.msrb.mxu0 %v9222_v6 }
0x3b46   :  { %3288 = vmatpush.msrb.mxu0 %v9227_v45 }
0x3b80   :  { %v2843_v61 = vpop.permute.xlu2 %2842 }
0x3b81   :  { %v2845_v63 = vmul.f32 %v2843_v61, %v2837_v62 }
0x3b83   :  { %2847 = vrot.lane.b32.xlu0 %v2845_v63, %s8337_s28 }
0x3bf5   :  { %v2848_v1 = vpop.permute.xlu0 %2847 }
0x3bf6   :  { %v2850_v5 = vadd.f32 %v2848_v1, %v2840_v0 }
0x3bf8   :  { %7159 = vtanh.f32 %v2850_v5 }
0x3bfe   :  { %v7160_v10 = vpop.eup %7159 }
0x3bff   :  { %2853 = vrot.lane.b32.xlu1 %v7160_v10, %s8336_s26 }
0x3c71   :  { %v2854_v4 = vpop.permute.xlu1 %2853 }
0x3c72   :  { %v2856_v11 = vmul.f32 %v2854_v4, %v2837_v62 }
0x3c74   :  { %2858 = vrot.lane.b32.xlu2 %v2856_v11, %s8337_s28 }
0x3cce   :  { %v2859_v13 = vpop.permute.xlu2 %2858 }
0x3ccf   :  { %2861 = vst.msk [vmem:[#allocation6 + $0x2] sm:$0x3] %vm701_vm5, %v2859_v13  ;;  %6716 = vmatmul.msk.f32.vlgmr.msra.gmra.mxu3 %vm635_vm6, %v2859_v13 }
0x3cd0   :  { %3219 = vmatpush.msra.mxu3 %v9215_v43 }
0x3cd2   :  { %3220 = vmatpush.msra.mxu3 %v9220_v40 }
0x3cd4   :  { %3221 = vmatpush.msra.mxu3 %v9222_v6 }
0x3cd6   :  { %3222 = vmatpush.msra.mxu3 %v9227_v45 }
0x3d52   :  { %v2882_v14 = vpop.f32.mrf.mxu3 }
0x3d53   :  { %v2885_v15 = vadd.f32 %v2882_v14, %v2862_v12 }
0x3d55   :  { %7161 = vtanh.f32 %v2885_v15  ;;  %v6717_v19 = vmul.f32 -1.442695, %v2885_v15 }
0x3d57   :  { %7163 = vpow2.f32 %v6717_v19 }
0x3d5b   :  { %v7162_v31 = vpop.eup %7161 }
0x3d5c   :  { %2908 = vrot.lane.b32.xlu0 %v7162_v31, %s8336_s26 }
0x3d5d   :  { %v7164_v20 = vpop.eup %7163 }
0x3d5e   :  { %v2889_v17 = vadd.f32 1.0, %v7164_v20 }
0x3d60   :  { %7165 = vrcp.f32 %v2889_v17  ;;  %v2901_v26 = vand.u32 2147483648, %v2889_v17  ;;  %vm2895_vm7 = vweird.f32 %v2889_v17  ;;  %v2899_v27 = vand.u32 2147483647, %v2889_v17 }
0x3d62   :  { %v2902_v29 = vor.u32 1.1754944e-38, %v2901_v26  ;;  %vm2900_vm9 = vcmp.eq.f32.partialorder %v2899_v27, 8.507059e+37 }
0x3d66   :  { %v7166_v23 = vpop.eup %7165 }
0x3d67   :  { %v2891_v24 = vmul.f32 %v7166_v23, %v2889_v17  ;;  %vm2896_vm4 = vweird.f32 %v7166_v23 }
0x3d68   :  { %vm2897_vm8 = vmor %vm2895_vm7, %vm2896_vm4 }
0x3d69   :  { %v2892_v25 = vsub.f32 1.0, %v2891_v24 }
0x3d6b   :  { %v2893_v22 = vmul.f32 %v7166_v23, %v2892_v25 }
0x3d6d   :  { %v2894_v3 = vadd.f32 %v7166_v23, %v2893_v22 }
0x3d6f   :  { %v2898_v28 = vsel %vm2897_vm8, %v7166_v23, %v2894_v3 }
0x3d70   :  { %v2903_v33 = vsel %vm2900_vm9, %v2902_v29, %v2898_v28 }
0x3d71   :  { %v2906_v36 = vmul.f32 %v2903_v33, %v2850_v5 }
0x3dce   :  { %v2909_v30 = vpop.permute.xlu0 %2908 }
0x3dcf   :  { %v2911_v35 = vmul.f32 %v2909_v30, %v2903_v33 }
0x3dd1   :  { %2913 = vrot.lane.b32.xlu1 %v2911_v35, %s8337_s28 }
0x3e43   :  { %v2914_v9 = vpop.permute.xlu1 %2913 }
0x3e44   :  { %v2916_v32 = vadd.f32 %v2914_v9, %v2906_v36 }
0x3e46   :  { %7167 = vtanh.f32 %v2916_v32 }
0x3e4c   :  { %v7168_v18 = vpop.eup %7167 }
0x3e4d   :  { %2919 = vrot.lane.b32.xlu2 %v7168_v18, %s8336_s26 }
0x3ea7   :  { %v2920_v41 = vpop.permute.xlu2 %2919 }
0x3ea8   :  { %v2922_v42 = vmul.f32 %v2920_v41, %v2903_v33 }
0x3eaa   :  { %2924 = vrot.lane.b32.xlu0 %v2922_v42, %s8337_s28 }
0x3f1c   :  { %v2925_v7 = vpop.permute.xlu0 %2924 }
0x3f1d   :  { %2927 = vst.msk [vmem:[#allocation6] sm:$0x3] %vm701_vm5, %v2925_v7 }
0x3f24   :  { %v9253_v46 = vld [vmem:[#allocation6] sm:$0xff] }
0x3f25   :  { %6718 = vmatmul.msk.f32.vlgmr.msra.gmra.mxu0 %vm635_vm6, %v9253_v46 }
0x3f2d   :  { %6719 = vmatmul.msk.f32.gmra.mxu0 %vm635_vm6, %v9257_v47 }
0x3fa2   :  { %v2961_v50 = vpop.f32.mrf.mxu0 }
0x3fa3   :  { %v2991_v51 = vadd.f32 %v2990_v49, %v2961_v50 }
0x3fa5   :  { %v3000_v52 = vadd.f32 %v9262_v48, %v2991_v51 }
0x3fa7   :  { %3002 = vst [vmem:[#allocation2] sm:$0xff] %v3000_v52 }
0x3fae   :  { %v3008_v54 = vld [vmem:[#allocation2] sm:$0x3]  ;;  %v3072_v24 = vld [vmem:[#allocation2 + $0x2] sm:$0x3]  ;;  %v3138_v49 = vld [vmem:[#allocation2 + $0x4] sm:$0x3] }
0x3faf   :  { %v3029_v55 = vadd.f32 %v3026_v53, %v3008_v54 }
0x3fb1   :  { %7169 = vtanh.f32 %v3029_v55  ;;  %v6722_v57 = vmul.f32 -1.442695, %v3029_v55 }
0x3fb3   :  { %7171 = vpow2.f32 %v6722_v57 }
0x3fb7   :  { %v7170_v56 = vpop.eup %7169 }
0x3fb8   :  { %3052 = vrot.lane.b32.xlu1 %v7170_v56, %s8336_s26 }
0x3fb9   :  { %v7172_v58 = vpop.eup %7171 }
0x3fba   :  { %v3033_v59 = vadd.f32 1.0, %v7172_v58 }
0x3fbc   :  { %7173 = vrcp.f32 %v3033_v59  ;;  %v3045_v1 = vand.u32 2147483648, %v3033_v59  ;;  %vm3039_vm11 = vweird.f32 %v3033_v59  ;;  %v3043_v5 = vand.u32 2147483647, %v3033_v59 }
0x3fbe   :  { %v3046_v4 = vor.u32 1.1754944e-38, %v3045_v1  ;;  %vm3044_vm13 = vcmp.eq.f32.partialorder %v3043_v5, 8.507059e+37  ;;  %v2291_v1 = vadd.f32 %v9169_v34, %v9099_v16 }
0x3fc2   :  { %v7174_v60 = vpop.eup %7173 }
0x3fc3   :  { %v3035_v61 = vmul.f32 %v7174_v60, %v3033_v59  ;;  %vm3040_vm10 = vweird.f32 %v7174_v60 }
0x3fc4   :  { %vm3041_vm12 = vmor %vm3039_vm11, %vm3040_vm10 }
0x3fc5   :  { %v3036_v62 = vsub.f32 1.0, %v3035_v61 }
0x3fc7   :  { %v3037_v63 = vmul.f32 %v7174_v60, %v3036_v62 }
0x3fc9   :  { %v3038_v0 = vadd.f32 %v7174_v60, %v3037_v63 }
0x3fcb   :  { %v3042_v10 = vsel %vm3041_vm12, %v7174_v60, %v3038_v0 }
0x3fcc   :  { %v3047_v13 = vsel %vm3044_vm13, %v3046_v4, %v3042_v10 }
0x3fcd   :  { %v3050_v14 = vmul.f32 0.0, %v3047_v13 }
0x402a   :  { %v3053_v11 = vpop.permute.xlu1 %3052 }
0x402b   :  { %v3055_v12 = vmul.f32 %v3053_v11, %v3047_v13 }
0x402d   :  { %3057 = vrot.lane.b32.xlu2 %v3055_v12, %s8337_s28 }
0x4087   :  { %v3058_v15 = vpop.permute.xlu2 %3057 }
0x4088   :  { %v3060_v31 = vadd.f32 %v3058_v15, %v3050_v14 }
0x408a   :  { %7175 = vtanh.f32 %v3060_v31 }
0x4090   :  { %v7176_v19 = vpop.eup %7175 }
0x4091   :  { %3063 = vrot.lane.b32.xlu0 %v7176_v19, %s8336_s26 }
0x4103   :  { %v3064_v20 = vpop.permute.xlu0 %3063 }
0x4104   :  { %v3066_v17 = vmul.f32 %v3064_v20, %v3047_v13 }
0x4106   :  { %3068 = vrot.lane.b32.xlu1 %v3066_v17, %s8337_s28 }
0x4178   :  { %v3069_v23 = vpop.permute.xlu1 %3068 }
0x4179   :  { %3071 = vst.msk [vmem:[#allocation3] sm:$0x3] %vm701_vm5, %v3069_v23  ;;  %6723 = vmatmul.msk.f32.vlgmr.msrb.gmra.mxu3 %vm635_vm6, %v3069_v23 }
0x417a   :  { %3483 = vmatpush.msrb.mxu3 %v9215_v43 }
0x417c   :  { %3484 = vmatpush.msrb.mxu3 %v9220_v40 }
0x417e   :  { %3485 = vmatpush.msrb.mxu3 %v9222_v6 }
0x4180   :  { %3486 = vmatpush.msrb.mxu3 %v9227_v45 }
0x41fc   :  { %v3092_v25 = vpop.f32.mrf.mxu3 }
0x41fd   :  { %v3095_v22 = vadd.f32 %v3092_v25, %v3072_v24 }
0x41ff   :  { %7177 = vtanh.f32 %v3095_v22  ;;  %v6724_v26 = vmul.f32 -1.442695, %v3095_v22 }
0x4201   :  { %7179 = vpow2.f32 %v6724_v26 }
0x4205   :  { %v7178_v3 = vpop.eup %7177 }
0x4206   :  { %3118 = vrot.lane.b32.xlu2 %v7178_v3, %s8336_s26 }
0x4207   :  { %v7180_v27 = vpop.eup %7179 }
0x4208   :  { %v3099_v28 = vadd.f32 1.0, %v7180_v27 }
0x420a   :  { %7181 = vrcp.f32 %v3099_v28  ;;  %v3111_v9 = vand.u32 2147483648, %v3099_v28  ;;  %vm3105_vm15 = vweird.f32 %v3099_v28  ;;  %v3109_v32 = vand.u32 2147483647, %v3099_v28 }
0x420c   :  { %v3112_v41 = vor.u32 1.1754944e-38, %v3111_v9  ;;  %vm3110_vm2 = vcmp.eq.f32.partialorder %v3109_v32, 8.507059e+37 }
0x4210   :  { %v7182_v29 = vpop.eup %7181 }
0x4211   :  { %v3101_v30 = vmul.f32 %v7182_v29, %v3099_v28  ;;  %vm3106_vm14 = vweird.f32 %v7182_v29 }
0x4212   :  { %vm3107_vm1 = vmor %vm3105_vm15, %vm3106_vm14 }
0x4213   :  { %v3102_v33 = vsub.f32 1.0, %v3101_v30 }
0x4215   :  { %v3103_v35 = vmul.f32 %v7182_v29, %v3102_v33 }
0x4217   :  { %v3104_v36 = vadd.f32 %v7182_v29, %v3103_v35 }
0x4219   :  { %v3108_v18 = vsel %vm3107_vm1, %v7182_v29, %v3104_v36  ;;  %v3204_v36 = vld [vmem:[#allocation2 + $0x6] sm:$0x3] }
0x421a   :  { %v3113_v37 = vsel %vm3110_vm2, %v3112_v41, %v3108_v18 }
0x421b   :  { %v3116_v43 = vmul.f32 %v3113_v37, %v3060_v31  ;;  %v6698_v31 = vmul.f32 -1.442695, %v2291_v1 }
0x4260   :  { %v3119_v42 = vpop.permute.xlu2 %3118 }
0x4261   :  { %v3121_v38 = vmul.f32 %v3119_v42, %v3113_v37 }
0x4263   :  { %3123 = vrot.lane.b32.xlu0 %v3121_v38, %s8337_s28 }
0x42d5   :  { %v3124_v39 = vpop.permute.xlu0 %3123 }
0x42d6   :  { %v3126_v44 = vadd.f32 %v3124_v39, %v3116_v43 }
0x42d8   :  { %7183 = vtanh.f32 %v3126_v44 }
0x42de   :  { %v7184_v40 = vpop.eup %7183 }
0x42df   :  { %3129 = vrot.lane.b32.xlu1 %v7184_v40, %s8336_s26 }
0x4351   :  { %v3130_v6 = vpop.permute.xlu1 %3129 }
0x4352   :  { %v3132_v45 = vmul.f32 %v3130_v6, %v3113_v37 }
0x4354   :  { %3134 = vrot.lane.b32.xlu2 %v3132_v45, %s8337_s28 }
0x43ae   :  { %v3135_v7 = vpop.permute.xlu2 %3134 }
0x43af   :  { %3137 = vst.msk [vmem:[#allocation3 + $0x2] sm:$0x3] %vm701_vm5, %v3135_v7  ;;  %6725 = vmatmul.msk.f32.vlgmr.msrb.gmra.mxu2 %vm635_vm6, %v3135_v7 }
0x4432   :  { %v3158_v50 = vpop.f32.mrf.mxu2 }
0x4433   :  { %v3161_v51 = vadd.f32 %v3158_v50, %v3138_v49 }
0x4435   :  { %7185 = vtanh.f32 %v3161_v51  ;;  %v6726_v53 = vmul.f32 -1.442695, %v3161_v51 }
0x4437   :  { %7187 = vpow2.f32 %v6726_v53 }
0x443b   :  { %v7186_v52 = vpop.eup %7185 }
0x443c   :  { %3184 = vrot.lane.b32.xlu0 %v7186_v52, %s8336_s26 }
0x443d   :  { %v7188_v54 = vpop.eup %7187 }
0x443e   :  { %v3165_v55 = vadd.f32 1.0, %v7188_v54 }
0x4440   :  { %7189 = vrcp.f32 %v3165_v55  ;;  %v3177_v61 = vand.u32 2147483648, %v3165_v55  ;;  %vm3171_vm4 = vweird.f32 %v3165_v55  ;;  %v3175_v62 = vand.u32 2147483647, %v3165_v55 }
0x4441   :  { %7191 = vtanh.f32 %v2291_v1 }
0x4442   :  { %v3178_v0 = vor.u32 1.1754944e-38, %v3177_v61  ;;  %vm3176_vm8 = vcmp.eq.f32.partialorder %v3175_v62, 8.507059e+37 }
0x4446   :  { %v7190_v56 = vpop.eup %7189 }
0x4447   :  { %v3167_v57 = vmul.f32 %v7190_v56, %v3165_v55  ;;  %vm3172_vm3 = vweird.f32 %v7190_v56  ;;  %v7192_v11 = vpop.eup %7191 }
0x4448   :  { %vm3173_vm7 = vmor %vm3171_vm4, %vm3172_vm3 }
0x4449   :  { %v3168_v58 = vsub.f32 1.0, %v3167_v57 }
0x444b   :  { %v3169_v59 = vmul.f32 %v7190_v56, %v3168_v58 }
0x444d   :  { %v3170_v60 = vadd.f32 %v7190_v56, %v3169_v59 }
0x444f   :  { %v3174_v63 = vsel %vm3173_vm7, %v7190_v56, %v3170_v60 }
0x4450   :  { %v3179_v10 = vsel %vm3176_vm8, %v3178_v0, %v3174_v63 }
0x4451   :  { %v3182_v13 = vmul.f32 %v3179_v10, %v3126_v44 }
0x44ae   :  { %v3185_v5 = vpop.permute.xlu0 %3184 }
0x44af   :  { %v3187_v4 = vmul.f32 %v3185_v5, %v3179_v10  ;;  %v2964_v5 = vpop.f32.mrf.mxu0 }
0x44b1   :  { %3189 = vrot.lane.b32.xlu1 %v3187_v4, %s8337_s28 }
0x44b9   :  { %2314 = vrot.lane.b32.xlu1 %v7192_v11, %s8336_s26 }
0x4523   :  { %v3190_v12 = vpop.permute.xlu1 %3189 }
0x4524   :  { %v9286_v14 = vadd.f32 %v3190_v12, %v3182_v13  ;;  %v3543_v13 = vld [vmem:[#allocation28 + $0x18] sm:$0xff]  ;;  %v3542_v12 = vld [vmem:[#allocation28 + $0x10] sm:$0xff] }
0x4525   :  { %3556 = vmatpush.msra.mxu0 %v3543_v13 }
0x4526   :  { %7193 = vtanh.f32 %v9286_v14 }
0x4527   :  { %7195 = vpow2.f32 %v6698_v31  ;;  %3557 = vmatpush.msra.mxu0 %v3542_v12 }
0x452b   :  { %v2315_v29 = vpop.permute.xlu1 %2314 }
0x452c   :  { %v7194_v15 = vpop.eup %7193 }
0x452d   :  { %3195 = vrot.lane.b32.xlu2 %v7194_v15, %s8336_s26  ;;  %v7196_v16 = vpop.eup %7195  ;;  %v3540_v15 = vld [vmem:[#allocation28] sm:$0xff] }
0x452e   :  { %v2295_v34 = vadd.f32 1.0, %v7196_v16 }
0x4530   :  { %7197 = vrcp.f32 %v2295_v34  ;;  %v2307_v3 = vand.u32 2147483648, %v2295_v34  ;;  %vm2301_vm10 = vweird.f32 %v2295_v34  ;;  %v2305_v26 = vand.u32 2147483647, %v2295_v34 }
0x4532   :  { %v2308_v28 = vor.u32 1.1754944e-38, %v2307_v3  ;;  %vm2306_vm12 = vcmp.eq.f32.partialorder %v2305_v26, 8.507059e+37 }
0x4536   :  { %v7198_v19 = vpop.eup %7197 }
0x4537   :  { %v2297_v20 = vmul.f32 %v7198_v19, %v2295_v34  ;;  %vm2302_vm9 = vweird.f32 %v7198_v19 }
0x4538   :  { %vm2303_vm11 = vmor %vm2301_vm10, %vm2302_vm9 }
0x4539   :  { %v2298_v17 = vsub.f32 1.0, %v2297_v20 }
0x453b   :  { %v2299_v23 = vmul.f32 %v7198_v19, %v2298_v17 }
0x453d   :  { %v2300_v25 = vadd.f32 %v7198_v19, %v2299_v23 }
0x453f   :  { %v2304_v27 = vsel %vm2303_vm11, %v7198_v19, %v2300_v25 }
0x4540   :  { %v2309_v30 = vsel %vm2306_vm12, %v2308_v28, %v2304_v27 }
0x4541   :  { %v2317_v33 = vmul.f32 %v2315_v29, %v2309_v30  ;;  %v2312_v41 = vmul.f32 %v2309_v30, %v9151_v2 }
0x4587   :  { %v3196_v24 = vpop.permute.xlu2 %3195 }
0x4588   :  { %v3198_v22 = vmul.f32 %v3196_v24, %v3179_v10 }
0x458a   :  { %3200 = vrot.lane.b32.xlu0 %v3198_v22, %s8337_s28 }
0x4592   :  { %2319 = vrot.lane.b32.xlu0 %v2317_v33, %s8337_s28 }
0x45fc   :  { %v3201_v35 = vpop.permute.xlu0 %3200 }
0x45fd   :  { %3203 = vst.msk [vmem:[#allocation3 + $0x4] sm:$0x3] %vm701_vm5, %v3201_v35  ;;  %6727 = vmatmul.msk.f32.vlgmr.msra.gmra.mxu3 %vm635_vm6, %v3201_v35 }
0x4604   :  { %v2320_v18 = vpop.permute.xlu0 %2319 }
0x4605   :  { %v2322_v42 = vadd.f32 %v2320_v18, %v2312_v41 }
0x4680   :  { %v3224_v9 = vpop.f32.mrf.mxu3 }
0x4681   :  { %v3227_v32 = vadd.f32 %v3224_v9, %v3204_v36 }
0x4683   :  { %7199 = vtanh.f32 %v3227_v32  ;;  %v6728_v43 = vmul.f32 -1.442695, %v3227_v32 }
0x4684   :  { %7201 = vtanh.f32 %v2322_v42  ;;  %v3539_v42 = vld [vmem:[#allocation27 + $0x18] sm:$0xff] }
0x4685   :  { %7203 = vpow2.f32 %v6728_v43  ;;  %3579 = vmatpush.msra.mxu1 %v3539_v42  ;;  %v3536_v43 = vld [vmem:[#allocation27] sm:$0xff] }
0x4689   :  { %v7200_v37 = vpop.eup %7199 }
0x468a   :  { %3250 = vrot.lane.b32.xlu2 %v7200_v37, %s8336_s26  ;;  %v7202_v38 = vpop.eup %7201  ;;  %v3538_v37 = vld [vmem:[#allocation27 + $0x10] sm:$0xff] }
0x468b   :  { %v7204_v39 = vpop.eup %7203  ;;  %3580 = vmatpush.msra.mxu1 %v3538_v37 }
0x468c   :  { %v3231_v44 = vadd.f32 1.0, %v7204_v39 }
0x468e   :  { %7205 = vrcp.f32 %v3231_v44  ;;  %v3243_v2 = vand.u32 2147483648, %v3231_v44  ;;  %vm3237_vm14 = vweird.f32 %v3231_v44  ;;  %v3241_v50 = vand.u32 2147483647, %v3231_v44 }
0x4690   :  { %v3244_v52 = vor.u32 1.1754944e-38, %v3243_v2  ;;  %vm3242_vm1 = vcmp.eq.f32.partialorder %v3241_v50, 8.507059e+37 }
0x4692   :  { %2325 = vrot.lane.b32.xlu2 %v7202_v38, %s8336_s26  ;;  %v3537_v38 = vld [vmem:[#allocation27 + $0x8] sm:$0xff] }
0x4693   :  { %3581 = vmatpush.msra.mxu1 %v3537_v38 }
0x4694   :  { %v7206_v40 = vpop.eup %7205 }
0x4695   :  { %v3233_v6 = vmul.f32 %v7206_v40, %v3231_v44  ;;  %vm3238_vm13 = vweird.f32 %v7206_v40  ;;  %3582 = vmatpush.msra.mxu1 %v3536_v43 }
0x4696   :  { %vm3239_vm15 = vmor %vm3237_vm14, %vm3238_vm13 }
0x4697   :  { %v3234_v45 = vsub.f32 1.0, %v3233_v6 }
0x4699   :  { %v3235_v7 = vmul.f32 %v7206_v40, %v3234_v45 }
0x469b   :  { %v3236_v49 = vadd.f32 %v7206_v40, %v3235_v7  ;;  %v6915_v7 = vld [vmem:[%s9933_s4] ss:$0 sm:$0xff] }
0x469d   :  { %v3240_v51 = vsel %vm3239_vm15, %v7206_v40, %v3236_v49 }
0x469e   :  { %v3245_v54 = vsel %vm3242_vm1, %v3244_v52, %v3240_v51 }
0x469f   :  { %v3248_v58 = vmul.f32 %v3245_v54, %v9286_v14  ;;  %v3541_v14 = vld [vmem:[#allocation28 + $0x8] sm:$0xff] }
0x46a0   :  { %3558 = vmatpush.msra.mxu0 %v3541_v14 }
0x46a2   :  { %3559 = vmatpush.msra.mxu0 %v3540_v15 }
0x46e4   :  { %v3251_v53 = vpop.permute.xlu2 %3250 }
0x46e5   :  { %v3253_v55 = vmul.f32 %v3251_v53, %v3245_v54 }
0x46e7   :  { %3255 = vrot.lane.b32.xlu1 %v3253_v55, %s8337_s28 }
0x46ec   :  { %v2326_v56 = vpop.permute.xlu2 %2325 }
0x46ed   :  { %v2328_v57 = vmul.f32 %v2326_v56, %v2309_v30 }
0x46ef   :  { %2330 = vrot.lane.b32.xlu1 %v2328_v57, %s8337_s28 }
0x4759   :  { %v3256_v59 = vpop.permute.xlu1 %3255 }
0x475a   :  { %v3258_v60 = vadd.f32 %v3256_v59, %v3248_v58 }
0x475c   :  { %7207 = vtanh.f32 %v3258_v60 }
0x4761   :  { %v2331_v61 = vpop.permute.xlu1 %2330 }
0x4762   :  { %v7208_v62 = vpop.eup %7207  ;;  %2333 = vst.msk [vmem:[#allocation5 + $0xe] sm:$0x3] %vm701_vm5, %v2331_v61 }
0x4763   :  { %3261 = vrot.lane.b32.xlu0 %v7208_v62, %s8336_s26 }
0x4769   :  { %v9302_v63 = vld [vmem:[#allocation5 + $0x8] sm:$0xff] }
0x476a   :  { %6721 = vmatmul.msk.f32.gmra.mxu1 %vm635_vm6, %v9302_v63 }
0x47d5   :  { %v3262_v0 = vpop.permute.xlu0 %3261 }
0x47d6   :  { %v3264_v1 = vmul.f32 %v3262_v0, %v3245_v54 }
0x47d8   :  { %3266 = vrot.lane.b32.xlu2 %v3264_v1, %s8337_s28 }
0x47e7   :  { %v2993_v10 = vpop.f32.mrf.mxu1 }
0x47e8   :  { %v2994_v4 = vadd.f32 %v2993_v10, %v2964_v5 }
0x47ea   :  { %v3001_v11 = vadd.f32 %v9262_v48, %v2994_v4 }
0x47ec   :  { %3003 = vst [vmem:[#allocation2 + $0x8] sm:$0xff] %v3001_v11 }
0x47f3   :  { %v3270_v48 = vld [vmem:[#allocation2 + $0x8] sm:$0x3]  ;;  %v3336_v44 = vld [vmem:[#allocation2 + $0xa] sm:$0x3]  ;;  %v9326_v55 = vld [vmem:[#allocation2 + $0xc] sm:$0x3] }
0x47f4   :  { %v9328_v56 = vld [vmem:[#allocation2 + $0xe] sm:$0x3] }
0x4832   :  { %v3267_v31 = vpop.permute.xlu2 %3266 }
0x4833   :  { %3269 = vst.msk [vmem:[#allocation3 + $0x6] sm:$0x3] %vm701_vm5, %v3267_v31  ;;  %6729 = vmatmul.msk.f32.vlgmr.msrb.gmra.mxu0 %vm635_vm6, %v3267_v31 }
0x483b   :  { %6737 = vmatmul.msk.f32.vlgmr.msra.gmra.mxu0 %vm635_vm6, %v9253_v46 }
0x4843   :  { %6738 = vmatmul.msk.f32.gmra.mxu0 %vm635_vm6, %v9257_v47 }
0x48b0   :  { %v3290_v16 = vpop.f32.mrf.mxu0 }
0x48b1   :  { %v3293_v34 = vadd.f32 %v3290_v16, %v3270_v48 }
0x48b3   :  { %7209 = vtanh.f32 %v3293_v34  ;;  %v6730_v20 = vmul.f32 -1.442695, %v3293_v34 }
0x48b5   :  { %7211 = vpow2.f32 %v6730_v20  ;;  %v9338_v20 = vld [vmem:[#allocation30 + $0x10] sm:$0xff] }
0x48b8   :  { %v3561_v45 = vpop.f32.mrf.mxu0 }
0x48b9   :  { %v7210_v19 = vpop.eup %7209 }
0x48ba   :  { %3316 = vrot.lane.b32.xlu0 %v7210_v19, %s8336_s26  ;;  %v9336_v19 = vld [vmem:[#allocation30 + $0x18] sm:$0xff] }
0x48bb   :  { %v7212_v17 = vpop.eup %7211  ;;  %3615 = vmatpush.msrb.mxu2 %v9336_v19  ;;  %3681 = vmatpush.msra.mxu3 %v9336_v19 }
0x48bc   :  { %v3297_v23 = vadd.f32 1.0, %v7212_v17  ;;  %v9342_v17 = vld [vmem:[#allocation30 + $0x8] sm:$0xff]  ;;  %3879 = vmatpush.msrb.mxu0 %v9336_v19 }
0x48bd   :  { %3616 = vmatpush.msrb.mxu2 %v9338_v20  ;;  %3682 = vmatpush.msra.mxu3 %v9338_v20 }
0x48be   :  { %7213 = vrcp.f32 %v3297_v23  ;;  %v3309_v26 = vand.u32 2147483648, %v3297_v23  ;;  %vm3303_vm3 = vweird.f32 %v3297_v23  ;;  %v3307_v47 = vand.u32 2147483647, %v3297_v23  ;;  %3880 = vmatpush.msrb.mxu0 %v9338_v20 }
0x48bf   :  { %3617 = vmatpush.msrb.mxu2 %v9342_v17  ;;  %3683 = vmatpush.msra.mxu3 %v9342_v17 }
0x48c0   :  { %v3310_v28 = vor.u32 1.1754944e-38, %v3309_v26  ;;  %vm3308_vm7 = vcmp.eq.f32.partialorder %v3307_v47, 8.507059e+37  ;;  %v3564_v52 = vpop.f32.mrf.mxu0  ;;  %3881 = vmatpush.msrb.mxu0 %v9342_v17 }
0x48c4   :  { %v7214_v24 = vpop.eup %7213 }
0x48c5   :  { %v3299_v25 = vmul.f32 %v7214_v24, %v3297_v23  ;;  %vm3304_vm2 = vweird.f32 %v7214_v24  ;;  %v9348_v23 = vld [vmem:[#allocation30] sm:$0xff] }
0x48c6   :  { %vm3305_vm4 = vmor %vm3303_vm3, %vm3304_vm2  ;;  %3618 = vmatpush.msrb.mxu2 %v9348_v23  ;;  %3684 = vmatpush.msra.mxu3 %v9348_v23 }
0x48c7   :  { %v3300_v22 = vsub.f32 1.0, %v3299_v25  ;;  %3882 = vmatpush.msrb.mxu0 %v9348_v23 }
0x48c9   :  { %v3301_v3 = vmul.f32 %v7214_v24, %v3300_v22 }
0x48cb   :  { %v3302_v46 = vadd.f32 %v7214_v24, %v3301_v3 }
0x48cd   :  { %v3306_v27 = vsel %vm3305_vm4, %v7214_v24, %v3302_v46 }
0x48ce   :  { %v3311_v30 = vsel %vm3308_vm7, %v3310_v28, %v3306_v27 }
0x48cf   :  { %v3314_v35 = vmul.f32 %v3311_v30, %v3258_v60 }
0x492c   :  { %v3317_v29 = vpop.permute.xlu0 %3316 }
0x492d   :  { %v3319_v33 = vmul.f32 %v3317_v29, %v3311_v30 }
0x492f   :  { %3321 = vrot.lane.b32.xlu1 %v3319_v33, %s8337_s28 }
0x49a1   :  { %v3322_v36 = vpop.permute.xlu1 %3321 }
0x49a2   :  { %v3324_v9 = vadd.f32 %v3322_v36, %v3314_v35 }
0x49a4   :  { %7215 = vtanh.f32 %v3324_v9 }
0x49aa   :  { %v7216_v32 = vpop.eup %7215 }
0x49ab   :  { %3327 = vrot.lane.b32.xlu2 %v7216_v32, %s8336_s26 }
0x4a05   :  { %v3328_v18 = vpop.permute.xlu2 %3327 }
0x4a06   :  { %v3330_v41 = vmul.f32 %v3328_v18, %v3311_v30 }
0x4a08   :  { %3332 = vrot.lane.b32.xlu0 %v3330_v41, %s8337_s28 }
0x4a7a   :  { %v3333_v39 = vpop.permute.xlu0 %3332 }
0x4a7b   :  { %3335 = vst.msk [vmem:[#allocation3 + $0x8] sm:$0x3] %vm701_vm5, %v3333_v39  ;;  %6731 = vmatmul.msk.f32.vlgmr.msrb.gmra.mxu1 %vm635_vm6, %v3333_v39 }
0x4a7c   :  { %3945 = vmatpush.msrb.mxu1 %v9336_v19 }
0x4a7e   :  { %3946 = vmatpush.msrb.mxu1 %v9338_v20 }
0x4a80   :  { %3947 = vmatpush.msrb.mxu1 %v9342_v17 }
0x4a82   :  { %3948 = vmatpush.msrb.mxu1 %v9348_v23 }
0x4a83   :  { %6739 = vmatmul.msk.f32.vlgmr.msra.gmra.mxu1 %vm635_vm6, %v9195_v21 }
0x4a8b   :  { %6740 = vmatmul.msk.f32.gmra.mxu1 %vm635_vm6, %v9302_v63 }
0x4af8   :  { %v3356_v40 = vpop.f32.mrf.mxu1 }
0x4af9   :  { %v3359_v6 = vadd.f32 %v3356_v40, %v3336_v44 }
0x4afb   :  { %7217 = vtanh.f32 %v3359_v6  ;;  %v6732_v57 = vmul.f32 -1.442695, %v3359_v6 }
0x4afd   :  { %7219 = vpow2.f32 %v6732_v57 }
0x4b00   :  { %v3584_v49 = vpop.f32.mrf.mxu1 }
0x4b01   :  { %v7218_v2 = vpop.eup %7217  ;;  %v3585_v50 = vadd.f32 %v3584_v49, %v3561_v45 }
0x4b02   :  { %3382 = vrot.lane.b32.xlu1 %v7218_v2, %s8336_s26 }
0x4b03   :  { %v3594_v51 = vadd.f32 %v6915_v7, %v3585_v50  ;;  %v7220_v58 = vpop.eup %7219 }
0x4b04   :  { %v3363_v59 = vadd.f32 1.0, %v7220_v58 }
0x4b05   :  { %3596 = vst [vmem:[#allocation2] sm:$0xff] %v3594_v51 }
0x4b06   :  { %7221 = vrcp.f32 %v3363_v59  ;;  %v3375_v1 = vand.u32 2147483648, %v3363_v59  ;;  %vm3369_vm9 = vweird.f32 %v3363_v59  ;;  %v3373_v5 = vand.u32 2147483647, %v3363_v59 }
0x4b08   :  { %v3587_v53 = vpop.f32.mrf.mxu1  ;;  %v3376_v4 = vor.u32 1.1754944e-38, %v3375_v1  ;;  %vm3374_vm11 = vcmp.eq.f32.partialorder %v3373_v5, 8.507059e+37 }
0x4b09   :  { %v3588_v54 = vadd.f32 %v3587_v53, %v3564_v52 }
0x4b0b   :  { %v3595_v21 = vadd.f32 %v6915_v7, %v3588_v54 }
0x4b0c   :  { %v7222_v60 = vpop.eup %7221 }
0x4b0d   :  { %3597 = vst [vmem:[#allocation2 + $0x8] sm:$0xff] %v3595_v21  ;;  %v3365_v61 = vmul.f32 %v7222_v60, %v3363_v59  ;;  %vm3370_vm8 = vweird.f32 %v7222_v60 }
0x4b0e   :  { %vm3371_vm10 = vmor %vm3369_vm9, %vm3370_vm8 }
0x4b0f   :  { %v3366_v62 = vsub.f32 1.0, %v3365_v61 }
0x4b11   :  { %v3367_v63 = vmul.f32 %v7222_v60, %v3366_v62 }
0x4b13   :  { %v3368_v0 = vadd.f32 %v7222_v60, %v3367_v63 }
0x4b14   :  { %v3602_v3 = vld [vmem:[#allocation2 + $0xe] sm:$0x3] }
0x4b15   :  { %v3372_v10 = vsel %vm3371_vm10, %v7222_v60, %v3368_v0 }
0x4b16   :  { %v3377_v13 = vsel %vm3374_vm11, %v3376_v4, %v3372_v10 }
0x4b17   :  { %v3380_v14 = vmul.f32 %v3377_v13, %v3324_v9 }
0x4b74   :  { %v3383_v11 = vpop.permute.xlu1 %3382 }
0x4b75   :  { %v3385_v12 = vmul.f32 %v3383_v11, %v3377_v13 }
0x4b77   :  { %3387 = vrot.lane.b32.xlu2 %v3385_v12, %s8337_s28 }
0x4bd1   :  { %v3388_v15 = vpop.permute.xlu2 %3387 }
0x4bd2   :  { %v9331_v31 = vadd.f32 %v3388_v15, %v3380_v14  ;;  %v3666_v15 = vld [vmem:[#allocation2 + $0xc] sm:$0x3] }
0x4bd4   :  { %7223 = vtanh.f32 %v9331_v31 }
0x4bda   :  { %v7224_v48 = vpop.eup %7223 }
0x4bdb   :  { %3393 = vrot.lane.b32.xlu0 %v7224_v48, %s8336_s26 }
0x4c4d   :  { %v3394_v16 = vpop.permute.xlu0 %3393 }
0x4c4e   :  { %v3396_v34 = vmul.f32 %v3394_v16, %v3377_v13 }
0x4c50   :  { %3398 = vrot.lane.b32.xlu1 %v3396_v34, %s8337_s28 }
0x4cc2   :  { %v3399_v24 = vpop.permute.xlu1 %3398 }
0x4cc3   :  { %3401 = vst.msk [vmem:[#allocation3 + $0xa] sm:$0x3] %vm701_vm5, %v3399_v24  ;;  %6733 = vmatmul.msk.f32.vlgmr.msra.gmra.mxu2 %vm635_vm6, %v3399_v24 }
0x4cc4   :  { %3747 = vmatpush.msra.mxu2 %v9336_v19 }
0x4cc6   :  { %3748 = vmatpush.msra.mxu2 %v9338_v20 }
0x4cc8   :  { %3749 = vmatpush.msra.mxu2 %v9342_v17 }
0x4cca   :  { %3750 = vmatpush.msra.mxu2 %v9348_v23 }
0x4ccb   :  { %3619 = vmatmul.f32.vlgmr.msrb.gmra.mxu2 %v8335_v8 }
0x4ccc   :  { %4011 = vmatpush.msrb.mxu2 %v9336_v19 }
0x4cce   :  { %4012 = vmatpush.msrb.mxu2 %v9338_v20 }
0x4cd0   :  { %4013 = vmatpush.msrb.mxu2 %v9342_v17 }
0x4cd2   :  { %4014 = vmatpush.msrb.mxu2 %v9348_v23 }
0x4d46   :  { %v3422_v25 = vpop.f32.mrf.mxu2 }
0x4d47   :  { %v3425_v22 = vadd.f32 %v3422_v25, %v9326_v55 }
0x4d49   :  { %7225 = vtanh.f32 %v3425_v22  ;;  %v6734_v28 = vmul.f32 -1.442695, %v3425_v22 }
0x4d4e   :  { %v3620_v46 = vpop.f32.mrf.mxu2 }
0x4d4f   :  { %v7226_v26 = vpop.eup %7225  ;;  %v3623_v47 = vadd.f32 %v3620_v46, %v3602_v3 }
0x4d50   :  { %3448 = vrot.lane.b32.xlu2 %v7226_v26, %s8336_s26 }
0x4d51   :  { %7227 = vtanh.f32 %v3623_v47  ;;  %v6741_v9 = vmul.f32 -1.442695, %v3623_v47 }
0x4d52   :  { %7229 = vpow2.f32 %v6734_v28 }
0x4d57   :  { %v7228_v27 = vpop.eup %7227 }
0x4d58   :  { %3646 = vrot.lane.b32.xlu0 %v7228_v27, %s8336_s26  ;;  %v7230_v29 = vpop.eup %7229 }
0x4d59   :  { %v3429_v30 = vadd.f32 1.0, %v7230_v29 }
0x4d5b   :  { %7231 = vrcp.f32 %v3429_v30  ;;  %v3441_v41 = vand.u32 2147483648, %v3429_v30  ;;  %vm3435_vm13 = vweird.f32 %v3429_v30  ;;  %v3439_v42 = vand.u32 2147483647, %v3429_v30 }
0x4d5c   :  { %7233 = vpow2.f32 %v6741_v9 }
0x4d5d   :  { %v3442_v43 = vor.u32 1.1754944e-38, %v3441_v41  ;;  %vm3440_vm15 = vcmp.eq.f32.partialorder %v3439_v42, 8.507059e+37  ;;  %v3732_v41 = vld [vmem:[#allocation2 + $0xa] sm:$0x3] }
0x4d61   :  { %v7232_v33 = vpop.eup %7231 }
0x4d62   :  { %v3431_v35 = vmul.f32 %v7232_v33, %v3429_v30  ;;  %vm3436_vm12 = vweird.f32 %v7232_v33  ;;  %v7234_v37 = vpop.eup %7233 }
0x4d63   :  { %vm3437_vm14 = vmor %vm3435_vm13, %vm3436_vm12  ;;  %v3627_v39 = vadd.f32 1.0, %v7234_v37 }
0x4d64   :  { %v3432_v36 = vsub.f32 1.0, %v3431_v35 }
0x4d65   :  { %7235 = vrcp.f32 %v3627_v39  ;;  %v3639_v51 = vand.u32 2147483648, %v3627_v39  ;;  %vm3633_vm2 = vweird.f32 %v3627_v39  ;;  %v3637_v52 = vand.u32 2147483647, %v3627_v39 }
0x4d66   :  { %v3433_v32 = vmul.f32 %v7232_v33, %v3432_v36 }
0x4d67   :  { %v3640_v54 = vor.u32 1.1754944e-38, %v3639_v51  ;;  %vm3638_vm4 = vcmp.eq.f32.partialorder %v3637_v52, 8.507059e+37 }
0x4d68   :  { %v3434_v18 = vadd.f32 %v7232_v33, %v3433_v32 }
0x4d6a   :  { %v3438_v38 = vsel %vm3437_vm14, %v7232_v33, %v3434_v18 }
0x4d6b   :  { %v3443_v40 = vsel %vm3440_vm15, %v3442_v43, %v3438_v38  ;;  %v7236_v45 = vpop.eup %7235 }
0x4d6c   :  { %v3629_v7 = vmul.f32 %v7236_v45, %v3627_v39  ;;  %vm3634_vm1 = vweird.f32 %v7236_v45  ;;  %v3446_v58 = vmul.f32 %v3443_v40, %v9331_v31 }
0x4d6d   :  { %vm3635_vm3 = vmor %vm3633_vm2, %vm3634_vm1 }
0x4d6e   :  { %v3630_v49 = vsub.f32 1.0, %v3629_v7 }
0x4d70   :  { %v3631_v2 = vmul.f32 %v7236_v45, %v3630_v49 }
0x4d72   :  { %v3632_v50 = vadd.f32 %v7236_v45, %v3631_v2 }
0x4d74   :  { %v3636_v53 = vsel %vm3635_vm3, %v7236_v45, %v3632_v50 }
0x4d75   :  { %v3641_v55 = vsel %vm3638_vm4, %v3640_v54, %v3636_v53 }
0x4d76   :  { %v3644_v61 = vmul.f32 0.0, %v3641_v55 }
0x4daa   :  { %v3449_v44 = vpop.permute.xlu2 %3448 }
0x4dab   :  { %v3451_v6 = vmul.f32 %v3449_v44, %v3443_v40 }
0x4dad   :  { %3453 = vrot.lane.b32.xlu1 %v3451_v6, %s8337_s28 }
0x4dca   :  { %v3647_v21 = vpop.permute.xlu0 %3646 }
0x4dcb   :  { %v3649_v57 = vmul.f32 %v3647_v21, %v3641_v55 }
0x4dcd   :  { %3651 = vrot.lane.b32.xlu2 %v3649_v57, %s8337_s28 }
0x4e1f   :  { %v3454_v59 = vpop.permute.xlu1 %3453 }
0x4e20   :  { %v9377_v60 = vadd.f32 %v3454_v59, %v3446_v58 }
0x4e22   :  { %7237 = vtanh.f32 %v9377_v60 }
0x4e27   :  { %v3652_v62 = vpop.permute.xlu2 %3651 }
0x4e28   :  { %v7238_v63 = vpop.eup %7237  ;;  %v3654_v0 = vadd.f32 %v3652_v62, %v3644_v61 }
0x4e29   :  { %3459 = vrot.lane.b32.xlu0 %v7238_v63, %s8336_s26 }
0x4e2a   :  { %7239 = vtanh.f32 %v3654_v0 }
0x4e30   :  { %v7240_v1 = vpop.eup %7239 }
0x4e31   :  { %3657 = vrot.lane.b32.xlu1 %v7240_v1, %s8336_s26 }
0x4e9b   :  { %v3460_v5 = vpop.permute.xlu0 %3459 }
0x4e9c   :  { %v3462_v10 = vmul.f32 %v3460_v5, %v3443_v40 }
0x4e9e   :  { %3464 = vrot.lane.b32.xlu2 %v3462_v10, %s8337_s28 }
0x4ea3   :  { %v3658_v4 = vpop.permute.xlu1 %3657 }
0x4ea4   :  { %v3660_v11 = vmul.f32 %v3658_v4, %v3641_v55 }
0x4ea6   :  { %3662 = vrot.lane.b32.xlu0 %v3660_v11, %s8337_s28 }
0x4ef8   :  { %v3465_v13 = vpop.permute.xlu2 %3464 }
0x4ef9   :  { %3467 = vst.msk [vmem:[#allocation3 + $0xc] sm:$0x3] %vm701_vm5, %v3465_v13  ;;  %6735 = vmatmul.msk.f32.vlgmr.msrb.gmra.mxu3 %vm635_vm6, %v3465_v13 }
0x4efa   :  { %3813 = vmatpush.msrb.mxu3 %v9336_v19 }
0x4efc   :  { %3814 = vmatpush.msrb.mxu3 %v9338_v20 }
0x4efe   :  { %3815 = vmatpush.msrb.mxu3 %v9342_v17 }
0x4f00   :  { %3816 = vmatpush.msrb.mxu3 %v9348_v23 }
0x4f18   :  { %v3663_v12 = vpop.permute.xlu0 %3662 }
0x4f19   :  { %3665 = vst.msk [vmem:[#allocation4 + $0xe] sm:$0x3] %vm701_vm5, %v3663_v12  ;;  %6742 = vmatmul.msk.f32.vlgmr.msra.gmra.mxu3 %vm635_vm6, %v3663_v12 }
0x4f1a   :  { %4077 = vmatpush.msra.mxu3 %v9336_v19 }
0x4f1c   :  { %4078 = vmatpush.msra.mxu3 %v9338_v20 }
0x4f1e   :  { %4079 = vmatpush.msra.mxu3 %v9342_v17 }
0x4f20   :  { %4080 = vmatpush.msra.mxu3 %v9348_v23 }
0x4f7c   :  { %v9396_v14 = vpop.f32.mrf.mxu3 }
0x4f9c   :  { %v3686_v31 = vpop.f32.mrf.mxu3 }
0x4f9d   :  { %v3689_v48 = vadd.f32 %v3686_v31, %v3666_v15 }
0x4f9f   :  { %7241 = vtanh.f32 %v3689_v48  ;;  %v6743_v34 = vmul.f32 -1.442695, %v3689_v48 }
0x4fa1   :  { %7243 = vpow2.f32 %v6743_v34 }
0x4fa5   :  { %v7242_v16 = vpop.eup %7241 }
0x4fa6   :  { %3712 = vrot.lane.b32.xlu1 %v7242_v16, %s8336_s26 }
0x4fa7   :  { %v7244_v24 = vpop.eup %7243 }
0x4fa8   :  { %v3693_v25 = vadd.f32 1.0, %v7244_v24 }
0x4faa   :  { %7245 = vrcp.f32 %v3693_v25  ;;  %v3705_v23 = vand.u32 2147483648, %v3693_v25  ;;  %vm3699_vm8 = vweird.f32 %v3693_v25  ;;  %v3703_v46 = vand.u32 2147483647, %v3693_v25 }
0x4fac   :  { %v3706_v47 = vor.u32 1.1754944e-38, %v3705_v23  ;;  %vm3704_vm10 = vcmp.eq.f32.partialorder %v3703_v46, 8.507059e+37 }
0x4fb0   :  { %v7246_v19 = vpop.eup %7245 }
0x4fb1   :  { %v3695_v20 = vmul.f32 %v7246_v19, %v3693_v25  ;;  %vm3700_vm7 = vweird.f32 %v7246_v19 }
0x4fb2   :  { %vm3701_vm9 = vmor %vm3699_vm8, %vm3700_vm7 }
0x4fb3   :  { %v3696_v22 = vsub.f32 1.0, %v3695_v20 }
0x4fb5   :  { %v3697_v17 = vmul.f32 %v7246_v19, %v3696_v22 }
0x4fb7   :  { %v3698_v3 = vadd.f32 %v7246_v19, %v3697_v17 }
0x4fb9   :  { %v3702_v26 = vsel %vm3701_vm9, %v7246_v19, %v3698_v3 }
0x4fba   :  { %v3707_v28 = vsel %vm3704_vm10, %v3706_v47, %v3702_v26 }
0x4fbb   :  { %v3710_v30 = vmul.f32 %v3707_v28, %v3654_v0  ;;  %v3798_v0 = vld [vmem:[#allocation2 + $0x8] sm:$0x3] }
0x5018   :  { %v3713_v27 = vpop.permute.xlu1 %3712 }
0x5019   :  { %v3715_v29 = vmul.f32 %v3713_v27, %v3707_v28 }
0x501b   :  { %3717 = vrot.lane.b32.xlu2 %v3715_v29, %s8337_s28  ;;  %v3864_v29 = vld [vmem:[#allocation2 + $0x6] sm:$0x3] }
0x5075   :  { %v3718_v33 = vpop.permute.xlu2 %3717 }
0x5076   :  { %v3720_v35 = vadd.f32 %v3718_v33, %v3710_v30 }
0x5078   :  { %7247 = vtanh.f32 %v3720_v35 }
0x507e   :  { %v7248_v36 = vpop.eup %7247 }
0x507f   :  { %3723 = vrot.lane.b32.xlu0 %v7248_v36, %s8336_s26 }
0x50f1   :  { %v3724_v9 = vpop.permute.xlu0 %3723 }
0x50f2   :  { %v3726_v32 = vmul.f32 %v3724_v9, %v3707_v28 }
0x50f4   :  { %3728 = vrot.lane.b32.xlu1 %v3726_v32, %s8337_s28 }
0x5166   :  { %v3729_v18 = vpop.permute.xlu1 %3728 }
0x5167   :  { %3731 = vst.msk [vmem:[#allocation4 + $0xc] sm:$0x3] %vm701_vm5, %v3729_v18  ;;  %6744 = vmatmul.msk.f32.vlgmr.msra.gmra.mxu2 %vm635_vm6, %v3729_v18 }
0x51ea   :  { %v3752_v42 = vpop.f32.mrf.mxu2 }
0x51eb   :  { %v3755_v37 = vadd.f32 %v3752_v42, %v3732_v41 }
0x51ed   :  { %7249 = vtanh.f32 %v3755_v37  ;;  %v6745_v43 = vmul.f32 -1.442695, %v3755_v37 }
0x51ef   :  { %7251 = vpow2.f32 %v6745_v43 }
0x51f3   :  { %v7250_v38 = vpop.eup %7249 }
0x51f4   :  { %3778 = vrot.lane.b32.xlu2 %v7250_v38, %s8336_s26 }
0x51f5   :  { %v7252_v39 = vpop.eup %7251 }
0x51f6   :  { %v3759_v44 = vadd.f32 1.0, %v7252_v39 }
0x51f8   :  { %7253 = vrcp.f32 %v3759_v44  ;;  %v3771_v2 = vand.u32 2147483648, %v3759_v44  ;;  %vm3765_vm12 = vweird.f32 %v3759_v44  ;;  %v3769_v50 = vand.u32 2147483647, %v3759_v44 }
0x51fa   :  { %v3772_v52 = vor.u32 1.1754944e-38, %v3771_v2  ;;  %vm3770_vm14 = vcmp.eq.f32.partialorder %v3769_v50, 8.507059e+37 }
0x51fe   :  { %v7254_v40 = vpop.eup %7253 }
0x51ff   :  { %v3761_v6 = vmul.f32 %v7254_v40, %v3759_v44  ;;  %vm3766_vm11 = vweird.f32 %v7254_v40 }
0x5200   :  { %vm3767_vm13 = vmor %vm3765_vm12, %vm3766_vm11 }
0x5201   :  { %v3762_v45 = vsub.f32 1.0, %v3761_v6 }
0x5203   :  { %v3763_v7 = vmul.f32 %v7254_v40, %v3762_v45 }
0x5205   :  { %v3764_v49 = vadd.f32 %v7254_v40, %v3763_v7 }
0x5207   :  { %v3768_v51 = vsel %vm3767_vm13, %v7254_v40, %v3764_v49 }
0x5208   :  { %v3773_v54 = vsel %vm3770_vm14, %v3772_v52, %v3768_v51 }
0x5209   :  { %v3776_v55 = vmul.f32 %v3773_v54, %v3720_v35 }
0x524e   :  { %v3779_v53 = vpop.permute.xlu2 %3778 }
0x524f   :  { %v3781_v21 = vmul.f32 %v3779_v53, %v3773_v54 }
0x5251   :  { %3783 = vrot.lane.b32.xlu0 %v3781_v21, %s8337_s28  ;;  %v4132_v21 = vld [vmem:[#allocation31 + $0x10] sm:$0xff] }
0x52c3   :  { %v3784_v57 = vpop.permute.xlu0 %3783 }
0x52c4   :  { %v3786_v58 = vadd.f32 %v3784_v57, %v3776_v55  ;;  %v4131_v55 = vld [vmem:[#allocation31 + $0x8] sm:$0xff]  ;;  %v4130_v57 = vld [vmem:[#allocation31] sm:$0xff] }
0x52c6   :  { %7255 = vtanh.f32 %v3786_v58 }
0x52cc   :  { %v7256_v59 = vpop.eup %7255 }
0x52cd   :  { %3789 = vrot.lane.b32.xlu1 %v7256_v59, %s8336_s26  ;;  %v9422_v59 = vld [vmem:[#allocation3] sm:$0xff] }
0x533f   :  { %v3790_v61 = vpop.permute.xlu1 %3789 }
0x5340   :  { %v3792_v62 = vmul.f32 %v3790_v61, %v3773_v54  ;;  %v4133_v54 = vld [vmem:[#allocation31 + $0x18] sm:$0xff]  ;;  %v3930_v61 = vld [vmem:[#allocation2 + $0x4] sm:$0x3] }
0x5341   :  { %4185 = vmatpush.msra.mxu1 %v4133_v54 }
0x5342   :  { %3794 = vrot.lane.b32.xlu2 %v3792_v62, %s8337_s28 }
0x5343   :  { %4186 = vmatpush.msra.mxu1 %v4132_v21 }
0x5345   :  { %4187 = vmatpush.msra.mxu1 %v4131_v55 }
0x5347   :  { %4188 = vmatpush.msra.mxu1 %v4130_v57 }
0x539c   :  { %v3795_v63 = vpop.permute.xlu2 %3794 }
0x539d   :  { %3797 = vst.msk [vmem:[#allocation4 + $0xa] sm:$0x3] %vm701_vm5, %v3795_v63  ;;  %6746 = vmatmul.msk.f32.vlgmr.msrb.gmra.mxu3 %vm635_vm6, %v3795_v63 }
0x5420   :  { %v3818_v1 = vpop.f32.mrf.mxu3 }
0x5421   :  { %v3821_v5 = vadd.f32 %v3818_v1, %v3798_v0 }
0x5423   :  { %7257 = vtanh.f32 %v3821_v5  ;;  %v6747_v4 = vmul.f32 -1.442695, %v3821_v5 }
0x5425   :  { %7259 = vpow2.f32 %v6747_v4 }
0x5429   :  { %v7258_v10 = vpop.eup %7257 }
0x542a   :  { %3844 = vrot.lane.b32.xlu0 %v7258_v10, %s8336_s26 }
0x542b   :  { %v7260_v11 = vpop.eup %7259 }
0x542c   :  { %v3825_v13 = vadd.f32 1.0, %v7260_v11 }
0x542e   :  { %7261 = vrcp.f32 %v3825_v13  ;;  %v3837_v34 = vand.u32 2147483648, %v3825_v13  ;;  %vm3831_vm1 = vweird.f32 %v3825_v13  ;;  %v3835_v24 = vand.u32 2147483647, %v3825_v13 }
0x5430   :  { %v3838_v19 = vor.u32 1.1754944e-38, %v3837_v34  ;;  %vm3836_vm3 = vcmp.eq.f32.partialorder %v3835_v24, 8.507059e+37 }
0x5434   :  { %v7262_v12 = vpop.eup %7261 }
0x5435   :  { %v3827_v15 = vmul.f32 %v7262_v12, %v3825_v13  ;;  %vm3832_vm15 = vweird.f32 %v7262_v12 }
0x5436   :  { %vm3833_vm2 = vmor %vm3831_vm1, %vm3832_vm15 }
0x5437   :  { %v3828_v31 = vsub.f32 1.0, %v3827_v15 }
0x5439   :  { %v3829_v48 = vmul.f32 %v7262_v12, %v3828_v31 }
0x543b   :  { %v3830_v16 = vadd.f32 %v7262_v12, %v3829_v48 }
0x543d   :  { %v3834_v25 = vsel %vm3833_vm2, %v7262_v12, %v3830_v16 }
0x543e   :  { %v3839_v22 = vsel %vm3836_vm3, %v3838_v19, %v3834_v25 }
0x543f   :  { %v3842_v3 = vmul.f32 %v3839_v22, %v3786_v58 }
0x549c   :  { %v3845_v20 = vpop.permute.xlu0 %3844 }
0x549d   :  { %v3847_v17 = vmul.f32 %v3845_v20, %v3839_v22 }
0x549f   :  { %3849 = vrot.lane.b32.xlu1 %v3847_v17, %s8337_s28 }
0x5511   :  { %v3850_v23 = vpop.permute.xlu1 %3849 }
0x5512   :  { %v3852_v46 = vadd.f32 %v3850_v23, %v3842_v3 }
0x5514   :  { %7263 = vtanh.f32 %v3852_v46 }
0x551a   :  { %v7264_v26 = vpop.eup %7263 }
0x551b   :  { %3855 = vrot.lane.b32.xlu2 %v7264_v26, %s8336_s26 }
0x5575   :  { %v3856_v47 = vpop.permute.xlu2 %3855 }
0x5576   :  { %v3858_v27 = vmul.f32 %v3856_v47, %v3839_v22  ;;  %v3996_v47 = vld [vmem:[#allocation2 + $0x2] sm:$0x3] }
0x5578   :  { %3860 = vrot.lane.b32.xlu0 %v3858_v27, %s8337_s28 }
0x55ea   :  { %v3861_v28 = vpop.permute.xlu0 %3860 }
0x55eb   :  { %3863 = vst.msk [vmem:[#allocation4 + $0x8] sm:$0x3] %vm701_vm5, %v3861_v28  ;;  %6748 = vmatmul.msk.f32.vlgmr.msrb.gmra.mxu0 %vm635_vm6, %v3861_v28 }
0x5668   :  { %v3884_v30 = vpop.f32.mrf.mxu0 }
0x5669   :  { %v3887_v33 = vadd.f32 %v3884_v30, %v3864_v29 }
0x566b   :  { %7265 = vtanh.f32 %v3887_v33  ;;  %v6749_v36 = vmul.f32 -1.442695, %v3887_v33 }
0x566d   :  { %7267 = vpow2.f32 %v6749_v36 }
0x5671   :  { %v7266_v35 = vpop.eup %7265 }
0x5672   :  { %3910 = vrot.lane.b32.xlu1 %v7266_v35, %s8336_s26 }
0x5673   :  { %v7268_v9 = vpop.eup %7267 }
0x5674   :  { %v3891_v32 = vadd.f32 1.0, %v7268_v9 }
0x5676   :  { %7269 = vrcp.f32 %v3891_v32  ;;  %v3903_v43 = vand.u32 2147483648, %v3891_v32  ;;  %vm3897_vm7 = vweird.f32 %v3891_v32  ;;  %v3901_v39 = vand.u32 2147483647, %v3891_v32 }
0x5678   :  { %v3904_v40 = vor.u32 1.1754944e-38, %v3903_v43  ;;  %vm3902_vm9 = vcmp.eq.f32.partialorder %v3901_v39, 8.507059e+37 }
0x567c   :  { %v7270_v18 = vpop.eup %7269 }
0x567d   :  { %v3893_v41 = vmul.f32 %v7270_v18, %v3891_v32  ;;  %vm3898_vm4 = vweird.f32 %v7270_v18 }
0x567e   :  { %vm3899_vm8 = vmor %vm3897_vm7, %vm3898_vm4 }
0x567f   :  { %v3894_v42 = vsub.f32 1.0, %v3893_v41 }
0x5681   :  { %v3895_v37 = vmul.f32 %v7270_v18, %v3894_v42 }
0x5683   :  { %v3896_v38 = vadd.f32 %v7270_v18, %v3895_v37 }
0x5685   :  { %v3900_v44 = vsel %vm3899_vm8, %v7270_v18, %v3896_v38 }
0x5686   :  { %v3905_v45 = vsel %vm3902_vm9, %v3904_v40, %v3900_v44 }
0x5687   :  { %v3908_v49 = vmul.f32 %v3905_v45, %v3852_v46 }
0x56e4   :  { %v3911_v6 = vpop.permute.xlu1 %3910 }
0x56e5   :  { %v3913_v7 = vmul.f32 %v3911_v6, %v3905_v45 }
0x56e7   :  { %3915 = vrot.lane.b32.xlu2 %v3913_v7, %s8337_s28 }
0x5741   :  { %v3916_v2 = vpop.permute.xlu2 %3915 }
0x5742   :  { %v3918_v50 = vadd.f32 %v3916_v2, %v3908_v49 }
0x5744   :  { %7271 = vtanh.f32 %v3918_v50 }
0x574a   :  { %v7272_v51 = vpop.eup %7271 }
0x574b   :  { %3921 = vrot.lane.b32.xlu0 %v7272_v51, %s8336_s26 }
0x57bd   :  { %v3922_v52 = vpop.permute.xlu0 %3921 }
0x57be   :  { %v3924_v53 = vmul.f32 %v3922_v52, %v3905_v45  ;;  %v4062_v52 = vld [vmem:[#allocation2] sm:$0x3] }
0x57c0   :  { %3926 = vrot.lane.b32.xlu1 %v3924_v53, %s8337_s28 }
0x5832   :  { %v3927_v58 = vpop.permute.xlu1 %3926 }
0x5833   :  { %3929 = vst.msk [vmem:[#allocation4 + $0x6] sm:$0x3] %vm701_vm5, %v3927_v58  ;;  %6750 = vmatmul.msk.f32.vlgmr.msrb.gmra.mxu1 %vm635_vm6, %v3927_v58 }
0x583b   :  { %6758 = vmatmul.msk.f32.vlgmr.msra.gmra.mxu1 %vm635_vm6, %v9422_v59 }
0x58b0   :  { %v3950_v62 = vpop.f32.mrf.mxu1 }
0x58b1   :  { %v3953_v63 = vadd.f32 %v3950_v62, %v3930_v61 }
0x58b3   :  { %7273 = vtanh.f32 %v3953_v63  ;;  %v6751_v1 = vmul.f32 -1.442695, %v3953_v63 }
0x58b5   :  { %7275 = vpow2.f32 %v6751_v1 }
0x58b9   :  { %v7274_v0 = vpop.eup %7273 }
0x58ba   :  { %3976 = vrot.lane.b32.xlu2 %v7274_v0, %s8336_s26 }
0x58bb   :  { %v7276_v5 = vpop.eup %7275 }
0x58bc   :  { %v3957_v10 = vadd.f32 1.0, %v7276_v5 }
0x58be   :  { %7277 = vrcp.f32 %v3957_v10  ;;  %v3969_v31 = vand.u32 2147483648, %v3957_v10  ;;  %vm3963_vm11 = vweird.f32 %v3957_v10  ;;  %v3967_v48 = vand.u32 2147483647, %v3957_v10 }
0x58c0   :  { %v3970_v34 = vor.u32 1.1754944e-38, %v3969_v31  ;;  %vm3968_vm13 = vcmp.eq.f32.partialorder %v3967_v48, 8.507059e+37 }
0x58c4   :  { %v7278_v4 = vpop.eup %7277 }
0x58c5   :  { %v3959_v11 = vmul.f32 %v7278_v4, %v3957_v10  ;;  %vm3964_vm10 = vweird.f32 %v7278_v4 }
0x58c6   :  { %vm3965_vm12 = vmor %vm3963_vm11, %vm3964_vm10 }
0x58c7   :  { %v3960_v13 = vsub.f32 1.0, %v3959_v11 }
0x58c9   :  { %v3961_v12 = vmul.f32 %v7278_v4, %v3960_v13 }
0x58cb   :  { %v3962_v15 = vadd.f32 %v7278_v4, %v3961_v12 }
0x58cd   :  { %v3966_v16 = vsel %vm3965_vm12, %v7278_v4, %v3962_v15 }
0x58ce   :  { %v3971_v25 = vsel %vm3968_vm13, %v3970_v34, %v3966_v16 }
0x58cf   :  { %v3974_v20 = vmul.f32 %v3971_v25, %v3918_v50 }
0x5914   :  { %v3977_v24 = vpop.permute.xlu2 %3976 }
0x5915   :  { %v3979_v19 = vmul.f32 %v3977_v24, %v3971_v25 }
0x5917   :  { %3981 = vrot.lane.b32.xlu0 %v3979_v19, %s8337_s28  ;;  %v4137_v19 = vld [vmem:[#allocation33 + $0x18] sm:$0xff] }
0x5918   :  { %4156 = vmatpush.msra.mxu0 %v4137_v19 }
0x5989   :  { %v3982_v22 = vpop.permute.xlu0 %3981 }
0x598a   :  { %v3984_v17 = vadd.f32 %v3982_v22, %v3974_v20  ;;  %v4136_v20 = vld [vmem:[#allocation33 + $0x10] sm:$0xff]  ;;  %v9442_v22 = vld [vmem:[#allocation34 + $0x18] sm:$0xff] }
0x598b   :  { %4221 = vmatpush.msra.mxu2 %v9442_v22  ;;  %4287 = vmatpush.msrb.mxu3 %v9442_v22 }
0x598c   :  { %7279 = vtanh.f32 %v3984_v17  ;;  %4157 = vmatpush.msra.mxu0 %v4136_v20  ;;  %4551 = vmatpush.msrb.mxu1 %v9442_v22 }
0x5992   :  { %v7280_v3 = vpop.eup %7279 }
0x5993   :  { %3987 = vrot.lane.b32.xlu1 %v7280_v3, %s8336_s26  ;;  %v4134_v3 = vld [vmem:[#allocation33] sm:$0xff] }
0x5a05   :  { %v3988_v23 = vpop.permute.xlu1 %3987 }
0x5a06   :  { %v3990_v46 = vmul.f32 %v3988_v23, %v3971_v25  ;;  %v9447_v23 = vld [vmem:[#allocation34 + $0x10] sm:$0xff] }
0x5a07   :  { %4222 = vmatpush.msra.mxu2 %v9447_v23  ;;  %4288 = vmatpush.msrb.mxu3 %v9447_v23 }
0x5a08   :  { %3992 = vrot.lane.b32.xlu2 %v3990_v46, %s8337_s28  ;;  %v9449_v46 = vld [vmem:[#allocation34 + $0x8] sm:$0xff]  ;;  %4552 = vmatpush.msrb.mxu1 %v9447_v23 }
0x5a09   :  { %4223 = vmatpush.msra.mxu2 %v9449_v46  ;;  %4289 = vmatpush.msrb.mxu3 %v9449_v46 }
0x5a0a   :  { %4553 = vmatpush.msrb.mxu1 %v9449_v46 }
0x5a62   :  { %v3993_v26 = vpop.permute.xlu2 %3992 }
0x5a63   :  { %3995 = vst.msk [vmem:[#allocation4 + $0x4] sm:$0x3] %vm701_vm5, %v3993_v26  ;;  %6752 = vmatmul.msk.f32.vlgmr.msrb.gmra.mxu2 %vm635_vm6, %v3993_v26  ;;  %v9454_v26 = vld [vmem:[#allocation34] sm:$0xff] }
0x5a64   :  { %4224 = vmatpush.msra.mxu2 %v9454_v26  ;;  %4290 = vmatpush.msrb.mxu3 %v9454_v26 }
0x5a65   :  { %4554 = vmatpush.msrb.mxu1 %v9454_v26 }
0x5a66   :  { %4353 = vmatpush.msrb.mxu2 %v9442_v22 }
0x5a68   :  { %4354 = vmatpush.msrb.mxu2 %v9447_v23 }
0x5a6a   :  { %4355 = vmatpush.msrb.mxu2 %v9449_v46 }
0x5a6b   :  { %4225 = vmatmul.f32.vlgmr.msra.gmra.mxu2 %v8335_v8 }
0x5a6c   :  { %4356 = vmatpush.msrb.mxu2 %v9454_v26 }
0x5a6e   :  { %4617 = vmatpush.msra.mxu2 %v9442_v22 }
0x5a70   :  { %4618 = vmatpush.msra.mxu2 %v9447_v23 }
0x5a72   :  { %4619 = vmatpush.msra.mxu2 %v9449_v46 }
0x5a74   :  { %4620 = vmatpush.msra.mxu2 %v9454_v26 }
0x5ae6   :  { %v4016_v27 = vpop.f32.mrf.mxu2 }
0x5ae7   :  { %v4019_v28 = vadd.f32 %v4016_v27, %v3996_v47 }
0x5ae9   :  { %7281 = vtanh.f32 %v4019_v28  ;;  %v6753_v30 = vmul.f32 -1.442695, %v4019_v28  ;;  %v9484_v28 = vld [vmem:[#allocation4 + $0x8] sm:$0xff] }
0x5aeb   :  { %7283 = vpow2.f32 %v6753_v30  ;;  %v4190_v30 = vpop.f32.mrf.mxu1 }
0x5aef   :  { %v7282_v29 = vpop.eup %7281 }
0x5af0   :  { %4042 = vrot.lane.b32.xlu0 %v7282_v29, %s8336_s26  ;;  %v9489_v29 = vld [vmem:[%s9934_s2] ss:$0 sm:$0xff] }
0x5af1   :  { %v7284_v33 = vpop.eup %7283 }
0x5af2   :  { %v4023_v35 = vadd.f32 1.0, %v7284_v33 }
0x5af4   :  { %7285 = vrcp.f32 %v4023_v35  ;;  %v4035_v42 = vand.u32 2147483648, %v4023_v35  ;;  %vm4029_vm15 = vweird.f32 %v4023_v35  ;;  %v4033_v37 = vand.u32 2147483647, %v4023_v35 }
0x5af6   :  { %v4036_v43 = vor.u32 1.1754944e-38, %v4035_v42  ;;  %vm4034_vm2 = vcmp.eq.f32.partialorder %v4033_v37, 8.507059e+37 }
0x5afa   :  { %v7286_v36 = vpop.eup %7285 }
0x5afb   :  { %v4025_v9 = vmul.f32 %v7286_v36, %v4023_v35  ;;  %vm4030_vm14 = vweird.f32 %v7286_v36 }
0x5afc   :  { %vm4031_vm1 = vmor %vm4029_vm15, %vm4030_vm14 }
0x5afd   :  { %v4026_v32 = vsub.f32 1.0, %v4025_v9  ;;  %v4226_v9 = vpop.f32.mrf.mxu2 }
0x5aff   :  { %v4027_v18 = vmul.f32 %v7286_v36, %v4026_v32 }
0x5b01   :  { %v4028_v41 = vadd.f32 %v7286_v36, %v4027_v18 }
0x5b03   :  { %v4032_v38 = vsel %vm4031_vm1, %v7286_v36, %v4028_v41 }
0x5b04   :  { %v4037_v44 = vsel %vm4034_vm2, %v4036_v43, %v4032_v38 }
0x5b05   :  { %v4040_v6 = vmul.f32 %v4037_v44, %v3984_v17  ;;  %v4135_v17 = vld [vmem:[#allocation33 + $0x8] sm:$0xff] }
0x5b06   :  { %4158 = vmatpush.msra.mxu0 %v4135_v17 }
0x5b08   :  { %4159 = vmatpush.msra.mxu0 %v4134_v3 }
0x5b0a   :  { %4485 = vmatpush.msrb.mxu0 %v9442_v22 }
0x5b0c   :  { %4486 = vmatpush.msrb.mxu0 %v9447_v23 }
0x5b0e   :  { %4487 = vmatpush.msrb.mxu0 %v9449_v46 }
0x5b10   :  { %4488 = vmatpush.msrb.mxu0 %v9454_v26 }
0x5b62   :  { %v4043_v39 = vpop.permute.xlu0 %4042 }
0x5b63   :  { %v4045_v40 = vmul.f32 %v4043_v39, %v4037_v44 }
0x5b65   :  { %4047 = vrot.lane.b32.xlu1 %v4045_v40, %s8337_s28 }
0x5bd7   :  { %v4048_v45 = vpop.permute.xlu1 %4047 }
0x5bd8   :  { %v4050_v7 = vadd.f32 %v4048_v45, %v4040_v6 }
0x5bda   :  { %7287 = vtanh.f32 %v4050_v7 }
0x5be0   :  { %v7288_v49 = vpop.eup %7287 }
0x5be1   :  { %4053 = vrot.lane.b32.xlu2 %v7288_v49, %s8336_s26 }
0x5c3b   :  { %v4054_v2 = vpop.permute.xlu2 %4053 }
0x5c3c   :  { %v4056_v50 = vmul.f32 %v4054_v2, %v4037_v44 }
0x5c3e   :  { %4058 = vrot.lane.b32.xlu0 %v4056_v50, %s8337_s28 }
0x5cb0   :  { %v4059_v51 = vpop.permute.xlu0 %4058 }
0x5cb1   :  { %4061 = vst.msk [vmem:[#allocation4 + $0x2] sm:$0x3] %vm701_vm5, %v4059_v51  ;;  %6754 = vmatmul.msk.f32.vlgmr.msra.gmra.mxu3 %vm635_vm6, %v4059_v51 }
0x5cb2   :  { %4419 = vmatpush.msra.mxu3 %v9442_v22 }
0x5cb4   :  { %4420 = vmatpush.msra.mxu3 %v9447_v23 }
0x5cb6   :  { %4421 = vmatpush.msra.mxu3 %v9449_v46 }
0x5cb8   :  { %4422 = vmatpush.msra.mxu3 %v9454_v26 }
0x5d34   :  { %v4082_v53 = vpop.f32.mrf.mxu3 }
0x5d35   :  { %v4085_v54 = vadd.f32 %v4082_v53, %v4062_v52 }
0x5d37   :  { %7289 = vtanh.f32 %v4085_v54  ;;  %v6755_v55 = vmul.f32 -1.442695, %v4085_v54 }
0x5d39   :  { %7291 = vpow2.f32 %v6755_v55 }
0x5d3d   :  { %v7290_v21 = vpop.eup %7289 }
0x5d3e   :  { %4108 = vrot.lane.b32.xlu1 %v7290_v21, %s8336_s26 }
0x5d3f   :  { %v7292_v57 = vpop.eup %7291 }
0x5d40   :  { %v4089_v58 = vadd.f32 1.0, %v7292_v57 }
0x5d42   :  { %7293 = vrcp.f32 %v4089_v58  ;;  %v4101_v5 = vand.u32 2147483648, %v4089_v58  ;;  %vm4095_vm4 = vweird.f32 %v4089_v58  ;;  %v4099_v10 = vand.u32 2147483647, %v4089_v58 }
0x5d44   :  { %v4102_v11 = vor.u32 1.1754944e-38, %v4101_v5  ;;  %vm4100_vm8 = vcmp.eq.f32.partialorder %v4099_v10, 8.507059e+37 }
0x5d48   :  { %v7294_v61 = vpop.eup %7293 }
0x5d49   :  { %v4091_v62 = vmul.f32 %v7294_v61, %v4089_v58  ;;  %vm4096_vm3 = vweird.f32 %v7294_v61 }
0x5d4a   :  { %vm4097_vm7 = vmor %vm4095_vm4, %vm4096_vm3 }
0x5d4b   :  { %v4092_v63 = vsub.f32 1.0, %v4091_v62 }
0x5d4d   :  { %v4093_v0 = vmul.f32 %v7294_v61, %v4092_v63 }
0x5d4f   :  { %v4094_v1 = vadd.f32 %v7294_v61, %v4093_v0 }
0x5d51   :  { %v4098_v4 = vsel %vm4097_vm7, %v7294_v61, %v4094_v1 }
0x5d52   :  { %v4103_v12 = vsel %vm4100_vm8, %v4102_v11, %v4098_v4 }
0x5d53   :  { %v4106_v31 = vmul.f32 %v4103_v12, %v4050_v7 }
0x5db0   :  { %v4109_v13 = vpop.permute.xlu1 %4108 }
0x5db1   :  { %v4111_v15 = vmul.f32 %v4109_v13, %v4103_v12 }
0x5db3   :  { %4113 = vrot.lane.b32.xlu2 %v4111_v15, %s8337_s28 }
0x5e0d   :  { %v4114_v48 = vpop.permute.xlu2 %4113 }
0x5e0e   :  { %v4116_v16 = vadd.f32 %v4114_v48, %v4106_v31 }
0x5e10   :  { %7295 = vtanh.f32 %v4116_v16 }
0x5e16   :  { %v7296_v34 = vpop.eup %7295 }
0x5e17   :  { %4119 = vrot.lane.b32.xlu0 %v7296_v34, %s8336_s26 }
0x5e89   :  { %v4120_v24 = vpop.permute.xlu0 %4119 }
0x5e8a   :  { %v4122_v25 = vmul.f32 %v4120_v24, %v4103_v12 }
0x5e8c   :  { %4124 = vrot.lane.b32.xlu1 %v4122_v25, %s8337_s28 }
0x5efe   :  { %v4125_v47 = vpop.permute.xlu1 %4124 }
0x5eff   :  { %4127 = vst.msk [vmem:[#allocation4] sm:$0x3] %vm701_vm5, %v4125_v47 }
0x5f06   :  { %v9480_v27 = vld [vmem:[#allocation4] sm:$0xff] }
0x5f07   :  { %6756 = vmatmul.msk.f32.vlgmr.msra.gmra.mxu0 %vm635_vm6, %v9480_v27 }
0x5f0f   :  { %6757 = vmatmul.msk.f32.gmra.mxu0 %vm635_vm6, %v9484_v28 }
0x5f84   :  { %v4161_v33 = vpop.f32.mrf.mxu0 }
0x5f85   :  { %v4191_v35 = vadd.f32 %v4190_v30, %v4161_v33 }
0x5f87   :  { %v4200_v36 = vadd.f32 %v9489_v29, %v4191_v35 }
0x5f89   :  { %4202 = vst [vmem:[#allocation2] sm:$0xff] %v4200_v36 }
0x5f90   :  { %v4208_v32 = vld [vmem:[#allocation2] sm:$0x3]  ;;  %v4272_v62 = vld [vmem:[#allocation2 + $0x2] sm:$0x3]  ;;  %v4338_v30 = vld [vmem:[#allocation2 + $0x4] sm:$0x3] }
0x5f91   :  { %v4229_v18 = vadd.f32 %v4226_v9, %v4208_v32 }
0x5f93   :  { %7297 = vtanh.f32 %v4229_v18  ;;  %v6760_v42 = vmul.f32 -1.442695, %v4229_v18 }
0x5f95   :  { %7299 = vpow2.f32 %v6760_v42 }
0x5f99   :  { %v7298_v41 = vpop.eup %7297 }
0x5f9a   :  { %4252 = vrot.lane.b32.xlu2 %v7298_v41, %s8336_s26 }
0x5f9b   :  { %v7300_v37 = vpop.eup %7299 }
0x5f9c   :  { %v4233_v38 = vadd.f32 1.0, %v7300_v37 }
0x5f9e   :  { %7301 = vrcp.f32 %v4233_v38  ;;  %v4245_v45 = vand.u32 2147483648, %v4233_v38  ;;  %vm4239_vm10 = vweird.f32 %v4233_v38  ;;  %v4243_v7 = vand.u32 2147483647, %v4233_v38 }
0x5fa0   :  { %v4246_v2 = vor.u32 1.1754944e-38, %v4245_v45  ;;  %vm4244_vm12 = vcmp.eq.f32.partialorder %v4243_v7, 8.507059e+37  ;;  %v3491_v45 = vadd.f32 %v9396_v14, %v9328_v56 }
0x5fa4   :  { %v7302_v43 = vpop.eup %7301 }
0x5fa5   :  { %v4235_v39 = vmul.f32 %v7302_v43, %v4233_v38  ;;  %vm4240_vm9 = vweird.f32 %v7302_v43 }
0x5fa6   :  { %vm4241_vm11 = vmor %vm4239_vm10, %vm4240_vm9 }
0x5fa7   :  { %v4236_v44 = vsub.f32 1.0, %v4235_v39 }
0x5fa9   :  { %v4237_v40 = vmul.f32 %v7302_v43, %v4236_v44 }
0x5fab   :  { %v4238_v6 = vadd.f32 %v7302_v43, %v4237_v40 }
0x5fad   :  { %v4242_v49 = vsel %vm4241_vm11, %v7302_v43, %v4238_v6 }
0x5fae   :  { %v4247_v51 = vsel %vm4244_vm12, %v4246_v2, %v4242_v49 }
0x5faf   :  { %v4250_v53 = vmul.f32 0.0, %v4247_v51 }
0x5ff4   :  { %v4253_v50 = vpop.permute.xlu2 %4252 }
0x5ff5   :  { %v4255_v52 = vmul.f32 %v4253_v50, %v4247_v51 }
0x5ff7   :  { %4257 = vrot.lane.b32.xlu0 %v4255_v52, %s8337_s28 }
0x6069   :  { %v4258_v54 = vpop.permute.xlu0 %4257 }
0x606a   :  { %v4260_v21 = vadd.f32 %v4258_v54, %v4250_v53 }
0x606c   :  { %7303 = vtanh.f32 %v4260_v21 }
0x6072   :  { %v7304_v55 = vpop.eup %7303 }
0x6073   :  { %4263 = vrot.lane.b32.xlu1 %v7304_v55, %s8336_s26 }
0x60e5   :  { %v4264_v57 = vpop.permute.xlu1 %4263 }
0x60e6   :  { %v4266_v58 = vmul.f32 %v4264_v57, %v4247_v51 }
0x60e8   :  { %4268 = vrot.lane.b32.xlu2 %v4266_v58, %s8337_s28 }
0x6142   :  { %v4269_v61 = vpop.permute.xlu2 %4268 }
0x6143   :  { %4271 = vst.msk [vmem:[#allocation5] sm:$0x3] %vm701_vm5, %v4269_v61  ;;  %6761 = vmatmul.msk.f32.vlgmr.msrb.gmra.mxu3 %vm635_vm6, %v4269_v61 }
0x6144   :  { %4683 = vmatpush.msrb.mxu3 %v9442_v22 }
0x6146   :  { %4684 = vmatpush.msrb.mxu3 %v9447_v23 }
0x6148   :  { %4685 = vmatpush.msrb.mxu3 %v9449_v46 }
0x614a   :  { %4686 = vmatpush.msrb.mxu3 %v9454_v26 }
0x61c6   :  { %v4292_v63 = vpop.f32.mrf.mxu3 }
0x61c7   :  { %v4295_v0 = vadd.f32 %v4292_v63, %v4272_v62 }
0x61c9   :  { %7305 = vtanh.f32 %v4295_v0  ;;  %v6762_v5 = vmul.f32 -1.442695, %v4295_v0 }
0x61cb   :  { %7307 = vpow2.f32 %v6762_v5 }
0x61cf   :  { %v7306_v1 = vpop.eup %7305 }
0x61d0   :  { %4318 = vrot.lane.b32.xlu0 %v7306_v1, %s8336_s26 }
0x61d1   :  { %v7308_v10 = vpop.eup %7307 }
0x61d2   :  { %v4299_v4 = vadd.f32 1.0, %v7308_v10 }
0x61d4   :  { %7309 = vrcp.f32 %v4299_v4  ;;  %v4311_v48 = vand.u32 2147483648, %v4299_v4  ;;  %vm4305_vm14 = vweird.f32 %v4299_v4  ;;  %v4309_v16 = vand.u32 2147483647, %v4299_v4 }
0x61d6   :  { %v4312_v24 = vor.u32 1.1754944e-38, %v4311_v48  ;;  %vm4310_vm1 = vcmp.eq.f32.partialorder %v4309_v16, 8.507059e+37 }
0x61da   :  { %v7310_v11 = vpop.eup %7309 }
0x61db   :  { %v4301_v13 = vmul.f32 %v7310_v11, %v4299_v4  ;;  %vm4306_vm13 = vweird.f32 %v7310_v11 }
0x61dc   :  { %vm4307_vm15 = vmor %vm4305_vm14, %vm4306_vm13 }
0x61dd   :  { %v4302_v12 = vsub.f32 1.0, %v4301_v13 }
0x61df   :  { %v4303_v15 = vmul.f32 %v7310_v11, %v4302_v12 }
0x61e1   :  { %v4304_v31 = vadd.f32 %v7310_v11, %v4303_v15 }
0x61e3   :  { %v4308_v34 = vsel %vm4307_vm15, %v7310_v11, %v4304_v31  ;;  %v4404_v31 = vld [vmem:[#allocation2 + $0x6] sm:$0x3] }
0x61e4   :  { %v4313_v19 = vsel %vm4310_vm1, %v4312_v24, %v4308_v34 }
0x61e5   :  { %v4316_v22 = vmul.f32 %v4313_v19, %v4260_v21  ;;  %v6736_v21 = vmul.f32 -1.442695, %v3491_v45 }
0x6242   :  { %v4319_v25 = vpop.permute.xlu0 %4318 }
0x6243   :  { %v4321_v20 = vmul.f32 %v4319_v25, %v4313_v19 }
0x6245   :  { %4323 = vrot.lane.b32.xlu1 %v4321_v20, %s8337_s28 }
0x62b7   :  { %v4324_v17 = vpop.permute.xlu1 %4323 }
0x62b8   :  { %v4326_v3 = vadd.f32 %v4324_v17, %v4316_v22 }
0x62ba   :  { %7311 = vtanh.f32 %v4326_v3 }
0x62c0   :  { %v7312_v23 = vpop.eup %7311 }
0x62c1   :  { %4329 = vrot.lane.b32.xlu2 %v7312_v23, %s8336_s26 }
0x631b   :  { %v4330_v46 = vpop.permute.xlu2 %4329 }
0x631c   :  { %v4332_v26 = vmul.f32 %v4330_v46, %v4313_v19 }
0x631e   :  { %4334 = vrot.lane.b32.xlu0 %v4332_v26, %s8337_s28 }
0x6390   :  { %v4335_v47 = vpop.permute.xlu0 %4334 }
0x6391   :  { %4337 = vst.msk [vmem:[#allocation5 + $0x2] sm:$0x3] %vm701_vm5, %v4335_v47  ;;  %6763 = vmatmul.msk.f32.vlgmr.msrb.gmra.mxu2 %vm635_vm6, %v4335_v47 }
0x6414   :  { %v4358_v33 = vpop.f32.mrf.mxu2 }
0x6415   :  { %v4361_v35 = vadd.f32 %v4358_v33, %v4338_v30 }
0x6417   :  { %7313 = vtanh.f32 %v4361_v35  ;;  %v6764_v9 = vmul.f32 -1.442695, %v4361_v35 }
0x6419   :  { %7315 = vpow2.f32 %v6764_v9 }
0x641d   :  { %v7314_v36 = vpop.eup %7313 }
0x641e   :  { %4384 = vrot.lane.b32.xlu1 %v7314_v36, %s8336_s26 }
0x641f   :  { %v7316_v32 = vpop.eup %7315 }
0x6420   :  { %v4365_v18 = vadd.f32 1.0, %v7316_v32 }
0x6422   :  { %7317 = vrcp.f32 %v4365_v18  ;;  %v4377_v39 = vand.u32 2147483648, %v4365_v18  ;;  %vm4371_vm3 = vweird.f32 %v4365_v18  ;;  %v4375_v44 = vand.u32 2147483647, %v4365_v18 }
0x6423   :  { %7319 = vtanh.f32 %v3491_v45 }
0x6424   :  { %v4378_v6 = vor.u32 1.1754944e-38, %v4377_v39  ;;  %vm4376_vm7 = vcmp.eq.f32.partialorder %v4375_v44, 8.507059e+37 }
0x6428   :  { %v7318_v41 = vpop.eup %7317 }
0x6429   :  { %v4367_v42 = vmul.f32 %v7318_v41, %v4365_v18  ;;  %vm4372_vm2 = vweird.f32 %v7318_v41  ;;  %v7320_v50 = vpop.eup %7319 }
0x642a   :  { %vm4373_vm4 = vmor %vm4371_vm3, %vm4372_vm2 }
0x642b   :  { %v4368_v37 = vsub.f32 1.0, %v4367_v42 }
0x642d   :  { %v4369_v38 = vmul.f32 %v7318_v41, %v4368_v37 }
0x642f   :  { %v4370_v43 = vadd.f32 %v7318_v41, %v4369_v38 }
0x6431   :  { %v4374_v40 = vsel %vm4373_vm4, %v7318_v41, %v4370_v43 }
0x6432   :  { %v4379_v49 = vsel %vm4376_vm7, %v4378_v6, %v4374_v40 }
0x6433   :  { %v4382_v51 = vmul.f32 %v4379_v49, %v4326_v3 }
0x6490   :  { %v4385_v7 = vpop.permute.xlu1 %4384 }
0x6491   :  { %v4387_v2 = vmul.f32 %v4385_v7, %v4379_v49  ;;  %v4164_v7 = vpop.f32.mrf.mxu0 }
0x6493   :  { %4389 = vrot.lane.b32.xlu2 %v4387_v2, %s8337_s28 }
0x649b   :  { %3514 = vrot.lane.b32.xlu2 %v7320_v50, %s8336_s26 }
0x64ed   :  { %v4390_v52 = vpop.permute.xlu2 %4389 }
0x64ee   :  { %v9513_v53 = vadd.f32 %v4390_v52, %v4382_v51  ;;  %v4743_v51 = vld [vmem:[#allocation37 + $0x18] sm:$0xff]  ;;  %v4742_v52 = vld [vmem:[#allocation37 + $0x10] sm:$0xff] }
0x64ef   :  { %4756 = vmatpush.msra.mxu0 %v4743_v51 }
0x64f0   :  { %7321 = vtanh.f32 %v9513_v53 }
0x64f1   :  { %7323 = vpow2.f32 %v6736_v21  ;;  %4757 = vmatpush.msra.mxu0 %v4742_v52 }
0x64f5   :  { %v3515_v11 = vpop.permute.xlu2 %3514 }
0x64f6   :  { %v7322_v54 = vpop.eup %7321 }
0x64f7   :  { %4395 = vrot.lane.b32.xlu0 %v7322_v54, %s8336_s26  ;;  %v7324_v56 = vpop.eup %7323  ;;  %v4740_v54 = vld [vmem:[#allocation37] sm:$0xff] }
0x64f8   :  { %v3495_v14 = vadd.f32 1.0, %v7324_v56 }
0x64fa   :  { %7325 = vrcp.f32 %v3495_v14  ;;  %v3507_v1 = vand.u32 2147483648, %v3495_v14  ;;  %vm3501_vm9 = vweird.f32 %v3495_v14  ;;  %v3505_v5 = vand.u32 2147483647, %v3495_v14 }
0x64fc   :  { %v3508_v4 = vor.u32 1.1754944e-38, %v3507_v1  ;;  %vm3506_vm11 = vcmp.eq.f32.partialorder %v3505_v5, 8.507059e+37 }
0x6500   :  { %v7326_v55 = vpop.eup %7325 }
0x6501   :  { %v3497_v57 = vmul.f32 %v7326_v55, %v3495_v14  ;;  %vm3502_vm8 = vweird.f32 %v7326_v55 }
0x6502   :  { %vm3503_vm10 = vmor %vm3501_vm9, %vm3502_vm8 }
0x6503   :  { %v3498_v58 = vsub.f32 1.0, %v3497_v57 }
0x6505   :  { %v3499_v61 = vmul.f32 %v7326_v55, %v3498_v58 }
0x6507   :  { %v3500_v63 = vadd.f32 %v7326_v55, %v3499_v61 }
0x6509   :  { %v3504_v10 = vsel %vm3503_vm10, %v7326_v55, %v3500_v63 }
0x650a   :  { %v3509_v13 = vsel %vm3506_vm11, %v3508_v4, %v3504_v10 }
0x650b   :  { %v3517_v12 = vmul.f32 %v3515_v11, %v3509_v13  ;;  %v3512_v24 = vmul.f32 %v3509_v13, %v9377_v60 }
0x6569   :  { %v4396_v62 = vpop.permute.xlu0 %4395 }
0x656a   :  { %v4398_v0 = vmul.f32 %v4396_v62, %v4379_v49 }
0x656c   :  { %4400 = vrot.lane.b32.xlu1 %v4398_v0, %s8337_s28 }
0x6574   :  { %3519 = vrot.lane.b32.xlu1 %v3517_v12, %s8337_s28 }
0x65de   :  { %v4401_v15 = vpop.permute.xlu1 %4400 }
0x65df   :  { %4403 = vst.msk [vmem:[#allocation5 + $0x4] sm:$0x3] %vm701_vm5, %v4401_v15  ;;  %6765 = vmatmul.msk.f32.vlgmr.msra.gmra.mxu3 %vm635_vm6, %v4401_v15 }
0x65e6   :  { %v3520_v34 = vpop.permute.xlu1 %3519 }
0x65e7   :  { %v3522_v25 = vadd.f32 %v3520_v34, %v3512_v24 }
0x6662   :  { %v4424_v48 = vpop.f32.mrf.mxu3 }
0x6663   :  { %v4427_v16 = vadd.f32 %v4424_v48, %v4404_v31 }
0x6665   :  { %7327 = vtanh.f32 %v4427_v16  ;;  %v6766_v22 = vmul.f32 -1.442695, %v4427_v16 }
0x6666   :  { %7329 = vtanh.f32 %v3522_v25  ;;  %v4739_v25 = vld [vmem:[#allocation36 + $0x18] sm:$0xff] }
0x6667   :  { %7331 = vpow2.f32 %v6766_v22  ;;  %4779 = vmatpush.msra.mxu1 %v4739_v25  ;;  %v4736_v22 = vld [vmem:[#allocation36] sm:$0xff] }
0x666b   :  { %v7328_v19 = vpop.eup %7327 }
0x666c   :  { %4450 = vrot.lane.b32.xlu0 %v7328_v19, %s8336_s26  ;;  %v7330_v20 = vpop.eup %7329  ;;  %v4738_v19 = vld [vmem:[#allocation36 + $0x10] sm:$0xff] }
0x666d   :  { %v7332_v17 = vpop.eup %7331  ;;  %4780 = vmatpush.msra.mxu1 %v4738_v19 }
0x666e   :  { %v4431_v3 = vadd.f32 1.0, %v7332_v17 }
0x6670   :  { %7333 = vrcp.f32 %v4431_v3  ;;  %v4443_v60 = vand.u32 2147483648, %v4431_v3  ;;  %vm4437_vm13 = vweird.f32 %v4431_v3  ;;  %v4441_v33 = vand.u32 2147483647, %v4431_v3 }
0x6672   :  { %v4444_v36 = vor.u32 1.1754944e-38, %v4443_v60  ;;  %vm4442_vm15 = vcmp.eq.f32.partialorder %v4441_v33, 8.507059e+37 }
0x6674   :  { %3525 = vrot.lane.b32.xlu0 %v7330_v20, %s8336_s26  ;;  %v4737_v20 = vld [vmem:[#allocation36 + $0x8] sm:$0xff] }
0x6675   :  { %4781 = vmatpush.msra.mxu1 %v4737_v20 }
0x6676   :  { %v7334_v23 = vpop.eup %7333 }
0x6677   :  { %v4433_v46 = vmul.f32 %v7334_v23, %v4431_v3  ;;  %vm4438_vm12 = vweird.f32 %v7334_v23  ;;  %4782 = vmatpush.msra.mxu1 %v4736_v22 }
0x6678   :  { %vm4439_vm14 = vmor %vm4437_vm13, %vm4438_vm12 }
0x6679   :  { %v4434_v26 = vsub.f32 1.0, %v4433_v46 }
0x667b   :  { %v4435_v47 = vmul.f32 %v7334_v23, %v4434_v26 }
0x667d   :  { %v4436_v30 = vadd.f32 %v7334_v23, %v4435_v47  ;;  %v6917_v47 = vld [vmem:[%s9935_s7] ss:$0 sm:$0xff] }
0x667f   :  { %v4440_v35 = vsel %vm4439_vm14, %v7334_v23, %v4436_v30 }
0x6680   :  { %v4445_v32 = vsel %vm4442_vm15, %v4444_v36, %v4440_v35 }
0x6681   :  { %v4448_v37 = vmul.f32 %v4445_v32, %v9513_v53  ;;  %v4741_v53 = vld [vmem:[#allocation37 + $0x8] sm:$0xff] }
0x6682   :  { %4758 = vmatpush.msra.mxu0 %v4741_v53 }
0x6684   :  { %4759 = vmatpush.msra.mxu0 %v4740_v54 }
0x66de   :  { %v4451_v9 = vpop.permute.xlu0 %4450 }
0x66df   :  { %v4453_v18 = vmul.f32 %v4451_v9, %v4445_v32 }
0x66e1   :  { %4455 = vrot.lane.b32.xlu2 %v4453_v18, %s8337_s28 }
0x66e6   :  { %v3526_v41 = vpop.permute.xlu0 %3525 }
0x66e7   :  { %v3528_v42 = vmul.f32 %v3526_v41, %v3509_v13 }
0x66e9   :  { %3530 = vrot.lane.b32.xlu2 %v3528_v42, %s8337_s28 }
0x673b   :  { %v4456_v38 = vpop.permute.xlu2 %4455 }
0x673c   :  { %v4458_v43 = vadd.f32 %v4456_v38, %v4448_v37 }
0x673e   :  { %7335 = vtanh.f32 %v4458_v43 }
0x6743   :  { %v3531_v39 = vpop.permute.xlu2 %3530 }
0x6744   :  { %v7336_v44 = vpop.eup %7335  ;;  %3533 = vst.msk [vmem:[#allocation3 + $0xe] sm:$0x3] %vm701_vm5, %v3531_v39 }
0x6745   :  { %4461 = vrot.lane.b32.xlu1 %v7336_v44, %s8336_s26 }
0x674b   :  { %v9529_v40 = vld [vmem:[#allocation3 + $0x8] sm:$0xff] }
0x674c   :  { %6759 = vmatmul.msk.f32.gmra.mxu1 %vm635_vm6, %v9529_v40 }
0x67b7   :  { %v4462_v6 = vpop.permute.xlu1 %4461 }
0x67b8   :  { %v4464_v45 = vmul.f32 %v4462_v6, %v4445_v32 }
0x67ba   :  { %4466 = vrot.lane.b32.xlu0 %v4464_v45, %s8337_s28 }
0x67c9   :  { %v4193_v49 = vpop.f32.mrf.mxu1 }
0x67ca   :  { %v4194_v2 = vadd.f32 %v4193_v49, %v4164_v7 }
0x67cc   :  { %v4201_v50 = vadd.f32 %v9489_v29, %v4194_v2 }
0x67ce   :  { %4203 = vst [vmem:[#allocation2 + $0x8] sm:$0xff] %v4201_v50 }
0x67d5   :  { %v4470_v29 = vld [vmem:[#allocation2 + $0x8] sm:$0x3]  ;;  %v4536_v3 = vld [vmem:[#allocation2 + $0xa] sm:$0x3]  ;;  %v9553_v18 = vld [vmem:[#allocation2 + $0xc] sm:$0x3] }
0x67d6   :  { %v9555_v41 = vld [vmem:[#allocation2 + $0xe] sm:$0x3] }
0x682c   :  { %v4467_v21 = vpop.permute.xlu0 %4466 }
0x682d   :  { %4469 = vst.msk [vmem:[#allocation5 + $0x6] sm:$0x3] %vm701_vm5, %v4467_v21  ;;  %6767 = vmatmul.msk.f32.vlgmr.msrb.gmra.mxu0 %vm635_vm6, %v4467_v21 }
0x6835   :  { %6775 = vmatmul.msk.f32.vlgmr.msra.gmra.mxu0 %vm635_vm6, %v9480_v27 }
0x683d   :  { %6776 = vmatmul.msk.f32.gmra.mxu0 %vm635_vm6, %v9484_v28 }
0x68aa   :  { %v4490_v56 = vpop.f32.mrf.mxu0 }
0x68ab   :  { %v4493_v14 = vadd.f32 %v4490_v56, %v4470_v29 }
0x68ad   :  { %7337 = vtanh.f32 %v4493_v14  ;;  %v6768_v57 = vmul.f32 -1.442695, %v4493_v14 }
0x68af   :  { %7339 = vpow2.f32 %v6768_v57  ;;  %v9565_v57 = vld [vmem:[#allocation39 + $0x10] sm:$0xff] }
0x68b2   :  { %v4761_v26 = vpop.f32.mrf.mxu0 }
0x68b3   :  { %v7338_v55 = vpop.eup %7337 }
0x68b4   :  { %4516 = vrot.lane.b32.xlu1 %v7338_v55, %s8336_s26  ;;  %v9563_v55 = vld [vmem:[#allocation39 + $0x18] sm:$0xff] }
0x68b5   :  { %v7340_v58 = vpop.eup %7339  ;;  %4815 = vmatpush.msrb.mxu2 %v9563_v55  ;;  %4881 = vmatpush.msra.mxu3 %v9563_v55 }
0x68b6   :  { %v4497_v61 = vadd.f32 1.0, %v7340_v58  ;;  %v9569_v58 = vld [vmem:[#allocation39 + $0x8] sm:$0xff]  ;;  %5079 = vmatpush.msrb.mxu0 %v9563_v55 }
0x68b7   :  { %4816 = vmatpush.msrb.mxu2 %v9565_v57  ;;  %4882 = vmatpush.msra.mxu3 %v9565_v57 }
0x68b8   :  { %7341 = vrcp.f32 %v4497_v61  ;;  %v4509_v5 = vand.u32 2147483648, %v4497_v61  ;;  %vm4503_vm2 = vweird.f32 %v4497_v61  ;;  %v4507_v28 = vand.u32 2147483647, %v4497_v61  ;;  %5080 = vmatpush.msrb.mxu0 %v9565_v57 }
0x68b9   :  { %4817 = vmatpush.msrb.mxu2 %v9569_v58  ;;  %4883 = vmatpush.msra.mxu3 %v9569_v58 }
0x68ba   :  { %v4510_v4 = vor.u32 1.1754944e-38, %v4509_v5  ;;  %vm4508_vm4 = vcmp.eq.f32.partialorder %v4507_v28, 8.507059e+37  ;;  %v4764_v36 = vpop.f32.mrf.mxu0  ;;  %5081 = vmatpush.msrb.mxu0 %v9569_v58 }
0x68be   :  { %v7342_v62 = vpop.eup %7341 }
0x68bf   :  { %v4499_v63 = vmul.f32 %v7342_v62, %v4497_v61  ;;  %vm4504_vm1 = vweird.f32 %v7342_v62  ;;  %v9575_v61 = vld [vmem:[#allocation39] sm:$0xff] }
0x68c0   :  { %vm4505_vm3 = vmor %vm4503_vm2, %vm4504_vm1  ;;  %4818 = vmatpush.msrb.mxu2 %v9575_v61  ;;  %4884 = vmatpush.msra.mxu3 %v9575_v61 }
0x68c1   :  { %v4500_v0 = vsub.f32 1.0, %v4499_v63  ;;  %5082 = vmatpush.msrb.mxu0 %v9575_v61 }
0x68c3   :  { %v4501_v1 = vmul.f32 %v7342_v62, %v4500_v0 }
0x68c5   :  { %v4502_v27 = vadd.f32 %v7342_v62, %v4501_v1 }
0x68c7   :  { %v4506_v10 = vsel %vm4505_vm3, %v7342_v62, %v4502_v27 }
0x68c8   :  { %v4511_v13 = vsel %vm4508_vm4, %v4510_v4, %v4506_v10 }
0x68c9   :  { %v4514_v15 = vmul.f32 %v4511_v13, %v4458_v43 }
0x6926   :  { %v4517_v11 = vpop.permute.xlu1 %4516 }
0x6927   :  { %v4519_v12 = vmul.f32 %v4517_v11, %v4511_v13 }
0x6929   :  { %4521 = vrot.lane.b32.xlu2 %v4519_v12, %s8337_s28 }
0x6983   :  { %v4522_v31 = vpop.permute.xlu2 %4521 }
0x6984   :  { %v4524_v48 = vadd.f32 %v4522_v31, %v4514_v15 }
0x6986   :  { %7343 = vtanh.f32 %v4524_v48 }
0x698c   :  { %v7344_v16 = vpop.eup %7343 }
0x698d   :  { %4527 = vrot.lane.b32.xlu0 %v7344_v16, %s8336_s26 }
0x69ff   :  { %v4528_v34 = vpop.permute.xlu0 %4527 }
0x6a00   :  { %v4530_v24 = vmul.f32 %v4528_v34, %v4511_v13 }
0x6a02   :  { %4532 = vrot.lane.b32.xlu1 %v4530_v24, %s8337_s28 }
0x6a74   :  { %v4533_v17 = vpop.permute.xlu1 %4532 }
0x6a75   :  { %4535 = vst.msk [vmem:[#allocation5 + $0x8] sm:$0x3] %vm701_vm5, %v4533_v17  ;;  %6769 = vmatmul.msk.f32.vlgmr.msrb.gmra.mxu1 %vm635_vm6, %v4533_v17 }
0x6a76   :  { %5145 = vmatpush.msrb.mxu1 %v9563_v55 }
0x6a78   :  { %5146 = vmatpush.msrb.mxu1 %v9565_v57 }
0x6a7a   :  { %5147 = vmatpush.msrb.mxu1 %v9569_v58 }
0x6a7c   :  { %5148 = vmatpush.msrb.mxu1 %v9575_v61 }
0x6a7d   :  { %6777 = vmatmul.msk.f32.vlgmr.msra.gmra.mxu1 %vm635_vm6, %v9422_v59 }
0x6a85   :  { %6778 = vmatmul.msk.f32.gmra.mxu1 %vm635_vm6, %v9529_v40 }
0x6af2   :  { %v4556_v23 = vpop.f32.mrf.mxu1 }
0x6af3   :  { %v4559_v46 = vadd.f32 %v4556_v23, %v4536_v3 }
0x6af5   :  { %7345 = vtanh.f32 %v4559_v46  ;;  %v6770_v42 = vmul.f32 -1.442695, %v4559_v46 }
0x6af7   :  { %7347 = vpow2.f32 %v6770_v42 }
0x6afa   :  { %v4784_v30 = vpop.f32.mrf.mxu1 }
0x6afb   :  { %v7346_v60 = vpop.eup %7345  ;;  %v4785_v33 = vadd.f32 %v4784_v30, %v4761_v26 }
0x6afc   :  { %4582 = vrot.lane.b32.xlu2 %v7346_v60, %s8336_s26 }
0x6afd   :  { %v4794_v35 = vadd.f32 %v6917_v47, %v4785_v33  ;;  %v7348_v37 = vpop.eup %7347 }
0x6afe   :  { %v4563_v38 = vadd.f32 1.0, %v7348_v37 }
0x6aff   :  { %4796 = vst [vmem:[#allocation2] sm:$0xff] %v4794_v35 }
0x6b00   :  { %7349 = vrcp.f32 %v4563_v38  ;;  %v4575_v45 = vand.u32 2147483648, %v4563_v38  ;;  %vm4569_vm8 = vweird.f32 %v4563_v38  ;;  %v4573_v7 = vand.u32 2147483647, %v4563_v38 }
0x6b02   :  { %v4787_v9 = vpop.f32.mrf.mxu1  ;;  %v4576_v2 = vor.u32 1.1754944e-38, %v4575_v45  ;;  %vm4574_vm10 = vcmp.eq.f32.partialorder %v4573_v7, 8.507059e+37 }
0x6b03   :  { %v4788_v32 = vadd.f32 %v4787_v9, %v4764_v36 }
0x6b05   :  { %v4795_v59 = vadd.f32 %v6917_v47, %v4788_v32 }
0x6b06   :  { %v7350_v43 = vpop.eup %7349 }
0x6b07   :  { %4797 = vst [vmem:[#allocation2 + $0x8] sm:$0xff] %v4795_v59  ;;  %v4565_v39 = vmul.f32 %v7350_v43, %v4563_v38  ;;  %vm4570_vm7 = vweird.f32 %v7350_v43 }
0x6b08   :  { %vm4571_vm9 = vmor %vm4569_vm8, %vm4570_vm7 }
0x6b09   :  { %v4566_v44 = vsub.f32 1.0, %v4565_v39 }
0x6b0b   :  { %v4567_v40 = vmul.f32 %v7350_v43, %v4566_v44 }
0x6b0d   :  { %v4568_v6 = vadd.f32 %v7350_v43, %v4567_v40 }
0x6b0e   :  { %v4802_v1 = vld [vmem:[#allocation2 + $0xe] sm:$0x3] }
0x6b0f   :  { %v4572_v49 = vsel %vm4571_vm9, %v7350_v43, %v4568_v6 }
0x6b10   :  { %v4577_v51 = vsel %vm4574_vm10, %v4576_v2, %v4572_v49 }
0x6b11   :  { %v4580_v53 = vmul.f32 %v4577_v51, %v4524_v48 }
0x6b56   :  { %v4583_v50 = vpop.permute.xlu2 %4582 }
0x6b57   :  { %v4585_v52 = vmul.f32 %v4583_v50, %v4577_v51 }
0x6b59   :  { %4587 = vrot.lane.b32.xlu0 %v4585_v52, %s8337_s28 }
0x6bcb   :  { %v4588_v54 = vpop.permute.xlu0 %4587 }
0x6bcc   :  { %v9558_v21 = vadd.f32 %v4588_v54, %v4580_v53  ;;  %v4866_v54 = vld [vmem:[#allocation2 + $0xc] sm:$0x3] }
0x6bce   :  { %7351 = vtanh.f32 %v9558_v21 }
0x6bd4   :  { %v7352_v29 = vpop.eup %7351 }
0x6bd5   :  { %4593 = vrot.lane.b32.xlu1 %v7352_v29, %s8336_s26 }
0x6c47   :  { %v4594_v56 = vpop.permute.xlu1 %4593 }
0x6c48   :  { %v4596_v14 = vmul.f32 %v4594_v56, %v4577_v51 }
0x6c4a   :  { %4598 = vrot.lane.b32.xlu2 %v4596_v14, %s8337_s28 }
0x6ca4   :  { %v4599_v62 = vpop.permute.xlu2 %4598 }
0x6ca5   :  { %4601 = vst.msk [vmem:[#allocation5 + $0xa] sm:$0x3] %vm701_vm5, %v4599_v62  ;;  %6771 = vmatmul.msk.f32.vlgmr.msra.gmra.mxu2 %vm635_vm6, %v4599_v62 }
0x6ca6   :  { %4947 = vmatpush.msra.mxu2 %v9563_v55 }
0x6ca8   :  { %4948 = vmatpush.msra.mxu2 %v9565_v57 }
0x6caa   :  { %4949 = vmatpush.msra.mxu2 %v9569_v58 }
0x6cac   :  { %4950 = vmatpush.msra.mxu2 %v9575_v61 }
0x6cad   :  { %4819 = vmatmul.f32.vlgmr.msrb.gmra.mxu2 %v8335_v8 }
0x6cae   :  { %5211 = vmatpush.msrb.mxu2 %v9563_v55 }
0x6cb0   :  { %5212 = vmatpush.msrb.mxu2 %v9565_v57 }
0x6cb2   :  { %5213 = vmatpush.msrb.mxu2 %v9569_v58 }
0x6cb4   :  { %5214 = vmatpush.msrb.mxu2 %v9575_v61 }
0x6d28   :  { %v4622_v63 = vpop.f32.mrf.mxu2 }
0x6d29   :  { %v4625_v0 = vadd.f32 %v4622_v63, %v9553_v18 }
0x6d2b   :  { %7353 = vtanh.f32 %v4625_v0  ;;  %v6772_v4 = vmul.f32 -1.442695, %v4625_v0 }
0x6d30   :  { %v4820_v27 = vpop.f32.mrf.mxu2 }
0x6d31   :  { %v7354_v5 = vpop.eup %7353  ;;  %v4823_v28 = vadd.f32 %v4820_v27, %v4802_v1 }
0x6d32   :  { %4648 = vrot.lane.b32.xlu0 %v7354_v5, %s8336_s26 }
0x6d33   :  { %7355 = vtanh.f32 %v4823_v28  ;;  %v6779_v11 = vmul.f32 -1.442695, %v4823_v28 }
0x6d34   :  { %7357 = vpow2.f32 %v6772_v4 }
0x6d35   :  { %7359 = vpow2.f32 %v6779_v11 }
0x6d39   :  { %v7356_v10 = vpop.eup %7355 }
0x6d3a   :  { %4846 = vrot.lane.b32.xlu1 %v7356_v10, %s8336_s26  ;;  %v7358_v13 = vpop.eup %7357 }
0x6d3b   :  { %v4629_v12 = vadd.f32 1.0, %v7358_v13  ;;  %v7360_v15 = vpop.eup %7359 }
0x6d3c   :  { %v4827_v31 = vadd.f32 1.0, %v7360_v15 }
0x6d3d   :  { %7361 = vrcp.f32 %v4629_v12  ;;  %v4641_v17 = vand.u32 2147483648, %v4629_v12  ;;  %vm4635_vm12 = vweird.f32 %v4629_v12  ;;  %v4639_v3 = vand.u32 2147483647, %v4629_v12 }
0x6d3e   :  { %7363 = vrcp.f32 %v4827_v31  ;;  %v4839_v35 = vand.u32 2147483648, %v4827_v31  ;;  %vm4833_vm1 = vweird.f32 %v4827_v31  ;;  %v4837_v36 = vand.u32 2147483647, %v4827_v31 }
0x6d3f   :  { %v4642_v26 = vor.u32 1.1754944e-38, %v4641_v17  ;;  %vm4640_vm14 = vcmp.eq.f32.partialorder %v4639_v3, 8.507059e+37 }
0x6d40   :  { %v4840_v32 = vor.u32 1.1754944e-38, %v4839_v35  ;;  %vm4838_vm3 = vcmp.eq.f32.partialorder %v4837_v36, 8.507059e+37 }
0x6d43   :  { %v7362_v48 = vpop.eup %7361 }
0x6d44   :  { %v4631_v16 = vmul.f32 %v7362_v48, %v4629_v12  ;;  %v7364_v24 = vpop.eup %7363  ;;  %vm4636_vm11 = vweird.f32 %v7362_v48 }
0x6d45   :  { %v4829_v19 = vmul.f32 %v7364_v24, %v4827_v31  ;;  %vm4637_vm13 = vmor %vm4635_vm12, %vm4636_vm11  ;;  %vm4834_vm15 = vweird.f32 %v7364_v24 }
0x6d46   :  { %v4632_v34 = vsub.f32 1.0, %v4631_v16  ;;  %vm4835_vm2 = vmor %vm4833_vm1, %vm4834_vm15 }
0x6d47   :  { %v4830_v22 = vsub.f32 1.0, %v4829_v19 }
0x6d48   :  { %v4633_v25 = vmul.f32 %v7362_v48, %v4632_v34 }
0x6d49   :  { %v4831_v46 = vmul.f32 %v7364_v24, %v4830_v22 }
0x6d4a   :  { %v4634_v20 = vadd.f32 %v7362_v48, %v4633_v25 }
0x6d4b   :  { %v4832_v33 = vadd.f32 %v7364_v24, %v4831_v46 }
0x6d4c   :  { %v4638_v23 = vsel %vm4637_vm13, %v7362_v48, %v4634_v20 }
0x6d4d   :  { %v4643_v30 = vsel %vm4640_vm14, %v4642_v26, %v4638_v23  ;;  %v4836_v9 = vsel %vm4835_vm2, %v7364_v24, %v4832_v33  ;;  %v4932_v24 = vld [vmem:[#allocation2 + $0xa] sm:$0x3] }
0x6d4e   :  { %v4841_v18 = vsel %vm4838_vm3, %v4840_v32, %v4836_v9  ;;  %v4646_v37 = vmul.f32 %v4643_v30, %v9558_v21 }
0x6d4f   :  { %v4844_v44 = vmul.f32 0.0, %v4841_v18 }
0x6da4   :  { %v4649_v47 = vpop.permute.xlu0 %4648 }
0x6da5   :  { %v4651_v60 = vmul.f32 %v4649_v47, %v4643_v30 }
0x6da7   :  { %4653 = vrot.lane.b32.xlu2 %v4651_v60, %s8337_s28 }
0x6dac   :  { %v4847_v59 = vpop.permute.xlu1 %4846 }
0x6dad   :  { %v4849_v42 = vmul.f32 %v4847_v59, %v4841_v18 }
0x6daf   :  { %4851 = vrot.lane.b32.xlu0 %v4849_v42, %s8337_s28 }
0x6e01   :  { %v4654_v38 = vpop.permute.xlu2 %4653 }
0x6e02   :  { %v9604_v43 = vadd.f32 %v4654_v38, %v4646_v37 }
0x6e04   :  { %7365 = vtanh.f32 %v9604_v43 }
0x6e0a   :  { %v7366_v39 = vpop.eup %7365 }
0x6e0b   :  { %4659 = vrot.lane.b32.xlu1 %v7366_v39, %s8336_s26 }
0x6e21   :  { %v4852_v40 = vpop.permute.xlu0 %4851 }
0x6e22   :  { %v4854_v6 = vadd.f32 %v4852_v40, %v4844_v44 }
0x6e24   :  { %7367 = vtanh.f32 %v4854_v6 }
0x6e2a   :  { %v7368_v45 = vpop.eup %7367 }
0x6e2b   :  { %4857 = vrot.lane.b32.xlu2 %v7368_v45, %s8336_s26 }
0x6e7d   :  { %v4660_v7 = vpop.permute.xlu1 %4659 }
0x6e7e   :  { %v4662_v49 = vmul.f32 %v4660_v7, %v4643_v30 }
0x6e80   :  { %4664 = vrot.lane.b32.xlu0 %v4662_v49, %s8337_s28 }
0x6e85   :  { %v4858_v2 = vpop.permute.xlu2 %4857 }
0x6e86   :  { %v4860_v50 = vmul.f32 %v4858_v2, %v4841_v18 }
0x6e88   :  { %4862 = vrot.lane.b32.xlu1 %v4860_v50, %s8337_s28 }
0x6ef2   :  { %v4665_v51 = vpop.permute.xlu0 %4664 }
0x6ef3   :  { %4667 = vst.msk [vmem:[#allocation5 + $0xc] sm:$0x3] %vm701_vm5, %v4665_v51  ;;  %6773 = vmatmul.msk.f32.vlgmr.msrb.gmra.mxu3 %vm635_vm6, %v4665_v51 }
0x6ef4   :  { %5013 = vmatpush.msrb.mxu3 %v9563_v55 }
0x6ef6   :  { %5014 = vmatpush.msrb.mxu3 %v9565_v57 }
0x6ef8   :  { %5015 = vmatpush.msrb.mxu3 %v9569_v58 }
0x6efa   :  { %v4863_v52 = vpop.permute.xlu1 %4862  ;;  %5016 = vmatpush.msrb.mxu3 %v9575_v61 }
0x6efb   :  { %4865 = vst.msk [vmem:[#allocation6 + $0xe] sm:$0x3] %vm701_vm5, %v4863_v52  ;;  %6780 = vmatmul.msk.f32.vlgmr.msra.gmra.mxu3 %vm635_vm6, %v4863_v52 }
0x6efc   :  { %5277 = vmatpush.msra.mxu3 %v9563_v55 }
0x6efe   :  { %5278 = vmatpush.msra.mxu3 %v9565_v57 }
0x6f00   :  { %5279 = vmatpush.msra.mxu3 %v9569_v58 }
0x6f02   :  { %5280 = vmatpush.msra.mxu3 %v9575_v61 }
0x6f76   :  { %v9623_v53 = vpop.f32.mrf.mxu3 }
0x6f7e   :  { %v4886_v21 = vpop.f32.mrf.mxu3 }
0x6f7f   :  { %v4889_v29 = vadd.f32 %v4886_v21, %v4866_v54 }
0x6f81   :  { %7369 = vtanh.f32 %v4889_v29  ;;  %v6781_v14 = vmul.f32 -1.442695, %v4889_v29 }
0x6f83   :  { %7371 = vpow2.f32 %v6781_v14 }
0x6f87   :  { %v7370_v56 = vpop.eup %7369 }
0x6f88   :  { %4912 = vrot.lane.b32.xlu2 %v7370_v56, %s8336_s26 }
0x6f89   :  { %v7372_v62 = vpop.eup %7371 }
0x6f8a   :  { %v4893_v63 = vadd.f32 1.0, %v7372_v62 }
0x6f8c   :  { %7373 = vrcp.f32 %v4893_v63  ;;  %v4905_v61 = vand.u32 2147483648, %v4893_v63  ;;  %vm4899_vm7 = vweird.f32 %v4893_v63  ;;  %v4903_v27 = vand.u32 2147483647, %v4893_v63 }
0x6f8e   :  { %v4906_v28 = vor.u32 1.1754944e-38, %v4905_v61  ;;  %vm4904_vm9 = vcmp.eq.f32.partialorder %v4903_v27, 8.507059e+37 }
0x6f92   :  { %v7374_v55 = vpop.eup %7373 }
0x6f93   :  { %v4895_v57 = vmul.f32 %v7374_v55, %v4893_v63  ;;  %vm4900_vm4 = vweird.f32 %v7374_v55 }
0x6f94   :  { %vm4901_vm8 = vmor %vm4899_vm7, %vm4900_vm4 }
0x6f95   :  { %v4896_v0 = vsub.f32 1.0, %v4895_v57 }
0x6f97   :  { %v4897_v58 = vmul.f32 %v7374_v55, %v4896_v0 }
0x6f99   :  { %v4898_v1 = vadd.f32 %v7374_v55, %v4897_v58 }
0x6f9b   :  { %v4902_v5 = vsel %vm4901_vm8, %v7374_v55, %v4898_v1 }
0x6f9c   :  { %v4907_v4 = vsel %vm4904_vm9, %v4906_v28, %v4902_v5 }
0x6f9d   :  { %v4910_v13 = vmul.f32 %v4907_v4, %v4854_v6  ;;  %v4998_v6 = vld [vmem:[#allocation2 + $0x8] sm:$0x3] }
0x6fe2   :  { %v4913_v10 = vpop.permute.xlu2 %4912 }
0x6fe3   :  { %v4915_v11 = vmul.f32 %v4913_v10, %v4907_v4 }
0x6fe5   :  { %4917 = vrot.lane.b32.xlu0 %v4915_v11, %s8337_s28  ;;  %v5334_v11 = vld [vmem:[#allocation42 + $0x10] sm:$0xff] }
0x7057   :  { %v4918_v12 = vpop.permute.xlu0 %4917 }
0x7058   :  { %v4920_v15 = vadd.f32 %v4918_v12, %v4910_v13  ;;  %v5333_v13 = vld [vmem:[#allocation42 + $0x8] sm:$0xff]  ;;  %v5332_v12 = vld [vmem:[#allocation42] sm:$0xff] }
0x705a   :  { %7375 = vtanh.f32 %v4920_v15 }
0x7060   :  { %v7376_v31 = vpop.eup %7375 }
0x7061   :  { %4923 = vrot.lane.b32.xlu1 %v7376_v31, %s8336_s26  ;;  %v4734_v31 = vld [vmem:[#allocation5] sm:$0xff] }
0x70d3   :  { %v4924_v48 = vpop.permute.xlu1 %4923 }
0x70d4   :  { %v4926_v16 = vmul.f32 %v4924_v48, %v4907_v4  ;;  %v5335_v4 = vld [vmem:[#allocation42 + $0x18] sm:$0xff]  ;;  %v5064_v48 = vld [vmem:[#allocation2 + $0x6] sm:$0x3] }
0x70d5   :  { %5354 = vmatpush.msra.mxu0 %v5335_v4 }
0x70d6   :  { %4928 = vrot.lane.b32.xlu2 %v4926_v16, %s8337_s28 }
0x70d7   :  { %5355 = vmatpush.msra.mxu0 %v5334_v11 }
0x70d9   :  { %5356 = vmatpush.msra.mxu0 %v5333_v13  ;;  %v5196_v13 = vld [vmem:[#allocation2 + $0x2] sm:$0x3] }
0x70db   :  { %5357 = vmatpush.msra.mxu0 %v5332_v12 }
0x7130   :  { %v4929_v34 = vpop.permute.xlu2 %4928 }
0x7131   :  { %4931 = vst.msk [vmem:[#allocation6 + $0xc] sm:$0x3] %vm701_vm5, %v4929_v34  ;;  %6782 = vmatmul.msk.f32.vlgmr.msra.gmra.mxu2 %vm635_vm6, %v4929_v34 }
0x71b4   :  { %v4952_v25 = vpop.f32.mrf.mxu2 }
0x71b5   :  { %v4955_v19 = vadd.f32 %v4952_v25, %v4932_v24 }
0x71b7   :  { %7377 = vtanh.f32 %v4955_v19  ;;  %v6783_v22 = vmul.f32 -1.442695, %v4955_v19 }
0x71b9   :  { %7379 = vpow2.f32 %v6783_v22 }
0x71bd   :  { %v7378_v20 = vpop.eup %7377 }
0x71be   :  { %4978 = vrot.lane.b32.xlu0 %v7378_v20, %s8336_s26 }
0x71bf   :  { %v7380_v17 = vpop.eup %7379 }
0x71c0   :  { %v4959_v3 = vadd.f32 1.0, %v7380_v17 }
0x71c2   :  { %7381 = vrcp.f32 %v4959_v3  ;;  %v4971_v60 = vand.u32 2147483648, %v4959_v3  ;;  %vm4965_vm11 = vweird.f32 %v4959_v3  ;;  %v4969_v33 = vand.u32 2147483647, %v4959_v3 }
0x71c4   :  { %v4972_v36 = vor.u32 1.1754944e-38, %v4971_v60  ;;  %vm4970_vm13 = vcmp.eq.f32.partialorder %v4969_v33, 8.507059e+37 }
0x71c8   :  { %v7382_v23 = vpop.eup %7381 }
0x71c9   :  { %v4961_v46 = vmul.f32 %v7382_v23, %v4959_v3  ;;  %vm4966_vm10 = vweird.f32 %v7382_v23 }
0x71ca   :  { %vm4967_vm12 = vmor %vm4965_vm11, %vm4966_vm10 }
0x71cb   :  { %v4962_v26 = vsub.f32 1.0, %v4961_v46 }
0x71cd   :  { %v4963_v47 = vmul.f32 %v7382_v23, %v4962_v26 }
0x71cf   :  { %v4964_v30 = vadd.f32 %v7382_v23, %v4963_v47 }
0x71d1   :  { %v4968_v35 = vsel %vm4967_vm12, %v7382_v23, %v4964_v30 }
0x71d2   :  { %v4973_v32 = vsel %vm4970_vm13, %v4972_v36, %v4968_v35 }
0x71d3   :  { %v4976_v18 = vmul.f32 %v4973_v32, %v4920_v15 }
0x7230   :  { %v4979_v9 = vpop.permute.xlu0 %4978 }
0x7231   :  { %v4981_v59 = vmul.f32 %v4979_v9, %v4973_v32 }
0x7233   :  { %4983 = vrot.lane.b32.xlu1 %v4981_v59, %s8337_s28 }
0x72a5   :  { %v4984_v42 = vpop.permute.xlu1 %4983 }
0x72a6   :  { %v4986_v37 = vadd.f32 %v4984_v42, %v4976_v18 }
0x72a8   :  { %7383 = vtanh.f32 %v4986_v37 }
0x72ae   :  { %v7384_v38 = vpop.eup %7383 }
0x72af   :  { %4989 = vrot.lane.b32.xlu2 %v7384_v38, %s8336_s26  ;;  %v5331_v38 = vld [vmem:[#allocation40 + $0x8] sm:$0xff] }
0x72b0   :  { %5379 = vmatpush.msra.mxu1 %v5331_v38 }
0x7309   :  { %v4990_v39 = vpop.permute.xlu2 %4989 }
0x730a   :  { %v4992_v44 = vmul.f32 %v4990_v39, %v4973_v32  ;;  %v5330_v39 = vld [vmem:[#allocation40] sm:$0xff] }
0x730b   :  { %5380 = vmatpush.msra.mxu1 %v5330_v39 }
0x730c   :  { %4994 = vrot.lane.b32.xlu0 %v4992_v44, %s8337_s28 }
0x737e   :  { %v4995_v40 = vpop.permute.xlu0 %4994 }
0x737f   :  { %4997 = vst.msk [vmem:[#allocation6 + $0xa] sm:$0x3] %vm701_vm5, %v4995_v40  ;;  %6784 = vmatmul.msk.f32.vlgmr.msrb.gmra.mxu3 %vm635_vm6, %v4995_v40  ;;  %v7561_v40 = vld [vmem:[%s9926_s20] sm:$0xff] }
0x7402   :  { %v5018_v45 = vpop.f32.mrf.mxu3 }
0x7403   :  { %v5021_v7 = vadd.f32 %v5018_v45, %v4998_v6  ;;  %v7562_v6 = vld [vmem:[%s9926_s20 + $0x8] sm:$0xff]  ;;  %v5130_v45 = vld [vmem:[#allocation2 + $0x4] sm:$0x3] }
0x7405   :  { %7385 = vtanh.f32 %v5021_v7  ;;  %v6785_v2 = vmul.f32 -1.442695, %v5021_v7 }
0x7407   :  { %7387 = vpow2.f32 %v6785_v2 }
0x740b   :  { %v7386_v49 = vpop.eup %7385 }
0x740c   :  { %5044 = vrot.lane.b32.xlu1 %v7386_v49, %s8336_s26 }
0x740d   :  { %v7388_v50 = vpop.eup %7387 }
0x740e   :  { %v5025_v51 = vadd.f32 1.0, %v7388_v50 }
0x7410   :  { %7389 = vrcp.f32 %v5025_v51  ;;  %v5037_v14 = vand.u32 2147483648, %v5025_v51  ;;  %vm5031_vm15 = vweird.f32 %v5025_v51  ;;  %v5035_v62 = vand.u32 2147483647, %v5025_v51 }
0x7412   :  { %v5038_v55 = vor.u32 1.1754944e-38, %v5037_v14  ;;  %vm5036_vm2 = vcmp.eq.f32.partialorder %v5035_v62, 8.507059e+37 }
0x7416   :  { %v7390_v52 = vpop.eup %7389 }
0x7417   :  { %v5027_v54 = vmul.f32 %v7390_v52, %v5025_v51  ;;  %vm5032_vm14 = vweird.f32 %v7390_v52 }
0x7418   :  { %vm5033_vm1 = vmor %vm5031_vm15, %vm5032_vm14 }
0x7419   :  { %v5028_v21 = vsub.f32 1.0, %v5027_v54 }
0x741b   :  { %v5029_v29 = vmul.f32 %v7390_v52, %v5028_v21 }
0x741d   :  { %v5030_v56 = vadd.f32 %v7390_v52, %v5029_v29 }
0x741f   :  { %v5034_v63 = vsel %vm5033_vm1, %v7390_v52, %v5030_v56 }
0x7420   :  { %v5039_v0 = vsel %vm5036_vm2, %v5038_v55, %v5034_v63 }
0x7421   :  { %v5042_v1 = vmul.f32 %v5039_v0, %v4986_v37 }
0x747e   :  { %v5045_v57 = vpop.permute.xlu1 %5044 }
0x747f   :  { %v5047_v58 = vmul.f32 %v5045_v57, %v5039_v0 }
0x7481   :  { %5049 = vrot.lane.b32.xlu2 %v5047_v58, %s8337_s28 }
0x74db   :  { %v5050_v61 = vpop.permute.xlu2 %5049 }
0x74dc   :  { %v5052_v27 = vadd.f32 %v5050_v61, %v5042_v1 }
0x74de   :  { %7391 = vtanh.f32 %v5052_v27 }
0x74e4   :  { %v7392_v5 = vpop.eup %7391 }
0x74e5   :  { %5055 = vrot.lane.b32.xlu0 %v7392_v5, %s8336_s26 }
0x7557   :  { %v5056_v28 = vpop.permute.xlu0 %5055 }
0x7558   :  { %v5058_v10 = vmul.f32 %v5056_v28, %v5039_v0 }
0x755a   :  { %5060 = vrot.lane.b32.xlu1 %v5058_v10, %s8337_s28 }
0x75cc   :  { %v5061_v15 = vpop.permute.xlu1 %5060 }
0x75cd   :  { %5063 = vst.msk [vmem:[#allocation6 + $0x8] sm:$0x3] %vm701_vm5, %v5061_v15  ;;  %6786 = vmatmul.msk.f32.vlgmr.msrb.gmra.mxu0 %vm635_vm6, %v5061_v15 }
0x75d5   :  { %6794 = vmatmul.msk.f32.vlgmr.msra.gmra.mxu0 %vm635_vm6, %v4734_v31 }
0x764a   :  { %v5084_v16 = vpop.f32.mrf.mxu0 }
0x764b   :  { %v5087_v34 = vadd.f32 %v5084_v16, %v5064_v48 }
0x764d   :  { %7393 = vtanh.f32 %v5087_v34  ;;  %v6787_v25 = vmul.f32 -1.442695, %v5087_v34 }
0x764f   :  { %7395 = vpow2.f32 %v6787_v25 }
0x7653   :  { %v7394_v24 = vpop.eup %7393 }
0x7654   :  { %5110 = vrot.lane.b32.xlu2 %v7394_v24, %s8336_s26 }
0x7655   :  { %v7396_v19 = vpop.eup %7395 }
0x7656   :  { %v5091_v20 = vadd.f32 1.0, %v7396_v19 }
0x7658   :  { %7397 = vrcp.f32 %v5091_v20  ;;  %v5103_v26 = vand.u32 2147483648, %v5091_v20  ;;  %vm5097_vm4 = vweird.f32 %v5091_v20  ;;  %v5101_v47 = vand.u32 2147483647, %v5091_v20 }
0x765a   :  { %v5104_v60 = vor.u32 1.1754944e-38, %v5103_v26  ;;  %vm5102_vm8 = vcmp.eq.f32.partialorder %v5101_v47, 8.507059e+37 }
0x765e   :  { %v7398_v22 = vpop.eup %7397 }
0x765f   :  { %v5093_v17 = vmul.f32 %v7398_v22, %v5091_v20  ;;  %vm5098_vm3 = vweird.f32 %v7398_v22 }
0x7660   :  { %vm5099_vm7 = vmor %vm5097_vm4, %vm5098_vm3 }
0x7661   :  { %v5094_v3 = vsub.f32 1.0, %v5093_v17 }
0x7663   :  { %v5095_v23 = vmul.f32 %v7398_v22, %v5094_v3 }
0x7665   :  { %v5096_v46 = vadd.f32 %v7398_v22, %v5095_v23 }
0x7667   :  { %v5100_v30 = vsel %vm5099_vm7, %v7398_v22, %v5096_v46 }
0x7668   :  { %v5105_v35 = vsel %vm5102_vm8, %v5104_v60, %v5100_v30 }
0x7669   :  { %v5108_v9 = vmul.f32 %v5105_v35, %v5052_v27 }
0x76ae   :  { %v5111_v33 = vpop.permute.xlu2 %5110 }
0x76af   :  { %v5113_v36 = vmul.f32 %v5111_v33, %v5105_v35 }
0x76b1   :  { %5115 = vrot.lane.b32.xlu0 %v5113_v36, %s8337_s28 }
0x7723   :  { %v5116_v32 = vpop.permute.xlu0 %5115 }
0x7724   :  { %v5118_v59 = vadd.f32 %v5116_v32, %v5108_v9 }
0x7726   :  { %7399 = vtanh.f32 %v5118_v59 }
0x772c   :  { %v7400_v18 = vpop.eup %7399 }
0x772d   :  { %5121 = vrot.lane.b32.xlu1 %v7400_v18, %s8336_s26  ;;  %v5262_v18 = vld [vmem:[#allocation2] sm:$0x3] }
0x779f   :  { %v5122_v42 = vpop.permute.xlu1 %5121 }
0x77a0   :  { %v5124_v37 = vmul.f32 %v5122_v42, %v5105_v35 }
0x77a2   :  { %5126 = vrot.lane.b32.xlu2 %v5124_v37, %s8337_s28 }
0x77fc   :  { %v5127_v44 = vpop.permute.xlu2 %5126 }
0x77fd   :  { %5129 = vst.msk [vmem:[#allocation6 + $0x6] sm:$0x3] %vm701_vm5, %v5127_v44  ;;  %6788 = vmatmul.msk.f32.vlgmr.msrb.gmra.mxu1 %vm635_vm6, %v5127_v44 }
0x7805   :  { %6796 = vmatmul.msk.f32.vlgmr.msra.gmra.mxu1 %vm598_vm0, %v7561_v40 }
0x780d   :  { %6797 = vmatmul.msk.f32.gmra.mxu1 %vm598_vm0, %v7562_v6 }
0x787a   :  { %v5150_v7 = vpop.f32.mrf.mxu1 }
0x787b   :  { %v5153_v49 = vadd.f32 %v5150_v7, %v5130_v45 }
0x787d   :  { %7401 = vtanh.f32 %v5153_v49  ;;  %v6789_v50 = vmul.f32 -1.442695, %v5153_v49 }
0x787f   :  { %7403 = vpow2.f32 %v6789_v50 }
0x7883   :  { %v7402_v2 = vpop.eup %7401 }
0x7884   :  { %5176 = vrot.lane.b32.xlu0 %v7402_v2, %s8336_s26 }
0x7885   :  { %v7404_v51 = vpop.eup %7403 }
0x7886   :  { %v5157_v52 = vadd.f32 1.0, %v7404_v51 }
0x7888   :  { %7405 = vrcp.f32 %v5157_v52  ;;  %v5169_v62 = vand.u32 2147483648, %v5157_v52  ;;  %vm5163_vm10 = vweird.f32 %v5157_v52  ;;  %v5167_v63 = vand.u32 2147483647, %v5157_v52 }
0x788a   :  { %v5170_v57 = vor.u32 1.1754944e-38, %v5169_v62  ;;  %vm5168_vm12 = vcmp.eq.f32.partialorder %v5167_v63, 8.507059e+37 }
0x788e   :  { %v7406_v54 = vpop.eup %7405 }
0x788f   :  { %v5159_v21 = vmul.f32 %v7406_v54, %v5157_v52  ;;  %vm5164_vm9 = vweird.f32 %v7406_v54 }
0x7890   :  { %vm5165_vm11 = vmor %vm5163_vm10, %vm5164_vm9 }
0x7891   :  { %v5160_v29 = vsub.f32 1.0, %v5159_v21 }
0x7893   :  { %v5161_v56 = vmul.f32 %v7406_v54, %v5160_v29 }
0x7895   :  { %v5162_v14 = vadd.f32 %v7406_v54, %v5161_v56 }
0x7897   :  { %v5166_v55 = vsel %vm5165_vm11, %v7406_v54, %v5162_v14 }
0x7898   :  { %v5171_v58 = vsel %vm5168_vm12, %v5170_v57, %v5166_v55 }
0x7899   :  { %v5174_v61 = vmul.f32 %v5171_v58, %v5118_v59 }
0x78f6   :  { %v5177_v0 = vpop.permute.xlu0 %5176 }
0x78f7   :  { %v5179_v1 = vmul.f32 %v5177_v0, %v5171_v58 }
0x78f9   :  { %5181 = vrot.lane.b32.xlu1 %v5179_v1, %s8337_s28  ;;  %v5390_v1 = vld [vmem:[#allocation43 + $0x10] sm:$0xff] }
0x796b   :  { %v5182_v27 = vpop.permute.xlu1 %5181 }
0x796c   :  { %v5184_v5 = vadd.f32 %v5182_v27, %v5174_v61  ;;  %v5389_v61 = vld [vmem:[#allocation43 + $0x8] sm:$0xff]  ;;  %v5388_v27 = vld [vmem:[#allocation43] sm:$0xff] }
0x796e   :  { %7407 = vtanh.f32 %v5184_v5 }
0x7974   :  { %v7408_v28 = vpop.eup %7407 }
0x7975   :  { %5187 = vrot.lane.b32.xlu2 %v7408_v28, %s8336_s26  ;;  %v5433_v28 = vld [vmem:[#allocation45 + $0x10] sm:$0xff] }
0x79cf   :  { %v5188_v10 = vpop.permute.xlu2 %5187 }
0x79d0   :  { %v5190_v4 = vmul.f32 %v5188_v10, %v5171_v58  ;;  %v5391_v58 = vld [vmem:[#allocation43 + $0x18] sm:$0xff]  ;;  %v5432_v10 = vld [vmem:[#allocation45 + $0x8] sm:$0xff] }
0x79d1   :  { %5410 = vmatpush.msra.mxu2 %v5391_v58 }
0x79d2   :  { %5192 = vrot.lane.b32.xlu0 %v5190_v4, %s8337_s28  ;;  %v5431_v4 = vld [vmem:[#allocation45] sm:$0xff] }
0x79d3   :  { %5411 = vmatpush.msra.mxu2 %v5390_v1 }
0x79d5   :  { %5412 = vmatpush.msra.mxu2 %v5389_v61 }
0x79d7   :  { %5413 = vmatpush.msra.mxu2 %v5388_v27 }
0x7a44   :  { %v5193_v11 = vpop.permute.xlu0 %5192 }
0x7a45   :  { %5195 = vst.msk [vmem:[#allocation6 + $0x4] sm:$0x3] %vm701_vm5, %v5193_v11  ;;  %6790 = vmatmul.msk.f32.vlgmr.msrb.gmra.mxu2 %vm635_vm6, %v5193_v11 }
0x7ac8   :  { %v5216_v12 = vpop.f32.mrf.mxu2 }
0x7ac9   :  { %v5219_v15 = vadd.f32 %v5216_v12, %v5196_v13  ;;  %v5329_v12 = vld [vmem:[#allocation6 + $0x8] sm:$0xff] }
0x7acb   :  { %7409 = vtanh.f32 %v5219_v15  ;;  %v6791_v48 = vmul.f32 -1.442695, %v5219_v15  ;;  %v5382_v15 = vpop.f32.mrf.mxu1 }
0x7acd   :  { %7411 = vpow2.f32 %v6791_v48 }
0x7ad1   :  { %v7410_v31 = vpop.eup %7409 }
0x7ad2   :  { %5242 = vrot.lane.b32.xlu1 %v7410_v31, %s8336_s26  ;;  %v5359_v31 = vpop.f32.mrf.mxu0 }
0x7ad3   :  { %v7412_v16 = vpop.eup %7411  ;;  %v5383_v48 = vadd.f32 %v5382_v15, %v5359_v31 }
0x7ad4   :  { %v5223_v34 = vadd.f32 1.0, %v7412_v16  ;;  %v9675_v16 = vld [vmem:[%s9936_s1] ss:$0 sm:$0xff] }
0x7ad6   :  { %7413 = vrcp.f32 %v5223_v34  ;;  %v5235_v17 = vand.u32 2147483648, %v5223_v34  ;;  %vm5229_vm14 = vweird.f32 %v5223_v34  ;;  %v5233_v3 = vand.u32 2147483647, %v5223_v34 }
0x7ad8   :  { %v5236_v46 = vor.u32 1.1754944e-38, %v5235_v17  ;;  %vm5234_vm1 = vcmp.eq.f32.partialorder %v5233_v3, 8.507059e+37 }
0x7adc   :  { %v7414_v24 = vpop.eup %7413 }
0x7add   :  { %v5225_v25 = vmul.f32 %v7414_v24, %v5223_v34  ;;  %vm5230_vm13 = vweird.f32 %v7414_v24 }
0x7ade   :  { %vm5231_vm15 = vmor %vm5229_vm14, %vm5230_vm13 }
0x7adf   :  { %v5226_v19 = vsub.f32 1.0, %v5225_v25 }
0x7ae1   :  { %v5227_v20 = vmul.f32 %v7414_v24, %v5226_v19 }
0x7ae3   :  { %v5228_v22 = vadd.f32 %v7414_v24, %v5227_v20 }
0x7ae5   :  { %v5232_v23 = vsel %vm5231_vm15, %v7414_v24, %v5228_v22 }
0x7ae6   :  { %v5237_v47 = vsel %vm5234_vm1, %v5236_v46, %v5232_v23 }
0x7ae7   :  { %v5240_v60 = vmul.f32 %v5237_v47, %v5184_v5  ;;  %v5434_v5 = vld [vmem:[#allocation45 + $0x18] sm:$0xff] }
0x7ae8   :  { %5448 = vmatpush.msrb.mxu3 %v5434_v5  ;;  %5580 = vmatpush.msrb.mxu0 %v5434_v5 }
0x7ae9   :  { %5646 = vmatpush.msrb.mxu1 %v5434_v5  ;;  %5712 = vmatpush.msrb.mxu2 %v5434_v5 }
0x7aea   :  { %5449 = vmatpush.msrb.mxu3 %v5433_v28  ;;  %5581 = vmatpush.msrb.mxu0 %v5433_v28 }
0x7aeb   :  { %5647 = vmatpush.msrb.mxu1 %v5433_v28  ;;  %5713 = vmatpush.msrb.mxu2 %v5433_v28 }
0x7aec   :  { %5450 = vmatpush.msrb.mxu3 %v5432_v10  ;;  %5582 = vmatpush.msrb.mxu0 %v5432_v10 }
0x7aed   :  { %5648 = vmatpush.msrb.mxu1 %v5432_v10  ;;  %5714 = vmatpush.msrb.mxu2 %v5432_v10 }
0x7aee   :  { %5451 = vmatpush.msrb.mxu3 %v5431_v4  ;;  %5583 = vmatpush.msrb.mxu0 %v5431_v4 }
0x7aef   :  { %5649 = vmatpush.msrb.mxu1 %v5431_v4  ;;  %5715 = vmatpush.msrb.mxu2 %v5431_v4 }
0x7af0   :  { %5844 = vmatpush.msra.mxu0 %v5434_v5 }
0x7af1   :  { %5910 = vmatpush.msra.mxu1 %v5434_v5 }
0x7af2   :  { %5845 = vmatpush.msra.mxu0 %v5433_v28 }
0x7af3   :  { %5911 = vmatpush.msra.mxu1 %v5433_v28 }
0x7af4   :  { %5846 = vmatpush.msra.mxu0 %v5432_v10 }
0x7af5   :  { %5912 = vmatpush.msra.mxu1 %v5432_v10 }
0x7af6   :  { %5847 = vmatpush.msra.mxu0 %v5431_v4 }
0x7af7   :  { %5913 = vmatpush.msra.mxu1 %v5431_v4 }
0x7b44   :  { %v5243_v26 = vpop.permute.xlu1 %5242 }
0x7b45   :  { %v5245_v30 = vmul.f32 %v5243_v26, %v5237_v47 }
0x7b47   :  { %5247 = vrot.lane.b32.xlu2 %v5245_v30, %s8337_s28 }
0x7ba1   :  { %v5248_v33 = vpop.permute.xlu2 %5247 }
0x7ba2   :  { %v5250_v35 = vadd.f32 %v5248_v33, %v5240_v60 }
0x7ba4   :  { %7415 = vtanh.f32 %v5250_v35 }
0x7baa   :  { %v7416_v36 = vpop.eup %7415 }
0x7bab   :  { %5253 = vrot.lane.b32.xlu0 %v7416_v36, %s8336_s26 }
0x7c1d   :  { %v5254_v9 = vpop.permute.xlu0 %5253 }
0x7c1e   :  { %v5256_v32 = vmul.f32 %v5254_v9, %v5237_v47 }
0x7c20   :  { %5258 = vrot.lane.b32.xlu1 %v5256_v32, %s8337_s28 }
0x7c92   :  { %v5259_v59 = vpop.permute.xlu1 %5258 }
0x7c93   :  { %5261 = vst.msk [vmem:[#allocation6 + $0x2] sm:$0x3] %vm701_vm5, %v5259_v59  ;;  %6792 = vmatmul.msk.f32.vlgmr.msra.gmra.mxu3 %vm635_vm6, %v5259_v59  ;;  %v4691_v59 = vadd.f32 %v9623_v53, %v9555_v41 }
0x7c94   :  { %5514 = vmatpush.msra.mxu3 %v5434_v5 }
0x7c96   :  { %5515 = vmatpush.msra.mxu3 %v5433_v28 }
0x7c98   :  { %5516 = vmatpush.msra.mxu3 %v5432_v10 }
0x7c9a   :  { %5517 = vmatpush.msra.mxu3 %v5431_v4 }
0x7c9b   :  { %5452 = vmatmul.f32.vlgmr.msrb.gmra.mxu3 %v8335_v8 }
0x7c9c   :  { %5778 = vmatpush.msrb.mxu3 %v5434_v5 }
0x7c9e   :  { %5779 = vmatpush.msrb.mxu3 %v5433_v28 }
0x7ca0   :  { %5780 = vmatpush.msrb.mxu3 %v5432_v10 }
0x7ca2   :  { %5781 = vmatpush.msrb.mxu3 %v5431_v4 }
0x7d16   :  { %v5282_v42 = vpop.f32.mrf.mxu3 }
0x7d17   :  { %v5285_v37 = vadd.f32 %v5282_v42, %v5262_v18 }
0x7d19   :  { %7417 = vtanh.f32 %v5285_v37  ;;  %v6793_v39 = vmul.f32 -1.442695, %v5285_v37 }
0x7d1b   :  { %7419 = vpow2.f32 %v6793_v39 }
0x7d1e   :  { %v5453_v19 = vpop.f32.mrf.mxu3 }
0x7d1f   :  { %v7418_v38 = vpop.eup %7417 }
0x7d20   :  { %5308 = vrot.lane.b32.xlu2 %v7418_v38, %s8336_s26 }
0x7d21   :  { %v7420_v44 = vpop.eup %7419 }
0x7d22   :  { %v5289_v40 = vadd.f32 1.0, %v7420_v44 }
0x7d24   :  { %7421 = vrcp.f32 %v5289_v40  ;;  %v5301_v50 = vand.u32 2147483648, %v5289_v40  ;;  %vm5295_vm3 = vweird.f32 %v5289_v40  ;;  %v5299_v51 = vand.u32 2147483647, %v5289_v40 }
0x7d26   :  { %v5302_v54 = vor.u32 1.1754944e-38, %v5301_v50  ;;  %vm5300_vm7 = vcmp.eq.f32.partialorder %v5299_v51, 8.507059e+37 }
0x7d2a   :  { %v7422_v6 = vpop.eup %7421 }
0x7d2b   :  { %v5291_v45 = vmul.f32 %v7422_v6, %v5289_v40  ;;  %vm5296_vm2 = vweird.f32 %v7422_v6 }
0x7d2c   :  { %vm5297_vm4 = vmor %vm5295_vm3, %vm5296_vm2 }
0x7d2d   :  { %v5292_v7 = vsub.f32 1.0, %v5291_v45  ;;  %v6774_v45 = vmul.f32 -1.442695, %v4691_v59 }
0x7d2f   :  { %v5293_v49 = vmul.f32 %v7422_v6, %v5292_v7 }
0x7d31   :  { %v5294_v2 = vadd.f32 %v7422_v6, %v5293_v49 }
0x7d33   :  { %v5298_v52 = vsel %vm5297_vm4, %v7422_v6, %v5294_v2 }
0x7d34   :  { %v5303_v29 = vsel %vm5300_vm7, %v5302_v54, %v5298_v52 }
0x7d35   :  { %v5306_v14 = vmul.f32 %v5303_v29, %v5250_v35 }
0x7d7a   :  { %v5309_v21 = vpop.permute.xlu2 %5308 }
0x7d7b   :  { %v5311_v56 = vmul.f32 %v5309_v21, %v5303_v29 }
0x7d7d   :  { %5313 = vrot.lane.b32.xlu0 %v5311_v56, %s8337_s28 }
0x7def   :  { %v5314_v62 = vpop.permute.xlu0 %5313 }
0x7df0   :  { %v5316_v63 = vadd.f32 %v5314_v62, %v5306_v14 }
0x7df2   :  { %7423 = vtanh.f32 %v5316_v63 }
0x7df8   :  { %v7424_v55 = vpop.eup %7423 }
0x7df9   :  { %5319 = vrot.lane.b32.xlu1 %v7424_v55, %s8336_s26 }
0x7e6b   :  { %v5320_v57 = vpop.permute.xlu1 %5319 }
0x7e6c   :  { %v5322_v0 = vmul.f32 %v5320_v57, %v5303_v29 }
0x7e6e   :  { %5324 = vrot.lane.b32.xlu2 %v5322_v0, %s8337_s28 }
0x7ec8   :  { %v5325_v11 = vpop.permute.xlu2 %5324 }
0x7ec9   :  { %5327 = vst.msk [vmem:[#allocation6] sm:$0x3] %vm701_vm5, %v5325_v11 }
0x7ed0   :  { %v5328_v13 = vld [vmem:[#allocation6] sm:$0xff] }
0x7ed1   :  { %6798 = vmatmul.msk.f32.vlgmr.msra.gmra.mxu2 %vm635_vm6, %v5328_v13 }
0x7ed9   :  { %6799 = vmatmul.msk.f32.gmra.mxu2 %vm635_vm6, %v5329_v12 }
0x7f54   :  { %v5415_v34 = vpop.f32.mrf.mxu2 }
0x7f55   :  { %v5421_v24 = vadd.f32 %v5415_v34, %v5383_v48 }
0x7f57   :  { %v5427_v25 = vadd.f32 %v9675_v16, %v5421_v24 }
0x7f59   :  { %5429 = vst [vmem:[#allocation2] sm:$0xff] %v5427_v25 }
0x7f60   :  { %v5435_v20 = vld [vmem:[#allocation2] sm:$0x3]  ;;  %v5499_v0 = vld [vmem:[#allocation2 + $0x2] sm:$0x3] }
0x7f61   :  { %v5456_v22 = vadd.f32 %v5453_v19, %v5435_v20 }
0x7f63   :  { %7425 = vtanh.f32 %v5456_v22  ;;  %v6800_v3 = vmul.f32 -1.442695, %v5456_v22 }
0x7f65   :  { %7427 = vpow2.f32 %v6800_v3 }
0x7f69   :  { %v7426_v17 = vpop.eup %7425 }
0x7f6a   :  { %5479 = vrot.lane.b32.xlu0 %v7426_v17, %s8336_s26 }
0x7f6b   :  { %v7428_v23 = vpop.eup %7427 }
0x7f6c   :  { %v5460_v46 = vadd.f32 1.0, %v7428_v23 }
0x7f6e   :  { %7429 = vrcp.f32 %v5460_v46  ;;  %v5472_v35 = vand.u32 2147483648, %v5460_v46  ;;  %vm5466_vm9 = vweird.f32 %v5460_v46  ;;  %v5470_v36 = vand.u32 2147483647, %v5460_v46 }
0x7f6f   :  { %7431 = vtanh.f32 %v4691_v59 }
0x7f70   :  { %v5473_v32 = vor.u32 1.1754944e-38, %v5472_v35  ;;  %vm5471_vm11 = vcmp.eq.f32.partialorder %v5470_v36, 8.507059e+37 }
0x7f74   :  { %v7430_v26 = vpop.eup %7429 }
0x7f75   :  { %v5462_v47 = vmul.f32 %v7430_v26, %v5460_v46  ;;  %vm5467_vm8 = vweird.f32 %v7430_v26  ;;  %v7432_v38 = vpop.eup %7431 }
0x7f76   :  { %vm5468_vm10 = vmor %vm5466_vm9, %vm5467_vm8 }
0x7f77   :  { %v5463_v30 = vsub.f32 1.0, %v5462_v47 }
0x7f79   :  { %v5464_v60 = vmul.f32 %v7430_v26, %v5463_v30 }
0x7f7b   :  { %v5465_v33 = vadd.f32 %v7430_v26, %v5464_v60 }
0x7f7d   :  { %v5469_v9 = vsel %vm5468_vm10, %v7430_v26, %v5465_v33 }
0x7f7e   :  { %v5474_v42 = vsel %vm5471_vm11, %v5473_v32, %v5469_v9  ;;  %v5385_v9 = vpop.f32.mrf.mxu1 }
0x7f7f   :  { %v5477_v39 = vmul.f32 0.0, %v5474_v42 }
0x7fdc   :  { %v5480_v18 = vpop.permute.xlu0 %5479 }
0x7fdd   :  { %v5482_v37 = vmul.f32 %v5480_v18, %v5474_v42  ;;  %v5418_v18 = vpop.f32.mrf.mxu2 }
0x7fdf   :  { %5484 = vrot.lane.b32.xlu1 %v5482_v37, %s8337_s28 }
0x7fe7   :  { %4714 = vrot.lane.b32.xlu1 %v7432_v38, %s8336_s26 }
0x8051   :  { %v5485_v44 = vpop.permute.xlu1 %5484 }
0x8052   :  { %v9683_v40 = vadd.f32 %v5485_v44, %v5477_v39  ;;  %v5565_v39 = vld [vmem:[#allocation2 + $0x4] sm:$0x3] }
0x8054   :  { %7433 = vtanh.f32 %v9683_v40 }
0x8055   :  { %7435 = vpow2.f32 %v6774_v45 }
0x8059   :  { %v4715_v62 = vpop.permute.xlu1 %4714 }
0x805a   :  { %v7434_v6 = vpop.eup %7433 }
0x805b   :  { %5490 = vrot.lane.b32.xlu2 %v7434_v6, %s8336_s26  ;;  %v7436_v41 = vpop.eup %7435 }
0x805c   :  { %v4695_v53 = vadd.f32 1.0, %v7436_v41 }
0x805e   :  { %7437 = vrcp.f32 %v4695_v53  ;;  %v4707_v21 = vand.u32 2147483648, %v4695_v53  ;;  %vm4701_vm13 = vweird.f32 %v4695_v53  ;;  %v4705_v29 = vand.u32 2147483647, %v4695_v53 }
0x8060   :  { %v4708_v14 = vor.u32 1.1754944e-38, %v4707_v21  ;;  %vm4706_vm15 = vcmp.eq.f32.partialorder %v4705_v29, 8.507059e+37 }
0x8064   :  { %v7438_v7 = vpop.eup %7437 }
0x8065   :  { %v4697_v49 = vmul.f32 %v7438_v7, %v4695_v53  ;;  %vm4702_vm12 = vweird.f32 %v7438_v7 }
0x8066   :  { %vm4703_vm14 = vmor %vm4701_vm13, %vm4702_vm12 }
0x8067   :  { %v4698_v2 = vsub.f32 1.0, %v4697_v49 }
0x8069   :  { %v4699_v50 = vmul.f32 %v7438_v7, %v4698_v2 }
0x806b   :  { %v4700_v52 = vadd.f32 %v7438_v7, %v4699_v50 }
0x806d   :  { %v4704_v56 = vsel %vm4703_vm14, %v7438_v7, %v4700_v52 }
0x806e   :  { %v4709_v63 = vsel %vm4706_vm15, %v4708_v14, %v4704_v56 }
0x806f   :  { %v4717_v55 = vmul.f32 %v4715_v62, %v4709_v63  ;;  %v4712_v27 = vmul.f32 %v4709_v63, %v9604_v43 }
0x80b5   :  { %v5491_v51 = vpop.permute.xlu2 %5490 }
0x80b6   :  { %v5493_v54 = vmul.f32 %v5491_v51, %v5474_v42 }
0x80b8   :  { %5495 = vrot.lane.b32.xlu0 %v5493_v54, %s8337_s28 }
0x80c0   :  { %4719 = vrot.lane.b32.xlu0 %v4717_v55, %s8337_s28 }
0x812a   :  { %v5496_v57 = vpop.permute.xlu0 %5495 }
0x812b   :  { %5498 = vst.msk [vmem:[#allocation3] sm:$0x3] %vm701_vm5, %v5496_v57  ;;  %6801 = vmatmul.msk.f32.vlgmr.msra.gmra.mxu3 %vm635_vm6, %v5496_v57 }
0x8132   :  { %v4720_v61 = vpop.permute.xlu0 %4719 }
0x8133   :  { %v4722_v5 = vadd.f32 %v4720_v61, %v4712_v27  ;;  %v5631_v61 = vld [vmem:[#allocation2 + $0x6] sm:$0x3] }
0x81ae   :  { %v5519_v58 = vpop.f32.mrf.mxu3 }
0x81af   :  { %v5522_v1 = vadd.f32 %v5519_v58, %v5499_v0 }
0x81b1   :  { %7439 = vtanh.f32 %v5522_v1  ;;  %v6802_v4 = vmul.f32 -1.442695, %v5522_v1 }
0x81b2   :  { %7441 = vtanh.f32 %v4722_v5 }
0x81b3   :  { %7443 = vpow2.f32 %v6802_v4 }
0x81b7   :  { %v7440_v28 = vpop.eup %7439 }
0x81b8   :  { %5545 = vrot.lane.b32.xlu2 %v7440_v28, %s8336_s26  ;;  %v7442_v10 = vpop.eup %7441 }
0x81b9   :  { %v7444_v11 = vpop.eup %7443 }
0x81ba   :  { %v5526_v13 = vadd.f32 1.0, %v7444_v11 }
0x81bc   :  { %7445 = vrcp.f32 %v5526_v13  ;;  %v5538_v43 = vand.u32 2147483648, %v5526_v13  ;;  %vm5532_vm2 = vweird.f32 %v5526_v13  ;;  %v5536_v24 = vand.u32 2147483647, %v5526_v13 }
0x81be   :  { %v5539_v19 = vor.u32 1.1754944e-38, %v5538_v43  ;;  %vm5537_vm4 = vcmp.eq.f32.partialorder %v5536_v24, 8.507059e+37 }
0x81c0   :  { %4725 = vrot.lane.b32.xlu2 %v7442_v10, %s8336_s26 }
0x81c2   :  { %v7446_v12 = vpop.eup %7445 }
0x81c3   :  { %v5528_v15 = vmul.f32 %v7446_v12, %v5526_v13  ;;  %vm5533_vm1 = vweird.f32 %v7446_v12 }
0x81c4   :  { %vm5534_vm3 = vmor %vm5532_vm2, %vm5533_vm1 }
0x81c5   :  { %v5529_v31 = vsub.f32 1.0, %v5528_v15 }
0x81c7   :  { %v5530_v48 = vmul.f32 %v7446_v12, %v5529_v31 }
0x81c9   :  { %v5531_v34 = vadd.f32 %v7446_v12, %v5530_v48 }
0x81cb   :  { %v5535_v25 = vsel %vm5534_vm3, %v7446_v12, %v5531_v34 }
0x81cc   :  { %v5540_v22 = vsel %vm5537_vm4, %v5539_v19, %v5535_v25 }
0x81cd   :  { %v5543_v46 = vmul.f32 %v5540_v22, %v9683_v40 }
0x8212   :  { %v5546_v20 = vpop.permute.xlu2 %5545 }
0x8213   :  { %v5548_v17 = vmul.f32 %v5546_v20, %v5540_v22 }
0x8215   :  { %5550 = vrot.lane.b32.xlu1 %v5548_v17, %s8337_s28 }
0x821a   :  { %v4726_v3 = vpop.permute.xlu2 %4725 }
0x821b   :  { %v4728_v23 = vmul.f32 %v4726_v3, %v4709_v63 }
0x821d   :  { %4730 = vrot.lane.b32.xlu1 %v4728_v23, %s8337_s28 }
0x8287   :  { %v5551_v26 = vpop.permute.xlu1 %5550 }
0x8288   :  { %v5553_v47 = vadd.f32 %v5551_v26, %v5543_v46 }
0x828a   :  { %7447 = vtanh.f32 %v5553_v47 }
0x828f   :  { %v4731_v30 = vpop.permute.xlu1 %4730 }
0x8290   :  { %v7448_v60 = vpop.eup %7447  ;;  %4733 = vst.msk [vmem:[#allocation5 + $0xe] sm:$0x3] %vm701_vm5, %v4731_v30  ;;  %v5966_v30 = vld [vmem:[#allocation46 + $0x18] sm:$0xff] }
0x8291   :  { %5556 = vrot.lane.b32.xlu0 %v7448_v60, %s8336_s26  ;;  %v5965_v60 = vld [vmem:[#allocation46 + $0x10] sm:$0xff]  ;;  %5989 = vmatpush.msra.mxu2 %v5966_v30 }
0x8293   :  { %5990 = vmatpush.msra.mxu2 %v5965_v60 }
0x8297   :  { %v4735_v33 = vld [vmem:[#allocation5 + $0x8] sm:$0xff] }
0x8298   :  { %6795 = vmatmul.msk.f32.gmra.mxu0 %vm635_vm6, %v4735_v33  ;;  %v5964_v33 = vld [vmem:[#allocation46 + $0x8] sm:$0xff] }
0x8299   :  { %5991 = vmatpush.msra.mxu2 %v5964_v33 }
0x8303   :  { %v5557_v35 = vpop.permute.xlu0 %5556 }
0x8304   :  { %v5559_v36 = vmul.f32 %v5557_v35, %v5540_v22  ;;  %v5963_v35 = vld [vmem:[#allocation46] sm:$0xff] }
0x8305   :  { %5992 = vmatpush.msra.mxu2 %v5963_v35 }
0x8306   :  { %5561 = vrot.lane.b32.xlu2 %v5559_v36, %s8337_s28 }
0x8315   :  { %v5362_v32 = vpop.f32.mrf.mxu0 }
0x8316   :  { %v5386_v59 = vadd.f32 %v5385_v9, %v5362_v32 }
0x8318   :  { %v5422_v42 = vadd.f32 %v5418_v18, %v5386_v59 }
0x831a   :  { %v5428_v37 = vadd.f32 %v9675_v16, %v5422_v42  ;;  %v9718_v42 = vld [vmem:[%s8537_s12] ss:$0 sm:$0xff]  ;;  %s6579_s12 = sshll.u32 %s8552_s8, 4  ;;  %s6580_s12 = int_to_ptr.hbm [resolvable:$true] %s6579_s12 }
0x831b   :  { %s8223_s5 = sshra.s32 %s6580_s12, 4  ;;  %s8224_s5 = int_to_ptr.hbm [resolvable:$true] %s8223_s5 }
0x831c   :  { %5430 = vst [vmem:[#allocation2 + $0x8] sm:$0xff] %v5428_v37  ;;  %s8225_s10 = scalar_lea.hbm %s8224_s5, 16  ;;  %p8228_p10 = scmp.lt.s32.totalorder %s8224_s5, %s8552_s8 }
0x831d   :  { %p8226_p9 = scmp.ne.s32.totalorder %s8224_s5, %s8225_s10  ;;  %p8229_p11 = scmp.lt.s32.totalorder %s8227_s9, %s8225_s10 }
0x831f   :  { %p8230_p12 = por %p8229_p11, %p8228_p10 }
0x8321   :  { %p8231_p13 = pnand %p8230_p12, %p8226_p9 }
0x8323   :  { %v5697_v32 = vld [vmem:[#allocation2 + $0x8] sm:$0x3] }
0x8360   :  { %v5562_v38 = vpop.permute.xlu2 %5561 }
0x8361   :  { %5564 = vst.msk [vmem:[#allocation3 + $0x2] sm:$0x3] %vm701_vm5, %v5562_v38  ;;  %6803 = vmatmul.msk.f32.vlgmr.msrb.gmra.mxu0 %vm635_vm6, %v5562_v38 }
0x83de   :  { %v5585_v44 = vpop.f32.mrf.mxu0 }
0x83df   :  { %v5588_v40 = vadd.f32 %v5585_v44, %v5565_v39 }
0x83e1   :  { %7449 = vtanh.f32 %v5588_v40  ;;  %v6804_v45 = vmul.f32 -1.442695, %v5588_v40 }
0x83e3   :  { %7451 = vpow2.f32 %v6804_v45 }
0x83e7   :  { %v7450_v6 = vpop.eup %7449 }
0x83e8   :  { %5611 = vrot.lane.b32.xlu0 %v7450_v6, %s8336_s26 }
0x83e9   :  { %v7452_v41 = vpop.eup %7451 }
0x83ea   :  { %v5592_v53 = vadd.f32 1.0, %v7452_v41 }
0x83ec   :  { %7453 = vrcp.f32 %v5592_v53  ;;  %v5604_v51 = vand.u32 2147483648, %v5592_v53  ;;  %vm5598_vm8 = vweird.f32 %v5592_v53  ;;  %v5602_v52 = vand.u32 2147483647, %v5592_v53 }
0x83ee   :  { %v5605_v21 = vor.u32 1.1754944e-38, %v5604_v51  ;;  %vm5603_vm10 = vcmp.eq.f32.partialorder %v5602_v52, 8.507059e+37 }
0x83f2   :  { %v7454_v7 = vpop.eup %7453 }
0x83f3   :  { %v5594_v16 = vmul.f32 %v7454_v7, %v5592_v53  ;;  %vm5599_vm7 = vweird.f32 %v7454_v7 }
0x83f4   :  { %vm5600_vm9 = vmor %vm5598_vm8, %vm5599_vm7 }
0x83f5   :  { %v5595_v49 = vsub.f32 1.0, %v5594_v16 }
0x83f7   :  { %v5596_v2 = vmul.f32 %v7454_v7, %v5595_v49 }
0x83f9   :  { %v5597_v50 = vadd.f32 %v7454_v7, %v5596_v2 }
0x83fb   :  { %v5601_v54 = vsel %vm5600_vm9, %v7454_v7, %v5597_v50 }
0x83fc   :  { %v5606_v56 = vsel %vm5603_vm10, %v5605_v21, %v5601_v54 }
0x83fd   :  { %v5609_v62 = vmul.f32 %v5606_v56, %v5553_v47 }
0x845a   :  { %v5612_v29 = vpop.permute.xlu0 %5611 }
0x845b   :  { %v5614_v14 = vmul.f32 %v5612_v29, %v5606_v56 }
0x845d   :  { %5616 = vrot.lane.b32.xlu1 %v5614_v14, %s8337_s28 }
0x84cf   :  { %v5617_v63 = vpop.permute.xlu1 %5616 }
0x84d0   :  { %v5619_v55 = vadd.f32 %v5617_v63, %v5609_v62 }
0x84d2   :  { %7455 = vtanh.f32 %v5619_v55 }
0x84d8   :  { %v7456_v57 = vpop.eup %7455 }
0x84d9   :  { %5622 = vrot.lane.b32.xlu2 %v7456_v57, %s8336_s26  ;;  %v9728_v57 = vld [vmem:[#allocation48 + $0x18] sm:$0xff] }
0x84da   :  { %6019 = vmatpush.msra.mxu3 %v9728_v57  ;;  %6085 = vmatpush.msrb.mxu0 %v9728_v57 }
0x8533   :  { %v5623_v0 = vpop.permute.xlu2 %5622 }
0x8534   :  { %v5625_v58 = vmul.f32 %v5623_v0, %v5606_v56  ;;  %v9730_v0 = vld [vmem:[#allocation48 + $0x10] sm:$0xff] }
0x8535   :  { %6020 = vmatpush.msra.mxu3 %v9730_v0  ;;  %6086 = vmatpush.msrb.mxu0 %v9730_v0 }
0x8536   :  { %5627 = vrot.lane.b32.xlu0 %v5625_v58, %s8337_s28  ;;  %v9734_v58 = vld [vmem:[#allocation48 + $0x8] sm:$0xff] }
0x8537   :  { %6021 = vmatpush.msra.mxu3 %v9734_v58  ;;  %6087 = vmatpush.msrb.mxu0 %v9734_v58 }
0x85a8   :  { %v5628_v1 = vpop.permute.xlu0 %5627 }
0x85a9   :  { %5630 = vst.msk [vmem:[#allocation3 + $0x4] sm:$0x3] %vm701_vm5, %v5628_v1  ;;  %6805 = vmatmul.msk.f32.vlgmr.msrb.gmra.mxu1 %vm635_vm6, %v5628_v1  ;;  %v9740_v1 = vld [vmem:[#allocation48] sm:$0xff] }
0x85aa   :  { %6151 = vmatpush.msrb.mxu1 %v9728_v57  ;;  %6022 = vmatpush.msra.mxu3 %v9740_v1 }
0x85ab   :  { %6088 = vmatpush.msrb.mxu0 %v9740_v1 }
0x85ac   :  { %6152 = vmatpush.msrb.mxu1 %v9730_v0 }
0x85ae   :  { %6153 = vmatpush.msrb.mxu1 %v9734_v58 }
0x85b0   :  { %6154 = vmatpush.msrb.mxu1 %v9740_v1 }
0x8626   :  { %v5651_v27 = vpop.f32.mrf.mxu1 }
0x8627   :  { %v5654_v5 = vadd.f32 %v5651_v27, %v5631_v61  ;;  %v5763_v27 = vld [vmem:[#allocation2 + $0xa] sm:$0x3] }
0x8629   :  { %7457 = vtanh.f32 %v5654_v5  ;;  %v6806_v10 = vmul.f32 -1.442695, %v5654_v5 }
0x862b   :  { %7459 = vpow2.f32 %v6806_v10 }
0x862f   :  { %v7458_v28 = vpop.eup %7457 }
0x8630   :  { %5677 = vrot.lane.b32.xlu1 %v7458_v28, %s8336_s26 }
0x8631   :  { %v7460_v4 = vpop.eup %7459 }
0x8632   :  { %v5658_v11 = vadd.f32 1.0, %v7460_v4 }
0x8634   :  { %7461 = vrcp.f32 %v5658_v11  ;;  %v5670_v34 = vand.u32 2147483648, %v5658_v11  ;;  %vm5664_vm12 = vweird.f32 %v5658_v11  ;;  %v5668_v43 = vand.u32 2147483647, %v5658_v11 }
0x8636   :  { %v5671_v25 = vor.u32 1.1754944e-38, %v5670_v34  ;;  %vm5669_vm14 = vcmp.eq.f32.partialorder %v5668_v43, 8.507059e+37 }
0x863a   :  { %v7462_v13 = vpop.eup %7461 }
0x863b   :  { %v5660_v12 = vmul.f32 %v7462_v13, %v5658_v11  ;;  %vm5665_vm11 = vweird.f32 %v7462_v13 }
0x863c   :  { %vm5666_vm13 = vmor %vm5664_vm12, %vm5665_vm11 }
0x863d   :  { %v5661_v15 = vsub.f32 1.0, %v5660_v12 }
0x863f   :  { %v5662_v31 = vmul.f32 %v7462_v13, %v5661_v15 }
0x8641   :  { %v5663_v48 = vadd.f32 %v7462_v13, %v5662_v31 }
0x8643   :  { %v5667_v24 = vsel %vm5666_vm13, %v7462_v13, %v5663_v48 }
0x8644   :  { %v5672_v20 = vsel %vm5669_vm14, %v5671_v25, %v5667_v24 }
0x8645   :  { %v5675_v17 = vmul.f32 %v5672_v20, %v5619_v55 }
0x86a2   :  { %v5678_v19 = vpop.permute.xlu1 %5677 }
0x86a3   :  { %v5680_v22 = vmul.f32 %v5678_v19, %v5672_v20 }
0x86a5   :  { %5682 = vrot.lane.b32.xlu2 %v5680_v22, %s8337_s28 }
0x86ff   :  { %v5683_v3 = vpop.permute.xlu2 %5682 }
0x8700   :  { %v5685_v23 = vadd.f32 %v5683_v3, %v5675_v17 }
0x8702   :  { %7463 = vtanh.f32 %v5685_v23 }
0x8708   :  { %v7464_v46 = vpop.eup %7463 }
0x8709   :  { %5688 = vrot.lane.b32.xlu0 %v7464_v46, %s8336_s26 }
0x877b   :  { %v5689_v26 = vpop.permute.xlu0 %5688 }
0x877c   :  { %v5691_v47 = vmul.f32 %v5689_v26, %v5672_v20 }
0x877e   :  { %5693 = vrot.lane.b32.xlu1 %v5691_v47, %s8337_s28 }
0x87f0   :  { %v5694_v36 = vpop.permute.xlu1 %5693 }
0x87f1   :  { %5696 = vst.msk [vmem:[#allocation3 + $0x6] sm:$0x3] %vm701_vm5, %v5694_v36  ;;  %6807 = vmatmul.msk.f32.vlgmr.msrb.gmra.mxu2 %vm635_vm6, %v5694_v36 }
0x87f2   :  { %6415 = vmatpush.msrb.mxu2 %v9728_v57 }
0x87f4   :  { %6416 = vmatpush.msrb.mxu2 %v9730_v0 }
0x87f6   :  { %6417 = vmatpush.msrb.mxu2 %v9734_v58 }
0x87f8   :  { %v5961_v9 = vld [vmem:[#allocation3] sm:$0xff]  ;;  %6418 = vmatpush.msrb.mxu2 %v9740_v1 }
0x87f9   :  { %6815 = vmatmul.msk.f32.vlgmr.msra.gmra.mxu2 %vm635_vm6, %v5961_v9 }
0x8874   :  { %v5717_v59 = vpop.f32.mrf.mxu2 }
0x8875   :  { %v5720_v18 = vadd.f32 %v5717_v59, %v5697_v32 }
0x8877   :  { %7465 = vtanh.f32 %v5720_v18  ;;  %v6808_v44 = vmul.f32 -1.442695, %v5720_v18 }
0x8879   :  { %7467 = vpow2.f32 %v6808_v44 }
0x887c   :  { %v5994_v37 = vpop.f32.mrf.mxu2 }
0x887d   :  { %v7466_v38 = vpop.eup %7465  ;;  %v5995_v39 = vadd.f32 %v9718_v42, %v5994_v37 }
0x887e   :  { %5743 = vrot.lane.b32.xlu2 %v7466_v38, %s8336_s26 }
0x887f   :  { %6000 = vst [vmem:[#allocation2] sm:$0xff] %v5995_v39  ;;  %v7468_v40 = vpop.eup %7467 }
0x8880   :  { %v5724_v6 = vadd.f32 1.0, %v7468_v40 }
0x8882   :  { %7469 = vrcp.f32 %v5724_v6  ;;  %v5736_v49 = vand.u32 2147483648, %v5724_v6  ;;  %vm5730_vm1 = vweird.f32 %v5724_v6  ;;  %v5734_v2 = vand.u32 2147483647, %v5724_v6 }
0x8884   :  { %v5737_v51 = vor.u32 1.1754944e-38, %v5736_v49  ;;  %vm5735_vm3 = vcmp.eq.f32.partialorder %v5734_v2, 8.507059e+37 }
0x8886   :  { %v6006_v10 = vld [vmem:[#allocation2] sm:$0x3] }
0x8888   :  { %v7470_v45 = vpop.eup %7469 }
0x8889   :  { %v5726_v41 = vmul.f32 %v7470_v45, %v5724_v6  ;;  %vm5731_vm15 = vweird.f32 %v7470_v45 }
0x888a   :  { %vm5732_vm2 = vmor %vm5730_vm1, %vm5731_vm15 }
0x888b   :  { %v5727_v53 = vsub.f32 1.0, %v5726_v41 }
0x888d   :  { %v5728_v7 = vmul.f32 %v7470_v45, %v5727_v53 }
0x888f   :  { %v5729_v16 = vadd.f32 %v7470_v45, %v5728_v7 }
0x8891   :  { %v5733_v50 = vsel %vm5732_vm2, %v7470_v45, %v5729_v16 }
0x8892   :  { %v5738_v54 = vsel %vm5735_vm3, %v5737_v51, %v5733_v50 }
0x8893   :  { %v5741_v29 = vmul.f32 %v5738_v54, %v5685_v23 }
0x88d8   :  { %v5744_v52 = vpop.permute.xlu2 %5743 }
0x88d9   :  { %v5746_v21 = vmul.f32 %v5744_v52, %v5738_v54 }
0x88db   :  { %5748 = vrot.lane.b32.xlu0 %v5746_v21, %s8337_s28 }
0x894d   :  { %v5749_v56 = vpop.permute.xlu0 %5748 }
0x894e   :  { %v9723_v14 = vadd.f32 %v5749_v56, %v5741_v29  ;;  %v5829_v29 = vld [vmem:[#allocation2 + $0xc] sm:$0x3] }
0x8950   :  { %7471 = vtanh.f32 %v9723_v14 }
0x8956   :  { %v7472_v62 = vpop.eup %7471 }
0x8957   :  { %5754 = vrot.lane.b32.xlu1 %v7472_v62, %s8336_s26  ;;  %v6070_v62 = vld [vmem:[#allocation2 + $0x2] sm:$0x3] }
0x89c9   :  { %v5755_v63 = vpop.permute.xlu1 %5754 }
0x89ca   :  { %v5757_v55 = vmul.f32 %v5755_v63, %v5738_v54 }
0x89cc   :  { %5759 = vrot.lane.b32.xlu2 %v5757_v55, %s8337_s28 }
0x8a26   :  { %v5760_v61 = vpop.permute.xlu2 %5759 }
0x8a27   :  { %5762 = vst.msk [vmem:[#allocation3 + $0x8] sm:$0x3] %vm701_vm5, %v5760_v61  ;;  %6809 = vmatmul.msk.f32.vlgmr.msrb.gmra.mxu3 %vm635_vm6, %v5760_v61 }
0x8a28   :  { %6217 = vmatpush.msrb.mxu3 %v9728_v57 }
0x8a2a   :  { %6218 = vmatpush.msrb.mxu3 %v9730_v0 }
0x8a2c   :  { %6219 = vmatpush.msrb.mxu3 %v9734_v58 }
0x8a2e   :  { %6220 = vmatpush.msrb.mxu3 %v9740_v1 }
0x8a2f   :  { %6023 = vmatmul.f32.vlgmr.msra.gmra.mxu3 %v8335_v8 }
0x8a30   :  { %6481 = vmatpush.msra.mxu3 %v9728_v57 }
0x8a32   :  { %6482 = vmatpush.msra.mxu3 %v9730_v0 }
0x8a34   :  { %6483 = vmatpush.msra.mxu3 %v9734_v58 }
0x8a36   :  { %6484 = vmatpush.msra.mxu3 %v9740_v1 }
0x8aaa   :  { %v5783_v5 = vpop.f32.mrf.mxu3 }
0x8aab   :  { %v5786_v28 = vadd.f32 %v5783_v5, %v5763_v27 }
0x8aad   :  { %7473 = vtanh.f32 %v5786_v28  ;;  %v6810_v12 = vmul.f32 -1.442695, %v5786_v28 }
0x8ab2   :  { %v6024_v4 = vpop.f32.mrf.mxu3 }
0x8ab3   :  { %v7474_v11 = vpop.eup %7473  ;;  %v6027_v13 = vadd.f32 %v6024_v4, %v6006_v10 }
0x8ab4   :  { %5809 = vrot.lane.b32.xlu0 %v7474_v11, %s8336_s26 }
0x8ab5   :  { %7475 = vtanh.f32 %v6027_v13  ;;  %v6817_v15 = vmul.f32 -1.442695, %v6027_v13 }
0x8ab6   :  { %7477 = vpow2.f32 %v6810_v12 }
0x8ab7   :  { %7479 = vpow2.f32 %v6817_v15 }
0x8abb   :  { %v7476_v8 = vpop.eup %7475 }
0x8abc   :  { %6050 = vrot.lane.b32.xlu1 %v7476_v8, %s8336_s26  ;;  %v7478_v31 = vpop.eup %7477 }
0x8abd   :  { %v5790_v48 = vadd.f32 1.0, %v7478_v31  ;;  %v7480_v34 = vpop.eup %7479 }
0x8abe   :  { %v6031_v43 = vadd.f32 1.0, %v7480_v34 }
0x8abf   :  { %7481 = vrcp.f32 %v5790_v48  ;;  %v5802_v46 = vand.u32 2147483648, %v5790_v48  ;;  %vm5796_vm7 = vweird.f32 %v5790_v48  ;;  %v5800_v26 = vand.u32 2147483647, %v5790_v48 }
0x8ac0   :  { %7483 = vrcp.f32 %v6031_v43  ;;  %v6043_v32 = vand.u32 2147483648, %v6031_v43  ;;  %vm6037_vm11 = vweird.f32 %v6031_v43  ;;  %v6041_v59 = vand.u32 2147483647, %v6031_v43 }
0x8ac1   :  { %v5803_v60 = vor.u32 1.1754944e-38, %v5802_v46  ;;  %vm5801_vm9 = vcmp.eq.f32.partialorder %v5800_v26, 8.507059e+37 }
0x8ac2   :  { %v6044_v37 = vor.u32 1.1754944e-38, %v6043_v32  ;;  %vm6042_vm13 = vcmp.eq.f32.partialorder %v6041_v59, 8.507059e+37 }
0x8ac5   :  { %v7482_v24 = vpop.eup %7481 }
0x8ac6   :  { %v5792_v25 = vmul.f32 %v7482_v24, %v5790_v48  ;;  %v7484_v20 = vpop.eup %7483  ;;  %vm5797_vm4 = vweird.f32 %v7482_v24 }
0x8ac7   :  { %v6033_v17 = vmul.f32 %v7484_v20, %v6031_v43  ;;  %vm5798_vm8 = vmor %vm5796_vm7, %vm5797_vm4  ;;  %vm6038_vm10 = vweird.f32 %v7484_v20 }
0x8ac8   :  { %v5793_v19 = vsub.f32 1.0, %v5792_v25  ;;  %vm6039_vm12 = vmor %vm6037_vm11, %vm6038_vm10 }
0x8ac9   :  { %v6034_v23 = vsub.f32 1.0, %v6033_v17 }
0x8aca   :  { %v5794_v22 = vmul.f32 %v7482_v24, %v5793_v19 }
0x8acb   :  { %v6035_v30 = vmul.f32 %v7484_v20, %v6034_v23 }
0x8acc   :  { %v5795_v3 = vadd.f32 %v7482_v24, %v5794_v22 }
0x8acd   :  { %v6036_v9 = vadd.f32 %v7484_v20, %v6035_v30 }
0x8ace   :  { %v5799_v47 = vsel %vm5798_vm8, %v7482_v24, %v5795_v3 }
0x8acf   :  { %v5804_v35 = vsel %vm5801_vm9, %v5803_v60, %v5799_v47  ;;  %v6040_v18 = vsel %vm6039_vm12, %v7484_v20, %v6036_v9 }
0x8ad0   :  { %v6045_v39 = vsel %vm6042_vm13, %v6044_v37, %v6040_v18  ;;  %v5807_v40 = vmul.f32 %v5804_v35, %v9723_v14 }
0x8ad1   :  { %v6048_v53 = vmul.f32 0.0, %v6045_v39 }
0x8b26   :  { %v5810_v33 = vpop.permute.xlu0 %5809 }
0x8b27   :  { %v5812_v36 = vmul.f32 %v5810_v33, %v5804_v35 }
0x8b29   :  { %5814 = vrot.lane.b32.xlu2 %v5812_v36, %s8337_s28 }
0x8b2e   :  { %v6051_v38 = vpop.permute.xlu1 %6050 }
0x8b2f   :  { %v6053_v44 = vmul.f32 %v6051_v38, %v6045_v39 }
0x8b31   :  { %6055 = vrot.lane.b32.xlu0 %v6053_v44, %s8337_s28 }
0x8b83   :  { %v5815_v6 = vpop.permute.xlu2 %5814 }
0x8b84   :  { %v9768_v45 = vadd.f32 %v5815_v6, %v5807_v40 }
0x8b86   :  { %7485 = vtanh.f32 %v9768_v45 }
0x8b8c   :  { %v7486_v41 = vpop.eup %7485 }
0x8b8d   :  { %5820 = vrot.lane.b32.xlu1 %v7486_v41, %s8336_s26 }
0x8ba3   :  { %v6056_v7 = vpop.permute.xlu0 %6055 }
0x8ba4   :  { %v9772_v16 = vadd.f32 %v6056_v7, %v6048_v53 }
0x8ba6   :  { %7487 = vtanh.f32 %v9772_v16 }
0x8bac   :  { %v7488_v49 = vpop.eup %7487 }
0x8bad   :  { %6061 = vrot.lane.b32.xlu2 %v7488_v49, %s8336_s26 }
0x8bff   :  { %v5821_v2 = vpop.permute.xlu1 %5820 }
0x8c00   :  { %v5823_v50 = vmul.f32 %v5821_v2, %v5804_v35  ;;  %v6136_v2 = vld [vmem:[#allocation2 + $0x4] sm:$0x3] }
0x8c02   :  { %5825 = vrot.lane.b32.xlu0 %v5823_v50, %s8337_s28 }
0x8c07   :  { %v6062_v51 = vpop.permute.xlu2 %6061 }
0x8c08   :  { %v6064_v52 = vmul.f32 %v6062_v51, %v6045_v39 }
0x8c0a   :  { %6066 = vrot.lane.b32.xlu1 %v6064_v52, %s8337_s28 }
0x8c74   :  { %v5826_v54 = vpop.permute.xlu0 %5825 }
0x8c75   :  { %5828 = vst.msk [vmem:[#allocation3 + $0xa] sm:$0x3] %vm701_vm5, %v5826_v54  ;;  %6811 = vmatmul.msk.f32.vlgmr.msra.gmra.mxu0 %vm635_vm6, %v5826_v54 }
0x8c76   :  { %6283 = vmatpush.msra.mxu0 %v9728_v57 }
0x8c78   :  { %6284 = vmatpush.msra.mxu0 %v9730_v0 }
0x8c7a   :  { %6285 = vmatpush.msra.mxu0 %v9734_v58 }
0x8c7c   :  { %v6067_v21 = vpop.permute.xlu1 %6066  ;;  %6286 = vmatpush.msra.mxu0 %v9740_v1 }
0x8c7d   :  { %6069 = vst.msk [vmem:[#allocation4] sm:$0x3] %vm701_vm5, %v6067_v21  ;;  %6818 = vmatmul.msk.f32.vlgmr.msrb.gmra.mxu0 %vm635_vm6, %v6067_v21 }
0x8cf2   :  { %v5849_v56 = vpop.f32.mrf.mxu0 }
0x8cf3   :  { %v5852_v14 = vadd.f32 %v5849_v56, %v5829_v29 }
0x8cf5   :  { %7489 = vtanh.f32 %v5852_v14  ;;  %v6812_v5 = vmul.f32 -1.442695, %v5852_v14 }
0x8cfa   :  { %v6090_v63 = vpop.f32.mrf.mxu0 }
0x8cfb   :  { %v7490_v55 = vpop.eup %7489  ;;  %v6093_v61 = vadd.f32 %v6090_v63, %v6070_v62 }
0x8cfc   :  { %5875 = vrot.lane.b32.xlu2 %v7490_v55, %s8336_s26 }
0x8cfd   :  { %7491 = vtanh.f32 %v6093_v61  ;;  %v6819_v8 = vmul.f32 -1.442695, %v6093_v61  ;;  %v5895_v61 = vld [vmem:[#allocation2 + $0xe] sm:$0x3] }
0x8cfe   :  { %7493 = vpow2.f32 %v6812_v5 }
0x8d03   :  { %v7492_v27 = vpop.eup %7491 }
0x8d04   :  { %6116 = vrot.lane.b32.xlu0 %v7492_v27, %s8336_s26  ;;  %v7494_v28 = vpop.eup %7493 }
0x8d05   :  { %v5856_v10 = vadd.f32 1.0, %v7494_v28 }
0x8d07   :  { %7495 = vrcp.f32 %v5856_v10  ;;  %v5868_v31 = vand.u32 2147483648, %v5856_v10  ;;  %vm5862_vm15 = vweird.f32 %v5856_v10  ;;  %v5866_v48 = vand.u32 2147483647, %v5856_v10 }
0x8d08   :  { %7497 = vpow2.f32 %v6819_v8 }
0x8d09   :  { %v5869_v24 = vor.u32 1.1754944e-38, %v5868_v31  ;;  %vm5867_vm2 = vcmp.eq.f32.partialorder %v5866_v48, 8.507059e+37 }
0x8d0d   :  { %v7496_v4 = vpop.eup %7495 }
0x8d0e   :  { %v5858_v11 = vmul.f32 %v7496_v4, %v5856_v10  ;;  %vm5863_vm14 = vweird.f32 %v7496_v4  ;;  %v7498_v34 = vpop.eup %7497 }
0x8d0f   :  { %vm5864_vm1 = vmor %vm5862_vm15, %vm5863_vm14  ;;  %v6097_v25 = vadd.f32 1.0, %v7498_v34 }
0x8d10   :  { %v5859_v13 = vsub.f32 1.0, %v5858_v11 }
0x8d11   :  { %7499 = vrcp.f32 %v6097_v25  ;;  %v6109_v47 = vand.u32 2147483648, %v6097_v25  ;;  %vm6103_vm4 = vweird.f32 %v6097_v25  ;;  %v6107_v30 = vand.u32 2147483647, %v6097_v25 }
0x8d12   :  { %v5860_v12 = vmul.f32 %v7496_v4, %v5859_v13 }
0x8d13   :  { %v6110_v33 = vor.u32 1.1754944e-38, %v6109_v47  ;;  %vm6108_vm8 = vcmp.eq.f32.partialorder %v6107_v30, 8.507059e+37 }
0x8d14   :  { %v5861_v15 = vadd.f32 %v7496_v4, %v5860_v12 }
0x8d16   :  { %v5865_v43 = vsel %vm5864_vm1, %v7496_v4, %v5861_v15 }
0x8d17   :  { %v5870_v19 = vsel %vm5867_vm2, %v5869_v24, %v5865_v43  ;;  %v7500_v17 = vpop.eup %7499 }
0x8d18   :  { %v6099_v3 = vmul.f32 %v7500_v17, %v6097_v25  ;;  %vm6104_vm3 = vweird.f32 %v7500_v17  ;;  %v5873_v32 = vmul.f32 %v5870_v19, %v9768_v45 }
0x8d19   :  { %vm6105_vm7 = vmor %vm6103_vm4, %vm6104_vm3 }
0x8d1a   :  { %v6100_v23 = vsub.f32 1.0, %v6099_v3 }
0x8d1c   :  { %v6101_v46 = vmul.f32 %v7500_v17, %v6100_v23 }
0x8d1e   :  { %v6102_v26 = vadd.f32 %v7500_v17, %v6101_v46 }
0x8d20   :  { %v6106_v60 = vsel %vm6105_vm7, %v7500_v17, %v6102_v26 }
0x8d21   :  { %v6111_v36 = vsel %vm6108_vm8, %v6110_v33, %v6106_v60  ;;  %v6202_v33 = vld [vmem:[#allocation2 + $0x6] sm:$0x3] }
0x8d22   :  { %v6114_v37 = vmul.f32 %v6111_v36, %v9772_v16 }
0x8d56   :  { %v5876_v20 = vpop.permute.xlu2 %5875 }
0x8d57   :  { %v5878_v22 = vmul.f32 %v5876_v20, %v5870_v19 }
0x8d59   :  { %5880 = vrot.lane.b32.xlu1 %v5878_v22, %s8337_s28 }
0x8d76   :  { %v6117_v35 = vpop.permute.xlu0 %6116 }
0x8d77   :  { %v6119_v9 = vmul.f32 %v6117_v35, %v6111_v36 }
0x8d79   :  { %6121 = vrot.lane.b32.xlu2 %v6119_v9, %s8337_s28 }
0x8dcb   :  { %v5881_v59 = vpop.permute.xlu1 %5880 }
0x8dcc   :  { %v9791_v18 = vadd.f32 %v5881_v59, %v5873_v32 }
0x8dce   :  { %7501 = vtanh.f32 %v9791_v18 }
0x8dd3   :  { %v6122_v38 = vpop.permute.xlu2 %6121 }
0x8dd4   :  { %v7502_v39 = vpop.eup %7501  ;;  %v6124_v44 = vadd.f32 %v6122_v38, %v6114_v37 }
0x8dd5   :  { %5886 = vrot.lane.b32.xlu0 %v7502_v39, %s8336_s26 }
0x8dd6   :  { %7503 = vtanh.f32 %v6124_v44 }
0x8ddc   :  { %v7504_v40 = vpop.eup %7503 }
0x8ddd   :  { %6127 = vrot.lane.b32.xlu1 %v7504_v40, %s8336_s26 }
0x8e47   :  { %v5887_v6 = vpop.permute.xlu0 %5886 }
0x8e48   :  { %v5889_v41 = vmul.f32 %v5887_v6, %v5870_v19 }
0x8e4a   :  { %5891 = vrot.lane.b32.xlu2 %v5889_v41, %s8337_s28 }
0x8e4f   :  { %v6128_v45 = vpop.permute.xlu1 %6127 }
0x8e50   :  { %v6130_v53 = vmul.f32 %v6128_v45, %v6111_v36 }
0x8e52   :  { %6132 = vrot.lane.b32.xlu0 %v6130_v53, %s8337_s28 }
0x8ea4   :  { %v5892_v7 = vpop.permute.xlu2 %5891 }
0x8ea5   :  { %5894 = vst.msk [vmem:[#allocation3 + $0xc] sm:$0x3] %vm701_vm5, %v5892_v7  ;;  %6813 = vmatmul.msk.f32.vlgmr.msra.gmra.mxu1 %vm635_vm6, %v5892_v7 }
0x8ea6   :  { %6349 = vmatpush.msra.mxu1 %v9728_v57 }
0x8ea8   :  { %6350 = vmatpush.msra.mxu1 %v9730_v0 }
0x8eaa   :  { %6351 = vmatpush.msra.mxu1 %v9734_v58 }
0x8eac   :  { %6352 = vmatpush.msra.mxu1 %v9740_v1 }
0x8ec4   :  { %v6133_v16 = vpop.permute.xlu0 %6132 }
0x8ec5   :  { %6135 = vst.msk [vmem:[#allocation4 + $0x2] sm:$0x3] %vm701_vm5, %v6133_v16  ;;  %6820 = vmatmul.msk.f32.vlgmr.msrb.gmra.mxu1 %vm635_vm6, %v6133_v16 }
0x8f22   :  { %v5915_v49 = vpop.f32.mrf.mxu1 }
0x8f23   :  { %v5918_v27 = vadd.f32 %v5915_v49, %v5895_v61  ;;  %v6537_v61 = vld [vmem:[%s8542_s24 + $0x18] sm:$0xff] }
0x8f24   :  { %6560 = vmatpush.msrb.mxu0 %v6537_v61 }
0x8f25   :  { %v6814_v15 = vmul.f32 -1.442695, %v5918_v27 }
0x8f42   :  { %v6156_v50 = vpop.f32.mrf.mxu1 }
0x8f43   :  { %v6159_v51 = vadd.f32 %v6156_v50, %v6136_v2 }
0x8f45   :  { %7505 = vtanh.f32 %v6159_v51  ;;  %v6821_v57 = vmul.f32 -1.442695, %v6159_v51 }
0x8f47   :  { %7507 = vpow2.f32 %v6821_v57 }
0x8f4b   :  { %v7506_v52 = vpop.eup %7505 }
0x8f4c   :  { %6182 = vrot.lane.b32.xlu1 %v7506_v52, %s8336_s26 }
0x8f4d   :  { %v7508_v0 = vpop.eup %7507 }
0x8f4e   :  { %v6163_v54 = vadd.f32 1.0, %v7508_v0 }
0x8f50   :  { %7509 = vrcp.f32 %v6163_v54  ;;  %v6175_v14 = vand.u32 2147483648, %v6163_v54  ;;  %vm6169_vm10 = vweird.f32 %v6163_v54  ;;  %v6173_v62 = vand.u32 2147483647, %v6163_v54 }
0x8f51   :  { %7511 = vtanh.f32 %v5918_v27  ;;  %v6536_v27 = vld [vmem:[%s8542_s24 + $0x10] sm:$0xff] }
0x8f52   :  { %v6176_v55 = vor.u32 1.1754944e-38, %v6175_v14  ;;  %vm6174_vm12 = vcmp.eq.f32.partialorder %v6173_v62, 8.507059e+37  ;;  %6561 = vmatpush.msrb.mxu0 %v6536_v27 }
0x8f56   :  { %v7510_v58 = vpop.eup %7509 }
0x8f57   :  { %v6165_v1 = vmul.f32 %v7510_v58, %v6163_v54  ;;  %vm6170_vm9 = vweird.f32 %v7510_v58  ;;  %v7512_v4 = vpop.eup %7511 }
0x8f58   :  { %vm6171_vm11 = vmor %vm6169_vm10, %vm6170_vm9 }
0x8f59   :  { %v6166_v21 = vsub.f32 1.0, %v6165_v1 }
0x8f5b   :  { %v6167_v29 = vmul.f32 %v7510_v58, %v6166_v21 }
0x8f5d   :  { %v6168_v56 = vadd.f32 %v7510_v58, %v6167_v29 }
0x8f5f   :  { %v6172_v63 = vsel %vm6171_vm11, %v7510_v58, %v6168_v56 }
0x8f60   :  { %v6177_v28 = vsel %vm6174_vm12, %v6176_v55, %v6172_v63 }
0x8f61   :  { %v6180_v11 = vmul.f32 %v6177_v28, %v6124_v44 }
0x8fbe   :  { %v6183_v5 = vpop.permute.xlu1 %6182 }
0x8fbf   :  { %v6185_v10 = vmul.f32 %v6183_v5, %v6177_v28  ;;  %v6535_v5 = vld [vmem:[%s8542_s24 + $0x8] sm:$0xff] }
0x8fc0   :  { %6562 = vmatpush.msrb.mxu0 %v6535_v5 }
0x8fc1   :  { %6187 = vrot.lane.b32.xlu2 %v6185_v10, %s8337_s28 }
0x8fc9   :  { %5941 = vrot.lane.b32.xlu2 %v7512_v4, %s8336_s26 }
0x901b   :  { %v6188_v13 = vpop.permute.xlu2 %6187 }
0x901c   :  { %v9810_v8 = vadd.f32 %v6188_v13, %v6180_v11 }
0x901e   :  { %7513 = vtanh.f32 %v9810_v8 }
0x901f   :  { %7515 = vpow2.f32 %v6814_v15 }
0x9023   :  { %v5942_v46 = vpop.permute.xlu2 %5941 }
0x9024   :  { %v7514_v12 = vpop.eup %7513 }
0x9025   :  { %6193 = vrot.lane.b32.xlu0 %v7514_v12, %s8336_s26  ;;  %v7516_v31 = vpop.eup %7515 }
0x9026   :  { %v5922_v48 = vadd.f32 1.0, %v7516_v31 }
0x9028   :  { %7517 = vrcp.f32 %v5922_v48  ;;  %v5934_v17 = vand.u32 2147483648, %v5922_v48  ;;  %vm5928_vm14 = vweird.f32 %v5922_v48  ;;  %v5932_v3 = vand.u32 2147483647, %v5922_v48 }
0x902a   :  { %v5935_v26 = vor.u32 1.1754944e-38, %v5934_v17  ;;  %vm5933_vm1 = vcmp.eq.f32.partialorder %v5932_v3, 8.507059e+37 }
0x902e   :  { %v7518_v34 = vpop.eup %7517 }
0x902f   :  { %v5924_v43 = vmul.f32 %v7518_v34, %v5922_v48  ;;  %vm5929_vm13 = vweird.f32 %v7518_v34 }
0x9030   :  { %vm5930_vm15 = vmor %vm5928_vm14, %vm5929_vm13 }
0x9031   :  { %v5925_v24 = vsub.f32 1.0, %v5924_v43 }
0x9033   :  { %v5926_v25 = vmul.f32 %v7518_v34, %v5925_v24 }
0x9035   :  { %v5927_v20 = vadd.f32 %v7518_v34, %v5926_v25 }
0x9037   :  { %v5931_v23 = vsel %vm5930_vm15, %v7518_v34, %v5927_v20 }
0x9038   :  { %v5936_v47 = vsel %vm5933_vm1, %v5935_v26, %v5931_v23 }
0x9039   :  { %v5944_v30 = vmul.f32 %v5942_v46, %v5936_v47  ;;  %v5939_v32 = vmul.f32 %v5936_v47, %v9791_v18 }
0x9097   :  { %v6194_v19 = vpop.permute.xlu0 %6193 }
0x9098   :  { %v6196_v22 = vmul.f32 %v6194_v19, %v6177_v28  ;;  %v6534_v28 = vld [vmem:[%s8542_s24] sm:$0xff] }
0x9099   :  { %6563 = vmatpush.msrb.mxu0 %v6534_v28 }
0x909a   :  { %6198 = vrot.lane.b32.xlu1 %v6196_v22, %s8337_s28 }
0x90a2   :  { %5946 = vrot.lane.b32.xlu1 %v5944_v30, %s8337_s28 }
0x910c   :  { %v6199_v60 = vpop.permute.xlu1 %6198 }
0x910d   :  { %6201 = vst.msk [vmem:[#allocation4 + $0x4] sm:$0x3] %vm701_vm5, %v6199_v60  ;;  %6822 = vmatmul.msk.f32.vlgmr.msrb.gmra.mxu3 %vm635_vm6, %v6199_v60 }
0x9114   :  { %v5947_v9 = vpop.permute.xlu1 %5946 }
0x9115   :  { %v5949_v59 = vadd.f32 %v5947_v9, %v5939_v32 }
0x9190   :  { %v6222_v35 = vpop.f32.mrf.mxu3 }
0x9191   :  { %v6225_v36 = vadd.f32 %v6222_v35, %v6202_v33 }
0x9193   :  { %7519 = vtanh.f32 %v6225_v36  ;;  %v6823_v39 = vmul.f32 -1.442695, %v6225_v36 }
0x9194   :  { %7521 = vtanh.f32 %v5949_v59 }
0x9195   :  { %7523 = vpow2.f32 %v6823_v39 }
0x9199   :  { %v7520_v37 = vpop.eup %7519 }
0x919a   :  { %6248 = vrot.lane.b32.xlu0 %v7520_v37, %s8336_s26  ;;  %v7522_v38 = vpop.eup %7521 }
0x919b   :  { %v7524_v44 = vpop.eup %7523 }
0x919c   :  { %v6229_v40 = vadd.f32 1.0, %v7524_v44 }
0x919e   :  { %7525 = vrcp.f32 %v6229_v40  ;;  %v6241_v18 = vand.u32 2147483648, %v6229_v40  ;;  %vm6235_vm3 = vweird.f32 %v6229_v40  ;;  %v6239_v16 = vand.u32 2147483647, %v6229_v40 }
0x91a0   :  { %v6242_v2 = vor.u32 1.1754944e-38, %v6241_v18  ;;  %vm6240_vm7 = vcmp.eq.f32.partialorder %v6239_v16, 8.507059e+37 }
0x91a2   :  { %5952 = vrot.lane.b32.xlu0 %v7522_v38, %s8336_s26 }
0x91a4   :  { %v7526_v6 = vpop.eup %7525 }
0x91a5   :  { %v6231_v41 = vmul.f32 %v7526_v6, %v6229_v40  ;;  %vm6236_vm2 = vweird.f32 %v7526_v6 }
0x91a6   :  { %vm6237_vm4 = vmor %vm6235_vm3, %vm6236_vm2 }
0x91a7   :  { %v6232_v45 = vsub.f32 1.0, %v6231_v41 }
0x91a9   :  { %v6233_v53 = vmul.f32 %v7526_v6, %v6232_v45 }
0x91ab   :  { %v6234_v7 = vadd.f32 %v7526_v6, %v6233_v53 }
0x91ad   :  { %v6238_v49 = vsel %vm6237_vm4, %v7526_v6, %v6234_v7 }
0x91ae   :  { %v6243_v51 = vsel %vm6240_vm7, %v6242_v2, %v6238_v49 }
0x91af   :  { %v6246_v54 = vmul.f32 %v6243_v51, %v9810_v8  ;;  %v9837_v8 = vld [vmem:[%s8547_s25] ss:$0 sm:$0xff]  ;;  %s8338_s25 = smov [#allocation49]  }
0x91b0   :  { %s6577_s24 = sshll.u32 %s8338_s25, 4  ;;  %s6578_s24 = int_to_ptr.vmem [resolvable:$true] %s6577_s24 }
0x920c   :  { %v6249_v50 = vpop.permute.xlu0 %6248 }
0x920d   :  { %v6251_v52 = vmul.f32 %v6249_v50, %v6243_v51 }
0x920f   :  { %6253 = vrot.lane.b32.xlu2 %v6251_v52, %s8337_s28 }
0x9214   :  { %v5953_v57 = vpop.permute.xlu0 %5952 }
0x9215   :  { %v5955_v0 = vmul.f32 %v5953_v57, %v5936_v47 }
0x9217   :  { %5957 = vrot.lane.b32.xlu2 %v5955_v0, %s8337_s28 }
0x9269   :  { %v6254_v58 = vpop.permute.xlu2 %6253 }
0x926a   :  { %v6256_v1 = vadd.f32 %v6254_v58, %v6246_v54 }
0x926c   :  { %7527 = vtanh.f32 %v6256_v1 }
0x9271   :  { %v5958_v21 = vpop.permute.xlu2 %5957 }
0x9272   :  { %v7528_v29 = vpop.eup %7527  ;;  %5960 = vst.msk [vmem:[#allocation3 + $0xe] sm:$0x3] %vm701_vm5, %v5958_v21 }
0x9273   :  { %6259 = vrot.lane.b32.xlu1 %v7528_v29, %s8336_s26 }
0x9279   :  { %v5962_v56 = vld [vmem:[#allocation3 + $0x8] sm:$0xff] }
0x927a   :  { %6816 = vmatmul.msk.f32.gmra.mxu2 %vm635_vm6, %v5962_v56 }
0x92e5   :  { %v6260_v14 = vpop.permute.xlu1 %6259 }
0x92e6   :  { %v6262_v62 = vmul.f32 %v6260_v14, %v6243_v51 }
0x92e8   :  { %6264 = vrot.lane.b32.xlu0 %v6262_v62, %s8337_s28 }
0x92fd   :  { %v5997_v63 = vpop.f32.mrf.mxu2 }
0x92fe   :  { %v5998_v55 = vadd.f32 %v9718_v42, %v5997_v63 }
0x9300   :  { %6001 = vst [vmem:[#allocation2 + $0x8] sm:$0xff] %v5998_v55 }
0x9307   :  { %v6268_v11 = vld [vmem:[#allocation2 + $0x8] sm:$0x3]  ;;  %v6334_v37 = vld [vmem:[#allocation2 + $0xa] sm:$0x3]  ;;  %v6400_v62 = vld [vmem:[#allocation2 + $0xc] sm:$0x3] }
0x935a   :  { %v6265_v10 = vpop.permute.xlu0 %6264 }
0x935b   :  { %6267 = vst.msk [vmem:[#allocation4 + $0x6] sm:$0x3] %vm701_vm5, %v6265_v10  ;;  %6824 = vmatmul.msk.f32.vlgmr.msra.gmra.mxu0 %vm635_vm6, %v6265_v10 }
0x9362   :  { %v6532_v4 = vld [vmem:[#allocation4] sm:$0xff] }
0x9363   :  { %6832 = vmatmul.msk.f32.vlgmr.msrb.gmra.mxu0 %vm635_vm6, %v6532_v4 }
0x93d8   :  { %v6288_v42 = vpop.f32.mrf.mxu0 }
0x93d9   :  { %v6291_v13 = vadd.f32 %v6288_v42, %v6268_v11 }
0x93db   :  { %7529 = vtanh.f32 %v6291_v13  ;;  %v6825_v48 = vmul.f32 -1.442695, %v6291_v13 }
0x93dd   :  { %7531 = vpow2.f32 %v6825_v48 }
0x93e0   :  { %v6565_v12 = vpop.f32.mrf.mxu0 }
0x93e1   :  { %v7530_v15 = vpop.eup %7529  ;;  %v6566_v31 = vadd.f32 %v9837_v8, %v6565_v12 }
0x93e2   :  { %6314 = vrot.lane.b32.xlu1 %v7530_v15, %s8336_s26 }
0x93e3   :  { %6571 = vst.msk [vmem:[#allocation49] sm:$0xff] %vm598_vm0, %v6566_v31  ;;  %v7532_v34 = vpop.eup %7531 }
0x93e4   :  { %v6295_v43 = vadd.f32 1.0, %v7532_v34 }
0x93e6   :  { %7533 = vrcp.f32 %v6295_v43  ;;  %v6307_v17 = vand.u32 2147483648, %v6295_v43  ;;  %vm6301_vm9 = vweird.f32 %v6295_v43  ;;  %v6305_v3 = vand.u32 2147483647, %v6295_v43 }
0x93e8   :  { %v6308_v46 = vor.u32 1.1754944e-38, %v6307_v17  ;;  %vm6306_vm11 = vcmp.eq.f32.partialorder %v6305_v3, 8.507059e+37 }
0x93ec   :  { %v7534_v24 = vpop.eup %7533 }
0x93ed   :  { %v6297_v25 = vmul.f32 %v7534_v24, %v6295_v43  ;;  %vm6302_vm8 = vweird.f32 %v7534_v24 }
0x93ee   :  { %vm6303_vm10 = vmor %vm6301_vm9, %vm6302_vm8 }
0x93ef   :  { %v6298_v19 = vsub.f32 1.0, %v6297_v25 }
0x93f1   :  { %v6299_v20 = vmul.f32 %v7534_v24, %v6298_v19 }
0x93f3   :  { %v6300_v22 = vadd.f32 %v7534_v24, %v6299_v20 }
0x93f5   :  { %v6304_v23 = vsel %vm6303_vm10, %v7534_v24, %v6300_v22 }
0x93f6   :  { %v6309_v47 = vsel %vm6306_vm11, %v6308_v46, %v6304_v23  ;;  %v6466_v46 = vld [vmem:[#allocation2 + $0xe] sm:$0x3] }
0x93f7   :  { %v6312_v60 = vmul.f32 %v6309_v47, %v6256_v1 }
0x9454   :  { %v6315_v26 = vpop.permute.xlu1 %6314 }
0x9455   :  { %v6317_v30 = vmul.f32 %v6315_v26, %v6309_v47 }
0x9457   :  { %6319 = vrot.lane.b32.xlu2 %v6317_v30, %s8337_s28 }
0x94b1   :  { %v6320_v33 = vpop.permute.xlu2 %6319 }
0x94b2   :  { %v6322_v35 = vadd.f32 %v6320_v33, %v6312_v60 }
0x94b4   :  { %7535 = vtanh.f32 %v6322_v35 }
0x94ba   :  { %v7536_v36 = vpop.eup %7535 }
0x94bb   :  { %6325 = vrot.lane.b32.xlu0 %v7536_v36, %s8336_s26 }
0x952d   :  { %v6326_v9 = vpop.permute.xlu0 %6325 }
0x952e   :  { %v6328_v32 = vmul.f32 %v6326_v9, %v6309_v47 }
0x9530   :  { %6330 = vrot.lane.b32.xlu1 %v6328_v32, %s8337_s28 }
0x95a2   :  { %v6331_v59 = vpop.permute.xlu1 %6330 }
0x95a3   :  { %6333 = vst.msk [vmem:[#allocation4 + $0x8] sm:$0x3] %vm701_vm5, %v6331_v59  ;;  %6826 = vmatmul.msk.f32.vlgmr.msra.gmra.mxu1 %vm635_vm6, %v6331_v59 }
0x9620   :  { %v6354_v38 = vpop.f32.mrf.mxu1 }
0x9621   :  { %v6357_v39 = vadd.f32 %v6354_v38, %v6334_v37 }
0x9623   :  { %7537 = vtanh.f32 %v6357_v39  ;;  %v6827_v40 = vmul.f32 -1.442695, %v6357_v39 }
0x9625   :  { %7539 = vpow2.f32 %v6827_v40 }
0x9629   :  { %v7538_v44 = vpop.eup %7537 }
0x962a   :  { %6380 = vrot.lane.b32.xlu2 %v7538_v44, %s8336_s26 }
0x962b   :  { %v7540_v6 = vpop.eup %7539 }
0x962c   :  { %v6361_v41 = vadd.f32 1.0, %v7540_v6 }
0x962e   :  { %7541 = vrcp.f32 %v6361_v41  ;;  %v6373_v49 = vand.u32 2147483648, %v6361_v41  ;;  %vm6367_vm13 = vweird.f32 %v6361_v41  ;;  %v6371_v2 = vand.u32 2147483647, %v6361_v41 }
0x9630   :  { %v6374_v51 = vor.u32 1.1754944e-38, %v6373_v49  ;;  %vm6372_vm15 = vcmp.eq.f32.partialorder %v6371_v2, 8.507059e+37 }
0x9634   :  { %v7542_v45 = vpop.eup %7541 }
0x9635   :  { %v6363_v53 = vmul.f32 %v7542_v45, %v6361_v41  ;;  %vm6368_vm12 = vweird.f32 %v7542_v45 }
0x9636   :  { %vm6369_vm14 = vmor %vm6367_vm13, %vm6368_vm12 }
0x9637   :  { %v6364_v7 = vsub.f32 1.0, %v6363_v53 }
0x9639   :  { %v6365_v18 = vmul.f32 %v7542_v45, %v6364_v7 }
0x963b   :  { %v6366_v16 = vadd.f32 %v7542_v45, %v6365_v18 }
0x963d   :  { %v6370_v50 = vsel %vm6369_vm14, %v7542_v45, %v6366_v16 }
0x963e   :  { %v6375_v57 = vsel %vm6372_vm15, %v6374_v51, %v6370_v50 }
0x963f   :  { %v6378_v54 = vmul.f32 %v6375_v57, %v6322_v35 }
0x9684   :  { %v6381_v52 = vpop.permute.xlu2 %6380 }
0x9685   :  { %v6383_v0 = vmul.f32 %v6381_v52, %v6375_v57 }
0x9687   :  { %6385 = vrot.lane.b32.xlu0 %v6383_v0, %s8337_s28 }
0x96f9   :  { %v6386_v58 = vpop.permute.xlu0 %6385 }
0x96fa   :  { %v6388_v1 = vadd.f32 %v6386_v58, %v6378_v54 }
0x96fc   :  { %7543 = vtanh.f32 %v6388_v1 }
0x9702   :  { %v7544_v21 = vpop.eup %7543 }
0x9703   :  { %6391 = vrot.lane.b32.xlu1 %v7544_v21, %s8336_s26 }
0x9775   :  { %v6392_v29 = vpop.permute.xlu1 %6391 }
0x9776   :  { %v6394_v56 = vmul.f32 %v6392_v29, %v6375_v57 }
0x9778   :  { %6396 = vrot.lane.b32.xlu2 %v6394_v56, %s8337_s28 }
0x97d2   :  { %v6397_v14 = vpop.permute.xlu2 %6396 }
0x97d3   :  { %6399 = vst.msk [vmem:[#allocation4 + $0xa] sm:$0x3] %vm701_vm5, %v6397_v14  ;;  %6828 = vmatmul.msk.f32.vlgmr.msrb.gmra.mxu2 %vm635_vm6, %v6397_v14 }
0x9856   :  { %v6420_v63 = vpop.f32.mrf.mxu2 }
0x9857   :  { %v6423_v55 = vadd.f32 %v6420_v63, %v6400_v62 }
0x9859   :  { %7545 = vtanh.f32 %v6423_v55  ;;  %v6829_v27 = vmul.f32 -1.442695, %v6423_v55 }
0x985b   :  { %7547 = vpow2.f32 %v6829_v27 }
0x985f   :  { %v7546_v61 = vpop.eup %7545 }
0x9860   :  { %6446 = vrot.lane.b32.xlu0 %v7546_v61, %s8336_s26 }
0x9861   :  { %v7548_v5 = vpop.eup %7547 }
0x9862   :  { %v6427_v28 = vadd.f32 1.0, %v7548_v5 }
0x9864   :  { %7549 = vrcp.f32 %v6427_v28  ;;  %v6439_v12 = vand.u32 2147483648, %v6427_v28  ;;  %vm6433_vm2 = vweird.f32 %v6427_v28  ;;  %v6437_v15 = vand.u32 2147483647, %v6427_v28 }
0x9866   :  { %v6440_v48 = vor.u32 1.1754944e-38, %v6439_v12  ;;  %vm6438_vm4 = vcmp.eq.f32.partialorder %v6437_v15, 8.507059e+37 }
0x986a   :  { %v7550_v10 = vpop.eup %7549 }
0x986b   :  { %v6429_v4 = vmul.f32 %v7550_v10, %v6427_v28  ;;  %vm6434_vm1 = vweird.f32 %v7550_v10 }
0x986c   :  { %vm6435_vm3 = vmor %vm6433_vm2, %vm6434_vm1 }
0x986d   :  { %v6430_v11 = vsub.f32 1.0, %v6429_v4 }
0x986f   :  { %v6431_v42 = vmul.f32 %v7550_v10, %v6430_v11 }
0x9871   :  { %v6432_v13 = vadd.f32 %v7550_v10, %v6431_v42 }
0x9873   :  { %v6436_v31 = vsel %vm6435_vm3, %v7550_v10, %v6432_v13 }
0x9874   :  { %v6441_v43 = vsel %vm6438_vm4, %v6440_v48, %v6436_v31 }
0x9875   :  { %v6444_v25 = vmul.f32 %v6441_v43, %v6388_v1 }
0x98d2   :  { %v6447_v34 = vpop.permute.xlu0 %6446 }
0x98d3   :  { %v6449_v24 = vmul.f32 %v6447_v34, %v6441_v43 }
0x98d5   :  { %6451 = vrot.lane.b32.xlu1 %v6449_v24, %s8337_s28 }
0x9947   :  { %v6452_v19 = vpop.permute.xlu1 %6451 }
0x9948   :  { %v6454_v20 = vadd.f32 %v6452_v19, %v6444_v25 }
0x994a   :  { %7551 = vtanh.f32 %v6454_v20 }
0x9950   :  { %v7552_v22 = vpop.eup %7551 }
0x9951   :  { %6457 = vrot.lane.b32.xlu2 %v7552_v22, %s8336_s26 }
0x99ab   :  { %v6458_v17 = vpop.permute.xlu2 %6457 }
0x99ac   :  { %v6460_v3 = vmul.f32 %v6458_v17, %v6441_v43 }
0x99ae   :  { %6462 = vrot.lane.b32.xlu0 %v6460_v3, %s8337_s28 }
0x9a20   :  { %v6463_v23 = vpop.permute.xlu0 %6462 }
0x9a21   :  { %6465 = vst.msk [vmem:[#allocation4 + $0xc] sm:$0x3] %vm701_vm5, %v6463_v23  ;;  %6830 = vmatmul.msk.f32.vlgmr.msra.gmra.mxu3 %vm635_vm6, %v6463_v23 }
0x9aa4   :  { %v6486_v26 = vpop.f32.mrf.mxu3 }
0x9aa5   :  { %v6489_v47 = vadd.f32 %v6486_v26, %v6466_v46 }
0x9aa7   :  { %7553 = vtanh.f32 %v6489_v47  ;;  %v6831_v60 = vmul.f32 -1.442695, %v6489_v47 }
0x9aa9   :  { %7555 = vpow2.f32 %v6831_v60 }
0x9aad   :  { %v7554_v30 = vpop.eup %7553 }
0x9aae   :  { %6512 = vrot.lane.b32.xlu1 %v7554_v30, %s8336_s26 }
0x9aaf   :  { %v7556_v33 = vpop.eup %7555 }
0x9ab0   :  { %v6493_v35 = vadd.f32 1.0, %v7556_v33 }
0x9ab2   :  { %7557 = vrcp.f32 %v6493_v35  ;;  %v6505_v38 = vand.u32 2147483648, %v6493_v35  ;;  %vm6499_vm8 = vweird.f32 %v6493_v35  ;;  %v6503_v39 = vand.u32 2147483647, %v6493_v35 }
0x9ab4   :  { %v6506_v40 = vor.u32 1.1754944e-38, %v6505_v38  ;;  %vm6504_vm10 = vcmp.eq.f32.partialorder %v6503_v39, 8.507059e+37 }
0x9ab8   :  { %v7558_v36 = vpop.eup %7557 }
0x9ab9   :  { %v6495_v9 = vmul.f32 %v7558_v36, %v6493_v35  ;;  %vm6500_vm7 = vweird.f32 %v7558_v36 }
0x9aba   :  { %vm6501_vm9 = vmor %vm6499_vm8, %vm6500_vm7 }
0x9abb   :  { %v6496_v32 = vsub.f32 1.0, %v6495_v9 }
0x9abd   :  { %v6497_v59 = vmul.f32 %v7558_v36, %v6496_v32 }
0x9abf   :  { %v6498_v37 = vadd.f32 %v7558_v36, %v6497_v59 }
0x9ac1   :  { %v6502_v44 = vsel %vm6501_vm9, %v7558_v36, %v6498_v37 }
0x9ac2   :  { %v6507_v41 = vsel %vm6504_vm10, %v6506_v40, %v6502_v44 }
0x9ac3   :  { %v6510_v53 = vmul.f32 %v6507_v41, %v6454_v20 }
0x9b20   :  { %v6513_v6 = vpop.permute.xlu1 %6512 }
0x9b21   :  { %v6515_v45 = vmul.f32 %v6513_v6, %v6507_v41 }
0x9b23   :  { %6517 = vrot.lane.b32.xlu2 %v6515_v45, %s8337_s28 }
0x9b7d   :  { %v6518_v7 = vpop.permute.xlu2 %6517 }
0x9b7e   :  { %v6520_v18 = vadd.f32 %v6518_v7, %v6510_v53 }
0x9b80   :  { %7559 = vtanh.f32 %v6520_v18 }
0x9b86   :  { %v7560_v16 = vpop.eup %7559 }
0x9b87   :  { %6523 = vrot.lane.b32.xlu0 %v7560_v16, %s8336_s26 }
0x9bf9   :  { %v6524_v49 = vpop.permute.xlu0 %6523 }
0x9bfa   :  { %v6526_v2 = vmul.f32 %v6524_v49, %v6507_v41 }
0x9bfc   :  { %6528 = vrot.lane.b32.xlu1 %v6526_v2, %s8337_s28 }
0x9c6e   :  { %v6529_v50 = vpop.permute.xlu1 %6528 }
0x9c6f   :  { %6531 = vst.msk [vmem:[#allocation4 + $0xe] sm:$0x3] %vm701_vm5, %v6529_v50 }
0x9c76   :  { %v6533_v51 = vld [vmem:[#allocation4 + $0x8] sm:$0xff] }
0x9c77   :  { %6833 = vmatmul.msk.f32.gmra.mxu0 %vm635_vm6, %v6533_v51 }
0x9cf4   :  { %v6568_v52 = vpop.f32.mrf.mxu0 }
0x9cf5   :  { %v6569_v57 = vadd.f32 %v9837_v8, %v6568_v52 }
0x9cf7   :  { %6572 = vst.msk [vmem:[#allocation49 + $0x8] sm:$0xff] %vm598_vm0, %v6569_v57 }
0x9cf8   :  { %8234 = shalt.err (!%p8231_p13)
}
0x9cf9   :  { %6585 = dma.vmem_to_hbm [thread:$0]  %s6578_s24, 256, %s6580_s12, [#allocation9], %s8307_s22, %s8307_s22, %s8308_s23  }
0x9cfa   :  { %8263 = dma.done.wait [#allocation9], 256  }
0x9cfb   :  { %8264 = vsyncadd [#allocation9], 4294967040 }
0x9cfc   :  { %6590 = vsyncpa [#allocation8], 1 }
0x9cfd   :  { %6591 = vsyncpa [#allocation11], 1 }
0x9cfe   :  { %6592 = vsyncpa [#allocation14], 1 }
0x9cff   :  { %6593 = vsyncpa [#allocation17], 1 }
0x9d00   :  { %6594 = vsyncpa [#allocation20], 1 }
0x9d01   :  { %6595 = vsyncpa [#allocation23], 1 }
0x9d02   :  { %6596 = vsyncpa [#allocation26], 1 }
0x9d03   :  { %6597 = vsyncpa [#allocation29], 1 }
0x9d04   :  { %6598 = vsyncpa [#allocation32], 1 }
0x9d05   :  { %6599 = vsyncpa [#allocation35], 1 }
0x9d06   :  { %6600 = vsyncpa [#allocation38], 1 }
0x9d07   :  { %6601 = vsyncpa [#allocation41], 1 }
0x9d08   :  { %6602 = vsyncpa [#allocation44], 1 }
0x9d09   :  { %6603 = vsyncpa [#allocation47], 1 }
0x9d0a   :  { %6604 = vsyncpa [#allocation9], 1 }

</bundles_post_ra>
